<compile_context>
chip_gen: v7x
topology: tpu7x:2x2x1
jax: 0.10.0
libtpu: 0.0.40
codegen_flags: <defaults>
</compile_context>

<pallas_src>
import jax
import jax.numpy as jnp
from jax import lax
from jax.experimental import pallas as pl
from jax.experimental.pallas import tpu as pltpu

LANE = 128


def _pad_to_lane(c):
    return max(LANE, ((c + LANE - 1) // LANE) * LANE)


def _smem_spec():
    return pl.BlockSpec(memory_space=pltpu.MemorySpace.SMEM)


def _parallel():
    return pltpu.CompilerParams(dimension_semantics=("parallel",))


# ----------------------------- Pallas kernels ------------------------------

def _prelude_pad_kernel(x_ref, s_ref, o_ref):
    # o = zero_pad_spatial(relu(x + bias1) + bias2), stored in bf16.
    x = x_ref[0]                                    # (H, W, C) f32
    v = jnp.maximum(x + s_ref[0], 0.0) + s_ref[1]
    h, w = x.shape[0], x.shape[1]
    o_ref[...] = jnp.zeros_like(o_ref)
    o_ref[0, 1:h + 1, 1:w + 1, :] = v.astype(o_ref.dtype)


def _accum_taps(phase_refs, w_ref, taps, ho, wo):
    # 3x3 conv as 9 accumulated (Ho*Wo, C) @ (C, Cout) matmuls over shifted
    # windows of the (already zero-padded) VMEM-resident activation.
    cin = w_ref.shape[1]
    cout = w_ref.shape[2]
    acc = jnp.zeros((ho * wo, cout), jnp.float32)
    for t, (p, dh, dw) in enumerate(taps):
        a = phase_refs[p][0, dh:dh + ho, dw:dw + wo, :].reshape(ho * wo, cin)
        acc = acc + jnp.dot(a, w_ref[t], preferred_element_type=jnp.float32)
    return acc


_TAPS_S1 = tuple((0, kh, kw) for kh in range(3) for kw in range(3))


def _make_conv1_kernel(num_phases, taps, ho, wo):
    # out = zero_pad_spatial(relu(conv1(x_in) + bias3) + bias4), bf16, so the
    # conv2 kernel can consume it without any wrapper-side padding.
    def kernel(*refs):
        phase_refs = refs[:num_phases]
        w_ref, s_ref, o_ref = refs[num_phases:]
        acc = _accum_taps(phase_refs, w_ref, taps, ho, wo)
        cout = w_ref.shape[2]
        v = jnp.maximum(acc + s_ref[0], 0.0) + s_ref[1]
        o_ref[...] = jnp.zeros_like(o_ref)
        o_ref[0, 1:ho + 1, 1:wo + 1, :] = v.reshape(ho, wo, cout).astype(o_ref.dtype)
    return kernel


def _make_conv2_kernel(ho, wo, has_shortcut_conv):
    # out = scale * conv2(h) + residual; residual is either the block input
    # (plain elementwise add) or the fused 1x1 strided shortcut conv applied
    # to relu(x + bias1) recomputed in-kernel.
    def kernel(*refs):
        if has_shortcut_conv:
            h_ref, w_ref, xs_ref, wsc_ref, s_ref, o_ref = refs
        else:
            h_ref, w_ref, res_ref, s_ref, o_ref = refs
        acc = _accum_taps((h_ref,), w_ref, _TAPS_S1, ho, wo)
        cout = w_ref.shape[2]
        scale = s_ref[0]
        if has_shortcut_conv:
            cin = wsc_ref.shape[0]
            xs = xs_ref[0].reshape(ho * wo, cin)
            xo = jnp.maximum(xs + s_ref[1], 0.0).astype(wsc_ref.dtype)
            res = jnp.dot(xo, wsc_ref[...], preferred_element_type=jnp.float32)
        else:
            res = res_ref[0].reshape(ho * wo, cout).astype(jnp.float32)
        out = scale * acc + res
        o_ref[...] = out.reshape(1, ho, wo, cout).astype(o_ref.dtype)
    return kernel


# ------------------------------ kernel wrappers -----------------------------

def _prelude_call(x, s12):
    n, h, w, c = x.shape
    return pl.pallas_call(
        _prelude_pad_kernel,
        grid=(n,),
        in_specs=[pl.BlockSpec((1, h, w, c), lambda i: (i, 0, 0, 0)),
                  _smem_spec()],
        out_specs=pl.BlockSpec((1, h + 2, w + 2, c), lambda i: (i, 0, 0, 0)),
        out_shape=jax.ShapeDtypeStruct((n, h + 2, w + 2, c), jnp.bfloat16),
        compiler_params=_parallel(),
    )(x, s12)


def _conv1_call(phases, taps, w9, s34, ho, wo):
    n = phases[0].shape[0]
    cout = w9.shape[2]
    kernel = _make_conv1_kernel(len(phases), taps, ho, wo)
    in_specs = [pl.BlockSpec((1,) + tuple(ph.shape[1:]), lambda i: (i, 0, 0, 0))
                for ph in phases]
    in_specs += [pl.BlockSpec(w9.shape, lambda i: (0, 0, 0)), _smem_spec()]
    return pl.pallas_call(
        kernel,
        grid=(n,),
        in_specs=in_specs,
        out_specs=pl.BlockSpec((1, ho + 2, wo + 2, cout), lambda i: (i, 0, 0, 0)),
        out_shape=jax.ShapeDtypeStruct((n, ho + 2, wo + 2, cout), jnp.bfloat16),
        compiler_params=_parallel(),
    )(*phases, w9, s34)


def _conv2_call(h_pad, w9, residual_args, scalars, ho, wo, has_shortcut_conv):
    n = h_pad.shape[0]
    cout = w9.shape[2]
    kernel = _make_conv2_kernel(ho, wo, has_shortcut_conv)
    in_specs = [pl.BlockSpec((1, ho + 2, wo + 2, cout), lambda i: (i, 0, 0, 0)),
                pl.BlockSpec(w9.shape, lambda i: (0, 0, 0))]
    if has_shortcut_conv:
        xs, wsc = residual_args
        in_specs += [pl.BlockSpec((1,) + tuple(xs.shape[1:]), lambda i: (i, 0, 0, 0)),
                     pl.BlockSpec(wsc.shape, lambda i: (0, 0))]
        args = (h_pad, w9, xs, wsc, scalars)
    else:
        (res,) = residual_args
        in_specs += [pl.BlockSpec((1,) + tuple(res.shape[1:]), lambda i: (i, 0, 0, 0))]
        args = (h_pad, w9, res, scalars)
    in_specs += [_smem_spec()]
    return pl.pallas_call(
        kernel,
        grid=(n,),
        in_specs=in_specs,
        out_specs=pl.BlockSpec((1, ho, wo, cout), lambda i: (i, 0, 0, 0)),
        out_shape=jax.ShapeDtypeStruct((n, ho, wo, cout), jnp.float32),
        compiler_params=_parallel(),
    )(*args)


# ------------------------------ block / network -----------------------------

def prepare_block_params(p, cin, cout, cip, cop):
    """Channel-pad to 128 lanes, reshape conv weights to (9, Cin_p, Cout_p) bf16,
    and bundle the scalars into small SMEM vectors."""
    w1 = jnp.zeros((3, 3, cip, cop), jnp.float32).at[:, :, :cin, :cout].set(p["conv1"])
    w1 = w1.reshape(9, cip, cop).astype(jnp.bfloat16)
    w2 = jnp.zeros((3, 3, cop, cop), jnp.float32).at[:, :, :cout, :cout].set(p["conv2"])
    w2 = w2.reshape(9, cop, cop).astype(jnp.bfloat16)
    if "conv_sc" in p:
        wsc = jnp.zeros((cip, cop), jnp.float32).at[:cin, :cout].set(p["conv_sc"][0, 0])
        wsc = wsc.astype(jnp.bfloat16)
    else:
        wsc = None
    return {
        "w1": w1, "w2": w2, "wsc": wsc,
        "s12": jnp.concatenate([p["bias1"], p["bias2"]]).astype(jnp.float32),
        "s34": jnp.concatenate([p["bias3"], p["bias4"]]).astype(jnp.float32),
        "s_sc": jnp.concatenate([p["scale"], p["bias1"]]).astype(jnp.float32),
    }


def fixup_basic_block(x, kp, stride):
    # x: (N, H, W, Cin_padded) f32
    n, h, w, cip = x.shape
    cop = kp["w1"].shape[2]
    equal = kp["wsc"] is None
    if equal:
        # Identity shortcut only makes sense for stride 1 / equal widths
        # (same restriction as the PyTorch reference).
        assert stride == 1 and cip == cop

    ho = (h - 1) // stride + 1
    wo = (w - 1) // stride + 1

    # prelude: x_in_pad = zero_pad(relu(x + b1) + b2), bf16
    xin_pad = _prelude_call(x, kp["s12"])           # (N, H+2, W+2, Cip)

    # conv1 (3x3, stride s) as 9-tap accumulation.  For stride > 1, decompose
    # the padded input into stride*stride phase grids so every tap window is a
    # contiguous stride-1 slice.
    if stride == 1:
        phases = (xin_pad,)
        taps = _TAPS_S1
    else:
        s = stride
        phases = tuple(xin_pad[:, ph::s, pw::s, :]
                       for ph in range(s) for pw in range(s))
        taps = tuple(((kh % s) * s + (kw % s), kh // s, kw // s)
                     for kh in range(3) for kw in range(3))
    h_pad = _conv1_call(phases, taps, kp["w1"], kp["s34"], ho, wo)  # padded, bf16

    # conv2 (3x3, stride 1) + scale + residual, fused.
    if equal:
        out = _conv2_call(h_pad, kp["w2"], (x,), kp["s_sc"], ho, wo, False)
    else:
        xs = x[:, ::stride, ::stride, :]            # 1x1 stride-s sampling sites
        out = _conv2_call(h_pad, kp["w2"], (xs, kp["wsc"]), kp["s_sc"], ho, wo, True)
    # TODO(synk): dropout path (dropRate > 0, training=True) not implemented.
    return out


def fixup_network_block(x_nhwc, layer_params, stride):
    n, h, w, cin = x_nhwc.shape
    cout = layer_params[0]["conv1"].shape[-1]
    cip = _pad_to_lane(cin)
    cop = _pad_to_lane(cout)
    x = jnp.pad(x_nhwc.astype(jnp.float32), ((0, 0), (0, 0), (0, 0), (0, cip - cin)))
    for i, p in enumerate(layer_params):
        s = stride if i == 0 else 1
        c_in = cin if i == 0 else cout
        cp_in = cip if i == 0 else cop
        kp = prepare_block_params(p, c_in, cout, cp_in, cop)
        x = fixup_basic_block(x, kp, s)
    return x[..., :cout]


# ------------------------------ params & reference --------------------------

def init_block_params(key, in_planes, out_planes):
    ks = jax.random.split(key, 8)
    p = {
        "bias1": 0.1 * jax.random.normal(ks[0], (1,), jnp.float32),
        "bias2": 0.1 * jax.random.normal(ks[1], (1,), jnp.float32),
        "bias3": 0.1 * jax.random.normal(ks[2], (1,), jnp.float32),
        "bias4": 0.1 * jax.random.normal(ks[3], (1,), jnp.float32),
        "scale": 1.0 + 0.1 * jax.random.normal(ks[4], (1,), jnp.float32),
        "conv1": 0.1 * jax.random.normal(ks[5], (3, 3, in_planes, out_planes), jnp.float32),
        "conv2": 0.1 * jax.random.normal(ks[6], (3, 3, out_planes, out_planes), jnp.float32),
    }
    if in_planes != out_planes:
        p["conv_sc"] = 0.3 * jax.random.normal(ks[7], (1, 1, in_planes, out_planes), jnp.float32)
    return p


def _ref_block(x, p, stride):
    dn = ("NHWC", "HWIO", "NHWC")
    cin, cout = x.shape[-1], p["conv1"].shape[-1]
    xo = jax.nn.relu(x + p["bias1"][0])
    out = lax.conv_general_dilated(xo + p["bias2"][0], p["conv1"], (stride, stride),
                                   [(1, 1), (1, 1)], dimension_numbers=dn)
    out = jax.nn.relu(out + p["bias3"][0]) + p["bias4"][0]
    out = lax.conv_general_dilated(out, p["conv2"], (1, 1),
                                   [(1, 1), (1, 1)], dimension_numbers=dn)
    out = p["scale"][0] * out
    if cin == cout:
        return x + out
    sc = lax.conv_general_dilated(xo, p["conv_sc"], (stride, stride),
                                  [(0, 0), (0, 0)], dimension_numbers=dn)
    return sc + out


def _ref_network_block(x, layer_params, stride):
    out = x
    for i, p in enumerate(layer_params):
        out = _ref_block(out, p, stride if i == 0 else 1)
    return out


if __name__ == "__main__":
    key = jax.random.PRNGKey(0)
    kx, k0, k1 = jax.random.split(key, 3)

    batch, in_planes, out_planes, spatial = 2, 4, 8, 16
    nb_layers, stride = 2, 2

    x_nchw = jax.random.normal(kx, (batch, in_planes, spatial, spatial), jnp.float32)
    x_nhwc = jnp.transpose(x_nchw, (0, 2, 3, 1))   # NCHW (torch) -> NHWC (kernel)

    layer_params = [init_block_params(k0, in_planes, out_planes),
                    init_block_params(k1, out_planes, out_planes)]

    net = jax.jit(fixup_network_block, static_argnums=(2,))
    out = net(x_nhwc, layer_params, stride)
    out = jax.block_until_ready(out)

    ref = _ref_network_block(x_nhwc, layer_params, stride)
    assert out.shape == (batch, spatial // stride, spatial // stride, out_planes)
    max_err = float(jnp.max(jnp.abs(out - ref)))
    assert jnp.allclose(out, ref, atol=5e-2, rtol=5e-2), max_err
    print("KERNEL_OK")
</pallas_src>

<mosaic_0001>
module attributes {stable_mosaic.version = 11 : i64} {
  func.func @_prelude_pad_kernel(%arg0: i32, %arg1: memref<1x16x16x128xf32, #tpu.memory_space<vmem>>, %arg2: memref<2xf32, #tpu.memory_space<smem>>, %arg3: memref<1x18x18x128xbf16, #tpu.memory_space<vmem>>) attributes {dimension_semantics = [#tpu.dimension_semantics<parallel>], iteration_bounds = array<i64: 2>, scalar_prefetch = 0 : i64, scratch_operands = 0 : i64, tpu.core_type = #tpu.core_type<tc>, window_params = [{transform_indices = @transform_0, window_bounds = array<i64: 1, 16, 16, 128>}, {transform_indices = @transform_1, window_bounds = array<i64: 2>}, {transform_indices = @transform_2, window_bounds = array<i64: 1, 18, 18, 128>}]} {
    %c0 = arith.constant 0 : index
    %c0_0 = arith.constant 0 : index
    %c0_1 = arith.constant 0 : index
    %c0_2 = arith.constant 0 : index
    %0 = vector.load %arg1[%c0, %c0_0, %c0_1, %c0_2] : memref<1x16x16x128xf32, #tpu.memory_space<vmem>>, vector<1x16x16x128xf32>
    %1 = vector.shape_cast %0 : vector<1x16x16x128xf32> to vector<16x16x128xf32>
    %c0_3 = arith.constant 0 : index
    %2 = memref.load %arg2[%c0_3] : memref<2xf32, #tpu.memory_space<smem>>
    %3 = vector.broadcast %2 : f32 to vector<16x16x128xf32>
    %4 = arith.addf %1, %3 : vector<16x16x128xf32>
    %cst = arith.constant 0.000000e+00 : f32
    %5 = vector.broadcast %cst : f32 to vector<16x16x128xf32>
    %6 = arith.maximumf %4, %5 : vector<16x16x128xf32>
    %c1 = arith.constant 1 : index
    %7 = memref.load %arg2[%c1] : memref<2xf32, #tpu.memory_space<smem>>
    %8 = vector.broadcast %7 : f32 to vector<16x16x128xf32>
    %9 = arith.addf %6, %8 : vector<16x16x128xf32>
    %cst_4 = arith.constant 0.000000e+00 : bf16
    %10 = vector.broadcast %cst_4 : bf16 to vector<1x18x18x128xbf16>
    %c0_5 = arith.constant 0 : index
    %c0_6 = arith.constant 0 : index
    %c0_7 = arith.constant 0 : index
    %c0_8 = arith.constant 0 : index
    %11 = vector.load %arg3[%c0_5, %c0_6, %c0_7, %c0_8] : memref<1x18x18x128xbf16, #tpu.memory_space<vmem>>, vector<1x18x18x128xbf16>
    tpu.vector_store %arg3[%c0_5, %c0_6, %c0_7, %c0_8], %10 {strides = array<i32>} : memref<1x18x18x128xbf16, #tpu.memory_space<vmem>>, vector<1x18x18x128xbf16>,
    %12 = arith.truncf %9 : vector<16x16x128xf32> to vector<16x16x128xbf16>
    %c0_9 = arith.constant 0 : index
    %c1_10 = arith.constant 1 : index
    %c1_11 = arith.constant 1 : index
    %c0_12 = arith.constant 0 : index
    %13 = vector.load %arg3[%c0_9, %c1_10, %c1_11, %c0_12] : memref<1x18x18x128xbf16, #tpu.memory_space<vmem>>, vector<1x16x16x128xbf16>
    %14 = vector.shape_cast %13 : vector<1x16x16x128xbf16> to vector<16x16x128xbf16>
    %15 = vector.shape_cast %12 : vector<16x16x128xbf16> to vector<1x16x16x128xbf16>
    tpu.vector_store %arg3[%c0_9, %c1_10, %c1_11, %c0_12], %15 {strides = array<i32>} : memref<1x18x18x128xbf16, #tpu.memory_space<vmem>>, vector<1x16x16x128xbf16>,
    return
  }
  func.func @transform_0(%arg0: i32) -> (i32, i32, i32, i32) {
    %c0_i32 = arith.constant 0 : i32
    %c0_i32_0 = arith.constant 0 : i32
    %c0_i32_1 = arith.constant 0 : i32
    %c0_i32_2 = arith.constant 0 : i32
    return %arg0, %c0_i32, %c0_i32_0, %c0_i32_1 : i32, i32, i32, i32
  }
  func.func @transform_1(%arg0: i32) -> i32 {
    %c0_i32 = arith.constant 0 : i32
    %c0_i32_0 = arith.constant 0 : i32
    return %c0_i32 : i32
  }
  func.func @transform_2(%arg0: i32) -> (i32, i32, i32, i32) {
    %c0_i32 = arith.constant 0 : i32
    %c0_i32_0 = arith.constant 0 : i32
    %c0_i32_1 = arith.constant 0 : i32
    %c0_i32_2 = arith.constant 0 : i32
    return %arg0, %c0_i32, %c0_i32_0, %c0_i32_1 : i32, i32, i32, i32
  }
}

module attributes {stable_mosaic.version = 11 : i64} {
  func.func @kernel(%arg0: i32, %arg1: memref<1x9x9x128xbf16, #tpu.memory_space<vmem>>, %arg2: memref<1x9x9x128xbf16, #tpu.memory_space<vmem>>, %arg3: memref<1x9x9x128xbf16, #tpu.memory_space<vmem>>, %arg4: memref<1x9x9x128xbf16, #tpu.memory_space<vmem>>, %arg5: memref<9x128x128xbf16, #tpu.memory_space<vmem>>, %arg6: memref<2xf32, #tpu.memory_space<smem>>, %arg7: memref<1x10x10x128xbf16, #tpu.memory_space<vmem>>) attributes {dimension_semantics = [#tpu.dimension_semantics<parallel>], iteration_bounds = array<i64: 2>, scalar_prefetch = 0 : i64, scratch_operands = 0 : i64, tpu.core_type = #tpu.core_type<tc>, window_params = [{transform_indices = @transform_0, window_bounds = array<i64: 1, 9, 9, 128>}, {transform_indices = @transform_1, window_bounds = array<i64: 1, 9, 9, 128>}, {transform_indices = @transform_2, window_bounds = array<i64: 1, 9, 9, 128>}, {transform_indices = @transform_3, window_bounds = array<i64: 1, 9, 9, 128>}, {pipeline_mode = #tpu.pipeline_mode<synchronous>, transform_indices = @transform_4, window_bounds = array<i64: 9, 128, 128>}, {transform_indices = @transform_5, window_bounds = array<i64: 2>}, {transform_indices = @transform_6, window_bounds = array<i64: 1, 10, 10, 128>}]} {
    %cst = arith.constant 0.000000e+00 : f32
    %0 = vector.broadcast %cst : f32 to vector<64x128xf32>
    %c0 = arith.constant 0 : index
    %c0_0 = arith.constant 0 : index
    %c0_1 = arith.constant 0 : index
    %c0_2 = arith.constant 0 : index
    %1 = vector.load %arg1[%c0, %c0_0, %c0_1, %c0_2] : memref<1x9x9x128xbf16, #tpu.memory_space<vmem>>, vector<1x8x8x128xbf16>
    %2 = vector.shape_cast %1 : vector<1x8x8x128xbf16> to vector<8x8x128xbf16>
    %3 = vector.shape_cast %2 : vector<8x8x128xbf16> to vector<64x128xbf16>
    %c0_3 = arith.constant 0 : index
    %c0_4 = arith.constant 0 : index
    %c0_5 = arith.constant 0 : index
    %4 = vector.load %arg5[%c0_3, %c0_4, %c0_5] : memref<9x128x128xbf16, #tpu.memory_space<vmem>>, vector<1x128x128xbf16>
    %5 = vector.shape_cast %4 : vector<1x128x128xbf16> to vector<128x128xbf16>
    %cst_6 = arith.constant dense<0.000000e+00> : vector<64x128xf32>
    %6 = tpu.matmul %3, %5, %cst_6 {dimension_numbers = #tpu.dot_dimension_numbers<[1], [0], [0], [1], [0, 0, 1, 1], [], []>} : vector<64x128xbf16>, vector<128x128xbf16>, vector<64x128xf32> -> vector<64x128xf32>
    %7 = arith.addf %0, %6 : vector<64x128xf32>
    %c0_7 = arith.constant 0 : index
    %c0_8 = arith.constant 0 : index
    %c0_9 = arith.constant 0 : index
    %c0_10 = arith.constant 0 : index
    %8 = vector.load %arg2[%c0_7, %c0_8, %c0_9, %c0_10] : memref<1x9x9x128xbf16, #tpu.memory_space<vmem>>, vector<1x8x8x128xbf16>
    %9 = vector.shape_cast %8 : vector<1x8x8x128xbf16> to vector<8x8x128xbf16>
    %10 = vector.shape_cast %9 : vector<8x8x128xbf16> to vector<64x128xbf16>
    %c1 = arith.constant 1 : index
    %c0_11 = arith.constant 0 : index
    %c0_12 = arith.constant 0 : index
    %11 = vector.load %arg5[%c1, %c0_11, %c0_12] : memref<9x128x128xbf16, #tpu.memory_space<vmem>>, vector<1x128x128xbf16>
    %12 = vector.shape_cast %11 : vector<1x128x128xbf16> to vector<128x128xbf16>
    %cst_13 = arith.constant dense<0.000000e+00> : vector<64x128xf32>
    %13 = tpu.matmul %10, %12, %cst_13 {dimension_numbers = #tpu.dot_dimension_numbers<[1], [0], [0], [1], [0, 0, 1, 1], [], []>} : vector<64x128xbf16>, vector<128x128xbf16>, vector<64x128xf32> -> vector<64x128xf32>
    %14 = arith.addf %7, %13 : vector<64x128xf32>
    %c0_14 = arith.constant 0 : index
    %c0_15 = arith.constant 0 : index
    %c1_16 = arith.constant 1 : index
    %c0_17 = arith.constant 0 : index
    %15 = vector.load %arg1[%c0_14, %c0_15, %c1_16, %c0_17] : memref<1x9x9x128xbf16, #tpu.memory_space<vmem>>, vector<1x8x8x128xbf16>
    %16 = vector.shape_cast %15 : vector<1x8x8x128xbf16> to vector<8x8x128xbf16>
    %17 = vector.shape_cast %16 : vector<8x8x128xbf16> to vector<64x128xbf16>
    %c2 = arith.constant 2 : index
    %c0_18 = arith.constant 0 : index
    %c0_19 = arith.constant 0 : index
    %18 = vector.load %arg5[%c2, %c0_18, %c0_19] : memref<9x128x128xbf16, #tpu.memory_space<vmem>>, vector<1x128x128xbf16>
    %19 = vector.shape_cast %18 : vector<1x128x128xbf16> to vector<128x128xbf16>
    %cst_20 = arith.constant dense<0.000000e+00> : vector<64x128xf32>
    %20 = tpu.matmul %17, %19, %cst_20 {dimension_numbers = #tpu.dot_dimension_numbers<[1], [0], [0], [1], [0, 0, 1, 1], [], []>} : vector<64x128xbf16>, vector<128x128xbf16>, vector<64x128xf32> -> vector<64x128xf32>
    %21 = arith.addf %14, %20 : vector<64x128xf32>
    %c0_21 = arith.constant 0 : index
    %c0_22 = arith.constant 0 : index
    %c0_23 = arith.constant 0 : index
    %c0_24 = arith.constant 0 : index
    %22 = vector.load %arg3[%c0_21, %c0_22, %c0_23, %c0_24] : memref<1x9x9x128xbf16, #tpu.memory_space<vmem>>, vector<1x8x8x128xbf16>
    %23 = vector.shape_cast %22 : vector<1x8x8x128xbf16> to vector<8x8x128xbf16>
    %24 = vector.shape_cast %23 : vector<8x8x128xbf16> to vector<64x128xbf16>
    %c3 = arith.constant 3 : index
    %c0_25 = arith.constant 0 : index
    %c0_26 = arith.constant 0 : index
    %25 = vector.load %arg5[%c3, %c0_25, %c0_26] : memref<9x128x128xbf16, #tpu.memory_space<vmem>>, vector<1x128x128xbf16>
    %26 = vector.shape_cast %25 : vector<1x128x128xbf16> to vector<128x128xbf16>
    %cst_27 = arith.constant dense<0.000000e+00> : vector<64x128xf32>
    %27 = tpu.matmul %24, %26, %cst_27 {dimension_numbers = #tpu.dot_dimension_numbers<[1], [0], [0], [1], [0, 0, 1, 1], [], []>} : vector<64x128xbf16>, vector<128x128xbf16>, vector<64x128xf32> -> vector<64x128xf32>
    %28 = arith.addf %21, %27 : vector<64x128xf32>
    %c0_28 = arith.constant 0 : index
    %c0_29 = arith.constant 0 : index
    %c0_30 = arith.constant 0 : index
    %c0_31 = arith.constant 0 : index
    %29 = vector.load %arg4[%c0_28, %c0_29, %c0_30, %c0_31] : memref<1x9x9x128xbf16, #tpu.memory_space<vmem>>, vector<1x8x8x128xbf16>
    %30 = vector.shape_cast %29 : vector<1x8x8x128xbf16> to vector<8x8x128xbf16>
    %31 = vector.shape_cast %30 : vector<8x8x128xbf16> to vector<64x128xbf16>
    %c4 = arith.constant 4 : index
    %c0_32 = arith.constant 0 : index
    %c0_33 = arith.constant 0 : index
    %32 = vector.load %arg5[%c4, %c0_32, %c0_33] : memref<9x128x128xbf16, #tpu.memory_space<vmem>>, vector<1x128x128xbf16>
    %33 = vector.shape_cast %32 : vector<1x128x128xbf16> to vector<128x128xbf16>
    %cst_34 = arith.constant dense<0.000000e+00> : vector<64x128xf32>
    %34 = tpu.matmul %31, %33, %cst_34 {dimension_numbers = #tpu.dot_dimension_numbers<[1], [0], [0], [1], [0, 0, 1, 1], [], []>} : vector<64x128xbf16>, vector<128x128xbf16>, vector<64x128xf32> -> vector<64x128xf32>
    %35 = arith.addf %28, %34 : vector<64x128xf32>
    %c0_35 = arith.constant 0 : index
    %c0_36 = arith.constant 0 : index
    %c1_37 = arith.constant 1 : index
    %c0_38 = arith.constant 0 : index
    %36 = vector.load %arg3[%c0_35, %c0_36, %c1_37, %c0_38] : memref<1x9x9x128xbf16, #tpu.memory_space<vmem>>, vector<1x8x8x128xbf16>
    %37 = vector.shape_cast %36 : vector<1x8x8x128xbf16> to vector<8x8x128xbf16>
    %38 = vector.shape_cast %37 : vector<8x8x128xbf16> to vector<64x128xbf16>
    %c5 = arith.constant 5 : index
    %c0_39 = arith.constant 0 : index
    %c0_40 = arith.constant 0 : index
    %39 = vector.load %arg5[%c5, %c0_39, %c0_40] : memref<9x128x128xbf16, #tpu.memory_space<vmem>>, vector<1x128x128xbf16>
    %40 = vector.shape_cast %39 : vector<1x128x128xbf16> to vector<128x128xbf16>
    %cst_41 = arith.constant dense<0.000000e+00> : vector<64x128xf32>
    %41 = tpu.matmul %38, %40, %cst_41 {dimension_numbers = #tpu.dot_dimension_numbers<[1], [0], [0], [1], [0, 0, 1, 1], [], []>} : vector<64x128xbf16>, vector<128x128xbf16>, vector<64x128xf32> -> vector<64x128xf32>
    %42 = arith.addf %35, %41 : vector<64x128xf32>
    %c0_42 = arith.constant 0 : index
    %c1_43 = arith.constant 1 : index
    %c0_44 = arith.constant 0 : index
    %c0_45 = arith.constant 0 : index
    %43 = vector.load %arg1[%c0_42, %c1_43, %c0_44, %c0_45] : memref<1x9x9x128xbf16, #tpu.memory_space<vmem>>, vector<1x8x8x128xbf16>
    %44 = vector.shape_cast %43 : vector<1x8x8x128xbf16> to vector<8x8x128xbf16>
    %45 = vector.shape_cast %44 : vector<8x8x128xbf16> to vector<64x128xbf16>
    %c6 = arith.constant 6 : index
    %c0_46 = arith.constant 0 : index
    %c0_47 = arith.constant 0 : index
    %46 = vector.load %arg5[%c6, %c0_46, %c0_47] : memref<9x128x128xbf16, #tpu.memory_space<vmem>>, vector<1x128x128xbf16>
    %47 = vector.shape_cast %46 : vector<1x128x128xbf16> to vector<128x128xbf16>
    %cst_48 = arith.constant dense<0.000000e+00> : vector<64x128xf32>
    %48 = tpu.matmul %45, %47, %cst_48 {dimension_numbers = #tpu.dot_dimension_numbers<[1], [0], [0], [1], [0, 0, 1, 1], [], []>} : vector<64x128xbf16>, vector<128x128xbf16>, vector<64x128xf32> -> vector<64x128xf32>
    %49 = arith.addf %42, %48 : vector<64x128xf32>
    %c0_49 = arith.constant 0 : index
    %c1_50 = arith.constant 1 : index
    %c0_51 = arith.constant 0 : index
    %c0_52 = arith.constant 0 : index
    %50 = vector.load %arg2[%c0_49, %c1_50, %c0_51, %c0_52] : memref<1x9x9x128xbf16, #tpu.memory_space<vmem>>, vector<1x8x8x128xbf16>
    %51 = vector.shape_cast %50 : vector<1x8x8x128xbf16> to vector<8x8x128xbf16>
    %52 = vector.shape_cast %51 : vector<8x8x128xbf16> to vector<64x128xbf16>
    %c7 = arith.constant 7 : index
    %c0_53 = arith.constant 0 : index
    %c0_54 = arith.constant 0 : index
    %53 = vector.load %arg5[%c7, %c0_53, %c0_54] : memref<9x128x128xbf16, #tpu.memory_space<vmem>>, vector<1x128x128xbf16>
    %54 = vector.shape_cast %53 : vector<1x128x128xbf16> to vector<128x128xbf16>
    %cst_55 = arith.constant dense<0.000000e+00> : vector<64x128xf32>
    %55 = tpu.matmul %52, %54, %cst_55 {dimension_numbers = #tpu.dot_dimension_numbers<[1], [0], [0], [1], [0, 0, 1, 1], [], []>} : vector<64x128xbf16>, vector<128x128xbf16>, vector<64x128xf32> -> vector<64x128xf32>
    %56 = arith.addf %49, %55 : vector<64x128xf32>
    %c0_56 = arith.constant 0 : index
    %c1_57 = arith.constant 1 : index
    %c1_58 = arith.constant 1 : index
    %c0_59 = arith.constant 0 : index
    %57 = vector.load %arg1[%c0_56, %c1_57, %c1_58, %c0_59] : memref<1x9x9x128xbf16, #tpu.memory_space<vmem>>, vector<1x8x8x128xbf16>
    %58 = vector.shape_cast %57 : vector<1x8x8x128xbf16> to vector<8x8x128xbf16>
    %59 = vector.shape_cast %58 : vector<8x8x128xbf16> to vector<64x128xbf16>
    %c8 = arith.constant 8 : index
    %c0_60 = arith.constant 0 : index
    %c0_61 = arith.constant 0 : index
    %60 = vector.load %arg5[%c8, %c0_60, %c0_61] : memref<9x128x128xbf16, #tpu.memory_space<vmem>>, vector<1x128x128xbf16>
    %61 = vector.shape_cast %60 : vector<1x128x128xbf16> to vector<128x128xbf16>
    %cst_62 = arith.constant dense<0.000000e+00> : vector<64x128xf32>
    %62 = tpu.matmul %59, %61, %cst_62 {dimension_numbers = #tpu.dot_dimension_numbers<[1], [0], [0], [1], [0, 0, 1, 1], [], []>} : vector<64x128xbf16>, vector<128x128xbf16>, vector<64x128xf32> -> vector<64x128xf32>
    %63 = arith.addf %56, %62 : vector<64x128xf32>
    %c0_63 = arith.constant 0 : index
    %64 = memref.load %arg6[%c0_63] : memref<2xf32, #tpu.memory_space<smem>>
    %65 = vector.broadcast %64 : f32 to vector<64x128xf32>
    %66 = arith.addf %63, %65 : vector<64x128xf32>
    %cst_64 = arith.constant 0.000000e+00 : f32
    %67 = vector.broadcast %cst_64 : f32 to vector<64x128xf32>
    %68 = arith.maximumf %66, %67 : vector<64x128xf32>
    %c1_65 = arith.constant 1 : index
    %69 = memref.load %arg6[%c1_65] : memref<2xf32, #tpu.memory_space<smem>>
    %70 = vector.broadcast %69 : f32 to vector<64x128xf32>
    %71 = arith.addf %68, %70 : vector<64x128xf32>
    %cst_66 = arith.constant 0.000000e+00 : bf16
    %72 = vector.broadcast %cst_66 : bf16 to vector<1x10x10x128xbf16>
    %c0_67 = arith.constant 0 : index
    %c0_68 = arith.constant 0 : index
    %c0_69 = arith.constant 0 : index
    %c0_70 = arith.constant 0 : index
    %73 = vector.load %arg7[%c0_67, %c0_68, %c0_69, %c0_70] : memref<1x10x10x128xbf16, #tpu.memory_space<vmem>>, vector<1x10x10x128xbf16>
    tpu.vector_store %arg7[%c0_67, %c0_68, %c0_69, %c0_70], %72 {strides = array<i32>} : memref<1x10x10x128xbf16, #tpu.memory_space<vmem>>, vector<1x10x10x128xbf16>,
    %74 = vector.shape_cast %71 : vector<64x128xf32> to vector<8x8x128xf32>
    %75 = arith.truncf %74 : vector<8x8x128xf32> to vector<8x8x128xbf16>
    %c0_71 = arith.constant 0 : index
    %c1_72 = arith.constant 1 : index
    %c1_73 = arith.constant 1 : index
    %c0_74 = arith.constant 0 : index
    %76 = vector.load %arg7[%c0_71, %c1_72, %c1_73, %c0_74] : memref<1x10x10x128xbf16, #tpu.memory_space<vmem>>, vector<1x8x8x128xbf16>
    %77 = vector.shape_cast %76 : vector<1x8x8x128xbf16> to vector<8x8x128xbf16>
    %78 = vector.shape_cast %75 : vector<8x8x128xbf16> to vector<1x8x8x128xbf16>
    tpu.vector_store %arg7[%c0_71, %c1_72, %c1_73, %c0_74], %78 {strides = array<i32>} : memref<1x10x10x128xbf16, #tpu.memory_space<vmem>>, vector<1x8x8x128xbf16>,
    return
  }
  func.func @transform_0(%arg0: i32) -> (i32, i32, i32, i32) {
    %c0_i32 = arith.constant 0 : i32
    %c0_i32_0 = arith.constant 0 : i32
    %c0_i32_1 = arith.constant 0 : i32
    %c0_i32_2 = arith.constant 0 : i32
    return %arg0, %c0_i32, %c0_i32_0, %c0_i32_1 : i32, i32, i32, i32
  }
  func.func @transform_1(%arg0: i32) -> (i32, i32, i32, i32) {
    %c0_i32 = arith.constant 0 : i32
    %c0_i32_0 = arith.constant 0 : i32
    %c0_i32_1 = arith.constant 0 : i32
    %c0_i32_2 = arith.constant 0 : i32
    return %arg0, %c0_i32, %c0_i32_0, %c0_i32_1 : i32, i32, i32, i32
  }
  func.func @transform_2(%arg0: i32) -> (i32, i32, i32, i32) {
    %c0_i32 = arith.constant 0 : i32
    %c0_i32_0 = arith.constant 0 : i32
    %c0_i32_1 = arith.constant 0 : i32
    %c0_i32_2 = arith.constant 0 : i32
    return %arg0, %c0_i32, %c0_i32_0, %c0_i32_1 : i32, i32, i32, i32
  }
  func.func @transform_3(%arg0: i32) -> (i32, i32, i32, i32) {
    %c0_i32 = arith.constant 0 : i32
    %c0_i32_0 = arith.constant 0 : i32
    %c0_i32_1 = arith.constant 0 : i32
    %c0_i32_2 = arith.constant 0 : i32
    return %arg0, %c0_i32, %c0_i32_0, %c0_i32_1 : i32, i32, i32, i32
  }
  func.func @transform_4(%arg0: i32) -> (i32, i32, i32) {
    %c0_i32 = arith.constant 0 : i32
    %c0_i32_0 = arith.constant 0 : i32
    %c0_i32_1 = arith.constant 0 : i32
    %c0_i32_2 = arith.constant 0 : i32
    return %c0_i32, %c0_i32_0, %c0_i32_1 : i32, i32, i32
  }
  func.func @transform_5(%arg0: i32) -> i32 {
    %c0_i32 = arith.constant 0 : i32
    %c0_i32_0 = arith.constant 0 : i32
    return %c0_i32 : i32
  }
  func.func @transform_6(%arg0: i32) -> (i32, i32, i32, i32) {
    %c0_i32 = arith.constant 0 : i32
    %c0_i32_0 = arith.constant 0 : i32
    %c0_i32_1 = arith.constant 0 : i32
    %c0_i32_2 = arith.constant 0 : i32
    return %arg0, %c0_i32, %c0_i32_0, %c0_i32_1 : i32, i32, i32, i32
  }
}

module attributes {stable_mosaic.version = 11 : i64} {
  func.func @kernel(%arg0: i32, %arg1: memref<1x10x10x128xbf16, #tpu.memory_space<vmem>>, %arg2: memref<9x128x128xbf16, #tpu.memory_space<vmem>>, %arg3: memref<1x8x8x128xf32, #tpu.memory_space<vmem>>, %arg4: memref<128x128xbf16, #tpu.memory_space<vmem>>, %arg5: memref<2xf32, #tpu.memory_space<smem>>, %arg6: memref<1x8x8x128xf32, #tpu.memory_space<vmem>>) attributes {dimension_semantics = [#tpu.dimension_semantics<parallel>], iteration_bounds = array<i64: 2>, scalar_prefetch = 0 : i64, scratch_operands = 0 : i64, tpu.core_type = #tpu.core_type<tc>, window_params = [{transform_indices = @transform_0, window_bounds = array<i64: 1, 10, 10, 128>}, {pipeline_mode = #tpu.pipeline_mode<synchronous>, transform_indices = @transform_1, window_bounds = array<i64: 9, 128, 128>}, {transform_indices = @transform_2, window_bounds = array<i64: 1, 8, 8, 128>}, {pipeline_mode = #tpu.pipeline_mode<synchronous>, transform_indices = @transform_3, window_bounds = array<i64: 128, 128>}, {transform_indices = @transform_4, window_bounds = array<i64: 2>}, {transform_indices = @transform_5, window_bounds = array<i64: 1, 8, 8, 128>}]} {
    %cst = arith.constant 0.000000e+00 : f32
    %0 = vector.broadcast %cst : f32 to vector<64x128xf32>
    %c0 = arith.constant 0 : index
    %c0_0 = arith.constant 0 : index
    %c0_1 = arith.constant 0 : index
    %c0_2 = arith.constant 0 : index
    %1 = vector.load %arg1[%c0, %c0_0, %c0_1, %c0_2] : memref<1x10x10x128xbf16, #tpu.memory_space<vmem>>, vector<1x8x8x128xbf16>
    %2 = vector.shape_cast %1 : vector<1x8x8x128xbf16> to vector<8x8x128xbf16>
    %3 = vector.shape_cast %2 : vector<8x8x128xbf16> to vector<64x128xbf16>
    %c0_3 = arith.constant 0 : index
    %c0_4 = arith.constant 0 : index
    %c0_5 = arith.constant 0 : index
    %4 = vector.load %arg2[%c0_3, %c0_4, %c0_5] : memref<9x128x128xbf16, #tpu.memory_space<vmem>>, vector<1x128x128xbf16>
    %5 = vector.shape_cast %4 : vector<1x128x128xbf16> to vector<128x128xbf16>
    %cst_6 = arith.constant dense<0.000000e+00> : vector<64x128xf32>
    %6 = tpu.matmul %3, %5, %cst_6 {dimension_numbers = #tpu.dot_dimension_numbers<[1], [0], [0], [1], [0, 0, 1, 1], [], []>} : vector<64x128xbf16>, vector<128x128xbf16>, vector<64x128xf32> -> vector<64x128xf32>
    %7 = arith.addf %0, %6 : vector<64x128xf32>
    %c0_7 = arith.constant 0 : index
    %c0_8 = arith.constant 0 : index
    %c1 = arith.constant 1 : index
    %c0_9 = arith.constant 0 : index
    %8 = vector.load %arg1[%c0_7, %c0_8, %c1, %c0_9] : memref<1x10x10x128xbf16, #tpu.memory_space<vmem>>, vector<1x8x8x128xbf16>
    %9 = vector.shape_cast %8 : vector<1x8x8x128xbf16> to vector<8x8x128xbf16>
    %10 = vector.shape_cast %9 : vector<8x8x128xbf16> to vector<64x128xbf16>
    %c1_10 = arith.constant 1 : index
    %c0_11 = arith.constant 0 : index
    %c0_12 = arith.constant 0 : index
    %11 = vector.load %arg2[%c1_10, %c0_11, %c0_12] : memref<9x128x128xbf16, #tpu.memory_space<vmem>>, vector<1x128x128xbf16>
    %12 = vector.shape_cast %11 : vector<1x128x128xbf16> to vector<128x128xbf16>
    %cst_13 = arith.constant dense<0.000000e+00> : vector<64x128xf32>
    %13 = tpu.matmul %10, %12, %cst_13 {dimension_numbers = #tpu.dot_dimension_numbers<[1], [0], [0], [1], [0, 0, 1, 1], [], []>} : vector<64x128xbf16>, vector<128x128xbf16>, vector<64x128xf32> -> vector<64x128xf32>
    %14 = arith.addf %7, %13 : vector<64x128xf32>
    %c0_14 = arith.constant 0 : index
    %c0_15 = arith.constant 0 : index
    %c2 = arith.constant 2 : index
    %c0_16 = arith.constant 0 : index
    %15 = vector.load %arg1[%c0_14, %c0_15, %c2, %c0_16] : memref<1x10x10x128xbf16, #tpu.memory_space<vmem>>, vector<1x8x8x128xbf16>
    %16 = vector.shape_cast %15 : vector<1x8x8x128xbf16> to vector<8x8x128xbf16>
    %17 = vector.shape_cast %16 : vector<8x8x128xbf16> to vector<64x128xbf16>
    %c2_17 = arith.constant 2 : index
    %c0_18 = arith.constant 0 : index
    %c0_19 = arith.constant 0 : index
    %18 = vector.load %arg2[%c2_17, %c0_18, %c0_19] : memref<9x128x128xbf16, #tpu.memory_space<vmem>>, vector<1x128x128xbf16>
    %19 = vector.shape_cast %18 : vector<1x128x128xbf16> to vector<128x128xbf16>
    %cst_20 = arith.constant dense<0.000000e+00> : vector<64x128xf32>
    %20 = tpu.matmul %17, %19, %cst_20 {dimension_numbers = #tpu.dot_dimension_numbers<[1], [0], [0], [1], [0, 0, 1, 1], [], []>} : vector<64x128xbf16>, vector<128x128xbf16>, vector<64x128xf32> -> vector<64x128xf32>
    %21 = arith.addf %14, %20 : vector<64x128xf32>
    %c0_21 = arith.constant 0 : index
    %c1_22 = arith.constant 1 : index
    %c0_23 = arith.constant 0 : index
    %c0_24 = arith.constant 0 : index
    %22 = vector.load %arg1[%c0_21, %c1_22, %c0_23, %c0_24] : memref<1x10x10x128xbf16, #tpu.memory_space<vmem>>, vector<1x8x8x128xbf16>
    %23 = vector.shape_cast %22 : vector<1x8x8x128xbf16> to vector<8x8x128xbf16>
    %24 = vector.shape_cast %23 : vector<8x8x128xbf16> to vector<64x128xbf16>
    %c3 = arith.constant 3 : index
    %c0_25 = arith.constant 0 : index
    %c0_26 = arith.constant 0 : index
    %25 = vector.load %arg2[%c3, %c0_25, %c0_26] : memref<9x128x128xbf16, #tpu.memory_space<vmem>>, vector<1x128x128xbf16>
    %26 = vector.shape_cast %25 : vector<1x128x128xbf16> to vector<128x128xbf16>
    %cst_27 = arith.constant dense<0.000000e+00> : vector<64x128xf32>
    %27 = tpu.matmul %24, %26, %cst_27 {dimension_numbers = #tpu.dot_dimension_numbers<[1], [0], [0], [1], [0, 0, 1, 1], [], []>} : vector<64x128xbf16>, vector<128x128xbf16>, vector<64x128xf32> -> vector<64x128xf32>
    %28 = arith.addf %21, %27 : vector<64x128xf32>
    %c0_28 = arith.constant 0 : index
    %c1_29 = arith.constant 1 : index
    %c1_30 = arith.constant 1 : index
    %c0_31 = arith.constant 0 : index
    %29 = vector.load %arg1[%c0_28, %c1_29, %c1_30, %c0_31] : memref<1x10x10x128xbf16, #tpu.memory_space<vmem>>, vector<1x8x8x128xbf16>
    %30 = vector.shape_cast %29 : vector<1x8x8x128xbf16> to vector<8x8x128xbf16>
    %31 = vector.shape_cast %30 : vector<8x8x128xbf16> to vector<64x128xbf16>
    %c4 = arith.constant 4 : index
    %c0_32 = arith.constant 0 : index
    %c0_33 = arith.constant 0 : index
    %32 = vector.load %arg2[%c4, %c0_32, %c0_33] : memref<9x128x128xbf16, #tpu.memory_space<vmem>>, vector<1x128x128xbf16>
    %33 = vector.shape_cast %32 : vector<1x128x128xbf16> to vector<128x128xbf16>
    %cst_34 = arith.constant dense<0.000000e+00> : vector<64x128xf32>
    %34 = tpu.matmul %31, %33, %cst_34 {dimension_numbers = #tpu.dot_dimension_numbers<[1], [0], [0], [1], [0, 0, 1, 1], [], []>} : vector<64x128xbf16>, vector<128x128xbf16>, vector<64x128xf32> -> vector<64x128xf32>
    %35 = arith.addf %28, %34 : vector<64x128xf32>
    %c0_35 = arith.constant 0 : index
    %c1_36 = arith.constant 1 : index
    %c2_37 = arith.constant 2 : index
    %c0_38 = arith.constant 0 : index
    %36 = vector.load %arg1[%c0_35, %c1_36, %c2_37, %c0_38] : memref<1x10x10x128xbf16, #tpu.memory_space<vmem>>, vector<1x8x8x128xbf16>
    %37 = vector.shape_cast %36 : vector<1x8x8x128xbf16> to vector<8x8x128xbf16>
    %38 = vector.shape_cast %37 : vector<8x8x128xbf16> to vector<64x128xbf16>
    %c5 = arith.constant 5 : index
    %c0_39 = arith.constant 0 : index
    %c0_40 = arith.constant 0 : index
    %39 = vector.load %arg2[%c5, %c0_39, %c0_40] : memref<9x128x128xbf16, #tpu.memory_space<vmem>>, vector<1x128x128xbf16>
    %40 = vector.shape_cast %39 : vector<1x128x128xbf16> to vector<128x128xbf16>
    %cst_41 = arith.constant dense<0.000000e+00> : vector<64x128xf32>
    %41 = tpu.matmul %38, %40, %cst_41 {dimension_numbers = #tpu.dot_dimension_numbers<[1], [0], [0], [1], [0, 0, 1, 1], [], []>} : vector<64x128xbf16>, vector<128x128xbf16>, vector<64x128xf32> -> vector<64x128xf32>
    %42 = arith.addf %35, %41 : vector<64x128xf32>
    %c0_42 = arith.constant 0 : index
    %c2_43 = arith.constant 2 : index
    %c0_44 = arith.constant 0 : index
    %c0_45 = arith.constant 0 : index
    %43 = vector.load %arg1[%c0_42, %c2_43, %c0_44, %c0_45] : memref<1x10x10x128xbf16, #tpu.memory_space<vmem>>, vector<1x8x8x128xbf16>
    %44 = vector.shape_cast %43 : vector<1x8x8x128xbf16> to vector<8x8x128xbf16>
    %45 = vector.shape_cast %44 : vector<8x8x128xbf16> to vector<64x128xbf16>
    %c6 = arith.constant 6 : index
    %c0_46 = arith.constant 0 : index
    %c0_47 = arith.constant 0 : index
    %46 = vector.load %arg2[%c6, %c0_46, %c0_47] : memref<9x128x128xbf16, #tpu.memory_space<vmem>>, vector<1x128x128xbf16>
    %47 = vector.shape_cast %46 : vector<1x128x128xbf16> to vector<128x128xbf16>
    %cst_48 = arith.constant dense<0.000000e+00> : vector<64x128xf32>
    %48 = tpu.matmul %45, %47, %cst_48 {dimension_numbers = #tpu.dot_dimension_numbers<[1], [0], [0], [1], [0, 0, 1, 1], [], []>} : vector<64x128xbf16>, vector<128x128xbf16>, vector<64x128xf32> -> vector<64x128xf32>
    %49 = arith.addf %42, %48 : vector<64x128xf32>
    %c0_49 = arith.constant 0 : index
    %c2_50 = arith.constant 2 : index
    %c1_51 = arith.constant 1 : index
    %c0_52 = arith.constant 0 : index
    %50 = vector.load %arg1[%c0_49, %c2_50, %c1_51, %c0_52] : memref<1x10x10x128xbf16, #tpu.memory_space<vmem>>, vector<1x8x8x128xbf16>
    %51 = vector.shape_cast %50 : vector<1x8x8x128xbf16> to vector<8x8x128xbf16>
    %52 = vector.shape_cast %51 : vector<8x8x128xbf16> to vector<64x128xbf16>
    %c7 = arith.constant 7 : index
    %c0_53 = arith.constant 0 : index
    %c0_54 = arith.constant 0 : index
    %53 = vector.load %arg2[%c7, %c0_53, %c0_54] : memref<9x128x128xbf16, #tpu.memory_space<vmem>>, vector<1x128x128xbf16>
    %54 = vector.shape_cast %53 : vector<1x128x128xbf16> to vector<128x128xbf16>
    %cst_55 = arith.constant dense<0.000000e+00> : vector<64x128xf32>
    %55 = tpu.matmul %52, %54, %cst_55 {dimension_numbers = #tpu.dot_dimension_numbers<[1], [0], [0], [1], [0, 0, 1, 1], [], []>} : vector<64x128xbf16>, vector<128x128xbf16>, vector<64x128xf32> -> vector<64x128xf32>
    %56 = arith.addf %49, %55 : vector<64x128xf32>
    %c0_56 = arith.constant 0 : index
    %c2_57 = arith.constant 2 : index
    %c2_58 = arith.constant 2 : index
    %c0_59 = arith.constant 0 : index
    %57 = vector.load %arg1[%c0_56, %c2_57, %c2_58, %c0_59] : memref<1x10x10x128xbf16, #tpu.memory_space<vmem>>, vector<1x8x8x128xbf16>
    %58 = vector.shape_cast %57 : vector<1x8x8x128xbf16> to vector<8x8x128xbf16>
    %59 = vector.shape_cast %58 : vector<8x8x128xbf16> to vector<64x128xbf16>
    %c8 = arith.constant 8 : index
    %c0_60 = arith.constant 0 : index
    %c0_61 = arith.constant 0 : index
    %60 = vector.load %arg2[%c8, %c0_60, %c0_61] : memref<9x128x128xbf16, #tpu.memory_space<vmem>>, vector<1x128x128xbf16>
    %61 = vector.shape_cast %60 : vector<1x128x128xbf16> to vector<128x128xbf16>
    %cst_62 = arith.constant dense<0.000000e+00> : vector<64x128xf32>
    %62 = tpu.matmul %59, %61, %cst_62 {dimension_numbers = #tpu.dot_dimension_numbers<[1], [0], [0], [1], [0, 0, 1, 1], [], []>} : vector<64x128xbf16>, vector<128x128xbf16>, vector<64x128xf32> -> vector<64x128xf32>
    %63 = arith.addf %56, %62 : vector<64x128xf32>
    %c0_63 = arith.constant 0 : index
    %64 = memref.load %arg5[%c0_63] : memref<2xf32, #tpu.memory_space<smem>>
    %c0_64 = arith.constant 0 : index
    %c0_65 = arith.constant 0 : index
    %c0_66 = arith.constant 0 : index
    %c0_67 = arith.constant 0 : index
    %65 = vector.load %arg3[%c0_64, %c0_65, %c0_66, %c0_67] : memref<1x8x8x128xf32, #tpu.memory_space<vmem>>, vector<1x8x8x128xf32>
    %66 = vector.shape_cast %65 : vector<1x8x8x128xf32> to vector<8x8x128xf32>
    %67 = vector.shape_cast %66 : vector<8x8x128xf32> to vector<64x128xf32>
    %c1_68 = arith.constant 1 : index
    %68 = memref.load %arg5[%c1_68] : memref<2xf32, #tpu.memory_space<smem>>
    %69 = vector.broadcast %68 : f32 to vector<64x128xf32>
    %70 = arith.addf %67, %69 : vector<64x128xf32>
    %cst_69 = arith.constant 0.000000e+00 : f32
    %71 = vector.broadcast %cst_69 : f32 to vector<64x128xf32>
    %72 = arith.maximumf %70, %71 : vector<64x128xf32>
    %73 = arith.truncf %72 : vector<64x128xf32> to vector<64x128xbf16>
    %c0_70 = arith.constant 0 : index
    %c0_71 = arith.constant 0 : index
    %74 = vector.load %arg4[%c0_70, %c0_71] : memref<128x128xbf16, #tpu.memory_space<vmem>>, vector<128x128xbf16>
    %cst_72 = arith.constant dense<0.000000e+00> : vector<64x128xf32>
    %75 = tpu.matmul %73, %74, %cst_72 {dimension_numbers = #tpu.dot_dimension_numbers<[1], [0], [0], [1], [0, 0, 1, 1], [], []>} : vector<64x128xbf16>, vector<128x128xbf16>, vector<64x128xf32> -> vector<64x128xf32>
    %76 = vector.broadcast %64 : f32 to vector<64x128xf32>
    %77 = arith.mulf %76, %63 : vector<64x128xf32>
    %78 = arith.addf %77, %75 : vector<64x128xf32>
    %79 = vector.shape_cast %78 : vector<64x128xf32> to vector<1x8x8x128xf32>
    %c0_73 = arith.constant 0 : index
    %c0_74 = arith.constant 0 : index
    %c0_75 = arith.constant 0 : index
    %c0_76 = arith.constant 0 : index
    %80 = vector.load %arg6[%c0_73, %c0_74, %c0_75, %c0_76] : memref<1x8x8x128xf32, #tpu.memory_space<vmem>>, vector<1x8x8x128xf32>
    tpu.vector_store %arg6[%c0_73, %c0_74, %c0_75, %c0_76], %79 {strides = array<i32>} : memref<1x8x8x128xf32, #tpu.memory_space<vmem>>, vector<1x8x8x128xf32>,
    return
  }
  func.func @transform_0(%arg0: i32) -> (i32, i32, i32, i32) {
    %c0_i32 = arith.constant 0 : i32
    %c0_i32_0 = arith.constant 0 : i32
    %c0_i32_1 = arith.constant 0 : i32
    %c0_i32_2 = arith.constant 0 : i32
    return %arg0, %c0_i32, %c0_i32_0, %c0_i32_1 : i32, i32, i32, i32
  }
  func.func @transform_1(%arg0: i32) -> (i32, i32, i32) {
    %c0_i32 = arith.constant 0 : i32
    %c0_i32_0 = arith.constant 0 : i32
    %c0_i32_1 = arith.constant 0 : i32
    %c0_i32_2 = arith.constant 0 : i32
    return %c0_i32, %c0_i32_0, %c0_i32_1 : i32, i32, i32
  }
  func.func @transform_2(%arg0: i32) -> (i32, i32, i32, i32) {
    %c0_i32 = arith.constant 0 : i32
    %c0_i32_0 = arith.constant 0 : i32
    %c0_i32_1 = arith.constant 0 : i32
    %c0_i32_2 = arith.constant 0 : i32
    return %arg0, %c0_i32, %c0_i32_0, %c0_i32_1 : i32, i32, i32, i32
  }
  func.func @transform_3(%arg0: i32) -> (i32, i32) {
    %c0_i32 = arith.constant 0 : i32
    %c0_i32_0 = arith.constant 0 : i32
    %c0_i32_1 = arith.constant 0 : i32
    return %c0_i32, %c0_i32_0 : i32, i32
  }
  func.func @transform_4(%arg0: i32) -> i32 {
    %c0_i32 = arith.constant 0 : i32
    %c0_i32_0 = arith.constant 0 : i32
    return %c0_i32 : i32
  }
  func.func @transform_5(%arg0: i32) -> (i32, i32, i32, i32) {
    %c0_i32 = arith.constant 0 : i32
    %c0_i32_0 = arith.constant 0 : i32
    %c0_i32_1 = arith.constant 0 : i32
    %c0_i32_2 = arith.constant 0 : i32
    return %arg0, %c0_i32, %c0_i32_0, %c0_i32_1 : i32, i32, i32, i32
  }
}

module attributes {stable_mosaic.version = 11 : i64} {
  func.func @_prelude_pad_kernel(%arg0: i32, %arg1: memref<1x8x8x128xf32, #tpu.memory_space<vmem>>, %arg2: memref<2xf32, #tpu.memory_space<smem>>, %arg3: memref<1x10x10x128xbf16, #tpu.memory_space<vmem>>) attributes {dimension_semantics = [#tpu.dimension_semantics<parallel>], iteration_bounds = array<i64: 2>, scalar_prefetch = 0 : i64, scratch_operands = 0 : i64, tpu.core_type = #tpu.core_type<tc>, window_params = [{transform_indices = @transform_0, window_bounds = array<i64: 1, 8, 8, 128>}, {transform_indices = @transform_1, window_bounds = array<i64: 2>}, {transform_indices = @transform_2, window_bounds = array<i64: 1, 10, 10, 128>}]} {
    %c0 = arith.constant 0 : index
    %c0_0 = arith.constant 0 : index
    %c0_1 = arith.constant 0 : index
    %c0_2 = arith.constant 0 : index
    %0 = vector.load %arg1[%c0, %c0_0, %c0_1, %c0_2] : memref<1x8x8x128xf32, #tpu.memory_space<vmem>>, vector<1x8x8x128xf32>
    %1 = vector.shape_cast %0 : vector<1x8x8x128xf32> to vector<8x8x128xf32>
    %c0_3 = arith.constant 0 : index
    %2 = memref.load %arg2[%c0_3] : memref<2xf32, #tpu.memory_space<smem>>
    %3 = vector.broadcast %2 : f32 to vector<8x8x128xf32>
    %4 = arith.addf %1, %3 : vector<8x8x128xf32>
    %cst = arith.constant 0.000000e+00 : f32
    %5 = vector.broadcast %cst : f32 to vector<8x8x128xf32>
    %6 = arith.maximumf %4, %5 : vector<8x8x128xf32>
    %c1 = arith.constant 1 : index
    %7 = memref.load %arg2[%c1] : memref<2xf32, #tpu.memory_space<smem>>
    %8 = vector.broadcast %7 : f32 to vector<8x8x128xf32>
    %9 = arith.addf %6, %8 : vector<8x8x128xf32>
    %cst_4 = arith.constant 0.000000e+00 : bf16
    %10 = vector.broadcast %cst_4 : bf16 to vector<1x10x10x128xbf16>
    %c0_5 = arith.constant 0 : index
    %c0_6 = arith.constant 0 : index
    %c0_7 = arith.constant 0 : index
    %c0_8 = arith.constant 0 : index
    %11 = vector.load %arg3[%c0_5, %c0_6, %c0_7, %c0_8] : memref<1x10x10x128xbf16, #tpu.memory_space<vmem>>, vector<1x10x10x128xbf16>
    tpu.vector_store %arg3[%c0_5, %c0_6, %c0_7, %c0_8], %10 {strides = array<i32>} : memref<1x10x10x128xbf16, #tpu.memory_space<vmem>>, vector<1x10x10x128xbf16>,
    %12 = arith.truncf %9 : vector<8x8x128xf32> to vector<8x8x128xbf16>
    %c0_9 = arith.constant 0 : index
    %c1_10 = arith.constant 1 : index
    %c1_11 = arith.constant 1 : index
    %c0_12 = arith.constant 0 : index
    %13 = vector.load %arg3[%c0_9, %c1_10, %c1_11, %c0_12] : memref<1x10x10x128xbf16, #tpu.memory_space<vmem>>, vector<1x8x8x128xbf16>
    %14 = vector.shape_cast %13 : vector<1x8x8x128xbf16> to vector<8x8x128xbf16>
    %15 = vector.shape_cast %12 : vector<8x8x128xbf16> to vector<1x8x8x128xbf16>
    tpu.vector_store %arg3[%c0_9, %c1_10, %c1_11, %c0_12], %15 {strides = array<i32>} : memref<1x10x10x128xbf16, #tpu.memory_space<vmem>>, vector<1x8x8x128xbf16>,
    return
  }
  func.func @transform_0(%arg0: i32) -> (i32, i32, i32, i32) {
    %c0_i32 = arith.constant 0 : i32
    %c0_i32_0 = arith.constant 0 : i32
    %c0_i32_1 = arith.constant 0 : i32
    %c0_i32_2 = arith.constant 0 : i32
    return %arg0, %c0_i32, %c0_i32_0, %c0_i32_1 : i32, i32, i32, i32
  }
  func.func @transform_1(%arg0: i32) -> i32 {
    %c0_i32 = arith.constant 0 : i32
    %c0_i32_0 = arith.constant 0 : i32
    return %c0_i32 : i32
  }
  func.func @transform_2(%arg0: i32) -> (i32, i32, i32, i32) {
    %c0_i32 = arith.constant 0 : i32
    %c0_i32_0 = arith.constant 0 : i32
    %c0_i32_1 = arith.constant 0 : i32
    %c0_i32_2 = arith.constant 0 : i32
    return %arg0, %c0_i32, %c0_i32_0, %c0_i32_1 : i32, i32, i32, i32
  }
}

module attributes {stable_mosaic.version = 11 : i64} {
  func.func @kernel(%arg0: i32, %arg1: memref<1x10x10x128xbf16, #tpu.memory_space<vmem>>, %arg2: memref<9x128x128xbf16, #tpu.memory_space<vmem>>, %arg3: memref<2xf32, #tpu.memory_space<smem>>, %arg4: memref<1x10x10x128xbf16, #tpu.memory_space<vmem>>) attributes {dimension_semantics = [#tpu.dimension_semantics<parallel>], iteration_bounds = array<i64: 2>, scalar_prefetch = 0 : i64, scratch_operands = 0 : i64, tpu.core_type = #tpu.core_type<tc>, window_params = [{transform_indices = @transform_0, window_bounds = array<i64: 1, 10, 10, 128>}, {pipeline_mode = #tpu.pipeline_mode<synchronous>, transform_indices = @transform_1, window_bounds = array<i64: 9, 128, 128>}, {transform_indices = @transform_2, window_bounds = array<i64: 2>}, {transform_indices = @transform_3, window_bounds = array<i64: 1, 10, 10, 128>}]} {
    %cst = arith.constant 0.000000e+00 : f32
    %0 = vector.broadcast %cst : f32 to vector<64x128xf32>
    %c0 = arith.constant 0 : index
    %c0_0 = arith.constant 0 : index
    %c0_1 = arith.constant 0 : index
    %c0_2 = arith.constant 0 : index
    %1 = vector.load %arg1[%c0, %c0_0, %c0_1, %c0_2] : memref<1x10x10x128xbf16, #tpu.memory_space<vmem>>, vector<1x8x8x128xbf16>
    %2 = vector.shape_cast %1 : vector<1x8x8x128xbf16> to vector<8x8x128xbf16>
    %3 = vector.shape_cast %2 : vector<8x8x128xbf16> to vector<64x128xbf16>
    %c0_3 = arith.constant 0 : index
    %c0_4 = arith.constant 0 : index
    %c0_5 = arith.constant 0 : index
    %4 = vector.load %arg2[%c0_3, %c0_4, %c0_5] : memref<9x128x128xbf16, #tpu.memory_space<vmem>>, vector<1x128x128xbf16>
    %5 = vector.shape_cast %4 : vector<1x128x128xbf16> to vector<128x128xbf16>
    %cst_6 = arith.constant dense<0.000000e+00> : vector<64x128xf32>
    %6 = tpu.matmul %3, %5, %cst_6 {dimension_numbers = #tpu.dot_dimension_numbers<[1], [0], [0], [1], [0, 0, 1, 1], [], []>} : vector<64x128xbf16>, vector<128x128xbf16>, vector<64x128xf32> -> vector<64x128xf32>
    %7 = arith.addf %0, %6 : vector<64x128xf32>
    %c0_7 = arith.constant 0 : index
    %c0_8 = arith.constant 0 : index
    %c1 = arith.constant 1 : index
    %c0_9 = arith.constant 0 : index
    %8 = vector.load %arg1[%c0_7, %c0_8, %c1, %c0_9] : memref<1x10x10x128xbf16, #tpu.memory_space<vmem>>, vector<1x8x8x128xbf16>
    %9 = vector.shape_cast %8 : vector<1x8x8x128xbf16> to vector<8x8x128xbf16>
    %10 = vector.shape_cast %9 : vector<8x8x128xbf16> to vector<64x128xbf16>
    %c1_10 = arith.constant 1 : index
    %c0_11 = arith.constant 0 : index
    %c0_12 = arith.constant 0 : index
    %11 = vector.load %arg2[%c1_10, %c0_11, %c0_12] : memref<9x128x128xbf16, #tpu.memory_space<vmem>>, vector<1x128x128xbf16>
    %12 = vector.shape_cast %11 : vector<1x128x128xbf16> to vector<128x128xbf16>
    %cst_13 = arith.constant dense<0.000000e+00> : vector<64x128xf32>
    %13 = tpu.matmul %10, %12, %cst_13 {dimension_numbers = #tpu.dot_dimension_numbers<[1], [0], [0], [1], [0, 0, 1, 1], [], []>} : vector<64x128xbf16>, vector<128x128xbf16>, vector<64x128xf32> -> vector<64x128xf32>
    %14 = arith.addf %7, %13 : vector<64x128xf32>
    %c0_14 = arith.constant 0 : index
    %c0_15 = arith.constant 0 : index
    %c2 = arith.constant 2 : index
    %c0_16 = arith.constant 0 : index
    %15 = vector.load %arg1[%c0_14, %c0_15, %c2, %c0_16] : memref<1x10x10x128xbf16, #tpu.memory_space<vmem>>, vector<1x8x8x128xbf16>
    %16 = vector.shape_cast %15 : vector<1x8x8x128xbf16> to vector<8x8x128xbf16>
    %17 = vector.shape_cast %16 : vector<8x8x128xbf16> to vector<64x128xbf16>
    %c2_17 = arith.constant 2 : index
    %c0_18 = arith.constant 0 : index
    %c0_19 = arith.constant 0 : index
    %18 = vector.load %arg2[%c2_17, %c0_18, %c0_19] : memref<9x128x128xbf16, #tpu.memory_space<vmem>>, vector<1x128x128xbf16>
    %19 = vector.shape_cast %18 : vector<1x128x128xbf16> to vector<128x128xbf16>
    %cst_20 = arith.constant dense<0.000000e+00> : vector<64x128xf32>
    %20 = tpu.matmul %17, %19, %cst_20 {dimension_numbers = #tpu.dot_dimension_numbers<[1], [0], [0], [1], [0, 0, 1, 1], [], []>} : vector<64x128xbf16>, vector<128x128xbf16>, vector<64x128xf32> -> vector<64x128xf32>
    %21 = arith.addf %14, %20 : vector<64x128xf32>
    %c0_21 = arith.constant 0 : index
    %c1_22 = arith.constant 1 : index
    %c0_23 = arith.constant 0 : index
    %c0_24 = arith.constant 0 : index
    %22 = vector.load %arg1[%c0_21, %c1_22, %c0_23, %c0_24] : memref<1x10x10x128xbf16, #tpu.memory_space<vmem>>, vector<1x8x8x128xbf16>
    %23 = vector.shape_cast %22 : vector<1x8x8x128xbf16> to vector<8x8x128xbf16>
    %24 = vector.shape_cast %23 : vector<8x8x128xbf16> to vector<64x128xbf16>
    %c3 = arith.constant 3 : index
    %c0_25 = arith.constant 0 : index
    %c0_26 = arith.constant 0 : index
    %25 = vector.load %arg2[%c3, %c0_25, %c0_26] : memref<9x128x128xbf16, #tpu.memory_space<vmem>>, vector<1x128x128xbf16>
    %26 = vector.shape_cast %25 : vector<1x128x128xbf16> to vector<128x128xbf16>
    %cst_27 = arith.constant dense<0.000000e+00> : vector<64x128xf32>
    %27 = tpu.matmul %24, %26, %cst_27 {dimension_numbers = #tpu.dot_dimension_numbers<[1], [0], [0], [1], [0, 0, 1, 1], [], []>} : vector<64x128xbf16>, vector<128x128xbf16>, vector<64x128xf32> -> vector<64x128xf32>
    %28 = arith.addf %21, %27 : vector<64x128xf32>
    %c0_28 = arith.constant 0 : index
    %c1_29 = arith.constant 1 : index
    %c1_30 = arith.constant 1 : index
    %c0_31 = arith.constant 0 : index
    %29 = vector.load %arg1[%c0_28, %c1_29, %c1_30, %c0_31] : memref<1x10x10x128xbf16, #tpu.memory_space<vmem>>, vector<1x8x8x128xbf16>
    %30 = vector.shape_cast %29 : vector<1x8x8x128xbf16> to vector<8x8x128xbf16>
    %31 = vector.shape_cast %30 : vector<8x8x128xbf16> to vector<64x128xbf16>
    %c4 = arith.constant 4 : index
    %c0_32 = arith.constant 0 : index
    %c0_33 = arith.constant 0 : index
    %32 = vector.load %arg2[%c4, %c0_32, %c0_33] : memref<9x128x128xbf16, #tpu.memory_space<vmem>>, vector<1x128x128xbf16>
    %33 = vector.shape_cast %32 : vector<1x128x128xbf16> to vector<128x128xbf16>
    %cst_34 = arith.constant dense<0.000000e+00> : vector<64x128xf32>
    %34 = tpu.matmul %31, %33, %cst_34 {dimension_numbers = #tpu.dot_dimension_numbers<[1], [0], [0], [1], [0, 0, 1, 1], [], []>} : vector<64x128xbf16>, vector<128x128xbf16>, vector<64x128xf32> -> vector<64x128xf32>
    %35 = arith.addf %28, %34 : vector<64x128xf32>
    %c0_35 = arith.constant 0 : index
    %c1_36 = arith.constant 1 : index
    %c2_37 = arith.constant 2 : index
    %c0_38 = arith.constant 0 : index
    %36 = vector.load %arg1[%c0_35, %c1_36, %c2_37, %c0_38] : memref<1x10x10x128xbf16, #tpu.memory_space<vmem>>, vector<1x8x8x128xbf16>
    %37 = vector.shape_cast %36 : vector<1x8x8x128xbf16> to vector<8x8x128xbf16>
    %38 = vector.shape_cast %37 : vector<8x8x128xbf16> to vector<64x128xbf16>
    %c5 = arith.constant 5 : index
    %c0_39 = arith.constant 0 : index
    %c0_40 = arith.constant 0 : index
    %39 = vector.load %arg2[%c5, %c0_39, %c0_40] : memref<9x128x128xbf16, #tpu.memory_space<vmem>>, vector<1x128x128xbf16>
    %40 = vector.shape_cast %39 : vector<1x128x128xbf16> to vector<128x128xbf16>
    %cst_41 = arith.constant dense<0.000000e+00> : vector<64x128xf32>
    %41 = tpu.matmul %38, %40, %cst_41 {dimension_numbers = #tpu.dot_dimension_numbers<[1], [0], [0], [1], [0, 0, 1, 1], [], []>} : vector<64x128xbf16>, vector<128x128xbf16>, vector<64x128xf32> -> vector<64x128xf32>
    %42 = arith.addf %35, %41 : vector<64x128xf32>
    %c0_42 = arith.constant 0 : index
    %c2_43 = arith.constant 2 : index
    %c0_44 = arith.constant 0 : index
    %c0_45 = arith.constant 0 : index
    %43 = vector.load %arg1[%c0_42, %c2_43, %c0_44, %c0_45] : memref<1x10x10x128xbf16, #tpu.memory_space<vmem>>, vector<1x8x8x128xbf16>
    %44 = vector.shape_cast %43 : vector<1x8x8x128xbf16> to vector<8x8x128xbf16>
    %45 = vector.shape_cast %44 : vector<8x8x128xbf16> to vector<64x128xbf16>
    %c6 = arith.constant 6 : index
    %c0_46 = arith.constant 0 : index
    %c0_47 = arith.constant 0 : index
    %46 = vector.load %arg2[%c6, %c0_46, %c0_47] : memref<9x128x128xbf16, #tpu.memory_space<vmem>>, vector<1x128x128xbf16>
    %47 = vector.shape_cast %46 : vector<1x128x128xbf16> to vector<128x128xbf16>
    %cst_48 = arith.constant dense<0.000000e+00> : vector<64x128xf32>
    %48 = tpu.matmul %45, %47, %cst_48 {dimension_numbers = #tpu.dot_dimension_numbers<[1], [0], [0], [1], [0, 0, 1, 1], [], []>} : vector<64x128xbf16>, vector<128x128xbf16>, vector<64x128xf32> -> vector<64x128xf32>
    %49 = arith.addf %42, %48 : vector<64x128xf32>
    %c0_49 = arith.constant 0 : index
    %c2_50 = arith.constant 2 : index
    %c1_51 = arith.constant 1 : index
    %c0_52 = arith.constant 0 : index
    %50 = vector.load %arg1[%c0_49, %c2_50, %c1_51, %c0_52] : memref<1x10x10x128xbf16, #tpu.memory_space<vmem>>, vector<1x8x8x128xbf16>
    %51 = vector.shape_cast %50 : vector<1x8x8x128xbf16> to vector<8x8x128xbf16>
    %52 = vector.shape_cast %51 : vector<8x8x128xbf16> to vector<64x128xbf16>
    %c7 = arith.constant 7 : index
    %c0_53 = arith.constant 0 : index
    %c0_54 = arith.constant 0 : index
    %53 = vector.load %arg2[%c7, %c0_53, %c0_54] : memref<9x128x128xbf16, #tpu.memory_space<vmem>>, vector<1x128x128xbf16>
    %54 = vector.shape_cast %53 : vector<1x128x128xbf16> to vector<128x128xbf16>
    %cst_55 = arith.constant dense<0.000000e+00> : vector<64x128xf32>
    %55 = tpu.matmul %52, %54, %cst_55 {dimension_numbers = #tpu.dot_dimension_numbers<[1], [0], [0], [1], [0, 0, 1, 1], [], []>} : vector<64x128xbf16>, vector<128x128xbf16>, vector<64x128xf32> -> vector<64x128xf32>
    %56 = arith.addf %49, %55 : vector<64x128xf32>
    %c0_56 = arith.constant 0 : index
    %c2_57 = arith.constant 2 : index
    %c2_58 = arith.constant 2 : index
    %c0_59 = arith.constant 0 : index
    %57 = vector.load %arg1[%c0_56, %c2_57, %c2_58, %c0_59] : memref<1x10x10x128xbf16, #tpu.memory_space<vmem>>, vector<1x8x8x128xbf16>
    %58 = vector.shape_cast %57 : vector<1x8x8x128xbf16> to vector<8x8x128xbf16>
    %59 = vector.shape_cast %58 : vector<8x8x128xbf16> to vector<64x128xbf16>
    %c8 = arith.constant 8 : index
    %c0_60 = arith.constant 0 : index
    %c0_61 = arith.constant 0 : index
    %60 = vector.load %arg2[%c8, %c0_60, %c0_61] : memref<9x128x128xbf16, #tpu.memory_space<vmem>>, vector<1x128x128xbf16>
    %61 = vector.shape_cast %60 : vector<1x128x128xbf16> to vector<128x128xbf16>
    %cst_62 = arith.constant dense<0.000000e+00> : vector<64x128xf32>
    %62 = tpu.matmul %59, %61, %cst_62 {dimension_numbers = #tpu.dot_dimension_numbers<[1], [0], [0], [1], [0, 0, 1, 1], [], []>} : vector<64x128xbf16>, vector<128x128xbf16>, vector<64x128xf32> -> vector<64x128xf32>
    %63 = arith.addf %56, %62 : vector<64x128xf32>
    %c0_63 = arith.constant 0 : index
    %64 = memref.load %arg3[%c0_63] : memref<2xf32, #tpu.memory_space<smem>>
    %65 = vector.broadcast %64 : f32 to vector<64x128xf32>
    %66 = arith.addf %63, %65 : vector<64x128xf32>
    %cst_64 = arith.constant 0.000000e+00 : f32
    %67 = vector.broadcast %cst_64 : f32 to vector<64x128xf32>
    %68 = arith.maximumf %66, %67 : vector<64x128xf32>
    %c1_65 = arith.constant 1 : index
    %69 = memref.load %arg3[%c1_65] : memref<2xf32, #tpu.memory_space<smem>>
    %70 = vector.broadcast %69 : f32 to vector<64x128xf32>
    %71 = arith.addf %68, %70 : vector<64x128xf32>
    %cst_66 = arith.constant 0.000000e+00 : bf16
    %72 = vector.broadcast %cst_66 : bf16 to vector<1x10x10x128xbf16>
    %c0_67 = arith.constant 0 : index
    %c0_68 = arith.constant 0 : index
    %c0_69 = arith.constant 0 : index
    %c0_70 = arith.constant 0 : index
    %73 = vector.load %arg4[%c0_67, %c0_68, %c0_69, %c0_70] : memref<1x10x10x128xbf16, #tpu.memory_space<vmem>>, vector<1x10x10x128xbf16>
    tpu.vector_store %arg4[%c0_67, %c0_68, %c0_69, %c0_70], %72 {strides = array<i32>} : memref<1x10x10x128xbf16, #tpu.memory_space<vmem>>, vector<1x10x10x128xbf16>,
    %74 = vector.shape_cast %71 : vector<64x128xf32> to vector<8x8x128xf32>
    %75 = arith.truncf %74 : vector<8x8x128xf32> to vector<8x8x128xbf16>
    %c0_71 = arith.constant 0 : index
    %c1_72 = arith.constant 1 : index
    %c1_73 = arith.constant 1 : index
    %c0_74 = arith.constant 0 : index
    %76 = vector.load %arg4[%c0_71, %c1_72, %c1_73, %c0_74] : memref<1x10x10x128xbf16, #tpu.memory_space<vmem>>, vector<1x8x8x128xbf16>
    %77 = vector.shape_cast %76 : vector<1x8x8x128xbf16> to vector<8x8x128xbf16>
    %78 = vector.shape_cast %75 : vector<8x8x128xbf16> to vector<1x8x8x128xbf16>
    tpu.vector_store %arg4[%c0_71, %c1_72, %c1_73, %c0_74], %78 {strides = array<i32>} : memref<1x10x10x128xbf16, #tpu.memory_space<vmem>>, vector<1x8x8x128xbf16>,
    return
  }
  func.func @transform_0(%arg0: i32) -> (i32, i32, i32, i32) {
    %c0_i32 = arith.constant 0 : i32
    %c0_i32_0 = arith.constant 0 : i32
    %c0_i32_1 = arith.constant 0 : i32
    %c0_i32_2 = arith.constant 0 : i32
    return %arg0, %c0_i32, %c0_i32_0, %c0_i32_1 : i32, i32, i32, i32
  }
  func.func @transform_1(%arg0: i32) -> (i32, i32, i32) {
    %c0_i32 = arith.constant 0 : i32
    %c0_i32_0 = arith.constant 0 : i32
    %c0_i32_1 = arith.constant 0 : i32
    %c0_i32_2 = arith.constant 0 : i32
    return %c0_i32, %c0_i32_0, %c0_i32_1 : i32, i32, i32
  }
  func.func @transform_2(%arg0: i32) -> i32 {
    %c0_i32 = arith.constant 0 : i32
    %c0_i32_0 = arith.constant 0 : i32
    return %c0_i32 : i32
  }
  func.func @transform_3(%arg0: i32) -> (i32, i32, i32, i32) {
    %c0_i32 = arith.constant 0 : i32
    %c0_i32_0 = arith.constant 0 : i32
    %c0_i32_1 = arith.constant 0 : i32
    %c0_i32_2 = arith.constant 0 : i32
    return %arg0, %c0_i32, %c0_i32_0, %c0_i32_1 : i32, i32, i32, i32
  }
}

module attributes {stable_mosaic.version = 11 : i64} {
  func.func @kernel(%arg0: i32, %arg1: memref<1x10x10x128xbf16, #tpu.memory_space<vmem>>, %arg2: memref<9x128x128xbf16, #tpu.memory_space<vmem>>, %arg3: memref<1x8x8x128xf32, #tpu.memory_space<vmem>>, %arg4: memref<2xf32, #tpu.memory_space<smem>>, %arg5: memref<1x8x8x128xf32, #tpu.memory_space<vmem>>) attributes {dimension_semantics = [#tpu.dimension_semantics<parallel>], iteration_bounds = array<i64: 2>, scalar_prefetch = 0 : i64, scratch_operands = 0 : i64, tpu.core_type = #tpu.core_type<tc>, window_params = [{transform_indices = @transform_0, window_bounds = array<i64: 1, 10, 10, 128>}, {pipeline_mode = #tpu.pipeline_mode<synchronous>, transform_indices = @transform_1, window_bounds = array<i64: 9, 128, 128>}, {transform_indices = @transform_2, window_bounds = array<i64: 1, 8, 8, 128>}, {transform_indices = @transform_3, window_bounds = array<i64: 2>}, {transform_indices = @transform_4, window_bounds = array<i64: 1, 8, 8, 128>}]} {
    %cst = arith.constant 0.000000e+00 : f32
    %0 = vector.broadcast %cst : f32 to vector<64x128xf32>
    %c0 = arith.constant 0 : index
    %c0_0 = arith.constant 0 : index
    %c0_1 = arith.constant 0 : index
    %c0_2 = arith.constant 0 : index
    %1 = vector.load %arg1[%c0, %c0_0, %c0_1, %c0_2] : memref<1x10x10x128xbf16, #tpu.memory_space<vmem>>, vector<1x8x8x128xbf16>
    %2 = vector.shape_cast %1 : vector<1x8x8x128xbf16> to vector<8x8x128xbf16>
    %3 = vector.shape_cast %2 : vector<8x8x128xbf16> to vector<64x128xbf16>
    %c0_3 = arith.constant 0 : index
    %c0_4 = arith.constant 0 : index
    %c0_5 = arith.constant 0 : index
    %4 = vector.load %arg2[%c0_3, %c0_4, %c0_5] : memref<9x128x128xbf16, #tpu.memory_space<vmem>>, vector<1x128x128xbf16>
    %5 = vector.shape_cast %4 : vector<1x128x128xbf16> to vector<128x128xbf16>
    %cst_6 = arith.constant dense<0.000000e+00> : vector<64x128xf32>
    %6 = tpu.matmul %3, %5, %cst_6 {dimension_numbers = #tpu.dot_dimension_numbers<[1], [0], [0], [1], [0, 0, 1, 1], [], []>} : vector<64x128xbf16>, vector<128x128xbf16>, vector<64x128xf32> -> vector<64x128xf32>
    %7 = arith.addf %0, %6 : vector<64x128xf32>
    %c0_7 = arith.constant 0 : index
    %c0_8 = arith.constant 0 : index
    %c1 = arith.constant 1 : index
    %c0_9 = arith.constant 0 : index
    %8 = vector.load %arg1[%c0_7, %c0_8, %c1, %c0_9] : memref<1x10x10x128xbf16, #tpu.memory_space<vmem>>, vector<1x8x8x128xbf16>
    %9 = vector.shape_cast %8 : vector<1x8x8x128xbf16> to vector<8x8x128xbf16>
    %10 = vector.shape_cast %9 : vector<8x8x128xbf16> to vector<64x128xbf16>
    %c1_10 = arith.constant 1 : index
    %c0_11 = arith.constant 0 : index
    %c0_12 = arith.constant 0 : index
    %11 = vector.load %arg2[%c1_10, %c0_11, %c0_12] : memref<9x128x128xbf16, #tpu.memory_space<vmem>>, vector<1x128x128xbf16>
    %12 = vector.shape_cast %11 : vector<1x128x128xbf16> to vector<128x128xbf16>
    %cst_13 = arith.constant dense<0.000000e+00> : vector<64x128xf32>
    %13 = tpu.matmul %10, %12, %cst_13 {dimension_numbers = #tpu.dot_dimension_numbers<[1], [0], [0], [1], [0, 0, 1, 1], [], []>} : vector<64x128xbf16>, vector<128x128xbf16>, vector<64x128xf32> -> vector<64x128xf32>
    %14 = arith.addf %7, %13 : vector<64x128xf32>
    %c0_14 = arith.constant 0 : index
    %c0_15 = arith.constant 0 : index
    %c2 = arith.constant 2 : index
    %c0_16 = arith.constant 0 : index
    %15 = vector.load %arg1[%c0_14, %c0_15, %c2, %c0_16] : memref<1x10x10x128xbf16, #tpu.memory_space<vmem>>, vector<1x8x8x128xbf16>
    %16 = vector.shape_cast %15 : vector<1x8x8x128xbf16> to vector<8x8x128xbf16>
    %17 = vector.shape_cast %16 : vector<8x8x128xbf16> to vector<64x128xbf16>
    %c2_17 = arith.constant 2 : index
    %c0_18 = arith.constant 0 : index
    %c0_19 = arith.constant 0 : index
    %18 = vector.load %arg2[%c2_17, %c0_18, %c0_19] : memref<9x128x128xbf16, #tpu.memory_space<vmem>>, vector<1x128x128xbf16>
    %19 = vector.shape_cast %18 : vector<1x128x128xbf16> to vector<128x128xbf16>
    %cst_20 = arith.constant dense<0.000000e+00> : vector<64x128xf32>
    %20 = tpu.matmul %17, %19, %cst_20 {dimension_numbers = #tpu.dot_dimension_numbers<[1], [0], [0], [1], [0, 0, 1, 1], [], []>} : vector<64x128xbf16>, vector<128x128xbf16>, vector<64x128xf32> -> vector<64x128xf32>
    %21 = arith.addf %14, %20 : vector<64x128xf32>
    %c0_21 = arith.constant 0 : index
    %c1_22 = arith.constant 1 : index
    %c0_23 = arith.constant 0 : index
    %c0_24 = arith.constant 0 : index
    %22 = vector.load %arg1[%c0_21, %c1_22, %c0_23, %c0_24] : memref<1x10x10x128xbf16, #tpu.memory_space<vmem>>, vector<1x8x8x128xbf16>
    %23 = vector.shape_cast %22 : vector<1x8x8x128xbf16> to vector<8x8x128xbf16>
    %24 = vector.shape_cast %23 : vector<8x8x128xbf16> to vector<64x128xbf16>
    %c3 = arith.constant 3 : index
    %c0_25 = arith.constant 0 : index
    %c0_26 = arith.constant 0 : index
    %25 = vector.load %arg2[%c3, %c0_25, %c0_26] : memref<9x128x128xbf16, #tpu.memory_space<vmem>>, vector<1x128x128xbf16>
    %26 = vector.shape_cast %25 : vector<1x128x128xbf16> to vector<128x128xbf16>
    %cst_27 = arith.constant dense<0.000000e+00> : vector<64x128xf32>
    %27 = tpu.matmul %24, %26, %cst_27 {dimension_numbers = #tpu.dot_dimension_numbers<[1], [0], [0], [1], [0, 0, 1, 1], [], []>} : vector<64x128xbf16>, vector<128x128xbf16>, vector<64x128xf32> -> vector<64x128xf32>
    %28 = arith.addf %21, %27 : vector<64x128xf32>
    %c0_28 = arith.constant 0 : index
    %c1_29 = arith.constant 1 : index
    %c1_30 = arith.constant 1 : index
    %c0_31 = arith.constant 0 : index
    %29 = vector.load %arg1[%c0_28, %c1_29, %c1_30, %c0_31] : memref<1x10x10x128xbf16, #tpu.memory_space<vmem>>, vector<1x8x8x128xbf16>
    %30 = vector.shape_cast %29 : vector<1x8x8x128xbf16> to vector<8x8x128xbf16>
    %31 = vector.shape_cast %30 : vector<8x8x128xbf16> to vector<64x128xbf16>
    %c4 = arith.constant 4 : index
    %c0_32 = arith.constant 0 : index
    %c0_33 = arith.constant 0 : index
    %32 = vector.load %arg2[%c4, %c0_32, %c0_33] : memref<9x128x128xbf16, #tpu.memory_space<vmem>>, vector<1x128x128xbf16>
    %33 = vector.shape_cast %32 : vector<1x128x128xbf16> to vector<128x128xbf16>
    %cst_34 = arith.constant dense<0.000000e+00> : vector<64x128xf32>
    %34 = tpu.matmul %31, %33, %cst_34 {dimension_numbers = #tpu.dot_dimension_numbers<[1], [0], [0], [1], [0, 0, 1, 1], [], []>} : vector<64x128xbf16>, vector<128x128xbf16>, vector<64x128xf32> -> vector<64x128xf32>
    %35 = arith.addf %28, %34 : vector<64x128xf32>
    %c0_35 = arith.constant 0 : index
    %c1_36 = arith.constant 1 : index
    %c2_37 = arith.constant 2 : index
    %c0_38 = arith.constant 0 : index
    %36 = vector.load %arg1[%c0_35, %c1_36, %c2_37, %c0_38] : memref<1x10x10x128xbf16, #tpu.memory_space<vmem>>, vector<1x8x8x128xbf16>
    %37 = vector.shape_cast %36 : vector<1x8x8x128xbf16> to vector<8x8x128xbf16>
    %38 = vector.shape_cast %37 : vector<8x8x128xbf16> to vector<64x128xbf16>
    %c5 = arith.constant 5 : index
    %c0_39 = arith.constant 0 : index
    %c0_40 = arith.constant 0 : index
    %39 = vector.load %arg2[%c5, %c0_39, %c0_40] : memref<9x128x128xbf16, #tpu.memory_space<vmem>>, vector<1x128x128xbf16>
    %40 = vector.shape_cast %39 : vector<1x128x128xbf16> to vector<128x128xbf16>
    %cst_41 = arith.constant dense<0.000000e+00> : vector<64x128xf32>
    %41 = tpu.matmul %38, %40, %cst_41 {dimension_numbers = #tpu.dot_dimension_numbers<[1], [0], [0], [1], [0, 0, 1, 1], [], []>} : vector<64x128xbf16>, vector<128x128xbf16>, vector<64x128xf32> -> vector<64x128xf32>
    %42 = arith.addf %35, %41 : vector<64x128xf32>
    %c0_42 = arith.constant 0 : index
    %c2_43 = arith.constant 2 : index
    %c0_44 = arith.constant 0 : index
    %c0_45 = arith.constant 0 : index
    %43 = vector.load %arg1[%c0_42, %c2_43, %c0_44, %c0_45] : memref<1x10x10x128xbf16, #tpu.memory_space<vmem>>, vector<1x8x8x128xbf16>
    %44 = vector.shape_cast %43 : vector<1x8x8x128xbf16> to vector<8x8x128xbf16>
    %45 = vector.shape_cast %44 : vector<8x8x128xbf16> to vector<64x128xbf16>
    %c6 = arith.constant 6 : index
    %c0_46 = arith.constant 0 : index
    %c0_47 = arith.constant 0 : index
    %46 = vector.load %arg2[%c6, %c0_46, %c0_47] : memref<9x128x128xbf16, #tpu.memory_space<vmem>>, vector<1x128x128xbf16>
    %47 = vector.shape_cast %46 : vector<1x128x128xbf16> to vector<128x128xbf16>
    %cst_48 = arith.constant dense<0.000000e+00> : vector<64x128xf32>
    %48 = tpu.matmul %45, %47, %cst_48 {dimension_numbers = #tpu.dot_dimension_numbers<[1], [0], [0], [1], [0, 0, 1, 1], [], []>} : vector<64x128xbf16>, vector<128x128xbf16>, vector<64x128xf32> -> vector<64x128xf32>
    %49 = arith.addf %42, %48 : vector<64x128xf32>
    %c0_49 = arith.constant 0 : index
    %c2_50 = arith.constant 2 : index
    %c1_51 = arith.constant 1 : index
    %c0_52 = arith.constant 0 : index
    %50 = vector.load %arg1[%c0_49, %c2_50, %c1_51, %c0_52] : memref<1x10x10x128xbf16, #tpu.memory_space<vmem>>, vector<1x8x8x128xbf16>
    %51 = vector.shape_cast %50 : vector<1x8x8x128xbf16> to vector<8x8x128xbf16>
    %52 = vector.shape_cast %51 : vector<8x8x128xbf16> to vector<64x128xbf16>
    %c7 = arith.constant 7 : index
    %c0_53 = arith.constant 0 : index
    %c0_54 = arith.constant 0 : index
    %53 = vector.load %arg2[%c7, %c0_53, %c0_54] : memref<9x128x128xbf16, #tpu.memory_space<vmem>>, vector<1x128x128xbf16>
    %54 = vector.shape_cast %53 : vector<1x128x128xbf16> to vector<128x128xbf16>
    %cst_55 = arith.constant dense<0.000000e+00> : vector<64x128xf32>
    %55 = tpu.matmul %52, %54, %cst_55 {dimension_numbers = #tpu.dot_dimension_numbers<[1], [0], [0], [1], [0, 0, 1, 1], [], []>} : vector<64x128xbf16>, vector<128x128xbf16>, vector<64x128xf32> -> vector<64x128xf32>
    %56 = arith.addf %49, %55 : vector<64x128xf32>
    %c0_56 = arith.constant 0 : index
    %c2_57 = arith.constant 2 : index
    %c2_58 = arith.constant 2 : index
    %c0_59 = arith.constant 0 : index
    %57 = vector.load %arg1[%c0_56, %c2_57, %c2_58, %c0_59] : memref<1x10x10x128xbf16, #tpu.memory_space<vmem>>, vector<1x8x8x128xbf16>
    %58 = vector.shape_cast %57 : vector<1x8x8x128xbf16> to vector<8x8x128xbf16>
    %59 = vector.shape_cast %58 : vector<8x8x128xbf16> to vector<64x128xbf16>
    %c8 = arith.constant 8 : index
    %c0_60 = arith.constant 0 : index
    %c0_61 = arith.constant 0 : index
    %60 = vector.load %arg2[%c8, %c0_60, %c0_61] : memref<9x128x128xbf16, #tpu.memory_space<vmem>>, vector<1x128x128xbf16>
    %61 = vector.shape_cast %60 : vector<1x128x128xbf16> to vector<128x128xbf16>
    %cst_62 = arith.constant dense<0.000000e+00> : vector<64x128xf32>
    %62 = tpu.matmul %59, %61, %cst_62 {dimension_numbers = #tpu.dot_dimension_numbers<[1], [0], [0], [1], [0, 0, 1, 1], [], []>} : vector<64x128xbf16>, vector<128x128xbf16>, vector<64x128xf32> -> vector<64x128xf32>
    %63 = arith.addf %56, %62 : vector<64x128xf32>
    %c0_63 = arith.constant 0 : index
    %64 = memref.load %arg4[%c0_63] : memref<2xf32, #tpu.memory_space<smem>>
    %c0_64 = arith.constant 0 : index
    %c0_65 = arith.constant 0 : index
    %c0_66 = arith.constant 0 : index
    %c0_67 = arith.constant 0 : index
    %65 = vector.load %arg3[%c0_64, %c0_65, %c0_66, %c0_67] : memref<1x8x8x128xf32, #tpu.memory_space<vmem>>, vector<1x8x8x128xf32>
    %66 = vector.shape_cast %65 : vector<1x8x8x128xf32> to vector<8x8x128xf32>
    %67 = vector.shape_cast %66 : vector<8x8x128xf32> to vector<64x128xf32>
    %68 = vector.broadcast %64 : f32 to vector<64x128xf32>
    %69 = arith.mulf %68, %63 : vector<64x128xf32>
    %70 = arith.addf %69, %67 : vector<64x128xf32>
    %71 = vector.shape_cast %70 : vector<64x128xf32> to vector<1x8x8x128xf32>
    %c0_68 = arith.constant 0 : index
    %c0_69 = arith.constant 0 : index
    %c0_70 = arith.constant 0 : index
    %c0_71 = arith.constant 0 : index
    %72 = vector.load %arg5[%c0_68, %c0_69, %c0_70, %c0_71] : memref<1x8x8x128xf32, #tpu.memory_space<vmem>>, vector<1x8x8x128xf32>
    tpu.vector_store %arg5[%c0_68, %c0_69, %c0_70, %c0_71], %71 {strides = array<i32>} : memref<1x8x8x128xf32, #tpu.memory_space<vmem>>, vector<1x8x8x128xf32>,
    return
  }
  func.func @transform_0(%arg0: i32) -> (i32, i32, i32, i32) {
    %c0_i32 = arith.constant 0 : i32
    %c0_i32_0 = arith.constant 0 : i32
    %c0_i32_1 = arith.constant 0 : i32
    %c0_i32_2 = arith.constant 0 : i32
    return %arg0, %c0_i32, %c0_i32_0, %c0_i32_1 : i32, i32, i32, i32
  }
  func.func @transform_1(%arg0: i32) -> (i32, i32, i32) {
    %c0_i32 = arith.constant 0 : i32
    %c0_i32_0 = arith.constant 0 : i32
    %c0_i32_1 = arith.constant 0 : i32
    %c0_i32_2 = arith.constant 0 : i32
    return %c0_i32, %c0_i32_0, %c0_i32_1 : i32, i32, i32
  }
  func.func @transform_2(%arg0: i32) -> (i32, i32, i32, i32) {
    %c0_i32 = arith.constant 0 : i32
    %c0_i32_0 = arith.constant 0 : i32
    %c0_i32_1 = arith.constant 0 : i32
    %c0_i32_2 = arith.constant 0 : i32
    return %arg0, %c0_i32, %c0_i32_0, %c0_i32_1 : i32, i32, i32, i32
  }
  func.func @transform_3(%arg0: i32) -> i32 {
    %c0_i32 = arith.constant 0 : i32
    %c0_i32_0 = arith.constant 0 : i32
    return %c0_i32 : i32
  }
  func.func @transform_4(%arg0: i32) -> (i32, i32, i32, i32) {
    %c0_i32 = arith.constant 0 : i32
    %c0_i32_0 = arith.constant 0 : i32
    %c0_i32_1 = arith.constant 0 : i32
    %c0_i32_2 = arith.constant 0 : i32
    return %arg0, %c0_i32, %c0_i32_0, %c0_i32_1 : i32, i32, i32, i32
  }
}

</mosaic_0001>

<bundles_post_ra>
// kernel: fixup_network_block.6
= control target key start
LH: loop header
LB: loop body
LE: loop exit
PB: predicated region body
PF: predicated region fallthrough
CT: control target
= control target key end

     0   :  { %7 = vsyncpa [#allocation3], 0  ;;  %s1172_s9 = smov 0   ;;  %s1565_s0 = inlined_call_operand.vmem [shape: f32[2,16,16,128], index: 0, kind: input, shape index: {}]   ;;  %s1566_s1 = inlined_call_operand.vmem [shape: f32[2], index: 1, kind: input, shape index: {}]   ;;  %s1567_s2 = inlined_call_operand.vmem [shape: bf16[2,18,18,128], index: 2, kind: output, shape index: {}]  }
   0x1 LB: > { %s949_s10 = sadd.s32 4294967295, %s1153_s9   ;;  %p951_p0 = scmp.ge.s32.totalorder %s1153_s9, 1  ;;  %s1153_s9 = sphi %s1172_s9, %s13_s9  }
   0x2   : > { %p91_p1 = scmp.lt.s32.totalorder %s1153_s9, 3  ;;  %s104_s13 = sshll.u32 %s1566_s1, 4  ;;  %s105_s13 = int_to_ptr.vmem [resolvable:$true] %s104_s13 }
   0x3   : > { %p1116_p3 = scmp.eq.s32.totalorder %s949_s10, 0  ;;  %s1128_s15 = scalar_lea.vmem %s105_s13, 16 }
   0x4   : > { %p1183_p2 = pnand %p951_p0, %p91_p1  ;;  %p1129_p6 = scmp.ne.s32.totalorder %s105_s13, %s1128_s15 }
   0x5   : > { %p1136_p10 = scmp.lt.s32.totalorder %s105_s13, %s105_s13  ;;  %p1137_p11 = scmp.lt.s32.totalorder %s1128_s15, %s1128_s15 }
   0x6   : > { %p1112_p4 = pneg %p1183_p2 }
   0x7   : > { %p1138_p12 = por %p1137_p11, %p1136_p10 }
   0x8   : > { %p1113_p5 = pnand %p1116_p3, %p1112_p4 }
   0xa   : > { %p1130_p7 = pneg %p1113_p5 }
   0xc   : > { %p1131_p8 = pnand %p1130_p7, %p1129_p6 }
   0xe   : > { %p1132_p9 = pneg %p1131_p8 }
  0x10   : > { %p1139_p13 = pnand %p1138_p12, %p1132_p9 }
  0x12   : > { %1142 = shalt.err (!%p1139_p13)
}
  0x13   : > { %s1155_s16 = smov [#allocation2]   ;;  %125 = sbr.rel (%p1183_p2) target bundleno = 135 (0x87), region = 28 }
  0x14   : > { %1115 = dma.vmem_to_smem (!%p1113_p5), %s105_s13, 16, %s1155_s16, [#allocation3]  }
  0x1a   : > { %1148 = dma.done.wait (%p1116_p3), [#allocation3], 16  }
  0x1b   : > { %1150 = vsyncadd (%p1116_p3), [#allocation3], 4294967280 }
  0x1c   : > { %131 = sfence }
  0x1d   : > { %p148_p0 = scmp.lt.s32.totalorder %s949_s10, 1  ;;  %s191_s17 = sld [smem:[#allocation2]]  ;;  %vm766_vm0 = vsmask.f32 7938  ;;  %vm765_vm1 = vcmask 1043456   ;;  %v1156_v4 = vmov 0  }
  0x1e   : > { %s1194_s18 = sld [smem:[#allocation2 + $0x1]]  ;;  %vm441_vm2 = vsmask.f32 256  ;;  %vm442_vm3 = vsmask.f32 4368  ;;  %vm772_vm4 = vcmask 1040384   ;;  %vm1291_vm5 = vmand %vm765_vm1, %vm766_vm0 }
  0x1f   : > { %s1576_s10 = smov (!%p148_p0, %s949_s10), 1  ;;  %vm1298_vm6 = vmor %vm441_vm2, %vm442_vm3 }
  0x20   : > { %s1107_s19 = smul.u32 216, %s1576_s10  ;;  %s1074_s20 = sshll.u32 %s1576_s10, 8  ;;  %vm1304_vm7 = vmand %vm772_vm4, %vm441_vm2 }
  0x21   : > { %s1199_s23 = scalar_lea.vmem %s1565_s0, %s1074_s20 }
  0x22   : > { %s1204_s26 = scalar_lea.vmem %s1567_s2, %s1107_s19  ;;  %v159_v0 = vld [vmem:[%s1199_s23] sm:$0xff]  ;;  %v160_v2 = vld [vmem:[%s1199_s23 + $0x8] sm:$0xff]  ;;  %v161_v3 = vld [vmem:[%s1199_s23 + $0x10] sm:$0xff] }
  0x23   : > { %v1207_v1 = vstv %s191_s17  ;;  %294 = vst [vmem:[%s1204_s26 + $0xc] sm:$0xf] %v1156_v4  ;;  %291 = vst [vmem:[%s1204_s26] sm:$0xf] %v1156_v4  ;;  %v162_v8 = vld [vmem:[%s1199_s23 + $0x18] sm:$0xff] }
  0x24   : > { %292 = vst [vmem:[%s1204_s26 + $0x4] sm:$0xf] %v1156_v4  ;;  %293 = vst [vmem:[%s1204_s26 + $0x8] sm:$0x1] %v1156_v4  ;;  %v193_v5 = vadd.f32 %v1207_v1, %v159_v0  ;;  %v194_v6 = vadd.f32 %v1207_v1, %v160_v2  ;;  %v195_v7 = vadd.f32 %v1207_v1, %v161_v3  ;;  %v163_v9 = vld [vmem:[%s1199_s23 + $0x20] sm:$0xff]  ;;  %v164_v10 = vld [vmem:[%s1199_s23 + $0x28] sm:$0xff] }
  0x25   : > { %295 = vst [vmem:[%s1204_s26 + $0x10] sm:$0xf] %v1156_v4  ;;  %296 = vst [vmem:[%s1204_s26 + $0x14] sm:$0x1] %v1156_v4  ;;  %v1272_v11 = vstv %s1194_s18  ;;  %v196_v12 = vadd.f32 %v1207_v1, %v162_v8  ;;  %v197_v13 = vadd.f32 %v1207_v1, %v163_v9  ;;  %v198_v14 = vadd.f32 %v1207_v1, %v164_v10  ;;  %v165_v15 = vld [vmem:[%s1199_s23 + $0x30] sm:$0xff] }
  0x26   : > { %297 = vst [vmem:[%s1204_s26 + $0x18] sm:$0xf] %v1156_v4  ;;  %298 = vst [vmem:[%s1204_s26 + $0x1c] sm:$0xf] %v1156_v4  ;;  %v166_v16 = vld [vmem:[%s1199_s23 + $0x38] sm:$0xff]  ;;  %v225_v17 = vmax.f32 %v193_v5, 0.0  ;;  %v199_v20 = vadd.f32 %v1207_v1, %v165_v15 }
  0x27   : > { %299 = vst [vmem:[%s1204_s26 + $0x20] sm:$0x1] %v1156_v4  ;;  %300 = vst [vmem:[%s1204_s26 + $0x24] sm:$0xf] %v1156_v4  ;;  %v226_v18 = vmax.f32 %v194_v6, 0.0  ;;  %v227_v19 = vmax.f32 %v195_v7, 0.0  ;;  %v200_v24 = vadd.f32 %v1207_v1, %v166_v16 }
  0x28   : > { %301 = vst [vmem:[%s1204_s26 + $0x28] sm:$0xf] %v1156_v4  ;;  %302 = vst [vmem:[%s1204_s26 + $0x2c] sm:$0x1] %v1156_v4  ;;  %v228_v21 = vmax.f32 %v196_v12, 0.0  ;;  %v229_v22 = vmax.f32 %v197_v13, 0.0  ;;  %v259_v25 = vadd.f32 %v1272_v11, %v225_v17 }
  0x29   : > { %303 = vst [vmem:[%s1204_s26 + $0x30] sm:$0xf] %v1156_v4  ;;  %304 = vst [vmem:[%s1204_s26 + $0x34] sm:$0xf] %v1156_v4  ;;  %v230_v23 = vmax.f32 %v198_v14, 0.0  ;;  %v260_v26 = vadd.f32 %v1272_v11, %v226_v18  ;;  %v261_v27 = vadd.f32 %v1272_v11, %v227_v19  ;;  %v231_v28 = vmax.f32 %v199_v20, 0.0 }
  0x2a   : > { %305 = vst [vmem:[%s1204_s26 + $0x38] sm:$0x1] %v1156_v4  ;;  %306 = vst [vmem:[%s1204_s26 + $0x3c] sm:$0xf] %v1156_v4  ;;  %v262_v29 = vadd.f32 %v1272_v11, %v228_v21  ;;  %v263_v30 = vadd.f32 %v1272_v11, %v229_v22  ;;  %v232_v32 = vmax.f32 %v200_v24, 0.0  ;;  %v1075_v33 = vpack.c.bf16 %v259_v25, %v259_v25  ;;  %v167_v14 = vld [vmem:[%s1199_s23 + $0x40] sm:$0xff] }
  0x2b   : > { %307 = vst [vmem:[%s1204_s26 + $0x40] sm:$0xf] %v1156_v4  ;;  %308 = vst [vmem:[%s1204_s26 + $0x44] sm:$0x1] %v1156_v4  ;;  %v264_v31 = vadd.f32 %v1272_v11, %v230_v23  ;;  %v1076_v34 = vpack.c.bf16 %v260_v26, %v260_v26  ;;  %v1077_v35 = vpack.c.bf16 %v261_v27, %v261_v27  ;;  %v992_v51 = vld [vmem:[%s1204_s26 + $0xc] sm:$0xf] }
  0x2c   : > { %309 = vst [vmem:[%s1204_s26 + $0x48] sm:$0xf] %v1156_v4  ;;  %310 = vst [vmem:[%s1204_s26 + $0x4c] sm:$0xf] %v1156_v4  ;;  %v265_v36 = vadd.f32 %v1272_v11, %v231_v28  ;;  %v1078_v37 = vpack.c.bf16 %v262_v29, %v262_v29  ;;  %v1079_v38 = vpack.c.bf16 %v263_v30, %v263_v30  ;;  %v445_v41 = vshrl.u32 %v1075_v33, 16  ;;  %v168_v15 = vld [vmem:[%s1199_s23 + $0x48] sm:$0xff] }
  0x2d   : > { %311 = vst [vmem:[%s1204_s26 + $0x50] sm:$0x1] %v1156_v4  ;;  %312 = vst [vmem:[%s1204_s26 + $0x54] sm:$0xf] %v1156_v4  ;;  %v1080_v39 = vpack.c.bf16 %v264_v31, %v264_v31  ;;  %v266_v40 = vadd.f32 %v1272_v11, %v232_v32  ;;  %v448_v42 = vshll.u32 %v1075_v33, 16  ;;  %v453_v43 = vshrl.u32 %v1076_v34, 16 }
  0x2e   : > { %313 = vst [vmem:[%s1204_s26 + $0x58] sm:$0xf] %v1156_v4  ;;  %314 = vst [vmem:[%s1204_s26 + $0x5c] sm:$0x1] %v1156_v4  ;;  %v456_v44 = vshll.u32 %v1076_v34, 16  ;;  %v462_v46 = vshrl.u32 %v1077_v35, 16  ;;  %v1081_v24 = vpack.c.bf16 %v265_v36, %v265_v36  ;;  %v201_v28 = vadd.f32 %v1207_v1, %v167_v14 }
  0x2f   : > { %315 = vst [vmem:[%s1204_s26 + $0x60] sm:$0xf] %v1156_v4  ;;  %316 = vst [vmem:[%s1204_s26 + $0x64] sm:$0xf] %v1156_v4  ;;  %v465_v47 = vshll.u32 %v1077_v35, 16  ;;  %v470_v48 = vshrl.u32 %v1078_v37, 16  ;;  %v1082_v25 = vpack.c.bf16 %v266_v40, %v266_v40  ;;  %v202_v29 = vadd.f32 %v1207_v1, %v168_v15 }
  0x30   : > { %317 = vst [vmem:[%s1204_s26 + $0x68] sm:$0x1] %v1156_v4  ;;  %318 = vst [vmem:[%s1204_s26 + $0x6c] sm:$0xf] %v1156_v4  ;;  %v473_v49 = vshll.u32 %v1078_v37, 16  ;;  %v447_v50 = vrot.slane %v445_v41, 7 }
  0x31   : > { %319 = vst [vmem:[%s1204_s26 + $0x70] sm:$0xf] %v1156_v4  ;;  %320 = vst [vmem:[%s1204_s26 + $0x74] sm:$0x1] %v1156_v4  ;;  %v455_v53 = vrot.slane %v453_v43, 7  ;;  %v479_v54 = vshrl.u32 %v1079_v38, 16 }
  0x32   : > { %321 = vst [vmem:[%s1204_s26 + $0x78] sm:$0xf] %v1156_v4  ;;  %322 = vst [vmem:[%s1204_s26 + $0x7c] sm:$0xf] %v1156_v4  ;;  %v482_v55 = vshll.u32 %v1079_v38, 16  ;;  %v464_v58 = vrot.slane %v462_v46, 7  ;;  %v450_v62 = vor.u32 %v448_v42, %v447_v50 }
  0x33   : > { %323 = vst [vmem:[%s1204_s26 + $0x80] sm:$0x1] %v1156_v4  ;;  %324 = vst [vmem:[%s1204_s26 + $0x84] sm:$0xf] %v1156_v4  ;;  %v995_v57 = vld [vmem:[%s1204_s26 + $0x14] sm:$0x1]  ;;  %v458_v0 = vor.u32 %v456_v44, %v455_v53 }
  0x34   : > { %325 = vst [vmem:[%s1204_s26 + $0x88] sm:$0xf] %v1156_v4  ;;  %326 = vst [vmem:[%s1204_s26 + $0x8c] sm:$0x1] %v1156_v4  ;;  %v472_v59 = vrot.slane %v470_v48, 7  ;;  %v487_v60 = vshrl.u32 %v1080_v39, 16  ;;  %v467_v5 = vor.u32 %v465_v47, %v464_v58  ;;  %v769_v9 = vsel %vm1291_vm5, %v450_v62, %v992_v51 }
  0x35   : > { %327 = vst [vmem:[%s1204_s26 + $0x90] sm:$0xf] %v1156_v4  ;;  %328 = vst [vmem:[%s1204_s26 + $0x94] sm:$0xf] %v1156_v4  ;;  %v490_v61 = vshll.u32 %v1080_v39, 16  ;;  %v451_v63 = vrot.slane %v447_v50, 4 }
  0x36   : > { %329 = vst [vmem:[%s1204_s26 + $0x98] sm:$0x1] %v1156_v4  ;;  %330 = vst [vmem:[%s1204_s26 + $0x9c] sm:$0xf] %v1156_v4  ;;  %v460_v2 = vrot.slane %v455_v53, 4  ;;  %v468_v6 = vrot.slane %v464_v58, 4  ;;  %v475_v7 = vor.u32 %v473_v49, %v472_v59 }
  0x37   : > { %331 = vst [vmem:[%s1204_s26 + $0xa0] sm:$0xf] %v1156_v4  ;;  %332 = vst [vmem:[%s1204_s26 + $0xa4] sm:$0x1] %v1156_v4  ;;  %v997_v3 = vld [vmem:[%s1204_s26 + $0x18] sm:$0xf]  ;;  %v459_v10 = vsel %vm1298_vm6, %v451_v63, %v458_v0 }
  0x38   : > { %333 = vst [vmem:[%s1204_s26 + $0xa8] sm:$0xf] %v1156_v4  ;;  %334 = vst [vmem:[%s1204_s26 + $0xac] sm:$0xf] %v1156_v4  ;;  %v477_v8 = vrot.slane %v472_v59, 4  ;;  %v775_v12 = vsel %vm1304_vm7, %v460_v2, %v995_v57  ;;  %v481_v13 = vrot.slane %v479_v54, 7  ;;  %v778_v16 = vsel %vm1291_vm5, %v467_v5, %v997_v3 }
  0x39   : > { %335 = vst [vmem:[%s1204_s26 + $0xb0] sm:$0x1] %v1156_v4  ;;  %336 = vst [vmem:[%s1204_s26 + $0xb4] sm:$0xf] %v1156_v4  ;;  %v476_v17 = vsel %vm1298_vm6, %v468_v6, %v475_v7  ;;  %v1002_v19 = vld [vmem:[%s1204_s26 + $0x24] sm:$0xf] }
  0x3a   : > { %337 = vst [vmem:[%s1204_s26 + $0xb8] sm:$0xf] %v1156_v4  ;;  %338 = vst [vmem:[%s1204_s26 + $0xbc] sm:$0x1] %v1156_v4  ;;  %v489_v20 = vrot.slane %v487_v60, 7  ;;  %v484_v21 = vor.u32 %v482_v55, %v481_v13  ;;  %v485_v22 = vrot.slane %v481_v13, 4 }
  0x3b   : > { %339 = vst [vmem:[%s1204_s26 + $0xc0] sm:$0xf] %v1156_v4  ;;  %340 = vst [vmem:[%s1204_s26 + $0xc4] sm:$0xf] %v1156_v4  ;;  %v1005_v23 = vld [vmem:[%s1204_s26 + $0x2c] sm:$0x1] }
  0x3c   : > { %341 = vst [vmem:[%s1204_s26 + $0xc8] sm:$0x1] %v1156_v4  ;;  %342 = vst [vmem:[%s1204_s26 + $0xcc] sm:$0xf] %v1156_v4  ;;  %v492_v26 = vor.u32 %v490_v61, %v489_v20  ;;  %v494_v27 = vrot.slane %v489_v20, 4  ;;  %v169_v30 = vld [vmem:[%s1199_s23 + $0x50] sm:$0xff]  ;;  %v785_v31 = vsel %vm1291_vm5, %v484_v21, %v1002_v19 }
  0x3d   : > { %343 = vst [vmem:[%s1204_s26 + $0xd0] sm:$0xf] %v1156_v4  ;;  %344 = vst [vmem:[%s1204_s26 + $0xd4] sm:$0x1] %v1156_v4  ;;  %v1000_v4 = vld [vmem:[%s1204_s26 + $0x20] sm:$0x1]  ;;  %v203_v46 = vadd.f32 %v1207_v1, %v169_v30 }
  0x3e   : > { %993 = vst [vmem:[%s1204_s26 + $0xc] sm:$0xf] %v769_v9  ;;  %994 = vst [vmem:[%s1204_s26 + $0x10] sm:$0xf] %v459_v10  ;;  %v782_v18 = vsel %vm1304_vm7, %v477_v8, %v1000_v4  ;;  %v496_v32 = vshrl.u32 %v1081_v24, 16  ;;  %v499_v33 = vshll.u32 %v1081_v24, 16  ;;  %v493_v38 = vsel %vm1298_vm6, %v485_v22, %v492_v26 }
  0x3f   : > { %996 = vst [vmem:[%s1204_s26 + $0x14] sm:$0x1] %v775_v12  ;;  %998 = vst [vmem:[%s1204_s26 + $0x18] sm:$0xf] %v778_v16  ;;  %v504_v34 = vshrl.u32 %v1082_v25, 16  ;;  %v170_v35 = vld [vmem:[%s1199_s23 + $0x58] sm:$0xff]  ;;  %v789_v39 = vsel %vm1304_vm7, %v494_v27, %v1005_v23 }
  0x40   : > { %999 = vst [vmem:[%s1204_s26 + $0x1c] sm:$0xf] %v476_v17  ;;  %1001 = vst [vmem:[%s1204_s26 + $0x20] sm:$0x1] %v782_v18  ;;  %v171_v36 = vld [vmem:[%s1199_s23 + $0x60] sm:$0xff]  ;;  %v172_v37 = vld [vmem:[%s1199_s23 + $0x68] sm:$0xff]  ;;  %v204_v50 = vadd.f32 %v1207_v1, %v170_v35 }
  0x41   : > { %1003 = vst [vmem:[%s1204_s26 + $0x24] sm:$0xf] %v785_v31  ;;  %v507_v40 = vshll.u32 %v1082_v25, 16  ;;  %v233_v41 = vmax.f32 %v201_v28, 0.0  ;;  %1004 = vst [vmem:[%s1204_s26 + $0x28] sm:$0xf] %v493_v38  ;;  %v205_v51 = vadd.f32 %v1207_v1, %v171_v36  ;;  %v206_v53 = vadd.f32 %v1207_v1, %v172_v37 }
  0x42   : > { %1006 = vst [vmem:[%s1204_s26 + $0x2c] sm:$0x1] %v789_v39  ;;  %v498_v42 = vrot.slane %v496_v32, 7  ;;  %v506_v43 = vrot.slane %v504_v34, 7  ;;  %v234_v44 = vmax.f32 %v202_v29, 0.0  ;;  %v235_v61 = vmax.f32 %v203_v46, 0.0 }
  0x43   : > { %v1007_v47 = vld [vmem:[%s1204_s26 + $0x30] sm:$0xf]  ;;  %v1010_v48 = vld [vmem:[%s1204_s26 + $0x38] sm:$0x1]  ;;  %v267_v49 = vadd.f32 %v1272_v11, %v233_v41  ;;  %v236_v62 = vmax.f32 %v204_v50, 0.0  ;;  %v237_v4 = vmax.f32 %v205_v51, 0.0 }
  0x44   : > { %v501_v54 = vor.u32 %v499_v33, %v498_v42  ;;  %v502_v55 = vrot.slane %v498_v42, 4  ;;  %v509_v57 = vor.u32 %v507_v40, %v506_v43  ;;  %v511_v58 = vrot.slane %v506_v43, 4  ;;  %v173_v63 = vld [vmem:[%s1199_s23 + $0x70] sm:$0xff]  ;;  %v1012_v18 = vld [vmem:[%s1204_s26 + $0x3c] sm:$0xf] }
  0x45   : > { %v1083_v59 = vpack.c.bf16 %v267_v49, %v267_v49  ;;  %v268_v60 = vadd.f32 %v1272_v11, %v234_v44  ;;  %v269_v8 = vadd.f32 %v1272_v11, %v235_v61  ;;  %v270_v9 = vadd.f32 %v1272_v11, %v236_v62  ;;  %v1015_v27 = vld [vmem:[%s1204_s26 + $0x44] sm:$0x1]  ;;  %v1017_v36 = vld [vmem:[%s1204_s26 + $0x48] sm:$0xf]  ;;  %v1020_v46 = vld [vmem:[%s1204_s26 + $0x50] sm:$0x1] }
  0x46   : > { %v792_v0 = vsel %vm1291_vm5, %v501_v54, %v1007_v47  ;;  %v510_v2 = vsel %vm1298_vm6, %v502_v55, %v509_v57  ;;  %v796_v3 = vsel %vm1304_vm7, %v511_v58, %v1010_v48  ;;  %v271_v10 = vadd.f32 %v1272_v11, %v237_v4  ;;  %v1022_v47 = vld [vmem:[%s1204_s26 + $0x54] sm:$0xf]  ;;  %v174_v48 = vld [vmem:[%s1199_s23 + $0x78] sm:$0xff]  ;;  %v175_v54 = vld [vmem:[%s1199_s23 + $0x80] sm:$0xff] }
  0x47   : > { %1008 = vst [vmem:[%s1204_s26 + $0x30] sm:$0xf] %v792_v0  ;;  %1009 = vst [vmem:[%s1204_s26 + $0x34] sm:$0xf] %v510_v2  ;;  %v513_v5 = vshrl.u32 %v1083_v59, 16  ;;  %v516_v6 = vshll.u32 %v1083_v59, 16  ;;  %v1084_v7 = vpack.c.bf16 %v268_v60, %v268_v60  ;;  %v207_v13 = vadd.f32 %v1207_v1, %v173_v63 }
  0x48   : > { %1011 = vst [vmem:[%s1204_s26 + $0x38] sm:$0x1] %v796_v3  ;;  %v238_v12 = vmax.f32 %v206_v53, 0.0  ;;  %v1085_v17 = vpack.c.bf16 %v269_v8, %v269_v8  ;;  %v1086_v19 = vpack.c.bf16 %v270_v9, %v270_v9  ;;  %v1087_v20 = vpack.c.bf16 %v271_v10, %v271_v10  ;;  %v176_v55 = vld [vmem:[%s1199_s23 + $0x88] sm:$0xff]  ;;  %v177_v61 = vld [vmem:[%s1199_s23 + $0x90] sm:$0xff]  ;;  %v178_v62 = vld [vmem:[%s1199_s23 + $0x98] sm:$0xff] }
  0x49   : > { %v515_v14 = vrot.slane %v513_v5, 7  ;;  %v521_v15 = vshrl.u32 %v1084_v7, 16  ;;  %v524_v16 = vshll.u32 %v1084_v7, 16  ;;  %v239_v22 = vmax.f32 %v207_v13, 0.0  ;;  %v179_v63 = vld [vmem:[%s1199_s23 + $0xa0] sm:$0xff] }
  0x4a   : > { %v272_v21 = vadd.f32 %v1272_v11, %v238_v12  ;;  %v530_v26 = vshrl.u32 %v1085_v17, 16  ;;  %v533_v28 = vshll.u32 %v1085_v17, 16  ;;  %v538_v29 = vshrl.u32 %v1086_v19, 16  ;;  %v1025_v9 = vld [vmem:[%s1204_s26 + $0x5c] sm:$0x1] }
  0x4b   : > { %v518_v23 = vor.u32 %v516_v6, %v515_v14  ;;  %v519_v24 = vrot.slane %v515_v14, 4  ;;  %v523_v25 = vrot.slane %v521_v15, 7  ;;  %v541_v30 = vshll.u32 %v1086_v19, 16 }
  0x4c   : > { %v547_v31 = vshrl.u32 %v1087_v20, 16  ;;  %v532_v35 = vrot.slane %v530_v26, 7  ;;  %v540_v37 = vrot.slane %v538_v29, 7  ;;  %v550_v39 = vshll.u32 %v1087_v20, 16 }
  0x4d   : > { %v799_v32 = vsel %vm1291_vm5, %v518_v23, %v1012_v18  ;;  %v526_v33 = vor.u32 %v524_v16, %v523_v25  ;;  %v528_v34 = vrot.slane %v523_v25, 4  ;;  %v1088_v40 = vpack.c.bf16 %v272_v21, %v272_v21 }
  0x4e   : > { %1013 = vst [vmem:[%s1204_s26 + $0x3c] sm:$0xf] %v799_v32  ;;  %v549_v38 = vrot.slane %v547_v31, 7  ;;  %v535_v43 = vor.u32 %v533_v28, %v532_v35  ;;  %v536_v44 = vrot.slane %v532_v35, 4  ;;  %v543_v49 = vor.u32 %v541_v30, %v540_v37 }
  0x4f   : > { %v527_v41 = vsel %vm1298_vm6, %v519_v24, %v526_v33  ;;  %v803_v42 = vsel %vm1304_vm7, %v528_v34, %v1015_v27  ;;  %v545_v50 = vrot.slane %v540_v37, 4  ;;  %v555_v58 = vshrl.u32 %v1088_v40, 16  ;;  %v1027_v27 = vld [vmem:[%s1204_s26 + $0x60] sm:$0xf] }
  0x50   : > { %1014 = vst [vmem:[%s1204_s26 + $0x40] sm:$0xf] %v527_v41  ;;  %1016 = vst [vmem:[%s1204_s26 + $0x44] sm:$0x1] %v803_v42  ;;  %v552_v51 = vor.u32 %v550_v39, %v549_v38  ;;  %v553_v53 = vrot.slane %v549_v38, 4  ;;  %v806_v57 = vsel %vm1291_vm5, %v535_v43, %v1017_v36  ;;  %v558_v59 = vshll.u32 %v1088_v40, 16 }
  0x51   : > { %v273_v60 = vadd.f32 %v1272_v11, %v239_v22  ;;  %1018 = vst [vmem:[%s1204_s26 + $0x48] sm:$0xf] %v806_v57  ;;  %v544_v0 = vsel %vm1298_vm6, %v536_v44, %v543_v49  ;;  %v810_v2 = vsel %vm1304_vm7, %v545_v50, %v1020_v46  ;;  %v208_v4 = vadd.f32 %v1207_v1, %v174_v48  ;;  %v1030_v49 = vld [vmem:[%s1204_s26 + $0x68] sm:$0x1] }
  0x52   : > { %v813_v3 = vsel %vm1291_vm5, %v552_v51, %v1022_v47  ;;  %1019 = vst [vmem:[%s1204_s26 + $0x4c] sm:$0xf] %v544_v0  ;;  %1021 = vst [vmem:[%s1204_s26 + $0x50] sm:$0x1] %v810_v2  ;;  %v557_v5 = vrot.slane %v555_v58, 7  ;;  %v209_v7 = vadd.f32 %v1207_v1, %v175_v54  ;;  %v210_v8 = vadd.f32 %v1207_v1, %v176_v55 }
  0x53   : > { %1023 = vst [vmem:[%s1204_s26 + $0x54] sm:$0xf] %v813_v3  ;;  %v1089_v6 = vpack.c.bf16 %v273_v60, %v273_v60  ;;  %v240_v10 = vmax.f32 %v208_v4, 0.0  ;;  %v211_v12 = vadd.f32 %v1207_v1, %v177_v61  ;;  %v212_v13 = vadd.f32 %v1207_v1, %v178_v62  ;;  %v1032_v60 = vld [vmem:[%s1204_s26 + $0x6c] sm:$0xf] }
  0x54   : > { %v213_v14 = vadd.f32 %v1207_v1, %v179_v63  ;;  %v560_v15 = vor.u32 %v558_v59, %v557_v5  ;;  %v562_v16 = vrot.slane %v557_v5, 4  ;;  %v241_v20 = vmax.f32 %v209_v7, 0.0  ;;  %v1037_v7 = vld [vmem:[%s1204_s26 + $0x78] sm:$0xf] }
  0x55   : > { %v564_v17 = vshrl.u32 %v1089_v6, 16  ;;  %v567_v18 = vshll.u32 %v1089_v6, 16  ;;  %v274_v19 = vadd.f32 %v1272_v11, %v240_v10  ;;  %v242_v21 = vmax.f32 %v210_v8, 0.0  ;;  %v1035_v6 = vld [vmem:[%s1204_s26 + $0x74] sm:$0x1] }
  0x56   : > { %v243_v22 = vmax.f32 %v211_v12, 0.0  ;;  %v561_v23 = vsel %vm1298_vm6, %v553_v53, %v560_v15  ;;  %v817_v24 = vsel %vm1304_vm7, %v562_v16, %v1025_v9  ;;  %v244_v26 = vmax.f32 %v212_v13, 0.0  ;;  %v1040_v13 = vld [vmem:[%s1204_s26 + $0x80] sm:$0x1]  ;;  %v181_v15 = vld [vmem:[%s1199_s23 + $0xb0] sm:$0xff] }
  0x57   : > { %v566_v25 = vrot.slane %v564_v17, 7  ;;  %1024 = vst [vmem:[%s1204_s26 + $0x58] sm:$0xf] %v561_v23  ;;  %1026 = vst [vmem:[%s1204_s26 + $0x5c] sm:$0x1] %v817_v24  ;;  %v1090_v28 = vpack.c.bf16 %v274_v19, %v274_v19  ;;  %v275_v29 = vadd.f32 %v1272_v11, %v241_v20  ;;  %v276_v30 = vadd.f32 %v1272_v11, %v242_v21  ;;  %v182_v20 = vld [vmem:[%s1199_s23 + $0xb8] sm:$0xff] }
  0x58   : > { %v277_v31 = vadd.f32 %v1272_v11, %v243_v22  ;;  %v278_v34 = vadd.f32 %v1272_v11, %v244_v26  ;;  %v245_v35 = vmax.f32 %v213_v14, 0.0  ;;  %v180_v14 = vld [vmem:[%s1199_s23 + $0xa8] sm:$0xff]  ;;  %v183_v21 = vld [vmem:[%s1199_s23 + $0xc0] sm:$0xff] }
  0x59   : > { %v569_v32 = vor.u32 %v567_v18, %v566_v25  ;;  %v570_v33 = vrot.slane %v566_v25, 4  ;;  %v572_v36 = vshrl.u32 %v1090_v28, 16  ;;  %v575_v37 = vshll.u32 %v1090_v28, 16  ;;  %v184_v22 = vld [vmem:[%s1199_s23 + $0xc8] sm:$0xff] }
  0x5a   : > { %v1091_v38 = vpack.c.bf16 %v275_v29, %v275_v29  ;;  %v1092_v39 = vpack.c.bf16 %v276_v30, %v276_v30  ;;  %v1093_v41 = vpack.c.bf16 %v277_v31, %v277_v31  ;;  %v1094_v42 = vpack.c.bf16 %v278_v34, %v278_v34 }
  0x5b   : > { %v820_v40 = vsel %vm1291_vm5, %v569_v32, %v1027_v27  ;;  %v279_v43 = vadd.f32 %v1272_v11, %v245_v35  ;;  %v574_v44 = vrot.slane %v572_v36, 7  ;;  %v185_v27 = vld [vmem:[%s1199_s23 + $0xd0] sm:$0xff]  ;;  %v214_v31 = vadd.f32 %v1207_v1, %v180_v14  ;;  %v1042_v32 = vld [vmem:[%s1204_s26 + $0x84] sm:$0xf] }
  0x5c   : > { %1028 = vst [vmem:[%s1204_s26 + $0x60] sm:$0xf] %v820_v40  ;;  %v581_v46 = vshrl.u32 %v1091_v38, 16  ;;  %v584_v47 = vshll.u32 %v1091_v38, 16  ;;  %v589_v48 = vshrl.u32 %v1092_v39, 16  ;;  %v592_v50 = vshll.u32 %v1092_v39, 16 }
  0x5d   : > { %v598_v51 = vshrl.u32 %v1093_v41, 16  ;;  %v601_v53 = vshll.u32 %v1093_v41, 16  ;;  %v606_v54 = vshrl.u32 %v1094_v42, 16  ;;  %v577_v55 = vor.u32 %v575_v37, %v574_v44  ;;  %v186_v37 = vld [vmem:[%s1199_s23 + $0xd8] sm:$0xff] }
  0x5e   : > { %v579_v57 = vrot.slane %v574_v44, 4  ;;  %v583_v58 = vrot.slane %v581_v46, 7  ;;  %v591_v59 = vrot.slane %v589_v48, 7  ;;  %v609_v63 = vshll.u32 %v1094_v42, 16 }
  0x5f   : > { %v600_v61 = vrot.slane %v598_v51, 7  ;;  %v608_v62 = vrot.slane %v606_v54, 7  ;;  %v1095_v0 = vpack.c.bf16 %v279_v43, %v279_v43  ;;  %v578_v2 = vsel %vm1298_vm6, %v570_v33, %v577_v55 }
  0x60   : > { %v824_v3 = vsel %vm1304_vm7, %v579_v57, %v1030_v49  ;;  %v586_v4 = vor.u32 %v584_v47, %v583_v58  ;;  %v587_v5 = vrot.slane %v583_v58, 4  ;;  %1029 = vst [vmem:[%s1204_s26 + $0x64] sm:$0xf] %v578_v2  ;;  %v594_v8 = vor.u32 %v592_v50, %v591_v59  ;;  %v187_v47 = vld [vmem:[%s1199_s23 + $0xe0] sm:$0xff] }
  0x61   : > { %1031 = vst [vmem:[%s1204_s26 + $0x68] sm:$0x1] %v824_v3  ;;  %v596_v9 = vrot.slane %v591_v59, 4  ;;  %v603_v10 = vor.u32 %v601_v53, %v600_v61  ;;  %v604_v12 = vrot.slane %v600_v61, 4  ;;  %v611_v17 = vor.u32 %v609_v63, %v608_v62 }
  0x62   : > { %v827_v16 = vsel %vm1291_vm5, %v586_v4, %v1032_v60  ;;  %v613_v18 = vrot.slane %v608_v62, 4  ;;  %v615_v19 = vshrl.u32 %v1095_v0, 16  ;;  %v595_v23 = vsel %vm1298_vm6, %v587_v5, %v594_v8 }
  0x63   : > { %1033 = vst [vmem:[%s1204_s26 + $0x6c] sm:$0xf] %v827_v16  ;;  %v831_v24 = vsel %vm1304_vm7, %v596_v9, %v1035_v6  ;;  %v834_v25 = vsel %vm1291_vm5, %v603_v10, %v1037_v7  ;;  %v618_v26 = vshll.u32 %v1095_v0, 16  ;;  %1034 = vst [vmem:[%s1204_s26 + $0x70] sm:$0xf] %v595_v23  ;;  %v612_v28 = vsel %vm1298_vm6, %v604_v12, %v611_v17 }
  0x64   : > { %1036 = vst [vmem:[%s1204_s26 + $0x74] sm:$0x1] %v831_v24  ;;  %1038 = vst [vmem:[%s1204_s26 + $0x78] sm:$0xf] %v834_v25  ;;  %v838_v29 = vsel %vm1304_vm7, %v613_v18, %v1040_v13  ;;  %v1460_v30 = vrot.slane %v615_v19, 7  ;;  %v215_v33 = vadd.f32 %v1207_v1, %v181_v15  ;;  %v216_v34 = vadd.f32 %v1207_v1, %v182_v20 }
  0x65   : > { %1039 = vst [vmem:[%s1204_s26 + $0x7c] sm:$0xf] %v612_v28  ;;  %1041 = vst [vmem:[%s1204_s26 + $0x80] sm:$0x1] %v838_v29  ;;  %v217_v35 = vadd.f32 %v1207_v1, %v183_v21  ;;  %v218_v36 = vadd.f32 %v1207_v1, %v184_v22  ;;  %v246_v39 = vmax.f32 %v214_v31, 0.0  ;;  %v219_v41 = vadd.f32 %v1207_v1, %v185_v27 }
  0x66   : > { %v620_v38 = vor.u32 %v618_v26, %v1460_v30  ;;  %v621_v40 = vrot.slane %v1460_v30, 4  ;;  %v247_v42 = vmax.f32 %v215_v33, 0.0  ;;  %v248_v43 = vmax.f32 %v216_v34, 0.0  ;;  %v1045_v13 = vld [vmem:[%s1204_s26 + $0x8c] sm:$0x1] }
  0x67   : > { %v249_v44 = vmax.f32 %v217_v35, 0.0  ;;  %v250_v46 = vmax.f32 %v218_v36, 0.0  ;;  %v280_v49 = vadd.f32 %v1272_v11, %v246_v39  ;;  %v251_v50 = vmax.f32 %v219_v41, 0.0  ;;  %v1047_v18 = vld [vmem:[%s1204_s26 + $0x90] sm:$0xf]  ;;  %v188_v36 = vld [vmem:[%s1199_s23 + $0xe8] sm:$0xff] }
  0x68   : > { %v841_v48 = vsel %vm1291_vm5, %v620_v38, %v1042_v32  ;;  %v220_v51 = vadd.f32 %v1207_v1, %v186_v37  ;;  %v281_v53 = vadd.f32 %v1272_v11, %v247_v42  ;;  %v282_v54 = vadd.f32 %v1272_v11, %v248_v43  ;;  %v1050_v24 = vld [vmem:[%s1204_s26 + $0x98] sm:$0x1]  ;;  %v1052_v31 = vld [vmem:[%s1204_s26 + $0x9c] sm:$0xf]  ;;  %v1055_v41 = vld [vmem:[%s1204_s26 + $0xa4] sm:$0x1] }
  0x69   : > { %1043 = vst [vmem:[%s1204_s26 + $0x84] sm:$0xf] %v841_v48  ;;  %v283_v55 = vadd.f32 %v1272_v11, %v249_v44  ;;  %v284_v57 = vadd.f32 %v1272_v11, %v250_v46  ;;  %v1096_v58 = vpack.c.bf16 %v280_v49, %v280_v49  ;;  %v285_v59 = vadd.f32 %v1272_v11, %v251_v50  ;;  %v189_v42 = vld [vmem:[%s1199_s23 + $0xf0] sm:$0xff]  ;;  %v1057_v49 = vld [vmem:[%s1204_s26 + $0xa8] sm:$0xf] }
  0x6a   : > { %v252_v60 = vmax.f32 %v220_v51, 0.0  ;;  %v1486_v61 = vadd.f32 %v1207_v1, %v187_v47  ;;  %v1097_v62 = vpack.c.bf16 %v281_v53, %v281_v53  ;;  %v1098_v63 = vpack.c.bf16 %v282_v54, %v282_v54  ;;  %v190_v54 = vld [vmem:[%s1199_s23 + $0xf8] sm:$0xff] }
  0x6b   : > { %v1099_v0 = vpack.c.bf16 %v283_v55, %v283_v55  ;;  %v1100_v2 = vpack.c.bf16 %v284_v57, %v284_v57  ;;  %v623_v3 = vshrl.u32 %v1096_v58, 16  ;;  %v626_v4 = vshll.u32 %v1096_v58, 16 }
  0x6c   : > { %v1101_v5 = vpack.c.bf16 %v285_v59, %v285_v59  ;;  %v286_v6 = vadd.f32 %v1272_v11, %v252_v60  ;;  %v632_v7 = vshrl.u32 %v1097_v62, 16  ;;  %v635_v8 = vshll.u32 %v1097_v62, 16 }
  0x6d   : > { %v640_v9 = vshrl.u32 %v1098_v63, 16  ;;  %v643_v10 = vshll.u32 %v1098_v63, 16  ;;  %v625_v12 = vrot.slane %v623_v3, 7  ;;  %v649_v14 = vshrl.u32 %v1099_v0, 16 }
  0x6e   : > { %v652_v15 = vshll.u32 %v1099_v0, 16  ;;  %v657_v16 = vshrl.u32 %v1100_v2, 16  ;;  %v634_v17 = vrot.slane %v632_v7, 7  ;;  %v660_v20 = vshll.u32 %v1100_v2, 16  ;;  %v1060_v7 = vld [vmem:[%s1204_s26 + $0xb0] sm:$0x1] }
  0x6f   : > { %v642_v19 = vrot.slane %v640_v9, 7  ;;  %v666_v21 = vshrl.u32 %v1101_v5, 16  ;;  %v628_v22 = vor.u32 %v626_v4, %v625_v12  ;;  %v630_v23 = vrot.slane %v625_v12, 4 }
  0x70   : > { %v651_v25 = vrot.slane %v649_v14, 7  ;;  %v659_v26 = vrot.slane %v657_v16, 7  ;;  %v637_v27 = vor.u32 %v635_v8, %v634_v17  ;;  %v638_v28 = vrot.slane %v634_v17, 4 }
  0x71   : > { %v645_v29 = vor.u32 %v643_v10, %v642_v19  ;;  %v647_v30 = vrot.slane %v642_v19, 4  ;;  %v629_v32 = vsel %vm1298_vm6, %v621_v40, %v628_v22  ;;  %v845_v33 = vsel %vm1304_vm7, %v630_v23, %v1045_v13 }
  0x72   : > { %v654_v34 = vor.u32 %v652_v15, %v651_v25  ;;  %v655_v35 = vrot.slane %v651_v25, 4  ;;  %1044 = vst [vmem:[%s1204_s26 + $0x88] sm:$0xf] %v629_v32  ;;  %1046 = vst [vmem:[%s1204_s26 + $0x8c] sm:$0x1] %v845_v33  ;;  %v848_v37 = vsel %vm1291_vm5, %v637_v27, %v1047_v18  ;;  %v662_v40 = vor.u32 %v660_v20, %v659_v26 }
  0x73   : > { %v646_v38 = vsel %vm1298_vm6, %v638_v28, %v645_v29  ;;  %v852_v39 = vsel %vm1304_vm7, %v647_v30, %v1050_v24  ;;  %1048 = vst [vmem:[%s1204_s26 + $0x90] sm:$0xf] %v848_v37  ;;  %v664_v44 = vrot.slane %v659_v26, 4  ;;  %v668_v46 = vrot.slane %v666_v21, 7  ;;  %v1062_v20 = vld [vmem:[%s1204_s26 + $0xb4] sm:$0xf] }
  0x74   : > { %1049 = vst [vmem:[%s1204_s26 + $0x94] sm:$0xf] %v646_v38  ;;  %1051 = vst [vmem:[%s1204_s26 + $0x98] sm:$0x1] %v852_v39  ;;  %v855_v43 = vsel %vm1291_vm5, %v654_v34, %v1052_v31  ;;  %v669_v47 = vshll.u32 %v1101_v5, 16  ;;  %v663_v48 = vsel %vm1298_vm6, %v655_v35, %v662_v40  ;;  %v1102_v50 = vpack.c.bf16 %v286_v6, %v286_v6 }
  0x75   : > { %1053 = vst [vmem:[%s1204_s26 + $0x9c] sm:$0xf] %v855_v43  ;;  %v253_v51 = vmax.f32 %v1486_v61, 0.0  ;;  %v222_v53 = vadd.f32 %v1207_v1, %v188_v36  ;;  %1054 = vst [vmem:[%s1204_s26 + $0xa0] sm:$0xf] %v663_v48  ;;  %v859_v55 = vsel %vm1304_vm7, %v664_v44, %v1055_v41  ;;  %v223_v58 = vadd.f32 %v1207_v1, %v189_v42 }
  0x76   : > { %v671_v57 = vor.u32 %v669_v47, %v668_v46  ;;  %1056 = vst [vmem:[%s1204_s26 + $0xa4] sm:$0x1] %v859_v55  ;;  %v674_v59 = vshrl.u32 %v1102_v50, 16  ;;  %v677_v60 = vshll.u32 %v1102_v50, 16  ;;  %v224_v2 = vadd.f32 %v1207_v1, %v190_v54  ;;  %v1065_v30 = vld [vmem:[%s1204_s26 + $0xbc] sm:$0x1] }
  0x77   : > { %v287_v62 = vadd.f32 %v1272_v11, %v253_v51  ;;  %v254_v63 = vmax.f32 %v222_v53, 0.0  ;;  %v255_v0 = vmax.f32 %v223_v58, 0.0  ;;  %v672_v3 = vrot.slane %v668_v46, 4  ;;  %v1067_v31 = vld [vmem:[%s1204_s26 + $0xc0] sm:$0xf] }
  0x78   : > { %v862_v61 = vsel %vm1291_vm5, %v671_v57, %v1057_v49  ;;  %v676_v4 = vrot.slane %v674_v59, 7  ;;  %v256_v9 = vmax.f32 %v224_v2, 0.0  ;;  %v1070_v42 = vld [vmem:[%s1204_s26 + $0xc8] sm:$0x1] }
  0x79   : > { %1058 = vst [vmem:[%s1204_s26 + $0xa8] sm:$0xf] %v862_v61  ;;  %v1103_v5 = vpack.c.bf16 %v287_v62, %v287_v62  ;;  %v288_v6 = vadd.f32 %v1272_v11, %v254_v63  ;;  %v289_v8 = vadd.f32 %v1272_v11, %v255_v0 }
  0x7a   : > { %v679_v10 = vor.u32 %v677_v60, %v676_v4  ;;  %v681_v12 = vrot.slane %v676_v4, 4  ;;  %v290_v1 = vadd.f32 %v1272_v11, %v256_v9 }
  0x7b   : > { %v683_v13 = vshrl.u32 %v1103_v5, 16  ;;  %v686_v14 = vshll.u32 %v1103_v5, 16  ;;  %v1104_v15 = vpack.c.bf16 %v288_v6, %v288_v6  ;;  %v1105_v16 = vpack.c.bf16 %v289_v8, %v289_v8 }
  0x7c   : > { %v680_v17 = vsel %vm1298_vm6, %v672_v3, %v679_v10  ;;  %v866_v18 = vsel %vm1304_vm7, %v681_v12, %v1060_v7  ;;  %v1106_v26 = vpack.c.bf16 %v290_v1, %v290_v1 }
  0x7d   : > { %v685_v19 = vrot.slane %v683_v13, 7  ;;  %1059 = vst [vmem:[%s1204_s26 + $0xac] sm:$0xf] %v680_v17  ;;  %1061 = vst [vmem:[%s1204_s26 + $0xb0] sm:$0x1] %v866_v18  ;;  %v691_v21 = vshrl.u32 %v1104_v15, 16 }
  0x7e   : > { %v694_v22 = vshll.u32 %v1104_v15, 16  ;;  %v700_v23 = vshrl.u32 %v1105_v16, 16  ;;  %v703_v24 = vshll.u32 %v1105_v16, 16  ;;  %v708_v32 = vshrl.u32 %v1106_v26, 16 }
  0x7f   : > { %v688_v25 = vor.u32 %v686_v14, %v685_v19  ;;  %v689_v11 = vrot.slane %v685_v19, 4  ;;  %v693_v27 = vrot.slane %v691_v21, 7  ;;  %v711_v33 = vshll.u32 %v1106_v26, 16 }
  0x80   : > { %v702_v28 = vrot.slane %v700_v23, 7  ;;  %v710_v38 = vrot.slane %v708_v32, 7 }
  0x81   : > { %v869_v29 = vsel %vm1291_vm5, %v688_v25, %v1062_v20  ;;  %v696_v34 = vor.u32 %v694_v22, %v693_v27  ;;  %v698_v35 = vrot.slane %v693_v27, 4 }
  0x82   : > { %1063 = vst [vmem:[%s1204_s26 + $0xb4] sm:$0xf] %v869_v29  ;;  %v705_v36 = vor.u32 %v703_v24, %v702_v28  ;;  %v706_v37 = vrot.slane %v702_v28, 4  ;;  %v713_v43 = vor.u32 %v711_v33, %v710_v38  ;;  %v715_v44 = vrot.slane %v710_v38, 4 }
  0x83   : > { %v697_v39 = vsel %vm1298_vm6, %v689_v11, %v696_v34  ;;  %v873_v40 = vsel %vm1304_vm7, %v698_v35, %v1065_v30 }
  0x84   : > { %v876_v41 = vsel %vm1291_vm5, %v705_v36, %v1067_v31  ;;  %1064 = vst [vmem:[%s1204_s26 + $0xb8] sm:$0xf] %v697_v39  ;;  %1066 = vst [vmem:[%s1204_s26 + $0xbc] sm:$0x1] %v873_v40  ;;  %v714_v46 = vsel %vm1298_vm6, %v706_v37, %v713_v43  ;;  %v880_v47 = vsel %vm1304_vm7, %v715_v44, %v1070_v42 }
  0x85   : > { %1068 = vst [vmem:[%s1204_s26 + $0xc0] sm:$0xf] %v876_v41  ;;  %1069 = vst [vmem:[%s1204_s26 + $0xc4] sm:$0xf] %v714_v46 }
  0x86   : > { %1071 = vst [vmem:[%s1204_s26 + $0xc8] sm:$0x1] %v880_v47 }
  0x87 PF: > { %s13_s9 = sadd.s32 1, %s1153_s9  }
  0x88   : > { %p10_p1 = scmp.ge.s32.totalorder %s13_s9, 4  }
  0x8a   :  { %12 = sbr.rel (!%p10_p1) target bundleno = 1 (0x1), region = 64 }
  0x91   :  { %903 = vsyncpa [#allocation3], 1 }
  0x92   :  { %905 = vsyncpa [#allocation3 + $0x1], 1 }

// kernel: fixup_network_block.9
= control target key start
LH: loop header
LB: loop body
LE: loop exit
PB: predicated region body
PF: predicated region fallthrough
CT: control target
= control target key end

     0   :  { %7 = vsyncpa [#allocation3], 0  ;;  %s576_s9 = smov 0   ;;  %s730_s0 = inlined_call_operand.vmem [shape: f32[2,8,8,128], index: 0, kind: input, shape index: {}]   ;;  %s731_s1 = inlined_call_operand.vmem [shape: f32[2], index: 1, kind: input, shape index: {}]   ;;  %s732_s2 = inlined_call_operand.vmem [shape: bf16[2,10,10,128], index: 2, kind: output, shape index: {}]  }
   0x1 LB: > { %s449_s10 = sadd.s32 4294967295, %s557_s9   ;;  %p451_p0 = scmp.ge.s32.totalorder %s557_s9, 1  ;;  %s557_s9 = sphi %s576_s9, %s13_s9  }
   0x2   : > { %p91_p1 = scmp.lt.s32.totalorder %s557_s9, 3  ;;  %s104_s13 = sshll.u32 %s731_s1, 4  ;;  %s105_s13 = int_to_ptr.vmem [resolvable:$true] %s104_s13 }
   0x3   : > { %p520_p3 = scmp.eq.s32.totalorder %s449_s10, 0  ;;  %s532_s15 = scalar_lea.vmem %s105_s13, 16 }
   0x4   : > { %p587_p2 = pnand %p451_p0, %p91_p1  ;;  %p533_p6 = scmp.ne.s32.totalorder %s105_s13, %s532_s15 }
   0x5   : > { %p540_p10 = scmp.lt.s32.totalorder %s105_s13, %s105_s13  ;;  %p541_p11 = scmp.lt.s32.totalorder %s532_s15, %s532_s15 }
   0x6   : > { %p516_p4 = pneg %p587_p2 }
   0x7   : > { %p542_p12 = por %p541_p11, %p540_p10 }
   0x8   : > { %p517_p5 = pnand %p520_p3, %p516_p4 }
   0xa   : > { %p534_p7 = pneg %p517_p5 }
   0xc   : > { %p535_p8 = pnand %p534_p7, %p533_p6 }
   0xe   : > { %p536_p9 = pneg %p535_p8 }
  0x10   : > { %p543_p13 = pnand %p542_p12, %p536_p9 }
  0x12   : > { %546 = shalt.err (!%p543_p13)
}
  0x13   : > { %s559_s16 = smov [#allocation2]   ;;  %125 = sbr.rel (%p587_p2) target bundleno = 65 (0x41), region = 28 }
  0x14   : > { %519 = dma.vmem_to_smem (!%p517_p5), %s105_s13, 16, %s559_s16, [#allocation3]  }
  0x1a   : > { %552 = dma.done.wait (%p520_p3), [#allocation3], 16  }
  0x1b   : > { %554 = vsyncadd (%p520_p3), [#allocation3], 4294967280 }
  0x1c   : > { %131 = sfence }
  0x1d   : > { %p148_p0 = scmp.lt.s32.totalorder %s449_s10, 1  ;;  %s167_s17 = sld [smem:[#allocation2]]  ;;  %vm328_vm0 = vcmask 1043456   ;;  %vm329_vm1 = vsmask.f32 7938  ;;  %v560_v4 = vmov 0  }
  0x1e   : > { %s598_s18 = sld [smem:[#allocation2 + $0x1]]  ;;  %vm334_vm2 = vcmask 1040384   ;;  %vm335_vm3 = vsmask.f32 256  ;;  %vm649_vm4 = vmand %vm328_vm0, %vm329_vm1 }
  0x1f   : > { %s739_s10 = smov (!%p148_p0, %s449_s10), 1  ;;  %vm656_vm5 = vmand %vm334_vm2, %vm335_vm3 }
  0x20   : > { %s511_s19 = smul.u32 80, %s739_s10  ;;  %s502_s20 = sshll.u32 %s739_s10, 6 }
  0x21   : > { %s603_s23 = scalar_lea.vmem %s730_s0, %s502_s20 }
  0x22   : > { %s608_s26 = scalar_lea.vmem %s732_s2, %s511_s19  ;;  %v159_v0 = vld [vmem:[%s603_s23] sm:$0xff]  ;;  %v160_v2 = vld [vmem:[%s603_s23 + $0x8] sm:$0xff]  ;;  %v161_v3 = vld [vmem:[%s603_s23 + $0x10] sm:$0xff] }
  0x23   : > { %v168_v1 = vstv %s167_s17  ;;  %197 = vst [vmem:[%s608_s26 + $0x8] sm:$0xf] %v560_v4  ;;  %195 = vst [vmem:[%s608_s26] sm:$0xf] %v560_v4  ;;  %v162_v8 = vld [vmem:[%s603_s23 + $0x18] sm:$0xff] }
  0x24   : > { %196 = vst [vmem:[%s608_s26 + $0x4] sm:$0x1] %v560_v4  ;;  %198 = vst [vmem:[%s608_s26 + $0xc] sm:$0x1] %v560_v4  ;;  %v169_v5 = vadd.f32 %v168_v1, %v159_v0  ;;  %v170_v6 = vadd.f32 %v168_v1, %v160_v2  ;;  %v171_v7 = vadd.f32 %v168_v1, %v161_v3  ;;  %v163_v9 = vld [vmem:[%s603_s23 + $0x20] sm:$0xff]  ;;  %v164_v10 = vld [vmem:[%s603_s23 + $0x28] sm:$0xff] }
  0x25   : > { %199 = vst [vmem:[%s608_s26 + $0x10] sm:$0xf] %v560_v4  ;;  %200 = vst [vmem:[%s608_s26 + $0x14] sm:$0x1] %v560_v4  ;;  %v186_v11 = vstv %s598_s18  ;;  %v172_v12 = vadd.f32 %v168_v1, %v162_v8  ;;  %v173_v13 = vadd.f32 %v168_v1, %v163_v9  ;;  %v174_v14 = vadd.f32 %v168_v1, %v164_v10  ;;  %v165_v15 = vld [vmem:[%s603_s23 + $0x30] sm:$0xff] }
  0x26   : > { %201 = vst [vmem:[%s608_s26 + $0x18] sm:$0xf] %v560_v4  ;;  %202 = vst [vmem:[%s608_s26 + $0x1c] sm:$0x1] %v560_v4  ;;  %v166_v16 = vld [vmem:[%s603_s23 + $0x38] sm:$0xff]  ;;  %v177_v17 = vmax.f32 %v169_v5, 0.0  ;;  %v175_v20 = vadd.f32 %v168_v1, %v165_v15 }
  0x27   : > { %203 = vst [vmem:[%s608_s26 + $0x20] sm:$0xf] %v560_v4  ;;  %204 = vst [vmem:[%s608_s26 + $0x24] sm:$0x1] %v560_v4  ;;  %v178_v18 = vmax.f32 %v170_v6, 0.0  ;;  %v179_v19 = vmax.f32 %v171_v7, 0.0  ;;  %v176_v24 = vadd.f32 %v168_v1, %v166_v16 }
  0x28   : > { %205 = vst [vmem:[%s608_s26 + $0x28] sm:$0xf] %v560_v4  ;;  %206 = vst [vmem:[%s608_s26 + $0x2c] sm:$0x1] %v560_v4  ;;  %v180_v21 = vmax.f32 %v172_v12, 0.0  ;;  %v181_v22 = vmax.f32 %v173_v13, 0.0  ;;  %v187_v25 = vadd.f32 %v186_v11, %v177_v17 }
  0x29   : > { %207 = vst [vmem:[%s608_s26 + $0x30] sm:$0xf] %v560_v4  ;;  %208 = vst [vmem:[%s608_s26 + $0x34] sm:$0x1] %v560_v4  ;;  %v182_v23 = vmax.f32 %v174_v14, 0.0  ;;  %v188_v26 = vadd.f32 %v186_v11, %v178_v18  ;;  %v189_v27 = vadd.f32 %v186_v11, %v179_v19  ;;  %v183_v28 = vmax.f32 %v175_v20, 0.0 }
  0x2a   : > { %209 = vst [vmem:[%s608_s26 + $0x38] sm:$0xf] %v560_v4  ;;  %210 = vst [vmem:[%s608_s26 + $0x3c] sm:$0x1] %v560_v4  ;;  %v190_v29 = vadd.f32 %v186_v11, %v180_v21  ;;  %v191_v30 = vadd.f32 %v186_v11, %v181_v22  ;;  %v184_v32 = vmax.f32 %v176_v24, 0.0  ;;  %v503_v33 = vpack.c.bf16 %v187_v25, %v187_v25 }
  0x2b   : > { %211 = vst [vmem:[%s608_s26 + $0x40] sm:$0xf] %v560_v4  ;;  %212 = vst [vmem:[%s608_s26 + $0x44] sm:$0x1] %v560_v4  ;;  %v192_v31 = vadd.f32 %v186_v11, %v182_v23  ;;  %v504_v34 = vpack.c.bf16 %v188_v26, %v188_v26  ;;  %v505_v35 = vpack.c.bf16 %v189_v27, %v189_v27  ;;  %v468_v45 = vld [vmem:[%s608_s26 + $0x8] sm:$0xf] }
  0x2c   : > { %213 = vst [vmem:[%s608_s26 + $0x48] sm:$0xf] %v560_v4  ;;  %214 = vst [vmem:[%s608_s26 + $0x4c] sm:$0x1] %v560_v4  ;;  %v193_v36 = vadd.f32 %v186_v11, %v183_v28  ;;  %v506_v37 = vpack.c.bf16 %v190_v29, %v190_v29  ;;  %v507_v38 = vpack.c.bf16 %v191_v30, %v191_v30  ;;  %v248_v41 = vshrl.u32 %v503_v33, 16 }
  0x2d   : > { %v639_v39 = vpack.c.bf16 %v192_v31, %v192_v31  ;;  %v194_v40 = vadd.f32 %v186_v11, %v184_v32  ;;  %v251_v42 = vshll.u32 %v503_v33, 16  ;;  %v256_v43 = vshrl.u32 %v504_v34, 16  ;;  %v470_v46 = vld [vmem:[%s608_s26 + $0xc] sm:$0x1]  ;;  %v472_v54 = vld [vmem:[%s608_s26 + $0x10] sm:$0xf] }
  0x2e   : > { %v259_v44 = vshll.u32 %v504_v34, 16  ;;  %v264_v47 = vshrl.u32 %v505_v35, 16  ;;  %v267_v48 = vshll.u32 %v505_v35, 16  ;;  %v643_v49 = vpack.c.bf16 %v193_v36, %v193_v36  ;;  %v474_v58 = vld [vmem:[%s608_s26 + $0x14] sm:$0x1] }
  0x2f   : > { %v645_v50 = vpack.c.bf16 %v194_v40, %v194_v40  ;;  %v250_v51 = vrot.slane %v248_v41, 7  ;;  %v258_v53 = vrot.slane %v256_v43, 7  ;;  %v272_v55 = vshrl.u32 %v506_v37, 16  ;;  %v476_v3 = vld [vmem:[%s608_s26 + $0x18] sm:$0xf] }
  0x30   : > { %v275_v56 = vshll.u32 %v506_v37, 16  ;;  %v266_v59 = vrot.slane %v264_v47, 7  ;;  %v280_v60 = vshrl.u32 %v507_v38, 16  ;;  %v283_v61 = vshll.u32 %v507_v38, 16  ;;  %v478_v4 = vld [vmem:[%s608_s26 + $0x1c] sm:$0x1] }
  0x31   : > { %v288_v62 = vshrl.u32 %v639_v39, 16  ;;  %v253_v63 = vor.u32 %v251_v42, %v250_v51  ;;  %v254_v0 = vrot.slane %v250_v51, 4  ;;  %v261_v1 = vor.u32 %v259_v44, %v258_v53  ;;  %v480_v13 = vld [vmem:[%s608_s26 + $0x20] sm:$0xf]  ;;  %v482_v14 = vld [vmem:[%s608_s26 + $0x24] sm:$0x1] }
  0x32   : > { %v262_v2 = vrot.slane %v258_v53, 4  ;;  %v269_v5 = vor.u32 %v267_v48, %v266_v59  ;;  %v270_v6 = vrot.slane %v266_v59, 4  ;;  %v274_v7 = vrot.slane %v272_v55, 7  ;;  %v484_v19 = vld [vmem:[%s608_s26 + $0x28] sm:$0xf] }
  0x33   : > { %v282_v8 = vrot.slane %v280_v60, 7  ;;  %v332_v9 = vsel %vm649_vm4, %v253_v63, %v468_v45  ;;  %v338_v10 = vsel %vm656_vm5, %v254_v0, %v470_v46  ;;  %v341_v11 = vsel %vm649_vm4, %v261_v1, %v472_v54  ;;  %v486_v20 = vld [vmem:[%s608_s26 + $0x2c] sm:$0x1]  ;;  %v488_v27 = vld [vmem:[%s608_s26 + $0x30] sm:$0xf] }
  0x34   : > { %v344_v12 = vsel %vm656_vm5, %v262_v2, %v474_v58  ;;  %469 = vst [vmem:[%s608_s26 + $0x8] sm:$0xf] %v332_v9  ;;  %471 = vst [vmem:[%s608_s26 + $0xc] sm:$0x1] %v338_v10  ;;  %v347_v15 = vsel %vm649_vm4, %v269_v5, %v476_v3  ;;  %v350_v16 = vsel %vm656_vm5, %v270_v6, %v478_v4  ;;  %v278_v18 = vrot.slane %v274_v7, 4 }
  0x35   : > { %473 = vst [vmem:[%s608_s26 + $0x10] sm:$0xf] %v341_v11  ;;  %475 = vst [vmem:[%s608_s26 + $0x14] sm:$0x1] %v344_v12  ;;  %v277_v17 = vor.u32 %v275_v56, %v274_v7  ;;  %v285_v21 = vor.u32 %v283_v61, %v282_v8  ;;  %v286_v22 = vrot.slane %v282_v8, 4  ;;  %v290_v23 = vrot.slane %v288_v62, 7 }
  0x36   : > { %477 = vst [vmem:[%s608_s26 + $0x18] sm:$0xf] %v347_v15  ;;  %479 = vst [vmem:[%s608_s26 + $0x1c] sm:$0x1] %v350_v16  ;;  %v291_v24 = vshll.u32 %v639_v39, 16  ;;  %v356_v26 = vsel %vm656_vm5, %v278_v18, %v482_v14  ;;  %v296_v29 = vshrl.u32 %v643_v49, 16 }
  0x37   : > { %v353_v25 = vsel %vm649_vm4, %v277_v17, %v480_v13  ;;  %v490_v28 = vld [vmem:[%s608_s26 + $0x34] sm:$0x1]  ;;  %v299_v30 = vshll.u32 %v643_v49, 16  ;;  %483 = vst [vmem:[%s608_s26 + $0x24] sm:$0x1] %v356_v26  ;;  %v359_v31 = vsel %vm649_vm4, %v285_v21, %v484_v19  ;;  %v362_v32 = vsel %vm656_vm5, %v286_v22, %v486_v20 }
  0x38   : > { %481 = vst [vmem:[%s608_s26 + $0x20] sm:$0xf] %v353_v25  ;;  %v293_v33 = vor.u32 %v291_v24, %v290_v23  ;;  %v294_v34 = vrot.slane %v290_v23, 4  ;;  %485 = vst [vmem:[%s608_s26 + $0x28] sm:$0xf] %v359_v31  ;;  %v298_v35 = vrot.slane %v296_v29, 7 }
  0x39   : > { %487 = vst [vmem:[%s608_s26 + $0x2c] sm:$0x1] %v362_v32  ;;  %v304_v36 = vshrl.u32 %v645_v50, 16  ;;  %v307_v37 = vshll.u32 %v645_v50, 16  ;;  %v492_v40 = vld [vmem:[%s608_s26 + $0x38] sm:$0xf] }
  0x3a   : > { %v365_v38 = vsel %vm649_vm4, %v293_v33, %v488_v27  ;;  %v368_v39 = vsel %vm656_vm5, %v294_v34, %v490_v28  ;;  %v494_v41 = vld [vmem:[%s608_s26 + $0x3c] sm:$0x1]  ;;  %v301_v42 = vor.u32 %v299_v30, %v298_v35  ;;  %v302_v43 = vrot.slane %v298_v35, 4  ;;  %v496_v45 = vld [vmem:[%s608_s26 + $0x40] sm:$0xf] }
  0x3b   : > { %489 = vst [vmem:[%s608_s26 + $0x30] sm:$0xf] %v365_v38  ;;  %491 = vst [vmem:[%s608_s26 + $0x34] sm:$0x1] %v368_v39  ;;  %v306_v44 = vrot.slane %v304_v36, 7 }
  0x3c   : > { %v498_v46 = vld [vmem:[%s608_s26 + $0x44] sm:$0x1]  ;;  %v371_v47 = vsel %vm649_vm4, %v301_v42, %v492_v40  ;;  %v374_v48 = vsel %vm656_vm5, %v302_v43, %v494_v41 }
  0x3d   : > { %v309_v49 = vor.u32 %v307_v37, %v306_v44  ;;  %v310_v50 = vrot.slane %v306_v44, 4  ;;  %493 = vst [vmem:[%s608_s26 + $0x38] sm:$0xf] %v371_v47  ;;  %495 = vst [vmem:[%s608_s26 + $0x3c] sm:$0x1] %v374_v48 }
  0x3f   : > { %v377_v51 = vsel %vm649_vm4, %v309_v49, %v496_v45  ;;  %v380_v53 = vsel %vm656_vm5, %v310_v50, %v498_v46 }
  0x40   : > { %497 = vst [vmem:[%s608_s26 + $0x40] sm:$0xf] %v377_v51  ;;  %499 = vst [vmem:[%s608_s26 + $0x44] sm:$0x1] %v380_v53 }
  0x41 PF: > { %s13_s9 = sadd.s32 1, %s557_s9  }
  0x42   : > { %p10_p1 = scmp.ge.s32.totalorder %s13_s9, 4  }
  0x44   :  { %12 = sbr.rel (!%p10_p1) target bundleno = 1 (0x1), region = 64 }
  0x4b   :  { %403 = vsyncpa [#allocation3], 1 }
  0x4c   :  { %405 = vsyncpa [#allocation3 + $0x1], 1 }

// kernel: fixup_network_block.7
= control target key start
LH: loop header
LB: loop body
LE: loop exit
PB: predicated region body
PF: predicated region fallthrough
CT: control target
= control target key end

     0   :  { %11 = vsyncpa [#allocation3], 0  ;;  %s3416_s21 = smov 0   ;;  %s3939_s0 = inlined_call_operand.vmem [shape: bf16[2,9,9,128], index: 0, kind: input, shape index: {}]   ;;  %s3940_s1 = inlined_call_operand.vmem [shape: bf16[2,9,9,128], index: 1, kind: input, shape index: {}]   ;;  %s3941_s2 = inlined_call_operand.vmem [shape: bf16[2,9,9,128], index: 2, kind: input, shape index: {}]   ;;  %s3942_s3 = inlined_call_operand.vmem [shape: bf16[2,9,9,128], index: 3, kind: input, shape index: {}]   ;;  %s3943_s4 = inlined_call_operand.vmem [shape: bf16[9,128,128], index: 4, kind: input, shape index: {}]   ;;  %s3944_s5 = inlined_call_operand.vmem [shape: f32[2], index: 5, kind: input, shape index: {}]   ;;  %s3945_s6 = inlined_call_operand.vmem [shape: bf16[2,10,10,128], index: 6, kind: output, shape index: {}]  }
   0x1 LB: > { %s3422_s22 = sadd.s32 4294967295, %s3377_s21   ;;  %p2501_p0 = scmp.ge.s32.totalorder %s3377_s21, 1  ;;  %s3377_s21 = sphi %s3416_s21, %s17_s21  }
   0x2   : > { %p194_p1 = scmp.lt.s32.totalorder %s3377_s21, 3  ;;  %s210_s25 = sshll.u32 %s3944_s5, 4  ;;  %s211_s25 = int_to_ptr.vmem [resolvable:$true] %s210_s25 }
   0x3   : > { %p3244_p3 = scmp.eq.s32.totalorder %s3422_s22, 0  ;;  %s3352_s27 = scalar_lea.vmem %s211_s25, 16 }
   0x4   : > { %p3429_p2 = pnand %p2501_p0, %p194_p1  ;;  %p3353_p6 = scmp.ne.s32.totalorder %s211_s25, %s3352_s27 }
   0x5   : > { %p3360_p10 = scmp.lt.s32.totalorder %s211_s25, %s211_s25  ;;  %p3361_p11 = scmp.lt.s32.totalorder %s3352_s27, %s3352_s27 }
   0x6   : > { %p3240_p4 = pneg %p3429_p2 }
   0x7   : > { %p3362_p12 = por %p3361_p11, %p3360_p10 }
   0x8   : > { %p3241_p5 = pnand %p3244_p3, %p3240_p4 }
   0xa   : > { %p3354_p7 = pneg %p3241_p5 }
   0xc   : > { %p3355_p8 = pnand %p3354_p7, %p3353_p6 }
   0xe   : > { %p3356_p9 = pneg %p3355_p8 }
  0x10   : > { %p3363_p13 = pnand %p3362_p12, %p3356_p9 }
  0x12   : > { %3366 = shalt.err (!%p3363_p13)
}
  0x13   : > { %s3379_s28 = smov [#allocation2]   ;;  %255 = sbr.rel (%p3429_p2) target bundleno = 433 (0x1b1), region = 44 }
  0x14   : > { %3243 = dma.vmem_to_smem (!%p3241_p5), %s211_s25, 16, %s3379_s28, [#allocation3]  }
  0x1a   : > { %3372 = dma.done.wait (%p3244_p3), [#allocation3], 16  }
  0x1b   : > { %3374 = vsyncadd (%p3244_p3), [#allocation3], 4294967280 }
  0x1c   : > { %261 = sfence }
  0x1d   : > { %v3256_v0 = vld [vmem:[%s3943_s4 + $0x40] sm:$0xff]   ;;  %p301_p0 = scmp.lt.s32.totalorder %s3422_s22, 1  ;;  %v3258_v2 = vld [vmem:[%s3943_s4 + $0x48] sm:$0xff]   ;;  %v3260_v4 = vld [vmem:[%s3943_s4 + $0x50] sm:$0xff]   ;;  %vm666_vm0 = vsmask.f32 3328 }
  0x1e   : > { %v3257_v1 = vld [vmem:[%s3943_s4 + $0x100] sm:$0xff]   ;;  %2938 = vmatprep.subr.bf16.mxu1 %v3256_v0  ;;  %v3259_v3 = vld [vmem:[%s3943_s4 + $0x108] sm:$0xff]   ;;  %v3261_v5 = vld [vmem:[%s3943_s4 + $0x110] sm:$0xff]   ;;  %vm667_vm1 = vsmask.f32 7440  ;;  %v3380_v53 = vmov 0  }
  0x1f   : > { %3034 = vmatprep.subr.bf16.mxu0 %v3257_v1  ;;  %2939 = vmatpush3.bf16.msra.mxu1 %v3256_v0  ;;  %s3954_s22 = smov (!%p301_p0, %s3422_s22), 1  ;;  %v3262_v6 = vld [vmem:[%s3943_s4 + $0x58] sm:$0xff]   ;;  %v3264_v8 = vld [vmem:[%s3943_s4 + $0x60] sm:$0xff]   ;;  %v3266_v10 = vld [vmem:[%s3943_s4 + $0x68] sm:$0xff]   ;;  %s2779_s28 = sld [smem:[#allocation2 + $0x1]]  ;;  %vm2342_vm3 = vcmask 1043456  }
  0x20   : > { %3035 = vmatpush3.bf16.msra.mxu0 %v3257_v1  ;;  %2940 = vmatprep.subr.bf16.mxu1 %v3258_v2  ;;  %v3263_v7 = vld [vmem:[%s3943_s4 + $0x118] sm:$0xff]   ;;  %s3473_s23 = smul.u32 72, %s3954_s22  ;;  %v3265_v9 = vld [vmem:[%s3943_s4 + $0x120] sm:$0xff]   ;;  %v3267_v12 = vld [vmem:[%s3943_s4 + $0x128] sm:$0xff]   ;;  %vm2343_vm4 = vsmask.f32 7938 }
  0x21   : > { %3036 = vmatprep.subr.bf16.mxu0 %v3259_v3  ;;  %v3268_v14 = vld [vmem:[%s3943_s4 + $0x70] sm:$0xff]   ;;  %v3270_v16 = vld [vmem:[%s3943_s4 + $0x78] sm:$0xff]   ;;  %v3273_v18 = vld [vmem:[%s3943_s4] sm:$0xff]   ;;  %s3235_s26 = smul.u32 80, %s3954_s22  ;;  %s2181_s22 = sld [smem:[#allocation2]]  ;;  %vm2348_vm5 = vcmask 1040384  }
  0x22   : > { %s3485_s30 = scalar_lea.vmem %s3940_s1, %s3473_s23  ;;  %s3494_s11 = scalar_lea.vmem %s3942_s3, %s3473_s23  ;;  %v3269_v15 = vld [vmem:[%s3943_s4 + $0x130] sm:$0xff]   ;;  %v3271_v17 = vld [vmem:[%s3943_s4 + $0x138] sm:$0xff]   ;;  %v3275_v19 = vld [vmem:[%s3943_s4 + $0x140] sm:$0xff]   ;;  %vm2349_vm6 = vsmask.f32 256 }
  0x23   : > { %2941 = vmatpush3.bf16.msra.mxu1 %v3258_v2  ;;  %v3272_v11 = vld [vmem:[%s3485_s30] ss:$8 sps:$4 sm:$0xff]   ;;  %v3276_v20 = vld [vmem:[%s3485_s30 + $0x10] ss:$8 sps:$4 sm:$0xff]   ;;  %s3539_s17 = scalar_lea.vmem %s3939_s0, %s3473_s23  ;;  %s3549_s25 = scalar_lea.vmem %s3941_s2, %s3473_s23  ;;  %vm3574_vm2 = vmor %vm666_vm0, %vm667_vm1 }
  0x24   : > { %3037 = vmatpush3.bf16.msra.mxu0 %v3259_v3  ;;  %2942 = vmatprep.subr.bf16.mxu1 %v3260_v4  ;;  %v3274_v13 = vld [vmem:[%s3494_s11] ss:$8 sps:$4 sm:$0xff]   ;;  %v3277_v21 = vld [vmem:[%s3494_s11 + $0x10] ss:$8 sps:$4 sm:$0xff]   ;;  %v1276_v34 = vld [vmem:[%s3549_s25 + $0x4] sm:$0x1] }
  0x25   : > { %3038 = vmatprep.subr.bf16.mxu0 %v3261_v5  ;;  %2954 = vmatprep.mubr.bf16.mxu1 %v3272_v11  ;;  %v3278_v22 = vld [vmem:[%s3943_s4 + $0x8] sm:$0xff]   ;;  %v3280_v26 = vld [vmem:[%s3943_s4 + $0x10] sm:$0xff]   ;;  %v3282_v28 = vld [vmem:[%s3943_s4 + $0x18] sm:$0xff]   ;;  %v1301_v40 = vshll.u32 %v1276_v34, 16 }
  0x26   : > { %3050 = vmatprep.mubr.bf16.mxu0 %v3274_v13  ;;  %v3279_v23 = vld [vmem:[%s3943_s4 + $0x148] sm:$0xff]   ;;  %v3281_v27 = vld [vmem:[%s3943_s4 + $0x150] sm:$0xff]   ;;  %v3283_v31 = vld [vmem:[%s3943_s4 + $0x158] sm:$0xff]  }
  0x27   : > { %2943 = vmatpush3.bf16.msra.mxu1 %v3260_v4  ;;  %v3288_v24 = vld [vmem:[%s3485_s30 + $0x20] ss:$8 sps:$4 sm:$0xff]   ;;  %v3292_v29 = vld [vmem:[%s3485_s30 + $0x30] ss:$8 sps:$4 sm:$0xff]   ;;  %v1278_v39 = vld [vmem:[%s3549_s25 + $0xc] sm:$0x1] }
  0x28   : > { %3039 = vmatpush3.bf16.msra.mxu0 %v3261_v5  ;;  %2944 = vmatprep.subr.bf16.mxu1 %v3262_v6  ;;  %v3290_v25 = vld [vmem:[%s3494_s11 + $0x20] ss:$8 sps:$4 sm:$0xff]   ;;  %v3293_v30 = vld [vmem:[%s3494_s11 + $0x30] ss:$8 sps:$4 sm:$0xff]   ;;  %v1315_v46 = vshll.u32 %v1278_v39, 16  ;;  %v1303_v52 = vrot.slane %v1301_v40, 5  ;;  %s3821_s11 = scalar_lea.vmem %s3945_s6, %s3235_s26  ;;  %vm3860_vm7 = vmand %vm2342_vm3, %vm2343_vm4 }
  0x29   : > { %3040 = vmatprep.subr.bf16.mxu0 %v3263_v7  ;;  %v3296_v32 = vld [vmem:[%s3539_s17] ss:$8 sps:$4 sm:$0xff]   ;;  %v1279_v56 = vld [vmem:[%s3549_s25 + $0x10] sm:$0xf]  ;;  %v1280_v57 = vld [vmem:[%s3549_s25 + $0x14] sm:$0x1] }
  0x2a   : > { %v1275_v33 = vld [vmem:[%s3549_s25] sm:$0xf]  ;;  %v1277_v35 = vld [vmem:[%s3549_s25 + $0x8] sm:$0xf]  ;;  %v1317_v55 = vrot.slane %v1315_v46, 5  ;;  %v1320_v61 = vshrl.u32 %v1279_v56, 16  ;;  %vm3869_vm8 = vmand %vm2348_vm5, %vm2349_vm6 }
  0x2b   : > { %2945 = vmatpush3.bf16.msra.mxu1 %v3262_v6  ;;  %v1292_v36 = vshrl.u32 %v1275_v33, 16  ;;  %v1295_v37 = vshll.u32 %v1275_v33, 16  ;;  %v3284_v38 = vld [vmem:[%s3943_s4 + $0x20] sm:$0xff]   ;;  %v1306_v41 = vshrl.u32 %v1277_v35, 16  ;;  %v1309_v42 = vshll.u32 %v1277_v35, 16  ;;  %v3286_v47 = vld [vmem:[%s3943_s4 + $0x28] sm:$0xff]  }
  0x2c   : > { %3041 = vmatpush3.bf16.msra.mxu0 %v3263_v7  ;;  %2946 = vmatprep.subr.bf16.mxu1 %v3264_v8  ;;  %v3285_v43 = vld [vmem:[%s3943_s4 + $0x160] sm:$0xff]   ;;  %v3287_v50 = vld [vmem:[%s3943_s4 + $0x168] sm:$0xff]   ;;  %v1281_v59 = vld [vmem:[%s3549_s25 + $0x18] sm:$0xf]  ;;  %v1323_v63 = vshll.u32 %v1279_v56, 16  ;;  %v1329_v0 = vshll.u32 %v1280_v57, 16 }
  0x2d   : > { %3042 = vmatprep.subr.bf16.mxu0 %v3265_v9  ;;  %v1294_v44 = vrot.slane %v1292_v36, 4  ;;  %v1297_v45 = vrot.slane %v1295_v37, 5  ;;  %v1308_v48 = vrot.slane %v1306_v41, 4  ;;  %v1311_v49 = vrot.slane %v1309_v42, 5  ;;  %v1282_v60 = vld [vmem:[%s3549_s25 + $0x1c] sm:$0x1] }
  0x2e   : > { %v1334_v1 = vshrl.u32 %v1281_v59, 16  ;;  %v3289_v2 = vld [vmem:[%s3943_s4 + $0x30] sm:$0xff]   ;;  %v1322_v4 = vrot.slane %v1320_v61, 4  ;;  %v1337_v5 = vshll.u32 %v1281_v59, 16  ;;  %v3310_v37 = vld [vmem:[%s3539_s17 + $0x20] ss:$8 sps:$4 sm:$0xff]  }
  0x2f   : > { %2947 = vmatpush3.bf16.msra.mxu1 %v3264_v8  ;;  %v1298_v51 = vor.u32 %v1297_v45, %v1294_v44  ;;  %v1312_v54 = vor.u32 %v1311_v49, %v1308_v48  ;;  %v3291_v6 = vld [vmem:[%s3943_s4 + $0x170] sm:$0xff]   ;;  %v1325_v8 = vrot.slane %v1323_v63, 5  ;;  %v3304_v59 = vld [vmem:[%s3943_s4 + $0x98] sm:$0xff]   ;;  %2215 = vst [vmem:[%s3821_s11 + $0x18] sm:$0xf] %v3380_v53  ;;  %2209 = vst [vmem:[%s3821_s11] sm:$0xf] %v3380_v53 }
  0x30   : > { %3043 = vmatpush3.bf16.msra.mxu0 %v3265_v9  ;;  %2948 = vmatprep.subr.bf16.mxu1 %v3266_v10  ;;  %v1336_v9 = vrot.slane %v1334_v1, 4  ;;  %v1339_v13 = vrot.slane %v1337_v5, 5  ;;  %v3313_v48 = vld [vmem:[%s3539_s17 + $0x30] ss:$8 sps:$4 sm:$0xff]   ;;  %2216 = vst [vmem:[%s3821_s11 + $0x1c] sm:$0x1] %v3380_v53 }
  0x31   : > { %3044 = vmatprep.subr.bf16.mxu0 %v3267_v12  ;;  %v1299_v58 = vrot.slane %v1298_v51, 4  ;;  %v1313_v62 = vrot.slane %v1312_v54, 4  ;;  %v1287_v49 = vld [vmem:[%s3549_s25 + $0x30] sm:$0xf]  ;;  %v1289_v51 = vld [vmem:[%s3549_s25 + $0x38] sm:$0xf] }
  0x32   : > { %v1376_v56 = vshrl.u32 %v1287_v49, 16  ;;  %v1379_v57 = vshll.u32 %v1287_v49, 16  ;;  %v1390_v61 = vshrl.u32 %v1289_v51, 16  ;;  %2210 = vst [vmem:[%s3821_s11 + $0x4] sm:$0x1] %v3380_v53 }
  0x33   : > { %2949 = vmatpush3.bf16.msra.mxu1 %v3266_v10  ;;  %v1304_v3 = vsel %vm3574_vm2, %v1299_v58, %v1303_v52  ;;  %v1318_v7 = vsel %vm3574_vm2, %v1313_v62, %v1317_v55  ;;  %v1343_v10 = vshll.u32 %v1282_v60, 16  ;;  %v3303_v52 = vld [vmem:[%s3943_s4 + $0x190] sm:$0xff]   ;;  %v1290_v55 = vld [vmem:[%s3549_s25 + $0x3c] sm:$0x1]  ;;  %v1393_v62 = vshll.u32 %v1289_v51, 16 }
  0x34   : > { %3045 = vmatpush3.bf16.msra.mxu0 %v3267_v12  ;;  %2950 = vmatprep.subr.bf16.mxu1 %v3268_v14  ;;  %v2651_v11 = vcombine.low %v1304_v3, %v1318_v7  ;;  %v1331_v12 = vrot.slane %v1329_v0, 5  ;;  %v1399_v63 = vshll.u32 %v1290_v55, 16  ;;  %v1378_v1 = vrot.slane %v1376_v56, 4  ;;  %2211 = vst [vmem:[%s3821_s11 + $0x8] sm:$0xf] %v3380_v53 }
  0x35   : > { %3046 = vmatprep.subr.bf16.mxu0 %v3269_v15  ;;  %v1395_v7 = vrot.slane %v1393_v62, 5  ;;  %2212 = vst [vmem:[%s3821_s11 + $0xc] sm:$0x1] %v3380_v53  ;;  %2213 = vst [vmem:[%s3821_s11 + $0x10] sm:$0xf] %v3380_v53 }
  0x36   : > { %2214 = vst [vmem:[%s3821_s11 + $0x14] sm:$0x1] %v3380_v53  ;;  %2217 = vst [vmem:[%s3821_s11 + $0x20] sm:$0xf] %v3380_v53 }
  0x37   : > { %2951 = vmatpush3.bf16.msra.mxu1 %v3268_v14  ;;  %v3294_v14 = vld [vmem:[%s3943_s4 + $0x38] sm:$0xff]   ;;  %2218 = vst [vmem:[%s3821_s11 + $0x24] sm:$0x1] %v3380_v53  ;;  %2219 = vst [vmem:[%s3821_s11 + $0x28] sm:$0xf] %v3380_v53 }
  0x38   : > { %3047 = vmatpush3.bf16.msra.mxu0 %v3269_v15  ;;  %2952 = vmatprep.subr.bf16.mxu1 %v3270_v16  ;;  %v1326_v15 = vor.u32 %v1325_v8, %v1322_v4  ;;  %v3305_v4 = vld [vmem:[%s3943_s4 + $0x198] sm:$0xff]   ;;  %v1401_v8 = vrot.slane %v1399_v63, 5  ;;  %2220 = vst [vmem:[%s3821_s11 + $0x2c] sm:$0x1] %v3380_v53  ;;  %2221 = vst [vmem:[%s3821_s11 + $0x30] sm:$0xf] %v3380_v53 }
  0x39   : > { %3048 = vmatprep.subr.bf16.mxu0 %v3271_v17  ;;  %2222 = vst [vmem:[%s3821_s11 + $0x34] sm:$0x1] %v3380_v53  ;;  %2223 = vst [vmem:[%s3821_s11 + $0x38] sm:$0xf] %v3380_v53 }
  0x3a   : > { %2224 = vst [vmem:[%s3821_s11 + $0x3c] sm:$0x1] %v3380_v53  ;;  %2225 = vst [vmem:[%s3821_s11 + $0x40] sm:$0xf] %v3380_v53 }
  0x3b   : > { %2953 = vmatpush3.bf16.msra.mxu1 %v3270_v16  ;;  %v1340_v16 = vor.u32 %v1339_v13, %v1336_v9  ;;  %v3306_v13 = vld [vmem:[%s3943_s4 + $0xa0] sm:$0xff]   ;;  %2226 = vst [vmem:[%s3821_s11 + $0x44] sm:$0x1] %v3380_v53  ;;  %2227 = vst [vmem:[%s3821_s11 + $0x48] sm:$0xf] %v3380_v53 }
  0x3c   : > { %3049 = vmatpush3.bf16.msra.mxu0 %v3271_v17  ;;  %2962 = vmatprep.subr.bf16.mxu1 %v3273_v18  ;;  %v1327_v17 = vrot.slane %v1326_v15, 4  ;;  %2228 = vst [vmem:[%s3821_s11 + $0x4c] sm:$0x1] %v3380_v53 }
  0x3d   : > { %3058 = vmatprep.subr.bf16.mxu0 %v3275_v19 }
  0x3e   : > { %2955 = vmatmul.mubr.bf16.vlgmr.msra.gmra.mrb[0].mxu1 %v3276_v20  ;;  %v1341_v20 = vrot.slane %v1340_v16, 4  ;;  %v652_v16 = vld [vmem:[%s3539_s17 + $0x8] sm:$0xf] }
  0x3f   : > { %2963 = vmatpush3.bf16.msra.mxu1 %v3273_v18  ;;  %3051 = vmatmul.mubr.bf16.vlgmr.msra.gmra.mrb[0].mxu0 %v3277_v21  ;;  %v1345_v18 = vrot.slane %v1343_v10, 5  ;;  %v3297_v21 = vld [vmem:[%s3943_s4 + $0x80] sm:$0xff]  }
  0x40   : > { %3059 = vmatpush3.bf16.msra.mxu0 %v3275_v19  ;;  %2964 = vmatprep.subr.bf16.mxu1 %v3278_v22  ;;  %v3295_v19 = vld [vmem:[%s3943_s4 + $0x178] sm:$0xff]  }
  0x41   : > { %3060 = vmatprep.subr.bf16.mxu0 %v3279_v23  ;;  %2958 = vmatprep.mubr.bf16.mxu1 %v3288_v24  ;;  %v3298_v24 = vld [vmem:[%s3943_s4 + $0x180] sm:$0xff]  }
  0x42   : > { %3054 = vmatprep.mubr.bf16.mxu0 %v3290_v25  ;;  %v3299_v25 = vld [vmem:[%s3539_s17 + $0x10] ss:$8 sps:$4 sm:$0xff]  }
  0x43   : > { %2965 = vmatpush3.bf16.msra.mxu1 %v3278_v22  ;;  %v1332_v22 = vsel %vm3574_vm2, %v1327_v17, %v1331_v12  ;;  %v651_v12 = vld [vmem:[%s3539_s17 + $0x4] sm:$0x1]  ;;  %v653_v17 = vld [vmem:[%s3539_s17 + $0xc] sm:$0x1] }
  0x44   : > { %3061 = vmatpush3.bf16.msra.mxu0 %v3279_v23  ;;  %2966 = vmatprep.subr.bf16.mxu1 %v3280_v26  ;;  %v1346_v23 = vsel %vm3574_vm2, %v1341_v20, %v1345_v18 }
  0x45   : > { %3062 = vmatprep.subr.bf16.mxu0 %v3281_v27 }
  0x46   : > { %2959 = vmatmul.mubr.bf16.gmra.mrb[4].mxu1 %v3292_v29  ;;  %v3301_v29 = vld [vmem:[%s3943_s4 + $0x188] sm:$0xff]  }
  0x47   : > { %2967 = vmatpush3.bf16.msra.mxu1 %v3280_v26  ;;  %3055 = vmatmul.mubr.bf16.gmra.mrb[4].mxu0 %v3293_v30  ;;  %v3300_v26 = vld [vmem:[%s3943_s4 + $0x88] sm:$0xff]   ;;  %v1284_v30 = vld [vmem:[%s3549_s25 + $0x24] sm:$0x1] }
  0x48   : > { %3063 = vmatpush3.bf16.msra.mxu0 %v3281_v27  ;;  %2968 = vmatprep.subr.bf16.mxu1 %v3282_v28  ;;  %v1283_v27 = vld [vmem:[%s3549_s25 + $0x20] sm:$0xf]  ;;  %v1357_v35 = vshll.u32 %v1284_v30, 16 }
  0x49   : > { %3064 = vmatprep.subr.bf16.mxu0 %v3283_v31  ;;  %2978 = vmatprep.mubr.bf16.mxu1 %v3296_v32  ;;  %v1286_v32 = vld [vmem:[%s3549_s25 + $0x2c] sm:$0x1]  ;;  %v1348_v33 = vshrl.u32 %v1283_v27, 16  ;;  %v1351_v34 = vshll.u32 %v1283_v27, 16  ;;  %v693_v27 = vshll.u32 %v653_v17, 16 }
  0x4a   : > { %3074 = vmatprep.mubr.bf16.mxu0 %v2651_v11  ;;  %v1371_v39 = vshll.u32 %v1286_v32, 16  ;;  %v1359_v44 = vrot.slane %v1357_v35, 5  ;;  %v650_v11 = vld [vmem:[%s3539_s17] sm:$0xf]  ;;  %v3308_v32 = vld [vmem:[%s3943_s4 + $0xa8] sm:$0xff]  }
  0x4b   : > { %2969 = vmatpush3.bf16.msra.mxu1 %v3282_v28  ;;  %v2652_v28 = vcombine.low %v1332_v22, %v1346_v23  ;;  %v1350_v40 = vrot.slane %v1348_v33, 4  ;;  %v1353_v41 = vrot.slane %v1351_v34, 5  ;;  %v670_v18 = vshrl.u32 %v650_v11, 16  ;;  %v661_v17 = vld [vmem:[%s3539_s17 + $0x2c] sm:$0x1] }
  0x4c   : > { %3065 = vmatpush3.bf16.msra.mxu0 %v3283_v31  ;;  %2970 = vmatprep.subr.bf16.mxu1 %v3284_v38  ;;  %v1285_v31 = vld [vmem:[%s3549_s25 + $0x28] sm:$0xf]  ;;  %v1373_v46 = vrot.slane %v1371_v39, 5  ;;  %v684_v22 = vshrl.u32 %v652_v16, 16  ;;  %v687_v23 = vshll.u32 %v652_v16, 16 }
  0x4d   : > { %3066 = vmatprep.subr.bf16.mxu0 %v3285_v43  ;;  %v1362_v36 = vshrl.u32 %v1285_v31, 16  ;;  %v660_v16 = vld [vmem:[%s3539_s17 + $0x28] sm:$0xf] }
  0x4e   : > { %v686_v30 = vrot.slane %v684_v22, 4  ;;  %v740_v22 = vshrl.u32 %v660_v16, 16 }
  0x4f   : > { %2971 = vmatpush3.bf16.msra.mxu1 %v3284_v38  ;;  %v1365_v38 = vshll.u32 %v1285_v31, 16  ;;  %v1364_v42 = vrot.slane %v1362_v36, 4  ;;  %v689_v31 = vrot.slane %v687_v23, 5  ;;  %v695_v36 = vrot.slane %v693_v27, 5 }
  0x50   : > { %3067 = vmatpush3.bf16.msra.mxu0 %v3285_v43  ;;  %2972 = vmatprep.subr.bf16.mxu1 %v3286_v47  ;;  %v3302_v43 = vld [vmem:[%s3943_s4 + $0x90] sm:$0xff]   ;;  %v743_v23 = vshll.u32 %v660_v16, 16  ;;  %v2736_v16 = vld [vmem:[%s3539_s17 + $0xc] sm:$0x1] }
  0x51   : > { %3068 = vmatprep.subr.bf16.mxu0 %v3287_v50  ;;  %v1367_v45 = vrot.slane %v1365_v38, 5  ;;  %v3309_v38 = vld [vmem:[%s3943_s4 + $0x1a8] sm:$0xff]  }
  0x53   : > { %2973 = vmatpush3.bf16.msra.mxu1 %v3286_v47  ;;  %v1354_v47 = vor.u32 %v1353_v41, %v1350_v40  ;;  %v1368_v54 = vor.u32 %v1367_v45, %v1364_v42  ;;  %v690_v40 = vor.u32 %v689_v31, %v686_v30  ;;  %v654_v41 = vld [vmem:[%s3539_s17 + $0x10] sm:$0xf]  ;;  %v745_v31 = vrot.slane %v743_v23, 5 }
  0x54   : > { %3069 = vmatpush3.bf16.msra.mxu0 %v3287_v50  ;;  %2974 = vmatprep.subr.bf16.mxu1 %v3289_v2  ;;  %v1288_v50 = vld [vmem:[%s3549_s25 + $0x34] sm:$0x1]  ;;  %v698_v45 = vshrl.u32 %v654_v41, 16  ;;  %v662_v30 = vld [vmem:[%s3539_s17 + $0x30] sm:$0xf] }
  0x55   : > { %3070 = vmatprep.subr.bf16.mxu0 %v3291_v6  ;;  %v1385_v58 = vshll.u32 %v1288_v50, 16  ;;  %v1355_v60 = vrot.slane %v1354_v47, 4  ;;  %v1369_v0 = vrot.slane %v1368_v54, 4  ;;  %v657_v47 = vld [vmem:[%s3539_s17 + $0x1c] sm:$0x1] }
  0x57   : > { %2975 = vmatpush3.bf16.msra.mxu1 %v3289_v2  ;;  %v1381_v2 = vrot.slane %v1379_v57, 5  ;;  %v1387_v3 = vrot.slane %v1385_v58, 5  ;;  %v1360_v5 = vsel %vm3574_vm2, %v1355_v60, %v1359_v44  ;;  %v1374_v9 = vsel %vm3574_vm2, %v1369_v0, %v1373_v46  ;;  %v656_v44 = vld [vmem:[%s3539_s17 + $0x18] sm:$0xf]  ;;  %v3312_v60 = vld [vmem:[%s3943_s4 + $0x1b0] sm:$0xff]  }
  0x58   : > { %3071 = vmatpush3.bf16.msra.mxu0 %v3291_v6  ;;  %2976 = vmatprep.subr.bf16.mxu1 %v3294_v14  ;;  %v1392_v6 = vrot.slane %v1390_v61, 4  ;;  %v691_v46 = vrot.slane %v690_v40, 4  ;;  %v712_v50 = vshrl.u32 %v656_v44, 16  ;;  %v715_v54 = vshll.u32 %v656_v44, 16 }
  0x59   : > { %3072 = vmatprep.subr.bf16.mxu0 %v3295_v19  ;;  %v1382_v10 = vor.u32 %v1381_v2, %v1378_v1  ;;  %v721_v58 = vshll.u32 %v657_v47, 16 }
  0x5a   : > { %v1396_v15 = vor.u32 %v1395_v7, %v1392_v6  ;;  %v696_v55 = vsel %vm3574_vm2, %v691_v46, %v695_v36  ;;  %v714_v57 = vrot.slane %v712_v50, 4  ;;  %v717_v63 = vrot.slane %v715_v54, 5  ;;  %v3315_v6 = vld [vmem:[%s3943_s4 + $0x1b8] sm:$0xff]   ;;  %v3316_v7 = vld [vmem:[%s3943_s4 + $0xc0] sm:$0xff]  }
  0x5b   : > { %2977 = vmatpush3.bf16.msra.mxu1 %v3294_v14  ;;  %v2653_v14 = vcombine.low %v1360_v5, %v1374_v9  ;;  %v1383_v20 = vrot.slane %v1382_v10, 4  ;;  %v3318_v10 = vld [vmem:[%s3943_s4 + $0x1c0] sm:$0xff]   ;;  %v3324_v50 = vld [vmem:[%s3943_s4 + $0xd8] sm:$0xff]  }
  0x5c   : > { %3073 = vmatpush3.bf16.msra.mxu0 %v3295_v19  ;;  %2986 = vmatprep.subr.bf16.mxu1 %v3297_v21  ;;  %v673_v19 = vshll.u32 %v650_v11, 16  ;;  %v718_v1 = vor.u32 %v717_v63, %v714_v57  ;;  %v3319_v11 = vld [vmem:[%s3539_s17 + $0x18] ss:$8 sps:$4 sm:$0xff]  }
  0x5d   : > { %3082 = vmatprep.subr.bf16.mxu0 %v3298_v24 }
  0x5e   : > { %2979 = vmatmul.mubr.bf16.vlgmr.msra.gmra.mrb[0].mxu1 %v3299_v25  ;;  %v672_v25 = vrot.slane %v670_v18, 4  ;;  %v719_v5 = vrot.slane %v718_v1, 4  ;;  %v3321_v18 = vld [vmem:[%s3943_s4 + $0x1c8] sm:$0xff]   ;;  %v3326_v1 = vld [vmem:[%s3943_s4 + $0xe0] sm:$0xff]  }
  0x5f   : > { %2987 = vmatpush3.bf16.msra.mxu1 %v3297_v21  ;;  %3075 = vmatmul.mubr.bf16.vlgmr.msra.gmra.mrb[0].mxu0 %v2652_v28  ;;  %v679_v21 = vshll.u32 %v651_v12, 16  ;;  %v3307_v28 = vld [vmem:[%s3943_s4 + $0x1a0] sm:$0xff]  }
  0x60   : > { %3083 = vmatpush3.bf16.msra.mxu0 %v3298_v24  ;;  %2988 = vmatprep.subr.bf16.mxu1 %v3300_v26  ;;  %v1397_v24 = vrot.slane %v1396_v15, 4  ;;  %v658_v12 = vld [vmem:[%s3539_s17 + $0x20] sm:$0xf]  ;;  %v659_v15 = vld [vmem:[%s3539_s17 + $0x24] sm:$0x1] }
  0x61   : > { %3084 = vmatprep.subr.bf16.mxu0 %v3301_v29  ;;  %2982 = vmatprep.mubr.bf16.mxu1 %v3310_v37  ;;  %v681_v35 = vrot.slane %v679_v21, 5  ;;  %v3317_v37 = vld [vmem:[%s3539_s17 + $0x8] ss:$8 sps:$4 sm:$0xff]   ;;  %v735_v21 = vshll.u32 %v659_v15, 16 }
  0x62   : > { %3078 = vmatprep.mubr.bf16.mxu0 %v2653_v14  ;;  %v1402_v33 = vsel %vm3574_vm2, %v1397_v24, %v1401_v8  ;;  %v3320_v14 = vld [vmem:[%s3943_s4 + $0xc8] sm:$0xff]   ;;  %v749_v24 = vshll.u32 %v661_v17, 16  ;;  %v2737_v17 = vld [vmem:[%s3539_s17 + $0x10] sm:$0xf] }
  0x63   : > { %2989 = vmatpush3.bf16.msra.mxu1 %v3300_v26  ;;  %v675_v26 = vrot.slane %v673_v19, 5  ;;  %v726_v19 = vshrl.u32 %v658_v12, 16  ;;  %v2735_v15 = vld [vmem:[%s3539_s17 + $0x8] sm:$0xf]  ;;  %v1933_v23 = vshll.u32 %v2737_v17, 16 }
  0x64   : > { %3085 = vmatpush3.bf16.msra.mxu0 %v3301_v29  ;;  %2990 = vmatprep.subr.bf16.mxu1 %v3302_v43  ;;  %v1388_v29 = vsel %vm3574_vm2, %v1383_v20, %v1387_v3  ;;  %v723_v3 = vrot.slane %v721_v58, 5  ;;  %v729_v20 = vshll.u32 %v658_v12, 16  ;;  %v3332_v58 = vld [vmem:[%s3539_s17 + $0x38] ss:$8 sps:$4 sm:$0xff]  }
  0x65   : > { %3086 = vmatprep.subr.bf16.mxu0 %v3303_v52  ;;  %v676_v34 = vor.u32 %v675_v26, %v672_v25  ;;  %v2654_v39 = vcombine.low %v1388_v29, %v1402_v33  ;;  %v3330_v25 = vld [vmem:[%s3539_s17 + $0x28] ss:$8 sps:$4 sm:$0xff]   ;;  %v728_v26 = vrot.slane %v726_v19, 4  ;;  %v742_v29 = vrot.slane %v740_v22, 4  ;;  %v663_v33 = vld [vmem:[%s3539_s17 + $0x34] sm:$0x1] }
  0x66   : > { %2983 = vmatmul.mubr.bf16.gmra.mrb[4].mxu1 %v3313_v48  ;;  %v701_v48 = vshll.u32 %v654_v41, 16  ;;  %v724_v9 = vsel %vm3574_vm2, %v719_v5, %v723_v3  ;;  %v731_v27 = vrot.slane %v729_v20, 5  ;;  %v763_v40 = vshll.u32 %v663_v33, 16  ;;  %v3323_v41 = vld [vmem:[%s3943_s4 + $0x1d0] sm:$0xff]   ;;  %v3327_v5 = vld [vmem:[%s3943_s4 + $0x1e0] sm:$0xff]   ;;  %v3334_v12 = vld [vmem:[%s3943_s4 + $0xf8] sm:$0xff]  }
  0x67   : > { %2991 = vmatpush3.bf16.msra.mxu1 %v3302_v43  ;;  %v677_v42 = vrot.slane %v676_v34, 4  ;;  %v655_v43 = vld [vmem:[%s3539_s17 + $0x14] sm:$0x1]  ;;  %3079 = vmatmul.mubr.bf16.gmra.mrb[4].mxu0 %v2654_v39  ;;  %v664_v34 = vld [vmem:[%s3539_s17 + $0x38] sm:$0xf]  ;;  %v757_v39 = vshll.u32 %v662_v30, 16 }
  0x68   : > { %3087 = vmatpush3.bf16.msra.mxu0 %v3303_v52  ;;  %2992 = vmatprep.subr.bf16.mxu1 %v3304_v59  ;;  %v707_v49 = vshll.u32 %v655_v43, 16  ;;  %v700_v52 = vrot.slane %v698_v45, 4  ;;  %v703_v56 = vrot.slane %v701_v48, 5  ;;  %v732_v36 = vor.u32 %v731_v27, %v728_v26  ;;  %v2746_v33 = vld [vmem:[%s3539_s17 + $0x34] sm:$0x1] }
  0x69   : > { %3088 = vmatprep.subr.bf16.mxu0 %v3305_v4  ;;  %v682_v51 = vsel %vm3574_vm2, %v677_v42, %v681_v35  ;;  %3098 = vmatprep.mubr.bf16.mxu0 %v3317_v37  ;;  %v3322_v35 = vld [vmem:[%s3943_s4 + $0xd0] sm:$0xff]   ;;  %v665_v37 = vld [vmem:[%s3539_s17 + $0x3c] sm:$0x1]  ;;  %v746_v42 = vor.u32 %v745_v31, %v742_v29  ;;  %v768_v43 = vshrl.u32 %v664_v34, 16  ;;  %v771_v44 = vshll.u32 %v664_v34, 16 }
  0x6a   : > { %v2567_v61 = vcombine.low %v682_v51, %v696_v55  ;;  %v709_v62 = vrot.slane %v707_v49, 5  ;;  %v704_v0 = vor.u32 %v703_v56, %v700_v52  ;;  %v777_v45 = vshll.u32 %v665_v37, 16  ;;  %v2745_v29 = vld [vmem:[%s3539_s17 + $0x30] sm:$0xf]  ;;  %v3339_v34 = vld [vmem:[%s3485_s30 + $0x18] ss:$8 sps:$4 sm:$0xff]  }
  0x6b   : > { %2993 = vmatpush3.bf16.msra.mxu1 %v3304_v59  ;;  %v3311_v59 = vld [vmem:[%s3943_s4 + $0xb0] sm:$0xff]   ;;  %v733_v46 = vrot.slane %v732_v36, 4  ;;  %v759_v48 = vrot.slane %v757_v39, 5  ;;  %v765_v49 = vrot.slane %v763_v40, 5  ;;  %v747_v51 = vrot.slane %v746_v42, 4  ;;  %v3341_v39 = vld [vmem:[%s3943_s4 + $0x208] sm:$0xff]  }
  0x6c   : > { %3089 = vmatpush3.bf16.msra.mxu0 %v3305_v4  ;;  %2994 = vmatprep.subr.bf16.mxu1 %v3306_v13  ;;  %v705_v2 = vrot.slane %v704_v0, 4  ;;  %v3314_v4 = vld [vmem:[%s3943_s4 + $0xb8] sm:$0xff]   ;;  %v770_v52 = vrot.slane %v768_v43, 4  ;;  %v773_v54 = vrot.slane %v771_v44, 5  ;;  %v779_v55 = vrot.slane %v777_v45, 5 }
  0x6d   : > { %3090 = vmatprep.subr.bf16.mxu0 %v3307_v28  ;;  %3002 = vmatprep.mubr.bf16.mxu1 %v2567_v61  ;;  %v3325_v61 = vld [vmem:[%s3943_s4 + $0x1d8] sm:$0xff]   ;;  %v1916_v19 = vshrl.u32 %v2735_v15, 16  ;;  %v1919_v20 = vshll.u32 %v2735_v15, 16  ;;  %v1930_v22 = vshrl.u32 %v2737_v17, 16  ;;  %v1989_v42 = vshll.u32 %v2745_v29, 16  ;;  %v3348_v15 = vld [vmem:[%s3943_s4 + $0x220] sm:$0xff]  }
  0x6e   : > { %v710_v8 = vsel %vm3574_vm2, %v705_v2, %v709_v62  ;;  %v1995_v43 = vshll.u32 %v2746_v33, 16  ;;  %v3342_v44 = vld [vmem:[%s3549_s25 + $0x20] ss:$8 sps:$4 sm:$0xff]  }
  0x6f   : > { %2995 = vmatpush3.bf16.msra.mxu1 %v3306_v13  ;;  %v2568_v13 = vcombine.low %v710_v8, %v724_v9  ;;  %v3328_v8 = vld [vmem:[%s3943_s4 + $0xe8] sm:$0xff]   ;;  %v1918_v26 = vrot.slane %v1916_v19, 4  ;;  %v1921_v27 = vrot.slane %v1919_v20, 5  ;;  %v1932_v31 = vrot.slane %v1930_v22, 4 }
  0x70   : > { %3091 = vmatpush3.bf16.msra.mxu0 %v3307_v28  ;;  %2996 = vmatprep.subr.bf16.mxu1 %v3308_v32  ;;  %v737_v28 = vrot.slane %v735_v21, 5  ;;  %v3329_v9 = vld [vmem:[%s3943_s4 + $0x1e8] sm:$0xff]   ;;  %v1925_v21 = vshll.u32 %v2736_v16, 16 }
  0x71   : > { %3092 = vmatprep.subr.bf16.mxu0 %v3309_v38  ;;  %v3349_v20 = vld [vmem:[%s3943_s4 + $0x228] sm:$0xff]  }
  0x72   : > { %v738_v56 = vsel %vm3574_vm2, %v733_v46, %v737_v28  ;;  %v2744_v28 = vld [vmem:[%s3539_s17 + $0x2c] sm:$0x1]  ;;  %v1927_v45 = vrot.slane %v1925_v21, 5  ;;  %v2748_v21 = vld [vmem:[%s3539_s17 + $0x3c] sm:$0x1] }
  0x73   : > { %2997 = vmatpush3.bf16.msra.mxu1 %v3308_v32  ;;  %v751_v32 = vrot.slane %v749_v24, 5 }
  0x74   : > { %3093 = vmatpush3.bf16.msra.mxu0 %v3309_v38  ;;  %2998 = vmatprep.subr.bf16.mxu1 %v3311_v59  ;;  %v754_v38 = vshrl.u32 %v662_v30, 16  ;;  %v3338_v30 = vld [vmem:[%s3549_s25 + $0x10] ss:$8 sps:$4 sm:$0xff]  }
  0x75   : > { %3094 = vmatprep.subr.bf16.mxu0 %v3312_v60 }
  0x76   : > { %v756_v47 = vrot.slane %v754_v38, 4  ;;  %v1981_v38 = vshll.u32 %v2744_v28, 16 }
  0x77   : > { %2999 = vmatpush3.bf16.msra.mxu1 %v3311_v59  ;;  %v752_v59 = vsel %vm3574_vm2, %v747_v51, %v751_v32  ;;  %v1935_v32 = vrot.slane %v1933_v23, 5 }
  0x78   : > { %3095 = vmatpush3.bf16.msra.mxu0 %v3312_v60  ;;  %3000 = vmatprep.subr.bf16.mxu1 %v3314_v4  ;;  %v760_v57 = vor.u32 %v759_v48, %v756_v47  ;;  %v774_v60 = vor.u32 %v773_v54, %v770_v52  ;;  %v2569_v62 = vcombine.low %v738_v56, %v752_v59  ;;  %v1991_v54 = vrot.slane %v1989_v42, 5 }
  0x79   : > { %3096 = vmatprep.subr.bf16.mxu0 %v3315_v6  ;;  %v1936_v40 = vor.u32 %v1935_v32, %v1932_v31  ;;  %v1983_v56 = vrot.slane %v1981_v38, 5  ;;  %v1997_v59 = vrot.slane %v1995_v43, 5  ;;  %v2740_v31 = vld [vmem:[%s3539_s17 + $0x1c] sm:$0x1]  ;;  %v2742_v32 = vld [vmem:[%s3539_s17 + $0x24] sm:$0x1] }
  0x7a   : > { %v761_v63 = vrot.slane %v760_v57, 4  ;;  %v775_v0 = vrot.slane %v774_v60, 4  ;;  %v3346_v57 = vld [vmem:[%s3943_s4 + $0x210] sm:$0xff]  }
  0x7b   : > { %3001 = vmatpush3.bf16.msra.mxu1 %v3314_v4  ;;  %v3337_v4 = vld [vmem:[%s3485_s30 + $0x8] ss:$8 sps:$4 sm:$0xff]   ;;  %v1937_v51 = vrot.slane %v1936_v40, 4 }
  0x7c   : > { %3097 = vmatpush3.bf16.msra.mxu0 %v3315_v6  ;;  %3010 = vmatprep.subr.bf16.mxu1 %v3316_v7  ;;  %v766_v2 = vsel %vm3574_vm2, %v761_v63, %v765_v49  ;;  %v780_v3 = vsel %vm3574_vm2, %v775_v0, %v779_v55  ;;  %v3343_v49 = vld [vmem:[%s3485_s30 + $0x28] ss:$8 sps:$4 sm:$0xff]  }
  0x7d   : > { %3106 = vmatprep.subr.bf16.mxu0 %v3318_v10  ;;  %v2570_v6 = vcombine.low %v766_v2, %v780_v3  ;;  %v3347_v3 = vld [vmem:[%s3943_s4 + $0x218] sm:$0xff]  }
  0x7e   : > { %3003 = vmatmul.mubr.bf16.vlgmr.msra.gmra.mrb[0].mxu1 %v2568_v13  ;;  %v3335_v13 = vld [vmem:[%s3943_s4 + $0x1f8] sm:$0xff]  }
  0x7f   : > { %3011 = vmatpush3.bf16.msra.mxu1 %v3316_v7  ;;  %3099 = vmatmul.mubr.bf16.vlgmr.msra.gmra.mrb[0].mxu0 %v3319_v11  ;;  %v3336_v7 = vld [vmem:[%s3549_s25] ss:$8 sps:$4 sm:$0xff]   ;;  %v3333_v11 = vld [vmem:[%s3943_s4 + $0x1f0] sm:$0xff]  }
  0x80   : > { %3107 = vmatpush3.bf16.msra.mxu0 %v3318_v10  ;;  %3012 = vmatprep.subr.bf16.mxu1 %v3320_v14  ;;  %v3331_v10 = vld [vmem:[%s3943_s4 + $0xf0] sm:$0xff]  }
  0x81   : > { %3108 = vmatprep.subr.bf16.mxu0 %v3321_v18  ;;  %3102 = vmatprep.mubr.bf16.mxu0 %v3330_v25  ;;  %v2743_v25 = vld [vmem:[%s3539_s17 + $0x28] sm:$0xf] }
  0x82   : > { %3006 = vmatprep.mubr.bf16.mxu1 %v2569_v62  ;;  %v1972_v36 = vshrl.u32 %v2743_v25, 16  ;;  %v1975_v37 = vshll.u32 %v2743_v25, 16 }
  0x83   : > { %3013 = vmatpush3.bf16.msra.mxu1 %v3320_v14  ;;  %v3340_v14 = vld [vmem:[%s3943_s4 + $0x200] sm:$0xff]  }
  0x84   : > { %3109 = vmatpush3.bf16.msra.mxu0 %v3321_v18  ;;  %3014 = vmatprep.subr.bf16.mxu1 %v3322_v35  ;;  %v2738_v18 = vld [vmem:[%s3539_s17 + $0x14] sm:$0x1]  ;;  %v1974_v47 = vrot.slane %v1972_v36, 4  ;;  %v1977_v48 = vrot.slane %v1975_v37, 5 }
  0x85   : > { %3110 = vmatprep.subr.bf16.mxu0 %v3323_v41  ;;  %v1939_v24 = vshll.u32 %v2738_v18, 16  ;;  %v3350_v37 = vld [vmem:[%s3943_s4 + $0x230] sm:$0xff]  }
  0x86   : > { %3007 = vmatmul.mubr.bf16.gmra.mrb[4].mxu1 %v2570_v6  ;;  %v1978_v55 = vor.u32 %v1977_v48, %v1974_v47  ;;  %v2749_v6 = vld [vmem:[%s3539_s17 + $0x40] sm:$0xf] }
  0x87   : > { %3015 = vmatpush3.bf16.msra.mxu1 %v3322_v35  ;;  %3103 = vmatmul.mubr.bf16.gmra.mrb[4].mxu0 %v3332_v58  ;;  %v1922_v35 = vor.u32 %v1921_v27, %v1918_v26  ;;  %v1941_v46 = vrot.slane %v1939_v24, 5 }
  0x88   : > { %3111 = vmatpush3.bf16.msra.mxu0 %v3323_v41  ;;  %3016 = vmatprep.subr.bf16.mxu1 %v3324_v50  ;;  %v1986_v41 = vshrl.u32 %v2745_v29, 16  ;;  %v1979_v60 = vrot.slane %v1978_v55, 4 }
  0x89   : > { %3112 = vmatprep.subr.bf16.mxu0 %v3325_v61  ;;  %3122 = vmatprep.mubr.bf16.mxu0 %v3337_v4  ;;  %v1942_v63 = vsel %vm3574_vm2, %v1937_v51, %v1941_v46  ;;  %v3351_v46 = vld [vmem:[%s3943_s4 + $0x238] sm:$0xff]  }
  0x8a   : > { %3026 = vmatprep.mubr.bf16.mxu1 %v3336_v7  ;;  %v1988_v52 = vrot.slane %v1986_v41, 4  ;;  %v1984_v2 = vsel %vm3574_vm2, %v1979_v60, %v1983_v56  ;;  %v1967_v41 = vshll.u32 %v2742_v32, 16 }
  0x8b   : > { %3017 = vmatpush3.bf16.msra.mxu1 %v3324_v50  ;;  %v1923_v50 = vrot.slane %v1922_v35, 4 }
  0x8c   : > { %3113 = vmatpush3.bf16.msra.mxu0 %v3325_v61  ;;  %3018 = vmatprep.subr.bf16.mxu1 %v3326_v1  ;;  %v1992_v58 = vor.u32 %v1991_v54, %v1988_v52  ;;  %v3344_v61 = vld [vmem:[%s3549_s25 + $0x30] ss:$8 sps:$4 sm:$0xff]  }
  0x8d   : > { %3114 = vmatprep.subr.bf16.mxu0 %v3327_v5  ;;  %v1928_v62 = vsel %vm3574_vm2, %v1923_v50, %v1927_v45  ;;  %v1969_v50 = vrot.slane %v1967_v41, 5 }
  0x8e   : > { %v1993_v0 = vrot.slane %v1992_v58, 4  ;;  %v2767_v7 = vcombine.low %v1928_v62, %v1942_v63 }
  0x8f   : > { %3019 = vmatpush3.bf16.msra.mxu1 %v3326_v1  ;;  %v3345_v1 = vld [vmem:[%s3485_s30 + $0x38] ss:$8 sps:$4 sm:$0xff]  }
  0x90   : > { %3115 = vmatpush3.bf16.msra.mxu0 %v3327_v5  ;;  %3020 = vmatprep.subr.bf16.mxu1 %v3328_v8  ;;  %v1998_v4 = vsel %vm3574_vm2, %v1993_v0, %v1997_v59  ;;  %v2747_v5 = vld [vmem:[%s3539_s17 + $0x38] sm:$0xf] }
  0x91   : > { %3116 = vmatprep.subr.bf16.mxu0 %v3329_v9 }
  0x93   : > { %3021 = vmatpush3.bf16.msra.mxu1 %v3328_v8  ;;  %v2739_v8 = vld [vmem:[%s3539_s17 + $0x18] sm:$0xf] }
  0x94   : > { %3117 = vmatpush3.bf16.msra.mxu0 %v3329_v9  ;;  %3022 = vmatprep.subr.bf16.mxu1 %v3331_v10  ;;  %v2741_v9 = vld [vmem:[%s3539_s17 + $0x20] sm:$0xf]  ;;  %v1944_v16 = vshrl.u32 %v2739_v8, 16  ;;  %v1947_v17 = vshll.u32 %v2739_v8, 16 }
  0x95   : > { %3118 = vmatprep.subr.bf16.mxu0 %v3333_v11  ;;  %v1958_v18 = vshrl.u32 %v2741_v9, 16  ;;  %v1961_v19 = vshll.u32 %v2741_v9, 16 }
  0x96   : > { %v1946_v26 = vrot.slane %v1944_v16, 4  ;;  %v1949_v27 = vrot.slane %v1947_v17, 5 }
  0x97   : > { %3023 = vmatpush3.bf16.msra.mxu1 %v3331_v10  ;;  %v2769_v10 = vcombine.low %v1984_v2, %v1998_v4  ;;  %v1960_v28 = vrot.slane %v1958_v18, 4  ;;  %v1963_v29 = vrot.slane %v1961_v19, 5 }
  0x98   : > { %3119 = vmatpush3.bf16.msra.mxu0 %v3333_v11  ;;  %3024 = vmatprep.subr.bf16.mxu1 %v3334_v12  ;;  %v2000_v11 = vshrl.u32 %v2747_v5, 16  ;;  %v1950_v38 = vor.u32 %v1949_v27, %v1946_v26 }
  0x99   : > { %3120 = vmatprep.subr.bf16.mxu0 %v3335_v13  ;;  %v1964_v40 = vor.u32 %v1963_v29, %v1960_v28 }
  0x9a   : > { %v2002_v22 = vrot.slane %v2000_v11, 4  ;;  %v1951_v47 = vrot.slane %v1950_v38, 4 }
  0x9b   : > { %3025 = vmatpush3.bf16.msra.mxu1 %v3334_v12  ;;  %v2003_v12 = vshll.u32 %v2747_v5, 16 }
  0x9c   : > { %3121 = vmatpush3.bf16.msra.mxu0 %v3335_v13  ;;  %3154 = vmatprep.subr.bf16.mxu1 %v3340_v14  ;;  %v2014_v13 = vshrl.u32 %v2749_v6, 16 }
  0x9d   : > { %3130 = vmatprep.subr.bf16.mxu0 %v3340_v14  ;;  %v2005_v23 = vrot.slane %v2003_v12, 5 }
  0x9e   : > { %3027 = vmatmul.mubr.bf16.vlgmr.msra.gmra.mrb[0].mxu1 %v3338_v30  ;;  %v2016_v24 = vrot.slane %v2014_v13, 4  ;;  %v2750_v30 = vld [vmem:[%s3539_s17 + $0x44] sm:$0x1]  ;;  %v3843_v13 = vstv %s2779_s28 }
  0x9f   : > { %3123 = vmatmul.mubr.bf16.vlgmr.msra.gmra.mrb[0].mxu0 %v3339_v34  ;;  %3162 = vmatpush3.bf16.msra.mxu1 %v3340_v14  ;;  %v2006_v33 = vor.u32 %v2005_v23, %v2002_v22  ;;  %v2009_v34 = vshll.u32 %v2748_v21, 16  ;;  %v2023_v36 = vshll.u32 %v2750_v30, 16 }
  0xa0   : > { %3131 = vmatpush3.bf16.msra.mxu0 %v3340_v14  ;;  %3155 = vmatprep.subr.bf16.mxu1 %v3341_v39  ;;  %v2017_v14 = vshll.u32 %v2749_v6, 16 }
  0xa1   : > { %3132 = vmatprep.subr.bf16.mxu0 %v3341_v39  ;;  %3030 = vmatprep.mubr.bf16.mxu1 %v3342_v44  ;;  %v2007_v42 = vrot.slane %v2006_v33, 4  ;;  %v2011_v43 = vrot.slane %v2009_v34, 5  ;;  %v2025_v45 = vrot.slane %v2023_v36, 5 }
  0xa2   : > { %3126 = vmatprep.mubr.bf16.mxu0 %v3343_v49  ;;  %v2019_v25 = vrot.slane %v2017_v14, 5  ;;  %v1965_v49 = vrot.slane %v1964_v40, 4 }
  0xa3   : > { %3163 = vmatpush3.bf16.msra.mxu1 %v3341_v39  ;;  %v2012_v51 = vsel %vm3574_vm2, %v2007_v42, %v2011_v43 }
  0xa4   : > { %3133 = vmatpush3.bf16.msra.mxu0 %v3341_v39  ;;  %3156 = vmatprep.subr.bf16.mxu1 %v3346_v57  ;;  %v2020_v35 = vor.u32 %v2019_v25, %v2016_v24  ;;  %v1953_v39 = vshll.u32 %v2740_v31, 16  ;;  %v1970_v55 = vsel %vm3574_vm2, %v1965_v49, %v1969_v50 }
  0xa5   : > { %3134 = vmatprep.subr.bf16.mxu0 %v3346_v57 }
  0xa6   : > { %3031 = vmatmul.mubr.bf16.gmra.mrb[4].mxu1 %v3344_v61  ;;  %v2021_v44 = vrot.slane %v2020_v35, 4  ;;  %v1955_v48 = vrot.slane %v1953_v39, 5 }
  0xa7   : > { %3127 = vmatmul.mubr.bf16.gmra.mrb[4].mxu0 %v3345_v1  ;;  %3164 = vmatpush3.bf16.msra.mxu1 %v3346_v57 }
  0xa8   : > { %3135 = vmatpush3.bf16.msra.mxu0 %v3346_v57  ;;  %3157 = vmatprep.subr.bf16.mxu1 %v3347_v3  ;;  %v2026_v52 = vsel %vm3574_vm2, %v2021_v44, %v2025_v45  ;;  %v1956_v54 = vsel %vm3574_vm2, %v1951_v47, %v1955_v48 }
  0xa9   : > { %3136 = vmatprep.subr.bf16.mxu0 %v3347_v3  ;;  %3146 = vmatprep.mubr.bf16.mxu0 %v2767_v7  ;;  %v2770_v56 = vcombine.low %v2012_v51, %v2026_v52  ;;  %v2768_v57 = vcombine.low %v1956_v54, %v1970_v55 }
  0xaa   : > { %3150 = vmatprep.mubr.bf16.mxu1 %v2769_v10  ;;  %v2182_v10 = vstv %s2181_s22 }
  0xab   : > { %3165 = vmatpush3.bf16.msra.mxu1 %v3347_v3 }
  0xac   : > { %3137 = vmatpush3.bf16.msra.mxu0 %v3347_v3  ;;  %3158 = vmatprep.subr.bf16.mxu1 %v3348_v15 }
  0xad   : > { %3138 = vmatprep.subr.bf16.mxu0 %v3348_v15 }
  0xaf   : > { %3166 = vmatpush3.bf16.msra.mxu1 %v3348_v15 }
  0xb0   : > { %3139 = vmatpush3.bf16.msra.mxu0 %v3348_v15  ;;  %3159 = vmatprep.subr.bf16.mxu1 %v3349_v20 }
  0xb1   : > { %3140 = vmatprep.subr.bf16.mxu0 %v3349_v20 }
  0xb3   : > { %3167 = vmatpush3.bf16.msra.mxu1 %v3349_v20 }
  0xb4   : > { %3141 = vmatpush3.bf16.msra.mxu0 %v3349_v20  ;;  %3160 = vmatprep.subr.bf16.mxu1 %v3350_v37 }
  0xb5   : > { %3142 = vmatprep.subr.bf16.mxu0 %v3350_v37 }
  0xb7   : > { %3168 = vmatpush3.bf16.msra.mxu1 %v3350_v37 }
  0xb8   : > { %3143 = vmatpush3.bf16.msra.mxu0 %v3350_v37  ;;  %3161 = vmatprep.subr.bf16.mxu1 %v3351_v46 }
  0xb9   : > { %3144 = vmatprep.subr.bf16.mxu0 %v3351_v46 }
  0xbb   : > { %3169 = vmatpush3.bf16.msra.mxu1 %v3351_v46 }
  0xbc   : > { %3145 = vmatpush3.bf16.msra.mxu0 %v3351_v46 }
  0xbe   : > { %3151 = vmatmul.mubr.bf16.vlgmr.msra.gmra.mrb[8].mxu1 %v2770_v56 }
  0xbf   : > { %3147 = vmatmul.mubr.bf16.vlgmr.msra.gmra.mrb[0].mxu0 %v2768_v57 }
 0x171   : > { %v3028_v58 = vpop.f32.mrb[0].mxu1 }
 0x172   : > { %v1066_v59 = vpop.f32.mrb[1].mxu1 }
 0x173   : > { %v3029_v60 = vpop.f32.mrb[2].mxu1 }
 0x174   : > { %v1069_v61 = vpop.f32.mrb[3].mxu1 }
 0x179   : > { %v3032_v62 = vpop.f32.mrb[4].mxu1 }
 0x17a   : > { %v3128_v63 = vpop.f32.mrb[4].mxu0  ;;  %v1082_v0 = vpop.f32.mrb[5].mxu1 }
 0x17b   : > { %v3174_v1 = vadd.f32 %v3128_v63, %v3032_v62  ;;  %v1876_v2 = vpop.f32.mrb[5].mxu0  ;;  %v3033_v3 = vpop.f32.mrb[6].mxu1  ;;  %v2796_v63 = vld [vmem:[%s3821_s11 + $0x18] sm:$0xf] }
 0x17c   : > { %v3176_v4 = vadd.f32 %v1876_v2, %v1082_v0  ;;  %v3129_v5 = vpop.f32.mrb[6].mxu0  ;;  %v1085_v6 = vpop.f32.mrb[7].mxu1  ;;  %v2798_v0 = vld [vmem:[%s3821_s11 + $0x1c] sm:$0x1] }
 0x17d   : > { %v3178_v7 = vadd.f32 %v3129_v5, %v3033_v3  ;;  %v1879_v8 = vpop.f32.mrb[7].mxu0  ;;  %v2814_v2 = vld [vmem:[%s3821_s11 + $0x3c] sm:$0x1] }
 0x17e   : > { %v3180_v9 = vadd.f32 %v1879_v8, %v1085_v6 }
 0x191   : > { %v3152_v11 = vpop.f32.mrb[8].mxu1 }
 0x192   : > { %v3148_v12 = vpop.f32.mrb[0].mxu0  ;;  %v3175_v14 = vadd.f32 %v3174_v1, %v3152_v11  ;;  %v2158_v15 = vpop.f32.mrb[9].mxu1 }
 0x193   : > { %v3170_v16 = vadd.f32 %v3148_v12, %v3028_v58  ;;  %v2142_v17 = vpop.f32.mrb[1].mxu0  ;;  %v3177_v18 = vadd.f32 %v3176_v4, %v2158_v15  ;;  %v3153_v19 = vpop.f32.mrb[10].mxu1 }
 0x194   : > { %v2189_v20 = vadd.f32 %v3175_v14, %v2182_v10  ;;  %v3171_v21 = vadd.f32 %v2142_v17, %v1066_v59  ;;  %v3149_v22 = vpop.f32.mrb[2].mxu0  ;;  %v3179_v23 = vadd.f32 %v3178_v7, %v3153_v19  ;;  %v2161_v24 = vpop.f32.mrb[11].mxu1 }
 0x195   : > { %v2185_v25 = vadd.f32 %v3170_v16, %v2182_v10  ;;  %v2187_v26 = vadd.f32 %v3177_v18, %v2182_v10  ;;  %v3172_v27 = vadd.f32 %v3149_v22, %v3029_v60  ;;  %v2145_v28 = vpop.f32.mrb[3].mxu0  ;;  %v3181_v29 = vadd.f32 %v3180_v9, %v2161_v24  ;;  %v2812_v60 = vld [vmem:[%s3821_s11 + $0x38] sm:$0xf]  ;;  %v2806_v16 = vld [vmem:[%s3821_s11 + $0x2c] sm:$0x1] }
 0x196   : > { %v2197_v30 = vmax.f32 %v2189_v20, 0.0  ;;  %v2183_v31 = vadd.f32 %v3171_v21, %v2182_v10  ;;  %v2190_v32 = vadd.f32 %v3179_v23, %v2182_v10  ;;  %v3173_v33 = vadd.f32 %v2145_v28, %v1069_v61  ;;  %v2788_v20 = vld [vmem:[%s3821_s11 + $0x8] sm:$0xf]  ;;  %v2790_v21 = vld [vmem:[%s3821_s11 + $0xc] sm:$0x1] }
 0x197   : > { %v2193_v34 = vmax.f32 %v2185_v25, 0.0  ;;  %v2195_v35 = vmax.f32 %v2187_v26, 0.0  ;;  %v2186_v36 = vadd.f32 %v3172_v27, %v2182_v10  ;;  %v2188_v37 = vadd.f32 %v3181_v29, %v2182_v10 }
 0x198   : > { %v2207_v38 = vadd.f32 %v3843_v13, %v2197_v30  ;;  %v2191_v39 = vmax.f32 %v2183_v31, 0.0  ;;  %v2198_v40 = vmax.f32 %v2190_v32, 0.0  ;;  %v3846_v41 = vadd.f32 %v3173_v33, %v2182_v10  ;;  %v2804_v10 = vld [vmem:[%s3821_s11 + $0x28] sm:$0xf] }
 0x199   : > { %v2203_v42 = vadd.f32 %v3843_v13, %v2193_v34  ;;  %v2205_v43 = vadd.f32 %v3843_v13, %v2195_v35  ;;  %v2194_v44 = vmax.f32 %v2186_v36, 0.0  ;;  %v2196_v45 = vmax.f32 %v2188_v37, 0.0  ;;  %v2800_v36 = vld [vmem:[%s3821_s11 + $0x20] sm:$0xf]  ;;  %v2802_v37 = vld [vmem:[%s3821_s11 + $0x24] sm:$0x1] }
 0x19a   : > { %v2828_v46 = vpack.c.bf16 %v2207_v38, %v2207_v38  ;;  %v2201_v47 = vadd.f32 %v3843_v13, %v2191_v39  ;;  %v2208_v48 = vadd.f32 %v3843_v13, %v2198_v40  ;;  %v2192_v52 = vmax.f32 %v3846_v41, 0.0 }
 0x19b   : > { %v2824_v49 = vpack.c.bf16 %v2203_v42, %v2203_v42  ;;  %v2826_v50 = vpack.c.bf16 %v2205_v43, %v2205_v43  ;;  %v2204_v51 = vadd.f32 %v3843_v13, %v2194_v44  ;;  %v2206_v57 = vadd.f32 %v3843_v13, %v2196_v45  ;;  %v2816_v44 = vld [vmem:[%s3821_s11 + $0x40] sm:$0xf]  ;;  %v2818_v45 = vld [vmem:[%s3821_s11 + $0x44] sm:$0x1] }
 0x19c   : > { %v2310_v54 = vshrl.u32 %v2828_v46, 16  ;;  %v2822_v55 = vpack.c.bf16 %v2201_v47, %v2201_v47  ;;  %v3854_v56 = vpack.c.bf16 %v2208_v48, %v2208_v48  ;;  %v2313_v59 = vshll.u32 %v2828_v46, 16 }
 0x19d   : > { %v2278_v53 = vshrl.u32 %v2824_v49, 16  ;;  %v2281_v58 = vshll.u32 %v2824_v49, 16  ;;  %v2294_v61 = vshrl.u32 %v2826_v50, 16  ;;  %v2297_v4 = vshll.u32 %v2826_v50, 16 }
 0x19e   : > { %v2312_v1 = vrot.slane %v2310_v54, 7  ;;  %v2262_v3 = vshrl.u32 %v2822_v55, 16  ;;  %v2825_v5 = vpack.c.bf16 %v2204_v51, %v2204_v51  ;;  %v2265_v8 = vshll.u32 %v2822_v55, 16 }
 0x19f   : > { %v2280_v6 = vrot.slane %v2278_v53, 7  ;;  %v2296_v9 = vrot.slane %v2294_v61, 7  ;;  %v2318_v11 = vshrl.u32 %v3854_v56, 16  ;;  %v2321_v39 = vshll.u32 %v3854_v56, 16  ;;  %v2794_v61 = vld [vmem:[%s3821_s11 + $0x14] sm:$0x1] }
 0x1a0   : > { %v2315_v12 = vor.u32 %v2313_v59, %v2312_v1  ;;  %v2316_v14 = vrot.slane %v2312_v1, 4  ;;  %v2264_v15 = vrot.slane %v2262_v3, 7  ;;  %v2286_v17 = vshrl.u32 %v2825_v5, 16  ;;  %v2810_v59 = vld [vmem:[%s3821_s11 + $0x34] sm:$0x1] }
 0x1a1   : > { %v2283_v18 = vor.u32 %v2281_v58, %v2280_v6  ;;  %v2284_v19 = vrot.slane %v2280_v6, 4  ;;  %v2299_v22 = vor.u32 %v2297_v4, %v2296_v9  ;;  %v2300_v23 = vrot.slane %v2296_v9, 4  ;;  %v2808_v58 = vld [vmem:[%s3821_s11 + $0x30] sm:$0xf] }
 0x1a2   : > { %v2385_v24 = vsel %vm3860_vm7, %v2315_v12, %v2812_v60  ;;  %v2388_v25 = vsel %vm3869_vm8, %v2316_v14, %v2814_v2  ;;  %v2267_v26 = vor.u32 %v2265_v8, %v2264_v15  ;;  %v2268_v27 = vrot.slane %v2264_v15, 4  ;;  %v2792_v60 = vld [vmem:[%s3821_s11 + $0x10] sm:$0xf] }
 0x1a3   : > { %v2361_v28 = vsel %vm3860_vm7, %v2283_v18, %v2796_v63  ;;  %v2364_v29 = vsel %vm3869_vm8, %v2284_v19, %v2798_v0  ;;  %2813 = vst [vmem:[%s3821_s11 + $0x38] sm:$0xf] %v2385_v24  ;;  %2815 = vst [vmem:[%s3821_s11 + $0x3c] sm:$0x1] %v2388_v25  ;;  %v2373_v30 = vsel %vm3860_vm7, %v2299_v22, %v2804_v10  ;;  %v2288_v34 = vrot.slane %v2286_v17, 7 }
 0x1a4   : > { %v2376_v31 = vsel %vm3869_vm8, %v2300_v23, %v2806_v16  ;;  %2797 = vst [vmem:[%s3821_s11 + $0x18] sm:$0xf] %v2361_v28  ;;  %2799 = vst [vmem:[%s3821_s11 + $0x1c] sm:$0x1] %v2364_v29  ;;  %v2346_v32 = vsel %vm3860_vm7, %v2267_v26, %v2788_v20  ;;  %v2352_v33 = vsel %vm3869_vm8, %v2268_v27, %v2790_v21  ;;  %v2289_v35 = vshll.u32 %v2825_v5, 16 }
 0x1a5   : > { %2805 = vst [vmem:[%s3821_s11 + $0x28] sm:$0xf] %v2373_v30  ;;  %2807 = vst [vmem:[%s3821_s11 + $0x2c] sm:$0x1] %v2376_v31  ;;  %v2320_v38 = vrot.slane %v2318_v11, 7  ;;  %v2202_v40 = vadd.f32 %v3843_v13, %v2192_v52  ;;  %v2827_v41 = vpack.c.bf16 %v2206_v57, %v2206_v57  ;;  %v2292_v43 = vrot.slane %v2288_v34, 4 }
 0x1a6   : > { %2789 = vst [vmem:[%s3821_s11 + $0x8] sm:$0xf] %v2346_v32  ;;  %2791 = vst [vmem:[%s3821_s11 + $0xc] sm:$0x1] %v2352_v33  ;;  %v2291_v42 = vor.u32 %v2289_v35, %v2288_v34 }
 0x1a7   : > { %v2323_v46 = vor.u32 %v2321_v39, %v2320_v38  ;;  %v2324_v47 = vrot.slane %v2320_v38, 4  ;;  %v2823_v48 = vpack.c.bf16 %v2202_v40, %v2202_v40  ;;  %v2302_v49 = vshrl.u32 %v2827_v41, 16 }
 0x1a8   : > { %v2367_v50 = vsel %vm3860_vm7, %v2291_v42, %v2800_v36  ;;  %v2370_v13 = vsel %vm3869_vm8, %v2292_v43, %v2802_v37  ;;  %v2305_v56 = vshll.u32 %v2827_v41, 16 }
 0x1a9   : > { %2801 = vst [vmem:[%s3821_s11 + $0x20] sm:$0xf] %v2367_v50  ;;  %2803 = vst [vmem:[%s3821_s11 + $0x24] sm:$0x1] %v2370_v13  ;;  %v2391_v51 = vsel %vm3860_vm7, %v2323_v46, %v2816_v44  ;;  %v2394_v52 = vsel %vm3869_vm8, %v2324_v47, %v2818_v45  ;;  %v2270_v54 = vshrl.u32 %v2823_v48, 16  ;;  %v2304_v55 = vrot.slane %v2302_v49, 7 }
 0x1aa   : > { %2817 = vst [vmem:[%s3821_s11 + $0x40] sm:$0xf] %v2391_v51  ;;  %2819 = vst [vmem:[%s3821_s11 + $0x44] sm:$0x1] %v2394_v52  ;;  %v2273_v53 = vshll.u32 %v2823_v48, 16 }
 0x1ab   : > { %v2272_v57 = vrot.slane %v2270_v54, 7  ;;  %v2307_v63 = vor.u32 %v2305_v56, %v2304_v55  ;;  %v2308_v0 = vrot.slane %v2304_v55, 4 }
 0x1ad   : > { %v2275_v1 = vor.u32 %v2273_v53, %v2272_v57  ;;  %v2276_v2 = vrot.slane %v2272_v57, 4  ;;  %v2379_v3 = vsel %vm3860_vm7, %v2307_v63, %v2808_v58  ;;  %v2382_v4 = vsel %vm3869_vm8, %v2308_v0, %v2810_v59 }
 0x1ae   : > { %2809 = vst [vmem:[%s3821_s11 + $0x30] sm:$0xf] %v2379_v3  ;;  %2811 = vst [vmem:[%s3821_s11 + $0x34] sm:$0x1] %v2382_v4 }
 0x1af   : > { %v2355_v5 = vsel %vm3860_vm7, %v2275_v1, %v2792_v60  ;;  %v2358_v6 = vsel %vm3869_vm8, %v2276_v2, %v2794_v61 }
 0x1b0   : > { %2793 = vst [vmem:[%s3821_s11 + $0x10] sm:$0xf] %v2355_v5  ;;  %2795 = vst [vmem:[%s3821_s11 + $0x14] sm:$0x1] %v2358_v6 }
 0x1b1 PF: > { %s17_s21 = sadd.s32 1, %s3377_s21  }
 0x1b2   : > { %p14_p1 = scmp.ge.s32.totalorder %s17_s21, 4  }
 0x1b4   :  { %16 = sbr.rel (!%p14_p1) target bundleno = 1 (0x1), region = 99 }
 0x1bb   :  { %2417 = vsyncpa [#allocation3], 1 }
 0x1bc   :  { %2419 = vsyncpa [#allocation3 + $0x1], 1 }

// kernel: fixup_network_block.8
= control target key start
LH: loop header
LB: loop body
LE: loop exit
PB: predicated region body
PF: predicated region fallthrough
CT: control target
= control target key end

     0   :  { %10 = vsyncpa [#allocation3], 0  ;;  %s3436_s18 = smov 0   ;;  %s4091_s0 = inlined_call_operand.vmem [shape: bf16[2,10,10,128], index: 0, kind: input, shape index: {}]   ;;  %s4092_s1 = inlined_call_operand.vmem [shape: bf16[9,128,128], index: 1, kind: input, shape index: {}]   ;;  %s4093_s2 = inlined_call_operand.vmem [shape: f32[2,8,8,128], index: 2, kind: input, shape index: {}]   ;;  %s4094_s3 = inlined_call_operand.vmem [shape: bf16[128,128], index: 3, kind: input, shape index: {}]   ;;  %s4095_s4 = inlined_call_operand.vmem [shape: f32[2], index: 4, kind: input, shape index: {}]   ;;  %s4096_s5 = inlined_call_operand.vmem [shape: f32[2,8,8,128], index: 5, kind: output, shape index: {}]  }
   0x1 LB: > { %s3442_s19 = sadd.s32 4294967295, %s3403_s18   ;;  %p2495_p0 = scmp.ge.s32.totalorder %s3403_s18, 1  ;;  %s3403_s18 = sphi %s3436_s18, %s16_s18  }
   0x2   : > { %p162_p1 = scmp.lt.s32.totalorder %s3403_s18, 3  ;;  %s181_s22 = sshll.u32 %s4095_s4, 4  ;;  %s182_s22 = int_to_ptr.vmem [resolvable:$true] %s181_s22 }
   0x3   : > { %p3275_p3 = scmp.eq.s32.totalorder %s3442_s19, 0  ;;  %s3378_s24 = scalar_lea.vmem %s182_s22, 16 }
   0x4   : > { %p3449_p2 = pnand %p2495_p0, %p162_p1  ;;  %p3379_p6 = scmp.ne.s32.totalorder %s182_s22, %s3378_s24 }
   0x5   : > { %p3386_p10 = scmp.lt.s32.totalorder %s182_s22, %s182_s22  ;;  %p3387_p11 = scmp.lt.s32.totalorder %s3378_s24, %s3378_s24 }
   0x6   : > { %p3271_p4 = pneg %p3449_p2 }
   0x7   : > { %p3388_p12 = por %p3387_p11, %p3386_p10 }
   0x8   : > { %p3272_p5 = pnand %p3275_p3, %p3271_p4 }
   0xa   : > { %p3380_p7 = pneg %p3272_p5 }
   0xc   : > { %p3381_p8 = pnand %p3380_p7, %p3379_p6 }
   0xe   : > { %p3382_p9 = pneg %p3381_p8 }
  0x10   : > { %p3389_p13 = pnand %p3388_p12, %p3382_p9 }
  0x12   : > { %3392 = shalt.err (!%p3389_p13)
}
  0x13   : > { %s3405_s25 = smov [#allocation2]   ;;  %210 = sbr.rel (%p3449_p2) target bundleno = 426 (0x1aa), region = 40 }
  0x14   : > { %3274 = dma.vmem_to_smem (!%p3272_p5), %s182_s22, 16, %s3405_s25, [#allocation3]  }
  0x1a   : > { %3398 = dma.done.wait (%p3275_p3), [#allocation3], 16  }
  0x1b   : > { %3400 = vsyncadd (%p3275_p3), [#allocation3], 4294967280 }
  0x1c   : > { %216 = sfence }
  0x1d   : > { %v3286_v0 = vld [vmem:[%s4092_s1 + $0x40] sm:$0xff]   ;;  %p244_p0 = scmp.lt.s32.totalorder %s3442_s19, 1  ;;  %v3288_v2 = vld [vmem:[%s4092_s1 + $0x48] sm:$0xff]   ;;  %v3290_v4 = vld [vmem:[%s4092_s1 + $0x50] sm:$0xff]   ;;  %vm292_vm0 = vsmask.f32 3328 }
  0x1e   : > { %v3287_v1 = vld [vmem:[%s4092_s1 + $0x100] sm:$0xff]   ;;  %2962 = vmatprep.subr.bf16.mxu1 %v3286_v0  ;;  %v3289_v3 = vld [vmem:[%s4092_s1 + $0x108] sm:$0xff]   ;;  %v3291_v5 = vld [vmem:[%s4092_s1 + $0x110] sm:$0xff]   ;;  %vm293_vm1 = vsmask.f32 7440  ;;  %vm714_vm3 = vcmask 1042432  }
  0x1f   : > { %3058 = vmatprep.subr.bf16.mxu0 %v3287_v1  ;;  %2963 = vmatpush3.bf16.msra.mxu1 %v3286_v0  ;;  %s4103_s19 = smov (!%p244_p0, %s3442_s19), 1  ;;  %v3292_v6 = vld [vmem:[%s4092_s1 + $0x58] sm:$0xff]   ;;  %v3294_v8 = vld [vmem:[%s4092_s1 + $0x60] sm:$0xff]   ;;  %v3296_v10 = vld [vmem:[%s4092_s1 + $0x68] sm:$0xff]   ;;  %vm715_vm4 = vcmask 1046532   ;;  %s3969_s7 = sld [smem:[#allocation2 + $0x1]] }
  0x20   : > { %3059 = vmatpush3.bf16.msra.mxu0 %v3287_v1  ;;  %2964 = vmatprep.subr.bf16.mxu1 %v3288_v2  ;;  %v3293_v7 = vld [vmem:[%s4092_s1 + $0x118] sm:$0xff]   ;;  %s3266_s17 = smul.u32 80, %s4103_s19  ;;  %v3295_v9 = vld [vmem:[%s4092_s1 + $0x120] sm:$0xff]   ;;  %v3297_v14 = vld [vmem:[%s4092_s1 + $0x128] sm:$0xff]   ;;  %s2840_s29 = sshll.u32 %s4103_s19, 6 }
  0x21   : > { %3060 = vmatprep.subr.bf16.mxu0 %v3289_v3  ;;  %v3298_v22 = vld [vmem:[%s4092_s1 + $0x70] sm:$0xff]   ;;  %v3300_v37 = vld [vmem:[%s4092_s1 + $0x78] sm:$0xff]   ;;  %vm3547_vm2 = vmor %vm292_vm0, %vm293_vm1  ;;  %s3978_s10 = scalar_lea.vmem %s4093_s2, %s2840_s29  ;;  %s4078_s20 = scalar_lea.vmem %s4096_s5, %s2840_s29 }
  0x22   : > { %s3502_s26 = scalar_lea.vmem %s4091_s0, %s3266_s17  ;;  %v3299_v23 = vld [vmem:[%s4092_s1 + $0x130] sm:$0xff]   ;;  %v3301_v47 = vld [vmem:[%s4092_s1 + $0x138] sm:$0xff]   ;;  %v3302_v63 = vld [vmem:[%s4092_s1] sm:$0xff]  }
  0x23   : > { %2965 = vmatpush3.bf16.msra.mxu1 %v3288_v2  ;;  %v3508_v11 = vld [vmem:[%s3502_s26] sm:$0xf]  ;;  %v3511_v12 = vld [vmem:[%s3502_s26 + $0x8] sm:$0xf]  ;;  %v3514_v13 = vld [vmem:[%s3502_s26 + $0x4] sm:$0x1] }
  0x24   : > { %3061 = vmatpush3.bf16.msra.mxu0 %v3289_v3  ;;  %2966 = vmatprep.subr.bf16.mxu1 %v3290_v4  ;;  %v3520_v15 = vld [vmem:[%s3502_s26 + $0xc] sm:$0x1]  ;;  %v296_v16 = vshrl.u32 %v3508_v11, 16  ;;  %v299_v17 = vshll.u32 %v3508_v11, 16  ;;  %v305_v18 = vshll.u32 %v3514_v13, 16  ;;  %v310_v19 = vshrl.u32 %v3511_v12, 16  ;;  %vm3721_vm5 = vmor %vm714_vm3, %vm715_vm4 }
  0x25   : > { %3062 = vmatprep.subr.bf16.mxu0 %v3291_v5  ;;  %v313_v20 = vshll.u32 %v3511_v12, 16  ;;  %v319_v21 = vshll.u32 %v3520_v15, 16  ;;  %v2617_v30 = vld [vmem:[%s3502_s26 + $0x8] sm:$0xf]  ;;  %v3536_v31 = vld [vmem:[%s3502_s26 + $0xc] sm:$0x1] }
  0x26   : > { %v298_v24 = vrot.slane %v296_v16, 4  ;;  %v301_v25 = vrot.slane %v299_v17, 5  ;;  %v307_v26 = vrot.slane %v305_v18, 5  ;;  %v312_v27 = vrot.slane %v310_v19, 4  ;;  %v2619_v33 = vld [vmem:[%s3502_s26 + $0x10] sm:$0xf] }
  0x27   : > { %2967 = vmatpush3.bf16.msra.mxu1 %v3290_v4  ;;  %v315_v28 = vrot.slane %v313_v20, 5  ;;  %v321_v29 = vrot.slane %v319_v21, 5  ;;  %v3540_v34 = vld [vmem:[%s3502_s26 + $0x14] sm:$0x1]  ;;  %v1091_v35 = vshrl.u32 %v2617_v30, 16  ;;  %v1094_v36 = vshll.u32 %v2617_v30, 16 }
  0x28   : > { %3063 = vmatpush3.bf16.msra.mxu0 %v3291_v5  ;;  %2968 = vmatprep.subr.bf16.mxu1 %v3292_v6  ;;  %v302_v32 = vor.u32 %v301_v25, %v298_v24  ;;  %v1100_v40 = vshll.u32 %v3536_v31, 16  ;;  %v1105_v41 = vshrl.u32 %v2619_v33, 16  ;;  %v1108_v42 = vshll.u32 %v2619_v33, 16  ;;  %v3557_v51 = vld [vmem:[%s3502_s26 + $0x10] sm:$0xf]  ;;  %v3579_v1 = vld [vmem:[%s4092_s1 + $0x140] sm:$0xff]  }
  0x29   : > { %3064 = vmatprep.subr.bf16.mxu0 %v3293_v7  ;;  %v316_v39 = vor.u32 %v315_v28, %v312_v27  ;;  %v1093_v44 = vrot.slane %v1091_v35, 4  ;;  %v1096_v45 = vrot.slane %v1094_v36, 5  ;;  %v1114_v46 = vshll.u32 %v3540_v34, 16  ;;  %v3562_v55 = vld [vmem:[%s3502_s26 + $0x18] sm:$0xf] }
  0x2a   : > { %v303_v43 = vrot.slane %v302_v32, 4  ;;  %v1107_v49 = vrot.slane %v1105_v41, 4  ;;  %v1110_v50 = vrot.slane %v1108_v42, 5  ;;  %v1102_v54 = vrot.slane %v1100_v40, 5  ;;  %v3565_v56 = vld [vmem:[%s3502_s26 + $0x14] sm:$0x1] }
  0x2b   : > { %2969 = vmatpush3.bf16.msra.mxu1 %v3292_v6  ;;  %v317_v48 = vrot.slane %v316_v39, 4  ;;  %v1097_v53 = vor.u32 %v1096_v45, %v1093_v44  ;;  %v1116_v59 = vrot.slane %v1114_v46, 5  ;;  %v3570_v60 = vld [vmem:[%s3502_s26 + $0x1c] sm:$0x1]  ;;  %v324_v61 = vshrl.u32 %v3557_v51, 16 }
  0x2c   : > { %3065 = vmatpush3.bf16.msra.mxu0 %v3293_v7  ;;  %2970 = vmatprep.subr.bf16.mxu1 %v3294_v8  ;;  %v308_v52 = vsel %vm3547_vm2, %v303_v43, %v307_v26  ;;  %v1111_v58 = vor.u32 %v1110_v50, %v1107_v49  ;;  %v327_v2 = vshll.u32 %v3557_v51, 16  ;;  %v333_v3 = vshll.u32 %v3565_v56, 16  ;;  %v3590_v16 = vld [vmem:[%s3502_s26 + $0x1c] sm:$0x1]  ;;  %v2623_v17 = vld [vmem:[%s3502_s26 + $0x20] sm:$0xf] }
  0x2d   : > { %3066 = vmatprep.subr.bf16.mxu0 %v3295_v9  ;;  %v322_v57 = vsel %vm3547_vm2, %v317_v48, %v321_v29  ;;  %v1098_v0 = vrot.slane %v1097_v53, 4  ;;  %v326_v5 = vrot.slane %v324_v61, 4  ;;  %v338_v6 = vshrl.u32 %v3562_v55, 16  ;;  %v3596_v21 = vld [vmem:[%s3502_s26 + $0x24] sm:$0x1]  ;;  %v3304_v43 = vld [vmem:[%s4092_s1 + $0x8] sm:$0xff]  }
  0x2e   : > { %v2521_v62 = vcombine.low %v308_v52, %v322_v57  ;;  %v1112_v4 = vrot.slane %v1111_v58, 4  ;;  %v341_v7 = vshll.u32 %v3562_v55, 16  ;;  %v335_v24 = vrot.slane %v333_v3, 5 }
  0x2f   : > { %2971 = vmatpush3.bf16.msra.mxu1 %v3294_v8  ;;  %v2621_v8 = vld [vmem:[%s3502_s26 + $0x18] sm:$0xf]  ;;  %v340_v19 = vrot.slane %v338_v6, 4  ;;  %v1128_v29 = vshll.u32 %v3590_v16, 16  ;;  %v1133_v32 = vshrl.u32 %v2623_v17, 16  ;;  %v1136_v33 = vshll.u32 %v2623_v17, 16 }
  0x30   : > { %3067 = vmatpush3.bf16.msra.mxu0 %v3295_v9  ;;  %2972 = vmatprep.subr.bf16.mxu1 %v3296_v10  ;;  %v1103_v9 = vsel %vm3547_vm2, %v1098_v0, %v1102_v54  ;;  %v1117_v18 = vsel %vm3547_vm2, %v1112_v4, %v1116_v59  ;;  %v343_v20 = vrot.slane %v341_v7, 5  ;;  %v1119_v27 = vshrl.u32 %v2621_v8, 16  ;;  %v3305_v54 = vld [vmem:[%s4092_s1 + $0x148] sm:$0xff]   ;;  %v3306_v59 = vld [vmem:[%s4092_s1 + $0x10] sm:$0xff]   ;;  %v3626_v0 = vld [vmem:[%s3502_s26 + $0x24] sm:$0x1] }
  0x31   : > { %3068 = vmatprep.subr.bf16.mxu0 %v3297_v14  ;;  %2978 = vmatprep.mubr.bf16.mxu1 %v2521_v62  ;;  %v1122_v28 = vshll.u32 %v2621_v8, 16  ;;  %v1142_v35 = vshll.u32 %v3596_v21, 16  ;;  %v1135_v41 = vrot.slane %v1133_v32, 4  ;;  %v1138_v42 = vrot.slane %v1136_v33, 5  ;;  %v3620_v62 = vld [vmem:[%s3502_s26 + $0x20] sm:$0xf] }
  0x32   : > { %v344_v26 = vor.u32 %v343_v20, %v340_v19  ;;  %v1130_v46 = vrot.slane %v1128_v29, 5  ;;  %v1382_v57 = vrot.slane %v3536_v31, 5  ;;  %v352_v3 = vshrl.u32 %v3620_v62, 16  ;;  %v3309_v29 = vld [vmem:[%s4092_s1 + $0x158] sm:$0xff]  }
  0x33   : > { %2973 = vmatpush3.bf16.msra.mxu1 %v3296_v10  ;;  %v329_v10 = vrot.slane %v327_v2, 5  ;;  %v1124_v39 = vrot.slane %v1122_v28, 5  ;;  %v1139_v49 = vor.u32 %v1138_v42, %v1135_v41  ;;  %v3629_v2 = vld [vmem:[%s3502_s26 + $0x2c] sm:$0x1]  ;;  %v355_v4 = vshll.u32 %v3620_v62, 16 }
  0x34   : > { %3069 = vmatpush3.bf16.msra.mxu0 %v3297_v14  ;;  %2974 = vmatprep.subr.bf16.mxu1 %v3298_v22  ;;  %v347_v14 = vshll.u32 %v3570_v60, 16  ;;  %v345_v36 = vrot.slane %v344_v26, 4  ;;  %v375_v8 = vshll.u32 %v3629_v2, 16  ;;  %v3650_v26 = vld [vmem:[%s3502_s26 + $0x34] sm:$0x1] }
  0x35   : > { %3070 = vmatprep.subr.bf16.mxu0 %v3299_v23  ;;  %v1140_v52 = vrot.slane %v1139_v49, 4  ;;  %v357_v17 = vrot.slane %v355_v4, 5  ;;  %v1170_v41 = vshll.u32 %v3650_v26, 16 }
  0x36   : > { %v349_v25 = vrot.slane %v347_v14, 5  ;;  %v354_v14 = vrot.slane %v352_v3, 4 }
  0x37   : > { %2975 = vmatpush3.bf16.msra.mxu1 %v3298_v22  ;;  %v2649_v22 = vcombine.low %v1103_v9, %v1117_v18  ;;  %v3307_v9 = vld [vmem:[%s4092_s1 + $0x150] sm:$0xff]   ;;  %v1172_v49 = vrot.slane %v1170_v41, 5 }
  0x38   : > { %3071 = vmatpush3.bf16.msra.mxu0 %v3299_v23  ;;  %2976 = vmatprep.subr.bf16.mxu1 %v3300_v37  ;;  %v330_v23 = vor.u32 %v329_v10, %v326_v5  ;;  %v350_v44 = vsel %vm3547_vm2, %v345_v36, %v349_v25  ;;  %v361_v5 = vshll.u32 %v3626_v0, 16  ;;  %v3308_v10 = vld [vmem:[%s4092_s1 + $0x18] sm:$0xff]   ;;  %v2627_v25 = vld [vmem:[%s3502_s26 + $0x30] sm:$0xf] }
  0x39   : > { %3072 = vmatprep.subr.bf16.mxu0 %v3301_v47  ;;  %3074 = vmatprep.mubr.bf16.mxu0 %v2649_v22  ;;  %v377_v22 = vrot.slane %v375_v8, 5  ;;  %v1164_v36 = vshll.u32 %v2627_v25, 16 }
  0x3a   : > { %v331_v30 = vrot.slane %v330_v23, 4  ;;  %v363_v18 = vrot.slane %v361_v5, 5  ;;  %v2625_v23 = vld [vmem:[%s3502_s26 + $0x28] sm:$0xf]  ;;  %v2629_v5 = vld [vmem:[%s3502_s26 + $0x38] sm:$0xf] }
  0x3b   : > { %2977 = vmatpush3.bf16.msra.mxu1 %v3300_v37  ;;  %v1121_v37 = vrot.slane %v1119_v27, 4  ;;  %v1147_v27 = vshrl.u32 %v2625_v23, 16  ;;  %v1150_v28 = vshll.u32 %v2625_v23, 16 }
  0x3c   : > { %3073 = vmatpush3.bf16.msra.mxu0 %v3301_v47  ;;  %2986 = vmatprep.subr.bf16.mxu1 %v3302_v63  ;;  %v336_v40 = vsel %vm3547_vm2, %v331_v30, %v335_v24  ;;  %v1144_v47 = vrot.slane %v1142_v35, 5  ;;  %v3646_v24 = vld [vmem:[%s3502_s26 + $0x2c] sm:$0x1]  ;;  %v3310_v30 = vld [vmem:[%s4092_s1 + $0x20] sm:$0xff]   ;;  %v1161_v35 = vshrl.u32 %v2627_v25, 16 }
  0x3d   : > { %3082 = vmatprep.subr.bf16.mxu0 %v3579_v1  ;;  %v1125_v45 = vor.u32 %v1124_v39, %v1121_v37  ;;  %v2522_v48 = vcombine.low %v336_v40, %v350_v44  ;;  %v1156_v33 = vshll.u32 %v3646_v24, 16  ;;  %v1149_v39 = vrot.slane %v1147_v27, 4  ;;  %v3696_v27 = vld [vmem:[%s3502_s26 + $0x44] sm:$0x1] }
  0x3e   : > { %v1145_v58 = vsel %vm3547_vm2, %v1140_v52, %v1144_v47  ;;  %v1152_v40 = vrot.slane %v1150_v28, 5  ;;  %v1163_v44 = vrot.slane %v1161_v35, 4  ;;  %v3669_v52 = vld [vmem:[%s3502_s26 + $0x34] sm:$0x1]  ;;  %v1175_v28 = vshrl.u32 %v2629_v5, 16 }
  0x3f   : > { %v1126_v50 = vrot.slane %v1125_v45, 4  ;;  %2979 = vmatmul.mubr.bf16.vlgmr.msra.gmra.mrb[0].mxu1 %v2522_v48  ;;  %v1166_v45 = vrot.slane %v1164_v36, 5  ;;  %v389_v4 = vshll.u32 %v3669_v52, 16  ;;  %v1178_v36 = vshll.u32 %v2629_v5, 16 }
  0x40   : > { %2987 = vmatpush3.bf16.msra.mxu1 %v3302_v63  ;;  %v3623_v63 = vld [vmem:[%s3502_s26 + $0x28] sm:$0xf]  ;;  %v1153_v48 = vor.u32 %v1152_v40, %v1149_v39  ;;  %v1177_v41 = vrot.slane %v1175_v28, 4  ;;  %v3317_v28 = vld [vmem:[%s4092_s1 + $0x178] sm:$0xff]  }
  0x41   : > { %v1131_v53 = vsel %vm3547_vm2, %v1126_v50, %v1130_v46  ;;  %2988 = vmatprep.subr.bf16.mxu1 %v3304_v43  ;;  %v366_v6 = vshrl.u32 %v3623_v63, 16  ;;  %v369_v7 = vshll.u32 %v3623_v63, 16  ;;  %v3661_v46 = vld [vmem:[%s3502_s26 + $0x30] sm:$0xf]  ;;  %v3666_v50 = vld [vmem:[%s3502_s26 + $0x38] sm:$0xf] }
  0x42   : > { %v2650_v61 = vcombine.low %v1131_v53, %v1145_v58  ;;  %v380_v53 = vshrl.u32 %v3661_v46, 16  ;;  %v383_v3 = vshll.u32 %v3661_v46, 16  ;;  %v1154_v8 = vrot.slane %v1153_v48, 4 }
  0x43   : > { %v368_v19 = vrot.slane %v366_v6, 4  ;;  %v371_v20 = vrot.slane %v369_v7, 5  ;;  %v3312_v6 = vld [vmem:[%s4092_s1 + $0x28] sm:$0xff]   ;;  %v1390_v48 = vrot.slane %v3590_v16, 5 }
  0x44   : > { %3075 = vmatmul.mubr.bf16.vlgmr.msra.gmra.mrb[0].mxu0 %v2650_v61  ;;  %2989 = vmatpush3.bf16.msra.mxu1 %v3304_v43  ;;  %v1158_v43 = vrot.slane %v1156_v33, 5  ;;  %v3678_v61 = vld [vmem:[%s3502_s26 + $0x3c] sm:$0x1] }
  0x45   : > { %3083 = vmatpush3.bf16.msra.mxu0 %v3579_v1  ;;  %2990 = vmatprep.subr.bf16.mxu1 %v3306_v59  ;;  %v358_v1 = vor.u32 %v357_v17, %v354_v14  ;;  %v372_v32 = vor.u32 %v371_v20, %v368_v19  ;;  %v394_v14 = vshrl.u32 %v3666_v50, 16  ;;  %v3688_v17 = vld [vmem:[%s3502_s26 + $0x3c] sm:$0x1]  ;;  %v385_v19 = vrot.slane %v383_v3, 5 }
  0x46   : > { %3084 = vmatprep.subr.bf16.mxu0 %v3305_v54  ;;  %v391_v20 = vrot.slane %v389_v4, 5  ;;  %v1159_v23 = vsel %vm3547_vm2, %v1154_v8, %v1158_v43  ;;  %v403_v25 = vshll.u32 %v3678_v61, 16 }
  0x47   : > { %v359_v37 = vrot.slane %v358_v1, 4  ;;  %v373_v42 = vrot.slane %v372_v32, 4  ;;  %v396_v1 = vrot.slane %v394_v14, 4 }
  0x48   : > { %2991 = vmatpush3.bf16.msra.mxu1 %v3306_v59  ;;  %v1167_v59 = vor.u32 %v1166_v45, %v1163_v44  ;;  %v405_v40 = vrot.slane %v403_v25, 5  ;;  %v1180_v45 = vrot.slane %v1178_v36, 5  ;;  %v2663_v25 = vld [vmem:[%s3502_s26 + $0x18] sm:$0xe] }
  0x49   : > { %3085 = vmatpush3.bf16.msra.mxu0 %v3305_v54  ;;  %2992 = vmatprep.subr.bf16.mxu1 %v3308_v10  ;;  %v364_v47 = vsel %vm3547_vm2, %v359_v37, %v363_v18  ;;  %v3311_v54 = vld [vmem:[%s4092_s1 + $0x160] sm:$0xff]   ;;  %v378_v58 = vsel %vm3547_vm2, %v373_v42, %v377_v22  ;;  %v397_v22 = vshll.u32 %v3666_v50, 16  ;;  %v3314_v37 = vld [vmem:[%s4092_s1 + $0x30] sm:$0xff]   ;;  %v1184_v42 = vshll.u32 %v3688_v17, 16 }
  0x4a   : > { %3086 = vmatprep.subr.bf16.mxu0 %v3307_v9  ;;  %v2523_v7 = vcombine.low %v364_v47, %v378_v58  ;;  %v1168_v18 = vrot.slane %v1167_v59, 4  ;;  %v1386_v47 = vrot.slane %v3540_v34, 5  ;;  %v3315_v58 = vld [vmem:[%s4092_s1 + $0x170] sm:$0xff]   ;;  %v1181_v4 = vor.u32 %v1180_v45, %v1177_v41  ;;  %v3320_v41 = vld [vmem:[%s4092_s1 + $0x180] sm:$0xff]  }
  0x4b   : > { %v399_v35 = vrot.slane %v397_v22, 5  ;;  %v1186_v34 = vrot.slane %v1184_v42, 5  ;;  %v1394_v22 = vrot.slane %v3596_v21, 5  ;;  %v2671_v36 = vrot.slane %v2663_v25, 9 }
  0x4c   : > { %2993 = vmatpush3.bf16.msra.mxu1 %v3308_v10  ;;  %v382_v10 = vrot.slane %v380_v53, 4  ;;  %2982 = vmatprep.mubr.bf16.mxu1 %v2523_v7  ;;  %v1173_v32 = vsel %vm3547_vm2, %v1168_v18, %v1172_v49  ;;  %v1198_v53 = vshll.u32 %v3696_v27, 16  ;;  %v2661_v7 = vld [vmem:[%s3502_s26 + $0x8] sm:$0xe]  ;;  %v1182_v18 = vrot.slane %v1181_v4, 4 }
  0x4d   : > { %3087 = vmatpush3.bf16.msra.mxu0 %v3307_v9  ;;  %2994 = vmatprep.subr.bf16.mxu1 %v3310_v30  ;;  %v2631_v9 = vld [vmem:[%s3502_s26 + $0x40] sm:$0xf]  ;;  %v2651_v39 = vcombine.low %v1159_v23, %v1173_v32  ;;  %v400_v44 = vor.u32 %v399_v35, %v396_v1  ;;  %v2669_v14 = vrot.slane %v2661_v7, 9  ;;  %v1391_v42 = vsel %vm3721_vm5, %v2671_v36, %v1390_v48 }
  0x4e   : > { %3088 = vmatprep.subr.bf16.mxu0 %v3309_v29  ;;  %v386_v33 = vor.u32 %v385_v19, %v382_v10  ;;  %v1192_v49 = vshll.u32 %v2631_v9, 16  ;;  %v2662_v10 = vld [vmem:[%s3502_s26 + $0x10] sm:$0xe]  ;;  %v2533_v19 = vcombine.low %v3508_v11, %v3511_v12  ;;  %v1200_v1 = vrot.slane %v1198_v53, 5  ;;  %v2664_v12 = vld [vmem:[%s3502_s26 + $0x20] sm:$0xe] }
  0x4f   : > { %3078 = vmatprep.mubr.bf16.mxu0 %v2651_v39  ;;  %v401_v3 = vrot.slane %v400_v44, 4  ;;  %v1383_v32 = vsel %vm3721_vm5, %v2669_v14, %v1382_v57  ;;  %v1187_v21 = vsel %vm3547_vm2, %v1182_v18, %v1186_v34  ;;  %v3319_v35 = vld [vmem:[%s4092_s1 + $0x80] sm:$0xff]   ;;  %v3324_v44 = vld [vmem:[%s4092_s1 + $0x90] sm:$0xff]   ;;  %v1398_v45 = vrot.slane %v3646_v24, 5 }
  0x50   : > { %2995 = vmatpush3.bf16.msra.mxu1 %v3310_v30  ;;  %v3313_v30 = vld [vmem:[%s4092_s1 + $0x168] sm:$0xff]   ;;  %v387_v43 = vrot.slane %v386_v33, 4  ;;  %v1194_v16 = vrot.slane %v1192_v49, 5  ;;  %v1406_v53 = vrot.slane %v3688_v17, 5  ;;  %v1410_v24 = vrot.slane %v3696_v27, 5  ;;  %v3328_v18 = vld [vmem:[%s4092_s1 + $0xa0] sm:$0xff]  }
  0x51   : > { %3089 = vmatpush3.bf16.msra.mxu0 %v3309_v29  ;;  %2996 = vmatprep.subr.bf16.mxu1 %v3312_v6  ;;  %v1189_v29 = vshrl.u32 %v2631_v9, 16  ;;  %v723_v34 = vrot.slane %v3520_v15, 5  ;;  %v727_v17 = vrot.slane %v3565_v56, 5  ;;  %v691_v15 = vld [vmem:[%s3502_s26 + $0x8] sm:$0xe] }
  0x52   : > { %3090 = vmatprep.subr.bf16.mxu0 %v3311_v54  ;;  %v392_v59 = vsel %vm3547_vm2, %v387_v43, %v391_v20  ;;  %v2670_v20 = vrot.slane %v2662_v10, 9  ;;  %v3322_v43 = vld [vmem:[%s4092_s1 + $0x88] sm:$0xff]   ;;  %v3325_v10 = vld [vmem:[%s4092_s1 + $0x190] sm:$0xff]   ;;  %v2546_v14 = vrot.slane %v691_v15, 9  ;;  %v694_v36 = vld [vmem:[%s3502_s26 + $0x20] sm:$0xe] }
  0x53   : > { %v1191_v5 = vrot.slane %v1189_v29, 4  ;;  %v1402_v29 = vrot.slane %v3650_v26, 5  ;;  %v2536_v26 = vcombine.low %v3661_v46, %v3666_v50  ;;  %v3326_v46 = vld [vmem:[%s4092_s1 + $0x98] sm:$0xff]  }
  0x54   : > { %2997 = vmatpush3.bf16.msra.mxu1 %v3312_v6  ;;  %v3316_v6 = vld [vmem:[%s4092_s1 + $0x38] sm:$0xff]   ;;  %v1387_v11 = vsel %vm3721_vm5, %v2670_v20, %v1386_v47 }
  0x55   : > { %3091 = vmatpush3.bf16.msra.mxu0 %v3311_v54  ;;  %2998 = vmatprep.subr.bf16.mxu1 %v3314_v37  ;;  %v406_v54 = vsel %vm3547_vm2, %v401_v3, %v405_v40  ;;  %v1195_v23 = vor.u32 %v1194_v16, %v1191_v5  ;;  %v2693_v57 = vcombine.low %v1383_v32, %v1387_v11  ;;  %v690_v16 = vld [vmem:[%s3502_s26] sm:$0xe]  ;;  %v3327_v20 = vld [vmem:[%s4092_s1 + $0x198] sm:$0xff]  }
  0x56   : > { %3092 = vmatprep.subr.bf16.mxu0 %v3313_v30  ;;  %v2524_v9 = vcombine.low %v392_v59, %v406_v54  ;;  %v2534_v40 = vcombine.low %v3557_v51, %v3562_v55  ;;  %v2535_v51 = vcombine.low %v3620_v62, %v3623_v63  ;;  %v719_v55 = vrot.slane %v3514_v13, 5  ;;  %v3323_v62 = vld [vmem:[%s4092_s1 + $0x188] sm:$0xff]   ;;  %v2666_v63 = vld [vmem:[%s3502_s26 + $0x30] sm:$0xe]  ;;  %v2668_v59 = vld [vmem:[%s3502_s26 + $0x40] sm:$0xe] }
  0x57   : > { %v1196_v33 = vrot.slane %v1195_v23, 4  ;;  %v2665_v13 = vld [vmem:[%s3502_s26 + $0x28] sm:$0xe]  ;;  %v2674_v49 = vrot.slane %v2666_v63, 9  ;;  %v2676_v7 = vrot.slane %v2668_v59, 9  ;;  %v2545_v56 = vrot.slane %v690_v16, 9 }
  0x58   : > { %2999 = vmatpush3.bf16.msra.mxu1 %v3314_v37  ;;  %v2672_v37 = vrot.slane %v2664_v12, 9  ;;  %v2673_v48 = vrot.slane %v2665_v13, 9  ;;  %v731_v54 = vrot.slane %v3570_v60, 5  ;;  %v692_v23 = vld [vmem:[%s3502_s26 + $0x10] sm:$0xe]  ;;  %v3340_v63 = vld [vmem:[%s4092_s1 + $0x1c0] sm:$0xff]  }
  0x59   : > { %3093 = vmatpush3.bf16.msra.mxu0 %v3313_v30  ;;  %2983 = vmatmul.mubr.bf16.gmra.mrb[4].mxu1 %v2524_v9  ;;  %v1201_v31 = vsel %vm3547_vm2, %v1196_v33, %v1200_v1  ;;  %v1403_v4 = vsel %vm3721_vm5, %v2674_v49, %v1402_v29  ;;  %v724_v9 = vsel %vm3721_vm5, %v2546_v14, %v723_v34  ;;  %v693_v60 = vld [vmem:[%s3502_s26 + $0x18] sm:$0xe]  ;;  %v2547_v25 = vrot.slane %v692_v23, 9  ;;  %v3330_v33 = vld [vmem:[%s4092_s1 + $0xa8] sm:$0xff]   ;;  %v3869_v59 = vld [vmem:[%s3502_s26 + $0x1c] sm:$0x1] }
  0x5a   : > { %3094 = vmatprep.subr.bf16.mxu0 %v3315_v58  ;;  %3000 = vmatprep.subr.bf16.mxu1 %v3316_v6  ;;  %v2652_v39 = vcombine.low %v1187_v21, %v1201_v31  ;;  %v1395_v30 = vsel %vm3721_vm5, %v2672_v37, %v1394_v22  ;;  %v1399_v3 = vsel %vm3721_vm5, %v2673_v48, %v1398_v45  ;;  %v3339_v32 = vld [vmem:[%s3502_s26 + $0x10] ss:$8 sps:$4 sm:$0xff]   ;;  %v695_v37 = vld [vmem:[%s3502_s26 + $0x28] sm:$0xe]  ;;  %v743_v45 = vrot.slane %v3669_v52, 5 }
  0x5b   : > { %3002 = vmatprep.mubr.bf16.mxu1 %v2533_v19  ;;  %v2694_v47 = vcombine.low %v1391_v42, %v1395_v30  ;;  %v2695_v27 = vcombine.low %v1399_v3, %v1403_v4  ;;  %v720_v19 = vsel %vm3721_vm5, %v2545_v56, %v719_v55  ;;  %v728_v11 = vsel %vm3721_vm5, %v2547_v25, %v727_v17  ;;  %v3333_v31 = vld [vmem:[%s4092_s1 + $0xb0] sm:$0xff]   ;;  %v697_v55 = vld [vmem:[%s3502_s26 + $0x38] sm:$0xe]  ;;  %v3342_v52 = vld [vmem:[%s4092_s1 + $0xc8] sm:$0xff]  }
  0x5c   : > { %3001 = vmatpush3.bf16.msra.mxu1 %v3316_v6  ;;  %3079 = vmatmul.mubr.bf16.gmra.mrb[4].mxu0 %v2652_v39  ;;  %v1411_v6 = vsel %vm3721_vm5, %v2676_v7, %v1410_v24  ;;  %v2569_v1 = vcombine.low %v720_v19, %v724_v9  ;;  %v3336_v39 = vld [vmem:[%s4092_s1 + $0xb8] sm:$0xff]   ;;  %v2550_v42 = vrot.slane %v695_v37, 9  ;;  %v739_v30 = vrot.slane %v3629_v2, 5  ;;  %v3341_v49 = vld [vmem:[%s3502_s26 + $0x20] ss:$8 sps:$4 sm:$0xff]   ;;  %v3345_v23 = vld [vmem:[%s4092_s1 + $0x1d0] sm:$0xff]  }
  0x5d   : > { %3095 = vmatpush3.bf16.msra.mxu0 %v3315_v58  ;;  %3010 = vmatprep.subr.bf16.mxu1 %v3319_v35  ;;  %v2667_v58 = vld [vmem:[%s3502_s26 + $0x38] sm:$0xe]  ;;  %v2552_v13 = vrot.slane %v697_v55, 9  ;;  %v1777_v17 = vshll.u32 %v3869_v59, 16  ;;  %v3348_v25 = vld [vmem:[%s4092_s1 + $0xe0] sm:$0xff]  }
  0x5e   : > { %3096 = vmatprep.subr.bf16.mxu0 %v3317_v28  ;;  %3098 = vmatprep.mubr.bf16.mxu0 %v2693_v57  ;;  %v2675_v5 = vrot.slane %v2667_v58, 9  ;;  %v3331_v57 = vld [vmem:[%s4092_s1 + $0x1a8] sm:$0xff]   ;;  %v740_v2 = vsel %vm3721_vm5, %v2550_v42, %v739_v30  ;;  %v3337_v29 = vld [vmem:[%s4092_s1 + $0x1b8] sm:$0xff]  }
  0x5f   : > { %v2743_v58 = vld [vmem:[%s3502_s26 + $0x18] sm:$0xf]  ;;  %v3910_v30 = vld [vmem:[%s3502_s26 + $0x2c] sm:$0x1] }
  0x60   : > { %v1407_v50 = vsel %vm3721_vm5, %v2675_v5, %v1406_v53  ;;  %v2741_v53 = vld [vmem:[%s3502_s26 + $0x10] sm:$0xf]  ;;  %v1768_v7 = vshrl.u32 %v2743_v58, 16  ;;  %v1771_v34 = vshll.u32 %v2743_v58, 16 }
  0x61   : > { %3097 = vmatpush3.bf16.msra.mxu0 %v3317_v28  ;;  %3003 = vmatmul.mubr.bf16.vlgmr.msra.gmra.mrb[0].mxu1 %v2534_v40  ;;  %v2696_v22 = vcombine.low %v1407_v50, %v1411_v6  ;;  %v2548_v28 = vrot.slane %v693_v60, 9  ;;  %v2549_v40 = vrot.slane %v694_v36, 9  ;;  %v1754_v3 = vshrl.u32 %v2741_v53, 16  ;;  %v3343_v50 = vld [vmem:[%s4092_s1 + $0x1c8] sm:$0xff]   ;;  %v3353_v6 = vld [vmem:[%s3502_s26 + $0x30] ss:$8 sps:$4 sm:$0xff]  }
  0x62   : > { %3106 = vmatprep.subr.bf16.mxu0 %v3320_v41  ;;  %3011 = vmatpush3.bf16.msra.mxu1 %v3319_v35  ;;  %v3329_v35 = vld [vmem:[%s4092_s1 + $0x1a0] sm:$0xff]   ;;  %v1757_v4 = vshll.u32 %v2741_v53, 16  ;;  %v1770_v15 = vrot.slane %v1768_v7, 4  ;;  %v1773_v56 = vrot.slane %v1771_v34, 5  ;;  %v2755_v7 = vld [vmem:[%s3502_s26 + $0x48] sm:$0xf] }
  0x63   : > { %3012 = vmatprep.subr.bf16.mxu1 %v3322_v43  ;;  %3006 = vmatprep.mubr.bf16.mxu1 %v2535_v51  ;;  %v732_v12 = vsel %vm3721_vm5, %v2548_v28, %v731_v54  ;;  %v696_v51 = vld [vmem:[%s3502_s26 + $0x30] sm:$0xe]  ;;  %v1756_v16 = vrot.slane %v1754_v3, 4  ;;  %v3355_v28 = vld [vmem:[%s3502_s26 + $0x40] ss:$8 sps:$4 sm:$0xff]  }
  0x64   : > { %3099 = vmatmul.mubr.bf16.vlgmr.msra.gmra.mrb[0].mxu0 %v2694_v47  ;;  %v2570_v21 = vcombine.low %v728_v11, %v732_v12  ;;  %v747_v47 = vrot.slane %v3678_v61, 5  ;;  %v3861_v61 = vld [vmem:[%s3502_s26 + $0x14] sm:$0x1]  ;;  %v1774_v19 = vor.u32 %v1773_v56, %v1770_v15  ;;  %v2747_v11 = vld [vmem:[%s3502_s26 + $0x28] sm:$0xf] }
  0x65   : > { %3107 = vmatpush3.bf16.msra.mxu0 %v3320_v41  ;;  %3102 = vmatprep.mubr.bf16.mxu0 %v2695_v27  ;;  %v735_v41 = vrot.slane %v3626_v0, 5  ;;  %v1763_v5 = vshll.u32 %v3861_v61, 16  ;;  %v3344_v27 = vld [vmem:[%s4092_s1 + $0xd0] sm:$0xff]   ;;  %v3904_v36 = vld [vmem:[%s3502_s26 + $0x24] sm:$0x1]  ;;  %v1796_v37 = vshrl.u32 %v2747_v11, 16 }
  0x66   : > { %3013 = vmatpush3.bf16.msra.mxu1 %v3322_v43  ;;  %3108 = vmatprep.subr.bf16.mxu0 %v3323_v62  ;;  %v3334_v43 = vld [vmem:[%s4092_s1 + $0x1b0] sm:$0xff]   ;;  %v1775_v60 = vrot.slane %v1774_v19, 4  ;;  %v1791_v55 = vshll.u32 %v3904_v36, 16  ;;  %v1852_v19 = vshrl.u32 %v2755_v7, 16 }
  0x67   : > { %3014 = vmatprep.subr.bf16.mxu1 %v3324_v44  ;;  %v736_v0 = vsel %vm3721_vm5, %v2549_v40, %v735_v41  ;;  %v1765_v54 = vrot.slane %v1763_v5, 5  ;;  %v3349_v40 = vld [vmem:[%s4092_s1 + $0x1e0] sm:$0xff]   ;;  %v3354_v34 = vld [vmem:[%s4092_s1 + $0x1f0] sm:$0xff]  }
  0x68   : > { %v2571_v48 = vcombine.low %v736_v0, %v740_v2  ;;  %v1805_v2 = vshll.u32 %v3910_v30, 16 }
  0x69   : > { %3007 = vmatmul.mubr.bf16.gmra.mrb[4].mxu1 %v2536_v26  ;;  %3109 = vmatpush3.bf16.msra.mxu0 %v3323_v62  ;;  %v2551_v62 = vrot.slane %v696_v51, 9  ;;  %v748_v26 = vsel %vm3721_vm5, %v2552_v13, %v747_v47  ;;  %v3356_v47 = vld [vmem:[%s4092_s1 + $0xf8] sm:$0xff]   ;;  %v3925_v13 = vld [vmem:[%s3502_s26 + $0x34] sm:$0x1] }
  0x6a   : > { %3015 = vmatpush3.bf16.msra.mxu1 %v3324_v44  ;;  %3110 = vmatprep.subr.bf16.mxu0 %v3325_v10  ;;  %v3338_v44 = vld [vmem:[%s4092_s1 + $0xc0] sm:$0xff]   ;;  %v1807_v3 = vrot.slane %v1805_v2, 5  ;;  %v3367_v2 = vld [vmem:[%s4094_s3 + $0x10] sm:$0xff]  }
  0x6b   : > { %3016 = vmatprep.subr.bf16.mxu1 %v3326_v46  ;;  %3026 = vmatprep.mubr.bf16.mxu1 %v2569_v1  ;;  %v744_v24 = vsel %vm3721_vm5, %v2551_v62, %v743_v45  ;;  %v2745_v1 = vld [vmem:[%s3502_s26 + $0x20] sm:$0xf]  ;;  %v3351_v45 = vld [vmem:[%s4092_s1 + $0x1e8] sm:$0xff]  }
  0x6c   : > { %3103 = vmatmul.mubr.bf16.gmra.mrb[4].mxu0 %v2696_v22  ;;  %v3346_v22 = vld [vmem:[%s4092_s1 + $0xd8] sm:$0xff]  }
  0x6d   : > { %3111 = vmatpush3.bf16.msra.mxu0 %v3325_v10  ;;  %3122 = vmatprep.mubr.bf16.mxu0 %v3339_v32  ;;  %v2572_v10 = vcombine.low %v744_v24, %v748_v26  ;;  %v2753_v26 = vld [vmem:[%s3502_s26 + $0x40] sm:$0xf] }
  0x6e   : > { %3017 = vmatpush3.bf16.msra.mxu1 %v3326_v46  ;;  %3112 = vmatprep.subr.bf16.mxu0 %v3327_v20  ;;  %v1759_v46 = vrot.slane %v1757_v4, 5  ;;  %v1819_v4 = vshll.u32 %v3925_v13, 16  ;;  %v1838_v56 = vshrl.u32 %v2753_v26, 16 }
  0x6f   : > { %3018 = vmatprep.subr.bf16.mxu1 %v3328_v18 }
  0x70   : > { %v1760_v14 = vor.u32 %v1759_v46, %v1756_v16 }
  0x71   : > { %3113 = vmatpush3.bf16.msra.mxu0 %v3327_v20  ;;  %v1779_v20 = vrot.slane %v1777_v17, 5 }
  0x72   : > { %3019 = vmatpush3.bf16.msra.mxu1 %v3328_v18  ;;  %3114 = vmatprep.subr.bf16.mxu0 %v3329_v35  ;;  %v3358_v18 = vld [vmem:[%s3502_s26 + $0x8] ss:$8 sps:$4 sm:$0xff]   ;;  %v1761_v9 = vrot.slane %v1760_v14, 4  ;;  %v3357_v14 = vld [vmem:[%s4092_s1 + $0x1f8] sm:$0xff]  }
  0x73   : > { %3020 = vmatprep.subr.bf16.mxu1 %v3330_v33  ;;  %v1780_v12 = vsel %vm3547_vm2, %v1775_v60, %v1779_v20  ;;  %v1855_v20 = vshll.u32 %v2755_v7, 16  ;;  %v1840_v60 = vrot.slane %v1838_v56, 4  ;;  %v3368_v56 = vld [vmem:[%s4092_s1 + $0x218] sm:$0xff]  }
  0x74   : > { %v1766_v32 = vsel %vm3547_vm2, %v1761_v9, %v1765_v54 }
  0x75   : > { %3115 = vmatpush3.bf16.msra.mxu0 %v3329_v35  ;;  %v3347_v35 = vld [vmem:[%s4092_s1 + $0x1d8] sm:$0xff]  }
  0x76   : > { %3021 = vmatpush3.bf16.msra.mxu1 %v3330_v33  ;;  %3116 = vmatprep.subr.bf16.mxu0 %v3331_v57  ;;  %v1785_v33 = vshll.u32 %v2745_v1, 16 }
  0x77   : > { %3022 = vmatprep.subr.bf16.mxu1 %v3333_v31 }
  0x78   : > { %v1787_v42 = vrot.slane %v1785_v33, 5 }
  0x79   : > { %3117 = vmatpush3.bf16.msra.mxu0 %v3331_v57  ;;  %v3350_v57 = vld [vmem:[%s4092_s1 + $0xe8] sm:$0xff]  }
  0x7a   : > { %3023 = vmatpush3.bf16.msra.mxu1 %v3333_v31  ;;  %3118 = vmatprep.subr.bf16.mxu0 %v3334_v43  ;;  %v2773_v31 = vcombine.low %v1766_v32, %v1780_v12  ;;  %v1854_v32 = vrot.slane %v1852_v19, 4  ;;  %v3370_v19 = vld [vmem:[%s4092_s1 + $0x220] sm:$0xff]  }
  0x7b   : > { %3024 = vmatprep.subr.bf16.mxu1 %v3336_v39 }
  0x7d   : > { %3119 = vmatpush3.bf16.msra.mxu0 %v3334_v43  ;;  %v1798_v43 = vrot.slane %v1796_v37, 4 }
  0x7e   : > { %3025 = vmatpush3.bf16.msra.mxu1 %v3336_v39  ;;  %3120 = vmatprep.subr.bf16.mxu0 %v3337_v29  ;;  %v1799_v39 = vshll.u32 %v2747_v11, 16  ;;  %v1857_v11 = vrot.slane %v1855_v20, 5  ;;  %v2232_v20 = vld [vmem:[%s3978_s10 + $0x10] sm:$0xff] }
  0x7f   : > { %3034 = vmatprep.subr.bf16.mxu1 %v3338_v44 }
  0x80   : > { %v1801_v51 = vrot.slane %v1799_v39, 5 }
  0x81   : > { %3027 = vmatmul.mubr.bf16.vlgmr.msra.gmra.mrb[0].mxu1 %v2570_v21  ;;  %3121 = vmatpush3.bf16.msra.mxu0 %v3337_v29  ;;  %v1782_v21 = vshrl.u32 %v2745_v1, 16  ;;  %v2749_v29 = vld [vmem:[%s3502_s26 + $0x30] sm:$0xf] }
  0x82   : > { %3035 = vmatpush3.bf16.msra.mxu1 %v3338_v44  ;;  %3030 = vmatprep.mubr.bf16.mxu1 %v2571_v48  ;;  %v3352_v44 = vld [vmem:[%s4092_s1 + $0xf0] sm:$0xff]   ;;  %v1802_v62 = vor.u32 %v1801_v51, %v1798_v43  ;;  %v3929_v48 = vld [vmem:[%s3502_s26 + $0x3c] sm:$0x1]  ;;  %v1813_v53 = vshll.u32 %v2749_v29, 16 }
  0x83   : > { %3036 = vmatprep.subr.bf16.mxu1 %v3342_v52  ;;  %3130 = vmatprep.subr.bf16.mxu0 %v3340_v63  ;;  %v1784_v41 = vrot.slane %v1782_v21, 4  ;;  %v1833_v46 = vshll.u32 %v3929_v48, 16 }
  0x84   : > { %3123 = vmatmul.mubr.bf16.vlgmr.msra.gmra.mrb[0].mxu0 %v3341_v49  ;;  %v1810_v49 = vshrl.u32 %v2749_v29, 16 }
  0x85   : > { %3131 = vmatpush3.bf16.msra.mxu0 %v3340_v63  ;;  %3126 = vmatprep.mubr.bf16.mxu0 %v3353_v6  ;;  %v1788_v0 = vor.u32 %v1787_v42, %v1784_v41  ;;  %v2751_v63 = vld [vmem:[%s3502_s26 + $0x38] sm:$0xf]  ;;  %v3361_v6 = vld [vmem:[%s4094_s3] sm:$0xff]  }
  0x86   : > { %3037 = vmatpush3.bf16.msra.mxu1 %v3342_v52  ;;  %3132 = vmatprep.subr.bf16.mxu0 %v3343_v50  ;;  %v1793_v52 = vrot.slane %v1791_v55, 5  ;;  %v1824_v24 = vshrl.u32 %v2751_v63, 16  ;;  %v1827_v5 = vshll.u32 %v2751_v63, 16  ;;  %v1812_v17 = vrot.slane %v1810_v49, 4  ;;  %v3360_v42 = vld [vmem:[%s4092_s1 + $0x200] sm:$0xff]   ;;  %v3362_v63 = vld [vmem:[%s4092_s1 + $0x208] sm:$0xff]  }
  0x87   : > { %3038 = vmatprep.subr.bf16.mxu1 %v3344_v27  ;;  %v1789_v58 = vrot.slane %v1788_v0, 4  ;;  %v2786_v0 = vld [vmem:[%s3502_s26 + $0x18] sm:$0xe] }
  0x88   : > { %v1826_v16 = vrot.slane %v1824_v24, 4  ;;  %v1829_v15 = vrot.slane %v1827_v5, 5  ;;  %v2045_v24 = vrot.slane %v3861_v61, 5  ;;  %v3369_v5 = vld [vmem:[%s4094_s3 + $0x18] sm:$0xff]   ;;  %v3999_v61 = vstv %s3969_s7 }
  0x89   : > { %3031 = vmatmul.mubr.bf16.gmra.mrb[4].mxu1 %v2572_v10  ;;  %3133 = vmatpush3.bf16.msra.mxu0 %v3343_v50  ;;  %v1803_v50 = vrot.slane %v1802_v62, 4  ;;  %v1841_v10 = vshll.u32 %v2753_v26, 16  ;;  %v1794_v33 = vsel %vm3547_vm2, %v1789_v58, %v1793_v52  ;;  %v3365_v52 = vld [vmem:[%s3502_s26 + $0x38] ss:$8 sps:$4 sm:$0xff]   ;;  %v2794_v26 = vrot.slane %v2786_v0, 9 }
  0x8a   : > { %3039 = vmatpush3.bf16.msra.mxu1 %v3344_v27  ;;  %3050 = vmatprep.mubr.bf16.mxu1 %v3358_v18  ;;  %v1815_v27 = vrot.slane %v1813_v53, 5  ;;  %v3945_v18 = vld [vmem:[%s3502_s26 + $0x44] sm:$0x1]  ;;  %v1830_v9 = vor.u32 %v1829_v15, %v1826_v16  ;;  %v2049_v58 = vrot.slane %v3869_v59, 5  ;;  %v3366_v59 = vld [vmem:[%s4092_s1 + $0x210] sm:$0xff]  }
  0x8b   : > { %3040 = vmatprep.subr.bf16.mxu1 %v3346_v22  ;;  %3134 = vmatprep.subr.bf16.mxu0 %v3345_v23  ;;  %v1843_v1 = vrot.slane %v1841_v10, 5  ;;  %v1847_v39 = vshll.u32 %v3945_v18, 16  ;;  %v3371_v15 = vld [vmem:[%s4094_s3 + $0x20] sm:$0xff]  }
  0x8c   : > { %3127 = vmatmul.mubr.bf16.gmra.mrb[4].mxu0 %v3355_v28  ;;  %v1816_v54 = vor.u32 %v1815_v27, %v1812_v17  ;;  %v1835_v28 = vrot.slane %v1833_v46, 5  ;;  %v1831_v21 = vrot.slane %v1830_v9, 4  ;;  %v2050_v38 = vsel %vm3721_vm5, %v2794_v26, %v2049_v58  ;;  %v3375_v9 = vld [vmem:[%s4094_s3 + $0x30] sm:$0xff]   ;;  %v2791_v26 = vld [vmem:[%s3502_s26 + $0x40] sm:$0xe] }
  0x8d   : > { %3135 = vmatpush3.bf16.msra.mxu0 %v3345_v23  ;;  %3146 = vmatprep.mubr.bf16.mxu0 %v2773_v31  ;;  %v3949_v23 = vld [vmem:[%s3502_s26 + $0x4c] sm:$0x1]  ;;  %v3364_v31 = vld [vmem:[%s3502_s26 + $0x28] ss:$8 sps:$4 sm:$0xff]   ;;  %v1844_v37 = vor.u32 %v1843_v1, %v1840_v60  ;;  %v1849_v29 = vrot.slane %v1847_v39, 5  ;;  %v2234_v60 = vld [vmem:[%s3978_s10 + $0x20] sm:$0xff] }
  0x8e   : > { %3041 = vmatpush3.bf16.msra.mxu1 %v3346_v22  ;;  %3136 = vmatprep.subr.bf16.mxu0 %v3347_v35  ;;  %v3359_v22 = vld [vmem:[%s3502_s26 + $0x18] ss:$8 sps:$4 sm:$0xff]   ;;  %v1817_v12 = vrot.slane %v1816_v54, 4  ;;  %v1861_v41 = vshll.u32 %v3949_v23, 16  ;;  %v1836_v51 = vsel %vm3547_vm2, %v1831_v21, %v1835_v28  ;;  %v3373_v54 = vld [vmem:[%s4094_s3 + $0x28] sm:$0xff]   ;;  %v2242_v28 = vadd.f32 %v3999_v61, %v2232_v20 }
  0x8f   : > { %3042 = vmatprep.subr.bf16.mxu1 %v3348_v25  ;;  %v2235_v1 = vld [vmem:[%s3978_s10 + $0x28] sm:$0xff]  ;;  %v3377_v21 = vld [vmem:[%s4094_s3 + $0x38] sm:$0xff]   ;;  %v2789_v39 = vld [vmem:[%s3502_s26 + $0x30] sm:$0xe] }
  0x90   : > { %v1863_v62 = vrot.slane %v1861_v41, 5  ;;  %v2792_v58 = vld [vmem:[%s3502_s26 + $0x48] sm:$0xe] }
  0x91   : > { %3137 = vmatpush3.bf16.msra.mxu0 %v3347_v35  ;;  %v1808_v35 = vsel %vm3547_vm2, %v1803_v50, %v1807_v3  ;;  %v2230_v3 = vld [vmem:[%s3978_s10] sm:$0xff] }
  0x92   : > { %3043 = vmatpush3.bf16.msra.mxu1 %v3348_v25  ;;  %3138 = vmatprep.subr.bf16.mxu0 %v3349_v40  ;;  %v1821_v25 = vrot.slane %v1819_v4, 5  ;;  %v2774_v55 = vcombine.low %v1794_v33, %v1808_v35  ;;  %v2231_v4 = vld [vmem:[%s3978_s10 + $0x8] sm:$0xff]  ;;  %v2240_v17 = vadd.f32 %v3999_v61, %v2230_v3  ;;  %v3374_v33 = vld [vmem:[%s4092_s1 + $0x230] sm:$0xff]   ;;  %v2787_v35 = vld [vmem:[%s3502_s26 + $0x20] sm:$0xe] }
  0x93   : > { %3044 = vmatprep.subr.bf16.mxu1 %v3350_v57  ;;  %v2241_v27 = vadd.f32 %v3999_v61, %v2231_v4 }
  0x94   : > { %v1822_v43 = vsel %vm3547_vm2, %v1817_v12, %v1821_v25  ;;  %v2248_v50 = vmax.f32 %v2240_v17, 0.0  ;;  %v3372_v25 = vld [vmem:[%s4092_s1 + $0x228] sm:$0xff]   ;;  %v2245_v12 = vadd.f32 %v3999_v61, %v2235_v1  ;;  %v2073_v17 = vrot.slane %v3949_v23, 5 }
  0x95   : > { %3139 = vmatpush3.bf16.msra.mxu0 %v3349_v40  ;;  %v1858_v40 = vor.u32 %v1857_v11, %v1854_v32  ;;  %v2775_v49 = vcombine.low %v1822_v43, %v1836_v51  ;;  %v2244_v11 = vadd.f32 %v3999_v61, %v2234_v60  ;;  %v2236_v43 = vld [vmem:[%s3978_s10 + $0x30] sm:$0xff]  ;;  %v2237_v51 = vld [vmem:[%s3978_s10 + $0x38] sm:$0xff] }
  0x96   : > { %3045 = vmatpush3.bf16.msra.mxu1 %v3350_v57  ;;  %3140 = vmatprep.subr.bf16.mxu0 %v3351_v45  ;;  %v3363_v57 = vld [vmem:[%s4094_s3 + $0x8] sm:$0xff]  }
  0x97   : > { %3046 = vmatprep.subr.bf16.mxu1 %v3352_v44  ;;  %v2252_v41 = vmax.f32 %v2244_v11, 0.0 }
  0x99   : > { %3141 = vmatpush3.bf16.msra.mxu0 %v3351_v45  ;;  %v1845_v45 = vrot.slane %v1844_v37, 4 }
  0x9a   : > { %3047 = vmatpush3.bf16.msra.mxu1 %v3352_v44  ;;  %3142 = vmatprep.subr.bf16.mxu0 %v3354_v34  ;;  %v2785_v44 = vld [vmem:[%s3502_s26 + $0x10] sm:$0xe] }
  0x9b   : > { %3048 = vmatprep.subr.bf16.mxu1 %v3356_v47  ;;  %v2793_v53 = vrot.slane %v2785_v44, 9  ;;  %v1850_v7 = vsel %vm3547_vm2, %v1845_v45, %v1849_v29  ;;  %v2053_v44 = vrot.slane %v3904_v36, 5  ;;  %v3376_v45 = vld [vmem:[%s4092_s1 + $0x238] sm:$0xff]   ;;  %v2797_v29 = vrot.slane %v2789_v39, 9 }
  0x9c   : > { %v2247_v36 = vadd.f32 %v3999_v61, %v2237_v51 }
  0x9d   : > { %3143 = vmatpush3.bf16.msra.mxu0 %v3354_v34  ;;  %v2046_v16 = vsel %vm3721_vm5, %v2793_v53, %v2045_v24 }
  0x9e   : > { %3049 = vmatpush3.bf16.msra.mxu1 %v3356_v47  ;;  %3144 = vmatprep.subr.bf16.mxu0 %v3357_v14  ;;  %v1859_v47 = vrot.slane %v1858_v40, 4  ;;  %v2817_v10 = vcombine.low %v2046_v16, %v2050_v38  ;;  %v2790_v40 = vld [vmem:[%s3502_s26 + $0x38] sm:$0xe]  ;;  %v2255_v4 = vmax.f32 %v2247_v36, 0.0 }
  0x9f   : > { %3178 = vmatprep.subr.bf16.mxu1 %v3361_v6 }
  0xa0   : > { %v1864_v34 = vsel %vm3547_vm2, %v1859_v47, %v1863_v62  ;;  %v2061_v47 = vrot.slane %v3925_v13, 5  ;;  %v2798_v62 = vrot.slane %v2790_v40, 9 }
  0xa1   : > { %3051 = vmatmul.mubr.bf16.vlgmr.msra.gmra.mrb[0].mxu1 %v3359_v22  ;;  %3145 = vmatpush3.bf16.msra.mxu0 %v3357_v14  ;;  %v2776_v46 = vcombine.low %v1850_v7, %v1864_v34  ;;  %v2233_v22 = vld [vmem:[%s3978_s10 + $0x18] sm:$0xff]  ;;  %v2799_v7 = vrot.slane %v2791_v26, 9 }
  0xa2   : > { %3179 = vmatpush3.bf16.msra.mxu1 %v3361_v6  ;;  %3054 = vmatprep.mubr.bf16.mxu1 %v3364_v31  ;;  %v2249_v6 = vmax.f32 %v2241_v27, 0.0  ;;  %v2243_v32 = vadd.f32 %v3999_v61, %v2233_v22  ;;  %v2788_v31 = vld [vmem:[%s3502_s26 + $0x28] sm:$0xe]  ;;  %v2062_v13 = vsel %vm3721_vm5, %v2797_v29, %v2061_v47  ;;  %s2229_s26 = sld [smem:[#allocation2]] }
  0xa3   : > { %3180 = vmatprep.subr.bf16.mxu1 %v3363_v57  ;;  %3154 = vmatprep.subr.bf16.mxu0 %v3360_v42  ;;  %v2796_v0 = vrot.slane %v2788_v31, 9 }
  0xa4   : > { %3147 = vmatmul.mubr.bf16.vlgmr.msra.gmra.mrb[0].mxu0 %v2774_v55  ;;  %v2256_v14 = vpack.c.bf16 %v2249_v6, %v2248_v50  ;;  %v2251_v37 = vmax.f32 %v2243_v32, 0.0  ;;  %v2795_v55 = vrot.slane %v2787_v35, 9 }
  0xa5   : > { %3155 = vmatpush3.bf16.msra.mxu0 %v3360_v42  ;;  %3150 = vmatprep.mubr.bf16.mxu0 %v2775_v49  ;;  %v2253_v42 = vmax.f32 %v2245_v12, 0.0  ;;  %v2246_v49 = vadd.f32 %v3999_v61, %v2236_v43  ;;  %v2069_v61 = vrot.slane %v3945_v18, 5 }
  0xa6   : > { %3181 = vmatpush3.bf16.msra.mxu1 %v3363_v57  ;;  %3156 = vmatprep.subr.bf16.mxu0 %v3362_v63  ;;  %v2250_v57 = vmax.f32 %v2242_v28, 0.0 }
  0xa7   : > { %3182 = vmatprep.subr.bf16.mxu1 %v3367_v2  ;;  %v2258_v53 = vpack.c.bf16 %v2253_v42, %v2252_v41  ;;  %v2254_v3 = vmax.f32 %v2246_v49, 0.0  ;;  %v2070_v16 = vsel %vm3721_vm5, %v2799_v7, %v2069_v61 }
  0xa8   : > { %v2389_v8 = vstv %s2229_s26 }
  0xa9   : > { %3055 = vmatmul.mubr.bf16.gmra.mrb[4].mxu1 %v3365_v52  ;;  %3157 = vmatpush3.bf16.msra.mxu0 %v3362_v63  ;;  %v2065_v63 = vrot.slane %v3929_v48, 5  ;;  %v2257_v52 = vpack.c.bf16 %v2251_v37, %v2250_v57  ;;  %v2259_v27 = vpack.c.bf16 %v2255_v4, %v2254_v3 }
  0xaa   : > { %3183 = vmatpush3.bf16.msra.mxu1 %v3367_v2  ;;  %3158 = vmatprep.subr.bf16.mxu0 %v3366_v59  ;;  %v2057_v2 = vrot.slane %v3910_v30, 5  ;;  %v2054_v30 = vsel %vm3721_vm5, %v2795_v55, %v2053_v44 }
  0xab   : > { %3184 = vmatprep.subr.bf16.mxu1 %v3369_v5  ;;  %3194 = vmatprep.mubr.bf16.mxu1 %v2256_v14  ;;  %v2066_v48 = vsel %vm3721_vm5, %v2798_v62, %v2065_v63 }
  0xac   : > { %3151 = vmatmul.mubr.bf16.gmra.mrb[4].mxu0 %v2776_v46  ;;  %v2058_v24 = vsel %vm3721_vm5, %v2796_v0, %v2057_v2  ;;  %v2819_v34 = vcombine.low %v2062_v13, %v2066_v48 }
  0xad   : > { %3159 = vmatpush3.bf16.msra.mxu0 %v3366_v59  ;;  %3170 = vmatprep.mubr.bf16.mxu0 %v2817_v10  ;;  %v2800_v59 = vrot.slane %v2792_v58, 9 }
  0xae   : > { %3185 = vmatpush3.bf16.msra.mxu1 %v3369_v5  ;;  %3160 = vmatprep.subr.bf16.mxu0 %v3368_v56  ;;  %v2818_v5 = vcombine.low %v2054_v30, %v2058_v24 }
  0xaf   : > { %3186 = vmatprep.subr.bf16.mxu1 %v3371_v15  ;;  %v2074_v38 = vsel %vm3721_vm5, %v2800_v59, %v2073_v17 }
  0xb0   : > { %v2820_v46 = vcombine.low %v2070_v16, %v2074_v38 }
  0xb1   : > { %3161 = vmatpush3.bf16.msra.mxu0 %v3368_v56 }
  0xb2   : > { %3187 = vmatpush3.bf16.msra.mxu1 %v3371_v15  ;;  %3162 = vmatprep.subr.bf16.mxu0 %v3370_v19 }
  0xb3   : > { %3188 = vmatprep.subr.bf16.mxu1 %v3373_v54 }
  0xb5   : > { %3163 = vmatpush3.bf16.msra.mxu0 %v3370_v19 }
  0xb6   : > { %3189 = vmatpush3.bf16.msra.mxu1 %v3373_v54  ;;  %3164 = vmatprep.subr.bf16.mxu0 %v3372_v25 }
  0xb7   : > { %3190 = vmatprep.subr.bf16.mxu1 %v3375_v9 }
  0xb9   : > { %3165 = vmatpush3.bf16.msra.mxu0 %v3372_v25 }
  0xba   : > { %3191 = vmatpush3.bf16.msra.mxu1 %v3375_v9  ;;  %3166 = vmatprep.subr.bf16.mxu0 %v3374_v33 }
  0xbb   : > { %3192 = vmatprep.subr.bf16.mxu1 %v3377_v21 }
  0xbd   : > { %3167 = vmatpush3.bf16.msra.mxu0 %v3374_v33 }
  0xbe   : > { %3193 = vmatpush3.bf16.msra.mxu1 %v3377_v21  ;;  %3168 = vmatprep.subr.bf16.mxu0 %v3376_v45 }
  0xc1   : > { %3195 = vmatmul.mubr.bf16.vlgmr.msra.gmra.mrb[8].mxu1 %v2257_v52  ;;  %3169 = vmatpush3.bf16.msra.mxu0 %v3376_v45 }
  0xc2   : > { %3198 = vmatprep.mubr.bf16.mxu1 %v2258_v53 }
  0xc4   : > { %3171 = vmatmul.mubr.bf16.vlgmr.msra.gmra.mrb[0].mxu0 %v2818_v5 }
  0xc5   : > { %3174 = vmatprep.mubr.bf16.mxu0 %v2819_v34 }
  0xc9   : > { %3199 = vmatmul.mubr.bf16.gmra.mrb[12].mxu1 %v2259_v27 }
  0xcc   : > { %3175 = vmatmul.mubr.bf16.gmra.mrb[4].mxu0 %v2820_v46 }
 0x174   : > { %v3052_v50 = vpop.f32.mrb[0].mxu1 }
 0x175   : > { %v1035_v6 = vpop.f32.mrb[1].mxu1 }
 0x176   : > { %v3053_v15 = vpop.f32.mrb[2].mxu1 }
 0x177   : > { %v1038_v56 = vpop.f32.mrb[3].mxu1 }
 0x17c   : > { %v3056_v18 = vpop.f32.mrb[4].mxu1 }
 0x17d   : > { %v1051_v10 = vpop.f32.mrb[5].mxu1 }
 0x17e   : > { %v3057_v14 = vpop.f32.mrb[6].mxu1 }
 0x17f   : > { %v1054_v23 = vpop.f32.mrb[7].mxu1 }
 0x194   : > { %v3196_v54 = vpop.f32.mrb[8].mxu1 }
 0x195   : > { %v2358_v19 = vpop.f32.mrb[9].mxu1 }
 0x196   : > { %v3197_v20 = vpop.f32.mrb[10].mxu1 }
 0x197   : > { %v2361_v22 = vpop.f32.mrb[11].mxu1  ;;  %v3172_v9 = vpop.f32.mrb[0].mxu0 }
 0x198   : > { %v3202_v60 = vadd.f32 %v3172_v9, %v3052_v50  ;;  %v2190_v1 = vpop.f32.mrb[1].mxu0 }
 0x199   : > { %v3203_v25 = vadd.f32 %v2190_v1, %v1035_v6  ;;  %v3173_v28 = vpop.f32.mrb[2].mxu0 }
 0x19a   : > { %v2392_v32 = vmul.f32 %v3202_v60, %v2389_v8  ;;  %v3204_v11 = vadd.f32 %v3173_v28, %v3053_v15  ;;  %v2193_v12 = vpop.f32.mrb[3].mxu0 }
 0x19b   : > { %v2390_v33 = vmul.f32 %v3203_v25, %v2389_v8  ;;  %v3205_v35 = vadd.f32 %v2193_v12, %v1038_v56 }
 0x19c   : > { %v3200_v21 = vpop.f32.mrb[12].mxu1  ;;  %v2400_v57 = vadd.f32 %v3196_v54, %v2392_v32  ;;  %v2393_v37 = vmul.f32 %v3204_v11, %v2389_v8 }
 0x19d   : > { %v2374_v31 = vpop.f32.mrb[13].mxu1  ;;  %v2398_v40 = vadd.f32 %v2390_v33, %v2358_v19  ;;  %v2391_v41 = vmul.f32 %v3205_v35, %v2389_v8 }
 0x19e   : > { %v3201_v39 = vpop.f32.mrb[14].mxu1  ;;  %2408 = vst [vmem:[%s4078_s20 + $0x10] sm:$0xff] %v2400_v57  ;;  %v2401_v43 = vadd.f32 %v3197_v20, %v2393_v37 }
 0x19f   : > { %v2377_v42 = vpop.f32.mrb[15].mxu1  ;;  %2406 = vst [vmem:[%s4078_s20] sm:$0xff] %v2398_v40  ;;  %v2399_v51 = vadd.f32 %v2391_v41, %v2361_v22  ;;  %v3176_v55 = vpop.f32.mrb[4].mxu0 }
 0x1a0   : > { %2409 = vst [vmem:[%s4078_s20 + $0x18] sm:$0xff] %v2401_v43  ;;  %v3206_v44 = vadd.f32 %v3176_v55, %v3056_v18  ;;  %v2206_v0 = vpop.f32.mrb[5].mxu0 }
 0x1a1   : > { %2407 = vst [vmem:[%s4078_s20 + $0x8] sm:$0xff] %v2399_v51  ;;  %v3207_v2 = vadd.f32 %v2206_v0, %v1051_v10  ;;  %v3177_v45 = vpop.f32.mrb[6].mxu0 }
 0x1a2   : > { %v2396_v29 = vmul.f32 %v3206_v44, %v2389_v8  ;;  %v3208_v47 = vadd.f32 %v3177_v45, %v3057_v14  ;;  %v2209_v62 = vpop.f32.mrb[7].mxu0 }
 0x1a3   : > { %v2394_v63 = vmul.f32 %v3207_v2, %v2389_v8  ;;  %v3209_v52 = vadd.f32 %v2209_v62, %v1054_v23 }
 0x1a4   : > { %v2404_v49 = vadd.f32 %v3200_v21, %v2396_v29  ;;  %v2397_v36 = vmul.f32 %v3208_v47, %v2389_v8 }
 0x1a5   : > { %v2402_v53 = vadd.f32 %v2394_v63, %v2374_v31  ;;  %v2395_v30 = vmul.f32 %v3209_v52, %v2389_v8 }
 0x1a6   : > { %2412 = vst [vmem:[%s4078_s20 + $0x30] sm:$0xff] %v2404_v49  ;;  %v2405_v24 = vadd.f32 %v3201_v39, %v2397_v36 }
 0x1a7   : > { %2410 = vst [vmem:[%s4078_s20 + $0x20] sm:$0xff] %v2402_v53  ;;  %v2403_v26 = vadd.f32 %v2395_v30, %v2377_v42 }
 0x1a8   : > { %2413 = vst [vmem:[%s4078_s20 + $0x38] sm:$0xff] %v2405_v24 }
 0x1a9   : > { %2411 = vst [vmem:[%s4078_s20 + $0x28] sm:$0xff] %v2403_v26 }
 0x1aa PF: > { %s16_s18 = sadd.s32 1, %s3403_s18  }
 0x1ab   : > { %p13_p1 = scmp.ge.s32.totalorder %s16_s18, 4  }
 0x1ad   :  { %15 = sbr.rel (!%p13_p1) target bundleno = 1 (0x1), region = 88 }
 0x1b4   :  { %2435 = vsyncpa [#allocation3], 1 }
 0x1b5   :  { %2437 = vsyncpa [#allocation3 + $0x1], 1 }

// kernel: fixup_network_block.10
= control target key start
LH: loop header
LB: loop body
LE: loop exit
PB: predicated region body
PF: predicated region fallthrough
CT: control target
= control target key end

     0   :  { %8 = vsyncpa [#allocation3], 0  ;;  %s3379_s12 = smov 0   ;;  %s4085_s0 = inlined_call_operand.vmem [shape: bf16[2,10,10,128], index: 0, kind: input, shape index: {}]   ;;  %s4086_s1 = inlined_call_operand.vmem [shape: bf16[9,128,128], index: 1, kind: input, shape index: {}]   ;;  %s4087_s2 = inlined_call_operand.vmem [shape: f32[2], index: 2, kind: input, shape index: {}]   ;;  %s4088_s3 = inlined_call_operand.vmem [shape: bf16[2,10,10,128], index: 3, kind: output, shape index: {}]  }
   0x1 LB: > { %s3385_s13 = sadd.s32 4294967295, %s3355_s12   ;;  %p2439_p0 = scmp.ge.s32.totalorder %s3355_s12, 1  ;;  %s3355_s12 = sphi %s3379_s12, %s14_s12  }
   0x2   : > { %p113_p1 = scmp.lt.s32.totalorder %s3355_s12, 3  ;;  %s129_s16 = sshll.u32 %s4087_s2, 4  ;;  %s130_s16 = int_to_ptr.vmem [resolvable:$true] %s129_s16 }
   0x3   : > { %p3234_p3 = scmp.eq.s32.totalorder %s3385_s13, 0  ;;  %s3330_s18 = scalar_lea.vmem %s130_s16, 16 }
   0x4   : > { %p3392_p2 = pnand %p2439_p0, %p113_p1  ;;  %p3331_p6 = scmp.ne.s32.totalorder %s130_s16, %s3330_s18 }
   0x5   : > { %p3338_p10 = scmp.lt.s32.totalorder %s130_s16, %s130_s16  ;;  %p3339_p11 = scmp.lt.s32.totalorder %s3330_s18, %s3330_s18 }
   0x6   : > { %p3230_p4 = pneg %p3392_p2 }
   0x7   : > { %p3340_p12 = por %p3339_p11, %p3338_p10 }
   0x8   : > { %p3231_p5 = pnand %p3234_p3, %p3230_p4 }
   0xa   : > { %p3332_p7 = pneg %p3231_p5 }
   0xc   : > { %p3333_p8 = pnand %p3332_p7, %p3331_p6 }
   0xe   : > { %p3334_p9 = pneg %p3333_p8 }
  0x10   : > { %p3341_p13 = pnand %p3340_p12, %p3334_p9 }
  0x12   : > { %3344 = shalt.err (!%p3341_p13)
}
  0x13   : > { %s3357_s19 = smov [#allocation2]   ;;  %150 = sbr.rel (%p3392_p2) target bundleno = 437 (0x1b5), region = 32 }
  0x14   : > { %3233 = dma.vmem_to_smem (!%p3231_p5), %s130_s16, 16, %s3357_s19, [#allocation3]  }
  0x1a   : > { %3350 = dma.done.wait (%p3234_p3), [#allocation3], 16  }
  0x1b   : > { %3352 = vsyncadd (%p3234_p3), [#allocation3], 4294967280 }
  0x1c   : > { %156 = sfence }
  0x1d   : > { %v3246_v0 = vld [vmem:[%s4086_s1 + $0x40] sm:$0xff]   ;;  %p175_p0 = scmp.lt.s32.totalorder %s3385_s13, 1  ;;  %v3248_v2 = vld [vmem:[%s4086_s1 + $0x48] sm:$0xff]   ;;  %v3250_v4 = vld [vmem:[%s4086_s1 + $0x50] sm:$0xff]   ;;  %vm218_vm0 = vsmask.f32 3328 }
  0x1e   : > { %v3247_v1 = vld [vmem:[%s4086_s1 + $0x100] sm:$0xff]   ;;  %2929 = vmatprep.subr.bf16.mxu1 %v3246_v0  ;;  %v3249_v3 = vld [vmem:[%s4086_s1 + $0x108] sm:$0xff]   ;;  %v3251_v5 = vld [vmem:[%s4086_s1 + $0x110] sm:$0xff]   ;;  %vm219_vm1 = vsmask.f32 7440  ;;  %vm640_vm3 = vcmask 1042432  }
  0x1f   : > { %3025 = vmatprep.subr.bf16.mxu0 %v3247_v1  ;;  %2930 = vmatpush3.bf16.msra.mxu1 %v3246_v0  ;;  %s4099_s13 = smov (!%p175_p0, %s3385_s13), 1  ;;  %v3252_v6 = vld [vmem:[%s4086_s1 + $0x58] sm:$0xff]   ;;  %v3254_v8 = vld [vmem:[%s4086_s1 + $0x60] sm:$0xff]   ;;  %v3256_v10 = vld [vmem:[%s4086_s1 + $0x68] sm:$0xff]   ;;  %vm641_vm4 = vcmask 1046532   ;;  %vm2316_vm6 = vcmask 1043456  }
  0x20   : > { %3026 = vmatpush3.bf16.msra.mxu0 %v3247_v1  ;;  %2931 = vmatprep.subr.bf16.mxu1 %v3248_v2  ;;  %v3253_v7 = vld [vmem:[%s4086_s1 + $0x118] sm:$0xff]   ;;  %s3225_s9 = smul.u32 80, %s4099_s13  ;;  %v3255_v9 = vld [vmem:[%s4086_s1 + $0x120] sm:$0xff]   ;;  %v3257_v14 = vld [vmem:[%s4086_s1 + $0x128] sm:$0xff]   ;;  %s2155_s13 = sld [smem:[#allocation2]]  ;;  %vm2322_vm8 = vcmask 1040384  }
  0x21   : > { %3027 = vmatprep.subr.bf16.mxu0 %v3249_v3  ;;  %v3258_v22 = vld [vmem:[%s4086_s1 + $0x70] sm:$0xff]   ;;  %v3260_v37 = vld [vmem:[%s4086_s1 + $0x78] sm:$0xff]   ;;  %vm3492_vm2 = vmor %vm218_vm0, %vm219_vm1  ;;  %vm2317_vm7 = vsmask.f32 7938  ;;  %vm2323_vm9 = vsmask.f32 256 }
  0x22   : > { %s3447_s18 = scalar_lea.vmem %s4085_s0, %s3225_s9  ;;  %v3259_v23 = vld [vmem:[%s4086_s1 + $0x130] sm:$0xff]   ;;  %v3261_v47 = vld [vmem:[%s4086_s1 + $0x138] sm:$0xff]   ;;  %v3262_v63 = vld [vmem:[%s4086_s1] sm:$0xff]   ;;  %s3970_s29 = scalar_lea.vmem %s4088_s3, %s3225_s9 }
  0x23   : > { %2932 = vmatpush3.bf16.msra.mxu1 %v3248_v2  ;;  %v3453_v11 = vld [vmem:[%s3447_s18] sm:$0xf]  ;;  %v3456_v12 = vld [vmem:[%s3447_s18 + $0x8] sm:$0xf]  ;;  %v3459_v13 = vld [vmem:[%s3447_s18 + $0x4] sm:$0x1] }
  0x24   : > { %3028 = vmatpush3.bf16.msra.mxu0 %v3249_v3  ;;  %2933 = vmatprep.subr.bf16.mxu1 %v3250_v4  ;;  %v3465_v15 = vld [vmem:[%s3447_s18 + $0xc] sm:$0x1]  ;;  %v222_v16 = vshrl.u32 %v3453_v11, 16  ;;  %v225_v17 = vshll.u32 %v3453_v11, 16  ;;  %v231_v18 = vshll.u32 %v3459_v13, 16  ;;  %v236_v19 = vshrl.u32 %v3456_v12, 16  ;;  %vm3666_vm5 = vmor %vm640_vm3, %vm641_vm4 }
  0x25   : > { %3029 = vmatprep.subr.bf16.mxu0 %v3251_v5  ;;  %v239_v20 = vshll.u32 %v3456_v12, 16  ;;  %v245_v21 = vshll.u32 %v3465_v15, 16  ;;  %v2558_v30 = vld [vmem:[%s3447_s18 + $0x8] sm:$0xf]  ;;  %v3481_v31 = vld [vmem:[%s3447_s18 + $0xc] sm:$0x1]  ;;  %vm4003_vm10 = vmand %vm2316_vm6, %vm2317_vm7 }
  0x26   : > { %v224_v24 = vrot.slane %v222_v16, 4  ;;  %v227_v25 = vrot.slane %v225_v17, 5  ;;  %v233_v26 = vrot.slane %v231_v18, 5  ;;  %v238_v27 = vrot.slane %v236_v19, 4  ;;  %v2560_v33 = vld [vmem:[%s3447_s18 + $0x10] sm:$0xf]  ;;  %vm4010_vm11 = vmand %vm2322_vm8, %vm2323_vm9 }
  0x27   : > { %2934 = vmatpush3.bf16.msra.mxu1 %v3250_v4  ;;  %v241_v28 = vrot.slane %v239_v20, 5  ;;  %v247_v29 = vrot.slane %v245_v21, 5  ;;  %v3485_v34 = vld [vmem:[%s3447_s18 + $0x14] sm:$0x1]  ;;  %v1017_v35 = vshrl.u32 %v2558_v30, 16  ;;  %v1020_v36 = vshll.u32 %v2558_v30, 16 }
  0x28   : > { %3030 = vmatpush3.bf16.msra.mxu0 %v3251_v5  ;;  %2935 = vmatprep.subr.bf16.mxu1 %v3252_v6  ;;  %v228_v32 = vor.u32 %v227_v25, %v224_v24  ;;  %v1026_v40 = vshll.u32 %v3481_v31, 16  ;;  %v1031_v41 = vshrl.u32 %v2560_v33, 16  ;;  %v1034_v42 = vshll.u32 %v2560_v33, 16  ;;  %v3502_v51 = vld [vmem:[%s3447_s18 + $0x10] sm:$0xf]  ;;  %v3524_v1 = vld [vmem:[%s4086_s1 + $0x140] sm:$0xff]  }
  0x29   : > { %3031 = vmatprep.subr.bf16.mxu0 %v3253_v7  ;;  %v242_v39 = vor.u32 %v241_v28, %v238_v27  ;;  %v1019_v44 = vrot.slane %v1017_v35, 4  ;;  %v1022_v45 = vrot.slane %v1020_v36, 5  ;;  %v1040_v46 = vshll.u32 %v3485_v34, 16  ;;  %v3507_v55 = vld [vmem:[%s3447_s18 + $0x18] sm:$0xf]  ;;  %v3326_v38 = vld [vmem:[%s4086_s1 + $0x220] sm:$0xff]  }
  0x2a   : > { %v229_v43 = vrot.slane %v228_v32, 4  ;;  %v1033_v49 = vrot.slane %v1031_v41, 4  ;;  %v1036_v50 = vrot.slane %v1034_v42, 5  ;;  %v1028_v54 = vrot.slane %v1026_v40, 5  ;;  %v3510_v56 = vld [vmem:[%s3447_s18 + $0x14] sm:$0x1] }
  0x2b   : > { %2936 = vmatpush3.bf16.msra.mxu1 %v3252_v6  ;;  %v243_v48 = vrot.slane %v242_v39, 4  ;;  %v1023_v53 = vor.u32 %v1022_v45, %v1019_v44  ;;  %v1042_v59 = vrot.slane %v1040_v46, 5  ;;  %v3515_v60 = vld [vmem:[%s3447_s18 + $0x1c] sm:$0x1]  ;;  %v250_v61 = vshrl.u32 %v3502_v51, 16  ;;  %s2770_s9 = sld [smem:[#allocation2 + $0x1]] }
  0x2c   : > { %3032 = vmatpush3.bf16.msra.mxu0 %v3253_v7  ;;  %2937 = vmatprep.subr.bf16.mxu1 %v3254_v8  ;;  %v234_v52 = vsel %vm3492_vm2, %v229_v43, %v233_v26  ;;  %v1037_v58 = vor.u32 %v1036_v50, %v1033_v49  ;;  %v253_v2 = vshll.u32 %v3502_v51, 16  ;;  %v259_v3 = vshll.u32 %v3510_v56, 16  ;;  %v3535_v16 = vld [vmem:[%s3447_s18 + $0x1c] sm:$0x1]  ;;  %v2564_v17 = vld [vmem:[%s3447_s18 + $0x20] sm:$0xf] }
  0x2d   : > { %3033 = vmatprep.subr.bf16.mxu0 %v3255_v9  ;;  %v248_v57 = vsel %vm3492_vm2, %v243_v48, %v247_v29  ;;  %v1024_v0 = vrot.slane %v1023_v53, 4  ;;  %v252_v5 = vrot.slane %v250_v61, 4  ;;  %v264_v6 = vshrl.u32 %v3507_v55, 16  ;;  %v3541_v21 = vld [vmem:[%s3447_s18 + $0x24] sm:$0x1]  ;;  %v3264_v43 = vld [vmem:[%s4086_s1 + $0x8] sm:$0xff]  }
  0x2e   : > { %v2462_v62 = vcombine.low %v234_v52, %v248_v57  ;;  %v1038_v4 = vrot.slane %v1037_v58, 4  ;;  %v267_v7 = vshll.u32 %v3507_v55, 16  ;;  %v261_v24 = vrot.slane %v259_v3, 5 }
  0x2f   : > { %2938 = vmatpush3.bf16.msra.mxu1 %v3254_v8  ;;  %v2562_v8 = vld [vmem:[%s3447_s18 + $0x18] sm:$0xf]  ;;  %v266_v19 = vrot.slane %v264_v6, 4  ;;  %v1054_v29 = vshll.u32 %v3535_v16, 16  ;;  %v1059_v32 = vshrl.u32 %v2564_v17, 16  ;;  %v1062_v33 = vshll.u32 %v2564_v17, 16 }
  0x30   : > { %3034 = vmatpush3.bf16.msra.mxu0 %v3255_v9  ;;  %2939 = vmatprep.subr.bf16.mxu1 %v3256_v10  ;;  %v1029_v9 = vsel %vm3492_vm2, %v1024_v0, %v1028_v54  ;;  %v1043_v18 = vsel %vm3492_vm2, %v1038_v4, %v1042_v59  ;;  %v269_v20 = vrot.slane %v267_v7, 5  ;;  %v1045_v27 = vshrl.u32 %v2562_v8, 16  ;;  %v3265_v54 = vld [vmem:[%s4086_s1 + $0x148] sm:$0xff]   ;;  %v3266_v59 = vld [vmem:[%s4086_s1 + $0x10] sm:$0xff]   ;;  %v3571_v0 = vld [vmem:[%s3447_s18 + $0x24] sm:$0x1] }
  0x31   : > { %3035 = vmatprep.subr.bf16.mxu0 %v3257_v14  ;;  %2945 = vmatprep.mubr.bf16.mxu1 %v2462_v62  ;;  %v1048_v28 = vshll.u32 %v2562_v8, 16  ;;  %v1068_v35 = vshll.u32 %v3541_v21, 16  ;;  %v1061_v41 = vrot.slane %v1059_v32, 4  ;;  %v1064_v42 = vrot.slane %v1062_v33, 5  ;;  %v3565_v62 = vld [vmem:[%s3447_s18 + $0x20] sm:$0xf] }
  0x32   : > { %v270_v26 = vor.u32 %v269_v20, %v266_v19  ;;  %v1056_v46 = vrot.slane %v1054_v29, 5  ;;  %v1308_v57 = vrot.slane %v3481_v31, 5  ;;  %v278_v3 = vshrl.u32 %v3565_v62, 16  ;;  %v3269_v29 = vld [vmem:[%s4086_s1 + $0x158] sm:$0xff]  }
  0x33   : > { %2940 = vmatpush3.bf16.msra.mxu1 %v3256_v10  ;;  %v255_v10 = vrot.slane %v253_v2, 5  ;;  %v1050_v39 = vrot.slane %v1048_v28, 5  ;;  %v1065_v49 = vor.u32 %v1064_v42, %v1061_v41  ;;  %v3574_v2 = vld [vmem:[%s3447_s18 + $0x2c] sm:$0x1]  ;;  %v281_v4 = vshll.u32 %v3565_v62, 16 }
  0x34   : > { %3036 = vmatpush3.bf16.msra.mxu0 %v3257_v14  ;;  %2941 = vmatprep.subr.bf16.mxu1 %v3258_v22  ;;  %v273_v14 = vshll.u32 %v3515_v60, 16  ;;  %v271_v36 = vrot.slane %v270_v26, 4  ;;  %v301_v8 = vshll.u32 %v3574_v2, 16  ;;  %v3595_v26 = vld [vmem:[%s3447_s18 + $0x34] sm:$0x1] }
  0x35   : > { %3037 = vmatprep.subr.bf16.mxu0 %v3259_v23  ;;  %v1066_v52 = vrot.slane %v1065_v49, 4  ;;  %v283_v17 = vrot.slane %v281_v4, 5  ;;  %v1096_v41 = vshll.u32 %v3595_v26, 16 }
  0x36   : > { %v275_v25 = vrot.slane %v273_v14, 5  ;;  %v280_v14 = vrot.slane %v278_v3, 4 }
  0x37   : > { %2942 = vmatpush3.bf16.msra.mxu1 %v3258_v22  ;;  %v2590_v22 = vcombine.low %v1029_v9, %v1043_v18  ;;  %v3267_v9 = vld [vmem:[%s4086_s1 + $0x150] sm:$0xff]   ;;  %v1098_v49 = vrot.slane %v1096_v41, 5 }
  0x38   : > { %3038 = vmatpush3.bf16.msra.mxu0 %v3259_v23  ;;  %2943 = vmatprep.subr.bf16.mxu1 %v3260_v37  ;;  %v256_v23 = vor.u32 %v255_v10, %v252_v5  ;;  %v276_v44 = vsel %vm3492_vm2, %v271_v36, %v275_v25  ;;  %v287_v5 = vshll.u32 %v3571_v0, 16  ;;  %v3268_v10 = vld [vmem:[%s4086_s1 + $0x18] sm:$0xff]   ;;  %v2568_v25 = vld [vmem:[%s3447_s18 + $0x30] sm:$0xf] }
  0x39   : > { %3039 = vmatprep.subr.bf16.mxu0 %v3261_v47  ;;  %3041 = vmatprep.mubr.bf16.mxu0 %v2590_v22  ;;  %v303_v22 = vrot.slane %v301_v8, 5  ;;  %v1090_v36 = vshll.u32 %v2568_v25, 16 }
  0x3a   : > { %v257_v30 = vrot.slane %v256_v23, 4  ;;  %v289_v18 = vrot.slane %v287_v5, 5  ;;  %v2566_v23 = vld [vmem:[%s3447_s18 + $0x28] sm:$0xf]  ;;  %v2570_v5 = vld [vmem:[%s3447_s18 + $0x38] sm:$0xf] }
  0x3b   : > { %2944 = vmatpush3.bf16.msra.mxu1 %v3260_v37  ;;  %v1047_v37 = vrot.slane %v1045_v27, 4  ;;  %v1073_v27 = vshrl.u32 %v2566_v23, 16  ;;  %v1076_v28 = vshll.u32 %v2566_v23, 16 }
  0x3c   : > { %3040 = vmatpush3.bf16.msra.mxu0 %v3261_v47  ;;  %2953 = vmatprep.subr.bf16.mxu1 %v3262_v63  ;;  %v262_v40 = vsel %vm3492_vm2, %v257_v30, %v261_v24  ;;  %v1070_v47 = vrot.slane %v1068_v35, 5  ;;  %v3591_v24 = vld [vmem:[%s3447_s18 + $0x2c] sm:$0x1]  ;;  %v3270_v30 = vld [vmem:[%s4086_s1 + $0x20] sm:$0xff]   ;;  %v1087_v35 = vshrl.u32 %v2568_v25, 16 }
  0x3d   : > { %3049 = vmatprep.subr.bf16.mxu0 %v3524_v1  ;;  %v1051_v45 = vor.u32 %v1050_v39, %v1047_v37  ;;  %v2463_v48 = vcombine.low %v262_v40, %v276_v44  ;;  %v1082_v33 = vshll.u32 %v3591_v24, 16  ;;  %v1075_v39 = vrot.slane %v1073_v27, 4  ;;  %v3641_v27 = vld [vmem:[%s3447_s18 + $0x44] sm:$0x1] }
  0x3e   : > { %v1071_v58 = vsel %vm3492_vm2, %v1066_v52, %v1070_v47  ;;  %v1078_v40 = vrot.slane %v1076_v28, 5  ;;  %v1089_v44 = vrot.slane %v1087_v35, 4  ;;  %v3614_v52 = vld [vmem:[%s3447_s18 + $0x34] sm:$0x1]  ;;  %v1101_v28 = vshrl.u32 %v2570_v5, 16 }
  0x3f   : > { %v1052_v50 = vrot.slane %v1051_v45, 4  ;;  %2946 = vmatmul.mubr.bf16.vlgmr.msra.gmra.mrb[0].mxu1 %v2463_v48  ;;  %v1092_v45 = vrot.slane %v1090_v36, 5  ;;  %v315_v4 = vshll.u32 %v3614_v52, 16  ;;  %v1104_v36 = vshll.u32 %v2570_v5, 16 }
  0x40   : > { %2954 = vmatpush3.bf16.msra.mxu1 %v3262_v63  ;;  %v3568_v63 = vld [vmem:[%s3447_s18 + $0x28] sm:$0xf]  ;;  %v1079_v48 = vor.u32 %v1078_v40, %v1075_v39  ;;  %v1103_v41 = vrot.slane %v1101_v28, 4  ;;  %v3277_v28 = vld [vmem:[%s4086_s1 + $0x178] sm:$0xff]  }
  0x41   : > { %v1057_v53 = vsel %vm3492_vm2, %v1052_v50, %v1056_v46  ;;  %2955 = vmatprep.subr.bf16.mxu1 %v3264_v43  ;;  %v292_v6 = vshrl.u32 %v3568_v63, 16  ;;  %v295_v7 = vshll.u32 %v3568_v63, 16  ;;  %v3606_v46 = vld [vmem:[%s3447_s18 + $0x30] sm:$0xf]  ;;  %v3611_v50 = vld [vmem:[%s3447_s18 + $0x38] sm:$0xf] }
  0x42   : > { %v2591_v61 = vcombine.low %v1057_v53, %v1071_v58  ;;  %v306_v53 = vshrl.u32 %v3606_v46, 16  ;;  %v309_v3 = vshll.u32 %v3606_v46, 16  ;;  %v1080_v8 = vrot.slane %v1079_v48, 4 }
  0x43   : > { %v294_v19 = vrot.slane %v292_v6, 4  ;;  %v297_v20 = vrot.slane %v295_v7, 5  ;;  %v3272_v6 = vld [vmem:[%s4086_s1 + $0x28] sm:$0xff]   ;;  %v1316_v48 = vrot.slane %v3535_v16, 5 }
  0x44   : > { %3042 = vmatmul.mubr.bf16.vlgmr.msra.gmra.mrb[0].mxu0 %v2591_v61  ;;  %2956 = vmatpush3.bf16.msra.mxu1 %v3264_v43  ;;  %v1084_v43 = vrot.slane %v1082_v33, 5  ;;  %v3623_v61 = vld [vmem:[%s3447_s18 + $0x3c] sm:$0x1] }
  0x45   : > { %3050 = vmatpush3.bf16.msra.mxu0 %v3524_v1  ;;  %2957 = vmatprep.subr.bf16.mxu1 %v3266_v59  ;;  %v284_v1 = vor.u32 %v283_v17, %v280_v14  ;;  %v298_v32 = vor.u32 %v297_v20, %v294_v19  ;;  %v320_v14 = vshrl.u32 %v3611_v50, 16  ;;  %v3633_v17 = vld [vmem:[%s3447_s18 + $0x3c] sm:$0x1]  ;;  %v311_v19 = vrot.slane %v309_v3, 5 }
  0x46   : > { %3051 = vmatprep.subr.bf16.mxu0 %v3265_v54  ;;  %v317_v20 = vrot.slane %v315_v4, 5  ;;  %v1085_v23 = vsel %vm3492_vm2, %v1080_v8, %v1084_v43  ;;  %v329_v25 = vshll.u32 %v3623_v61, 16  ;;  %v3358_v8 = vmov 0  }
  0x47   : > { %v285_v37 = vrot.slane %v284_v1, 4  ;;  %v299_v42 = vrot.slane %v298_v32, 4  ;;  %v322_v1 = vrot.slane %v320_v14, 4  ;;  %2189 = vst [vmem:[%s3970_s29 + $0x18] sm:$0xf] %v3358_v8  ;;  %2183 = vst [vmem:[%s3970_s29] sm:$0xf] %v3358_v8 }
  0x48   : > { %2958 = vmatpush3.bf16.msra.mxu1 %v3266_v59  ;;  %v1093_v59 = vor.u32 %v1092_v45, %v1089_v44  ;;  %v331_v40 = vrot.slane %v329_v25, 5  ;;  %v1106_v45 = vrot.slane %v1104_v36, 5  ;;  %v2604_v25 = vld [vmem:[%s3447_s18 + $0x18] sm:$0xe]  ;;  %2190 = vst [vmem:[%s3970_s29 + $0x1c] sm:$0x1] %v3358_v8 }
  0x49   : > { %3052 = vmatpush3.bf16.msra.mxu0 %v3265_v54  ;;  %2959 = vmatprep.subr.bf16.mxu1 %v3268_v10  ;;  %v290_v47 = vsel %vm3492_vm2, %v285_v37, %v289_v18  ;;  %v3271_v54 = vld [vmem:[%s4086_s1 + $0x160] sm:$0xff]   ;;  %v304_v58 = vsel %vm3492_vm2, %v299_v42, %v303_v22  ;;  %v323_v22 = vshll.u32 %v3611_v50, 16  ;;  %v3274_v37 = vld [vmem:[%s4086_s1 + $0x30] sm:$0xff]   ;;  %v1110_v42 = vshll.u32 %v3633_v17, 16  ;;  %2184 = vst [vmem:[%s3970_s29 + $0x4] sm:$0x1] %v3358_v8 }
  0x4a   : > { %3053 = vmatprep.subr.bf16.mxu0 %v3267_v9  ;;  %v2464_v7 = vcombine.low %v290_v47, %v304_v58  ;;  %v1094_v18 = vrot.slane %v1093_v59, 4  ;;  %v1312_v47 = vrot.slane %v3485_v34, 5  ;;  %v3275_v58 = vld [vmem:[%s4086_s1 + $0x170] sm:$0xff]   ;;  %v1107_v4 = vor.u32 %v1106_v45, %v1103_v41  ;;  %v3280_v41 = vld [vmem:[%s4086_s1 + $0x180] sm:$0xff]   ;;  %2185 = vst [vmem:[%s3970_s29 + $0x8] sm:$0xf] %v3358_v8 }
  0x4b   : > { %v325_v35 = vrot.slane %v323_v22, 5  ;;  %v1112_v34 = vrot.slane %v1110_v42, 5  ;;  %v1320_v22 = vrot.slane %v3541_v21, 5  ;;  %v2612_v36 = vrot.slane %v2604_v25, 9  ;;  %2186 = vst [vmem:[%s3970_s29 + $0xc] sm:$0x1] %v3358_v8 }
  0x4c   : > { %2960 = vmatpush3.bf16.msra.mxu1 %v3268_v10  ;;  %v308_v10 = vrot.slane %v306_v53, 4  ;;  %2949 = vmatprep.mubr.bf16.mxu1 %v2464_v7  ;;  %v1099_v32 = vsel %vm3492_vm2, %v1094_v18, %v1098_v49  ;;  %v1124_v53 = vshll.u32 %v3641_v27, 16  ;;  %v2602_v7 = vld [vmem:[%s3447_s18 + $0x8] sm:$0xe]  ;;  %v1108_v18 = vrot.slane %v1107_v4, 4 }
  0x4d   : > { %3054 = vmatpush3.bf16.msra.mxu0 %v3267_v9  ;;  %2961 = vmatprep.subr.bf16.mxu1 %v3270_v30  ;;  %v2572_v9 = vld [vmem:[%s3447_s18 + $0x40] sm:$0xf]  ;;  %v2592_v39 = vcombine.low %v1085_v23, %v1099_v32  ;;  %v326_v44 = vor.u32 %v325_v35, %v322_v1  ;;  %v2610_v14 = vrot.slane %v2602_v7, 9  ;;  %v1317_v42 = vsel %vm3666_vm5, %v2612_v36, %v1316_v48 }
  0x4e   : > { %3055 = vmatprep.subr.bf16.mxu0 %v3269_v29  ;;  %v312_v33 = vor.u32 %v311_v19, %v308_v10  ;;  %v1118_v49 = vshll.u32 %v2572_v9, 16  ;;  %v2603_v10 = vld [vmem:[%s3447_s18 + $0x10] sm:$0xe]  ;;  %v2474_v19 = vcombine.low %v3453_v11, %v3456_v12  ;;  %v1126_v1 = vrot.slane %v1124_v53, 5  ;;  %v2605_v12 = vld [vmem:[%s3447_s18 + $0x20] sm:$0xe] }
  0x4f   : > { %3045 = vmatprep.mubr.bf16.mxu0 %v2592_v39  ;;  %v327_v3 = vrot.slane %v326_v44, 4  ;;  %v1309_v32 = vsel %vm3666_vm5, %v2610_v14, %v1308_v57  ;;  %v1113_v21 = vsel %vm3492_vm2, %v1108_v18, %v1112_v34  ;;  %v3279_v35 = vld [vmem:[%s4086_s1 + $0x80] sm:$0xff]   ;;  %v3284_v44 = vld [vmem:[%s4086_s1 + $0x90] sm:$0xff]   ;;  %v1324_v45 = vrot.slane %v3591_v24, 5  ;;  %2187 = vst [vmem:[%s3970_s29 + $0x10] sm:$0xf] %v3358_v8 }
  0x50   : > { %2962 = vmatpush3.bf16.msra.mxu1 %v3270_v30  ;;  %v3273_v30 = vld [vmem:[%s4086_s1 + $0x168] sm:$0xff]   ;;  %v313_v43 = vrot.slane %v312_v33, 4  ;;  %v1120_v16 = vrot.slane %v1118_v49, 5  ;;  %v1332_v53 = vrot.slane %v3633_v17, 5  ;;  %v1336_v24 = vrot.slane %v3641_v27, 5  ;;  %v3288_v18 = vld [vmem:[%s4086_s1 + $0xa0] sm:$0xff]  }
  0x51   : > { %3056 = vmatpush3.bf16.msra.mxu0 %v3269_v29  ;;  %2963 = vmatprep.subr.bf16.mxu1 %v3272_v6  ;;  %v1115_v29 = vshrl.u32 %v2572_v9, 16  ;;  %v649_v34 = vrot.slane %v3465_v15, 5  ;;  %v653_v17 = vrot.slane %v3510_v56, 5  ;;  %v617_v15 = vld [vmem:[%s3447_s18 + $0x8] sm:$0xe]  ;;  %v661_v36 = vrot.slane %v3571_v0, 5 }
  0x52   : > { %3057 = vmatprep.subr.bf16.mxu0 %v3271_v54  ;;  %v318_v59 = vsel %vm3492_vm2, %v313_v43, %v317_v20  ;;  %v2611_v20 = vrot.slane %v2603_v10, 9  ;;  %v3282_v43 = vld [vmem:[%s4086_s1 + $0x88] sm:$0xff]   ;;  %v3285_v10 = vld [vmem:[%s4086_s1 + $0x190] sm:$0xff]   ;;  %v2487_v14 = vrot.slane %v617_v15, 9  ;;  %v3298_v0 = vld [vmem:[%s4086_s1 + $0xc0] sm:$0xff]  }
  0x53   : > { %v1117_v5 = vrot.slane %v1115_v29, 4  ;;  %v1328_v29 = vrot.slane %v3595_v26, 5  ;;  %v2477_v26 = vcombine.low %v3606_v46, %v3611_v50  ;;  %v3286_v46 = vld [vmem:[%s4086_s1 + $0x98] sm:$0xff]   ;;  %v3303_v15 = vld [vmem:[%s4086_s1 + $0x1c8] sm:$0xff]   ;;  %2188 = vst [vmem:[%s3970_s29 + $0x14] sm:$0x1] %v3358_v8 }
  0x54   : > { %2964 = vmatpush3.bf16.msra.mxu1 %v3272_v6  ;;  %v3276_v6 = vld [vmem:[%s4086_s1 + $0x38] sm:$0xff]   ;;  %v1313_v11 = vsel %vm3666_vm5, %v2611_v20, %v1312_v47  ;;  %2191 = vst [vmem:[%s3970_s29 + $0x20] sm:$0xf] %v3358_v8  ;;  %2192 = vst [vmem:[%s3970_s29 + $0x24] sm:$0x1] %v3358_v8 }
  0x55   : > { %3058 = vmatpush3.bf16.msra.mxu0 %v3271_v54  ;;  %2965 = vmatprep.subr.bf16.mxu1 %v3274_v37  ;;  %v332_v54 = vsel %vm3492_vm2, %v327_v3, %v331_v40  ;;  %v1121_v23 = vor.u32 %v1120_v16, %v1117_v5  ;;  %v2634_v57 = vcombine.low %v1309_v32, %v1313_v11  ;;  %v616_v16 = vld [vmem:[%s3447_s18] sm:$0xe]  ;;  %v3287_v20 = vld [vmem:[%s4086_s1 + $0x198] sm:$0xff]  }
  0x56   : > { %3059 = vmatprep.subr.bf16.mxu0 %v3273_v30  ;;  %v2465_v9 = vcombine.low %v318_v59, %v332_v54  ;;  %v2475_v40 = vcombine.low %v3502_v51, %v3507_v55  ;;  %v2476_v51 = vcombine.low %v3565_v62, %v3568_v63  ;;  %v645_v55 = vrot.slane %v3459_v13, 5  ;;  %v3283_v62 = vld [vmem:[%s4086_s1 + $0x188] sm:$0xff]   ;;  %v2607_v63 = vld [vmem:[%s3447_s18 + $0x30] sm:$0xe]  ;;  %v2609_v59 = vld [vmem:[%s3447_s18 + $0x40] sm:$0xe] }
  0x57   : > { %v1122_v33 = vrot.slane %v1121_v23, 4  ;;  %v2606_v13 = vld [vmem:[%s3447_s18 + $0x28] sm:$0xe]  ;;  %v2615_v49 = vrot.slane %v2607_v63, 9  ;;  %v2617_v7 = vrot.slane %v2609_v59, 9  ;;  %v2486_v56 = vrot.slane %v616_v16, 9 }
  0x58   : > { %2966 = vmatpush3.bf16.msra.mxu1 %v3274_v37  ;;  %v2613_v37 = vrot.slane %v2605_v12, 9  ;;  %v2614_v48 = vrot.slane %v2606_v13, 9  ;;  %v657_v54 = vrot.slane %v3515_v60, 5  ;;  %v618_v23 = vld [vmem:[%s3447_s18 + $0x10] sm:$0xe] }
  0x59   : > { %3060 = vmatpush3.bf16.msra.mxu0 %v3273_v30  ;;  %2950 = vmatmul.mubr.bf16.gmra.mrb[4].mxu1 %v2465_v9  ;;  %v1127_v31 = vsel %vm3492_vm2, %v1122_v33, %v1126_v1  ;;  %v1329_v4 = vsel %vm3666_vm5, %v2615_v49, %v1328_v29  ;;  %v650_v9 = vsel %vm3666_vm5, %v2487_v14, %v649_v34  ;;  %v619_v60 = vld [vmem:[%s3447_s18 + $0x18] sm:$0xe]  ;;  %v2488_v25 = vrot.slane %v618_v23, 9  ;;  %v3290_v33 = vld [vmem:[%s4086_s1 + $0xa8] sm:$0xff]  }
  0x5a   : > { %3061 = vmatprep.subr.bf16.mxu0 %v3275_v58  ;;  %2967 = vmatprep.subr.bf16.mxu1 %v3276_v6  ;;  %v2593_v39 = vcombine.low %v1113_v21, %v1127_v31  ;;  %v1321_v30 = vsel %vm3666_vm5, %v2613_v37, %v1320_v22  ;;  %v1325_v3 = vsel %vm3666_vm5, %v2614_v48, %v1324_v45  ;;  %v3299_v32 = vld [vmem:[%s3447_s18 + $0x10] ss:$8 sps:$4 sm:$0xff]   ;;  %v669_v29 = vrot.slane %v3614_v52, 5  ;;  %v3302_v49 = vld [vmem:[%s4086_s1 + $0xc8] sm:$0xff]  }
  0x5b   : > { %2969 = vmatprep.mubr.bf16.mxu1 %v2474_v19  ;;  %v2635_v47 = vcombine.low %v1317_v42, %v1321_v30  ;;  %v2636_v27 = vcombine.low %v1325_v3, %v1329_v4  ;;  %v646_v19 = vsel %vm3666_vm5, %v2486_v56, %v645_v55  ;;  %v654_v11 = vsel %vm3666_vm5, %v2488_v25, %v653_v17  ;;  %v3293_v31 = vld [vmem:[%s4086_s1 + $0xb0] sm:$0xff]   ;;  %v3296_v37 = vld [vmem:[%s4086_s1 + $0xb8] sm:$0xff]   ;;  %v2688_v25 = vld [vmem:[%s3447_s18 + $0x28] sm:$0xf] }
  0x5c   : > { %2968 = vmatpush3.bf16.msra.mxu1 %v3276_v6  ;;  %3046 = vmatmul.mubr.bf16.gmra.mrb[4].mxu0 %v2593_v39  ;;  %v1337_v6 = vsel %vm3666_vm5, %v2617_v7, %v1336_v24  ;;  %v2510_v1 = vcombine.low %v646_v19, %v650_v9  ;;  %v620_v39 = vld [vmem:[%s3447_s18 + $0x20] sm:$0xe]  ;;  %v3297_v45 = vld [vmem:[%s4086_s1 + $0x1b8] sm:$0xff]   ;;  %v3805_v24 = vld [vmem:[%s3447_s18 + $0x14] sm:$0x1] }
  0x5d   : > { %3062 = vmatpush3.bf16.msra.mxu0 %v3275_v58  ;;  %2977 = vmatprep.subr.bf16.mxu1 %v3279_v35  ;;  %v2608_v58 = vld [vmem:[%s3447_s18 + $0x38] sm:$0xe]  ;;  %v2490_v42 = vrot.slane %v620_v39, 9  ;;  %v1689_v59 = vshll.u32 %v3805_v24, 16  ;;  %v3301_v7 = vld [vmem:[%s3447_s18 + $0x20] ss:$8 sps:$4 sm:$0xff]  }
  0x5e   : > { %3063 = vmatprep.subr.bf16.mxu0 %v3277_v28  ;;  %3065 = vmatprep.mubr.bf16.mxu0 %v2634_v57  ;;  %v2616_v5 = vrot.slane %v2608_v58, 9  ;;  %v3291_v57 = vld [vmem:[%s4086_s1 + $0x1a8] sm:$0xff]   ;;  %v2684_v52 = vld [vmem:[%s3447_s18 + $0x18] sm:$0xf]  ;;  %v3305_v9 = vld [vmem:[%s4086_s1 + $0x1d0] sm:$0xff]  }
  0x5f   : > { %v1694_v3 = vshrl.u32 %v2684_v52, 16  ;;  %v1697_v4 = vshll.u32 %v2684_v52, 16  ;;  %v3312_v56 = vld [vmem:[%s3447_s18 + $0x30] ss:$8 sps:$4 sm:$0xff]   ;;  %v3311_v52 = vld [vmem:[%s4086_s1 + $0x1e8] sm:$0xff]  }
  0x60   : > { %v1333_v50 = vsel %vm3666_vm5, %v2616_v5, %v1332_v53  ;;  %v2682_v53 = vld [vmem:[%s3447_s18 + $0x10] sm:$0xf]  ;;  %v3306_v23 = vld [vmem:[%s4086_s1 + $0xd8] sm:$0xff]   ;;  %2193 = vst [vmem:[%s3970_s29 + $0x28] sm:$0xf] %v3358_v8 }
  0x61   : > { %3064 = vmatpush3.bf16.msra.mxu0 %v3277_v28  ;;  %2970 = vmatmul.mubr.bf16.vlgmr.msra.gmra.mrb[0].mxu1 %v2475_v40  ;;  %v2637_v22 = vcombine.low %v1333_v50, %v1337_v6  ;;  %v2489_v28 = vrot.slane %v619_v60, 9  ;;  %v621_v40 = vld [vmem:[%s3447_s18 + $0x28] sm:$0xe]  ;;  %v1683_v58 = vshll.u32 %v2682_v53, 16  ;;  %v1696_v50 = vrot.slane %v1694_v3, 4 }
  0x62   : > { %3073 = vmatprep.subr.bf16.mxu0 %v3280_v41  ;;  %2978 = vmatpush3.bf16.msra.mxu1 %v3279_v35  ;;  %v3289_v35 = vld [vmem:[%s4086_s1 + $0x1a0] sm:$0xff]   ;;  %v2491_v30 = vrot.slane %v621_v40, 9  ;;  %v1699_v6 = vrot.slane %v1697_v4, 5  ;;  %2194 = vst [vmem:[%s3970_s29 + $0x2c] sm:$0x1] %v3358_v8 }
  0x63   : > { %2979 = vmatprep.subr.bf16.mxu1 %v3282_v43  ;;  %2973 = vmatprep.mubr.bf16.mxu1 %v2476_v51  ;;  %v658_v12 = vsel %vm3666_vm5, %v2489_v28, %v657_v54  ;;  %v622_v51 = vld [vmem:[%s3447_s18 + $0x30] sm:$0xe]  ;;  %v1685_v16 = vrot.slane %v1683_v58, 5  ;;  %v1691_v54 = vrot.slane %v1689_v59, 5  ;;  %2195 = vst [vmem:[%s3970_s29 + $0x30] sm:$0xf] %v3358_v8 }
  0x64   : > { %3066 = vmatmul.mubr.bf16.vlgmr.msra.gmra.mrb[0].mxu0 %v2635_v47  ;;  %v2511_v21 = vcombine.low %v654_v11, %v658_v12  ;;  %v673_v47 = vrot.slane %v3623_v61, 5  ;;  %v2492_v63 = vrot.slane %v622_v51, 9  ;;  %v3809_v61 = vld [vmem:[%s3447_s18 + $0x1c] sm:$0x1]  ;;  %v3314_v11 = vld [vmem:[%s3447_s18 + $0x40] ss:$8 sps:$4 sm:$0xff]  }
  0x65   : > { %3074 = vmatpush3.bf16.msra.mxu0 %v3280_v41  ;;  %3069 = vmatprep.mubr.bf16.mxu0 %v2636_v27  ;;  %v665_v41 = vrot.slane %v3574_v2, 5  ;;  %v662_v2 = vsel %vm3666_vm5, %v2490_v42, %v661_v36  ;;  %v1703_v5 = vshll.u32 %v3809_v61, 16  ;;  %v2690_v12 = vld [vmem:[%s3447_s18 + $0x30] sm:$0xf]  ;;  %v1725_v36 = vshll.u32 %v2688_v25, 16 }
  0x66   : > { %2980 = vmatpush3.bf16.msra.mxu1 %v3282_v43  ;;  %3075 = vmatprep.subr.bf16.mxu0 %v3283_v62  ;;  %v3294_v43 = vld [vmem:[%s4086_s1 + $0x1b0] sm:$0xff]   ;;  %v670_v34 = vsel %vm3666_vm5, %v2492_v63, %v669_v29  ;;  %v1736_v40 = vshrl.u32 %v2690_v12, 16  ;;  %v3854_v51 = vld [vmem:[%s3447_s18 + $0x24] sm:$0x1]  ;;  %2196 = vst [vmem:[%s3970_s29 + $0x34] sm:$0x1] %v3358_v8 }
  0x67   : > { %2981 = vmatprep.subr.bf16.mxu1 %v3284_v44  ;;  %v666_v55 = vsel %vm3666_vm5, %v2491_v30, %v665_v41  ;;  %v1705_v19 = vrot.slane %v1703_v5, 5  ;;  %v1739_v41 = vshll.u32 %v2690_v12, 16  ;;  %v1727_v29 = vrot.slane %v1725_v36, 5  ;;  %v2696_v5 = vld [vmem:[%s3447_s18 + $0x48] sm:$0xf]  ;;  %v3317_v12 = vld [vmem:[%s4086_s1 + $0x1f8] sm:$0xff]  }
  0x68   : > { %v2512_v13 = vcombine.low %v662_v2, %v666_v55  ;;  %v3857_v2 = vld [vmem:[%s3447_s18 + $0x2c] sm:$0x1]  ;;  %v1717_v58 = vshll.u32 %v3854_v51, 16  ;;  %2197 = vst [vmem:[%s3970_s29 + $0x38] sm:$0xf] %v3358_v8 }
  0x69   : > { %2974 = vmatmul.mubr.bf16.gmra.mrb[4].mxu1 %v2477_v26  ;;  %3076 = vmatpush3.bf16.msra.mxu0 %v3283_v62  ;;  %v3300_v62 = vld [vmem:[%s4086_s1 + $0x1c0] sm:$0xff]   ;;  %v1680_v26 = vshrl.u32 %v2682_v53, 16  ;;  %v1741_v63 = vrot.slane %v1739_v41, 5  ;;  %v1731_v59 = vshll.u32 %v3857_v2, 16  ;;  %2198 = vst [vmem:[%s3970_s29 + $0x3c] sm:$0x1] %v3358_v8 }
  0x6a   : > { %2982 = vmatpush3.bf16.msra.mxu1 %v3284_v44  ;;  %3077 = vmatprep.subr.bf16.mxu0 %v3285_v10  ;;  %v623_v44 = vld [vmem:[%s3447_s18 + $0x38] sm:$0xe]  ;;  %v2694_v53 = vld [vmem:[%s3447_s18 + $0x40] sm:$0xf]  ;;  %2199 = vst [vmem:[%s3970_s29 + $0x40] sm:$0xf] %v3358_v8 }
  0x6b   : > { %2983 = vmatprep.subr.bf16.mxu1 %v3286_v46  ;;  %2993 = vmatprep.mubr.bf16.mxu1 %v2510_v1  ;;  %v2493_v48 = vrot.slane %v623_v44, 9  ;;  %v1682_v27 = vrot.slane %v1680_v26, 4  ;;  %v2686_v1 = vld [vmem:[%s3447_s18 + $0x20] sm:$0xf]  ;;  %v3313_v26 = vld [vmem:[%s4086_s1 + $0xf0] sm:$0xff]  }
  0x6c   : > { %3070 = vmatmul.mubr.bf16.gmra.mrb[4].mxu0 %v2637_v22  ;;  %2200 = vst [vmem:[%s3970_s29 + $0x44] sm:$0x1] %v3358_v8  ;;  %2201 = vst [vmem:[%s3970_s29 + $0x48] sm:$0xf] %v3358_v8 }
  0x6d   : > { %3078 = vmatpush3.bf16.msra.mxu0 %v3285_v10  ;;  %3089 = vmatprep.mubr.bf16.mxu0 %v3299_v32  ;;  %v674_v17 = vsel %vm3666_vm5, %v2493_v48, %v673_v47  ;;  %v1686_v10 = vor.u32 %v1685_v16, %v1682_v27  ;;  %v3860_v47 = vld [vmem:[%s3447_s18 + $0x34] sm:$0x1]  ;;  %v1767_v27 = vshll.u32 %v2694_v53, 16  ;;  %2202 = vst [vmem:[%s3970_s29 + $0x4c] sm:$0x1] %v3358_v8 }
  0x6e   : > { %2984 = vmatpush3.bf16.msra.mxu1 %v3286_v46  ;;  %3079 = vmatprep.subr.bf16.mxu0 %v3287_v20  ;;  %v3304_v46 = vld [vmem:[%s4086_s1 + $0xd0] sm:$0xff]   ;;  %v2513_v14 = vcombine.low %v670_v34, %v674_v17  ;;  %v1745_v3 = vshll.u32 %v3860_v47, 16  ;;  %v1764_v17 = vshrl.u32 %v2694_v53, 16  ;;  %v2727_v53 = vld [vmem:[%s3447_s18 + $0x18] sm:$0xe] }
  0x6f   : > { %2985 = vmatprep.subr.bf16.mxu1 %v3288_v18  ;;  %v1687_v22 = vrot.slane %v1686_v10, 4 }
  0x71   : > { %3080 = vmatpush3.bf16.msra.mxu0 %v3287_v20  ;;  %v3318_v20 = vld [vmem:[%s3447_s18 + $0x8] ss:$8 sps:$4 sm:$0xff]   ;;  %v1692_v28 = vsel %vm3492_vm2, %v1687_v22, %v1691_v54 }
  0x72   : > { %2986 = vmatpush3.bf16.msra.mxu1 %v3288_v18  ;;  %3081 = vmatprep.subr.bf16.mxu0 %v3289_v35  ;;  %v1700_v18 = vor.u32 %v1699_v6, %v1696_v50  ;;  %v1778_v50 = vshrl.u32 %v2696_v5, 16  ;;  %v1781_v6 = vshll.u32 %v2696_v5, 16  ;;  %v2735_v5 = vrot.slane %v2727_v53, 9 }
  0x73   : > { %2987 = vmatprep.subr.bf16.mxu1 %v3290_v33 }
  0x74   : > { %v1701_v60 = vrot.slane %v1700_v18, 4  ;;  %v1733_v18 = vrot.slane %v1731_v59, 5  ;;  %v3323_v59 = vld [vmem:[%s3447_s18 + $0x38] ss:$8 sps:$4 sm:$0xff]  }
  0x75   : > { %3082 = vmatpush3.bf16.msra.mxu0 %v3289_v35  ;;  %v1708_v35 = vshrl.u32 %v2686_v1, 16 }
  0x76   : > { %2988 = vmatpush3.bf16.msra.mxu1 %v3290_v33  ;;  %3083 = vmatprep.subr.bf16.mxu0 %v3291_v57  ;;  %v1706_v32 = vsel %vm3492_vm2, %v1701_v60, %v1705_v19  ;;  %v3308_v33 = vld [vmem:[%s4086_s1 + $0xe0] sm:$0xff]   ;;  %v3887_v60 = vld [vmem:[%s3447_s18 + $0x4c] sm:$0x1] }
  0x77   : > { %2989 = vmatprep.subr.bf16.mxu1 %v3293_v31  ;;  %v2714_v39 = vcombine.low %v1692_v28, %v1706_v32  ;;  %v1710_v55 = vrot.slane %v1708_v35, 4  ;;  %v1780_v28 = vrot.slane %v1778_v50, 4  ;;  %v1783_v32 = vrot.slane %v1781_v6, 5  ;;  %v3319_v35 = vld [vmem:[%s3447_s18 + $0x18] ss:$8 sps:$4 sm:$0xff]   ;;  %v3327_v6 = vld [vmem:[%s4086_s1 + $0x228] sm:$0xff]  }
  0x79   : > { %3084 = vmatpush3.bf16.msra.mxu0 %v3291_v57  ;;  %v1722_v57 = vshrl.u32 %v2688_v25, 16  ;;  %v1769_v25 = vrot.slane %v1767_v27, 5 }
  0x7a   : > { %2990 = vmatpush3.bf16.msra.mxu1 %v3293_v31  ;;  %3085 = vmatprep.subr.bf16.mxu0 %v3294_v43  ;;  %v1711_v31 = vshll.u32 %v2686_v1, 16  ;;  %v1766_v1 = vrot.slane %v1764_v17, 4 }
  0x7b   : > { %2991 = vmatprep.subr.bf16.mxu1 %v3296_v37 }
  0x7c   : > { %v1713_v44 = vrot.slane %v1711_v31, 5 }
  0x7d   : > { %3086 = vmatpush3.bf16.msra.mxu0 %v3294_v43  ;;  %v3309_v43 = vld [vmem:[%s4086_s1 + $0x1e0] sm:$0xff]  }
  0x7e   : > { %2992 = vmatpush3.bf16.msra.mxu1 %v3296_v37  ;;  %3087 = vmatprep.subr.bf16.mxu0 %v3297_v45  ;;  %v3307_v37 = vld [vmem:[%s4086_s1 + $0x1d8] sm:$0xff]  }
  0x7f   : > { %3001 = vmatprep.subr.bf16.mxu1 %v3298_v0 }
  0x81   : > { %2994 = vmatmul.mubr.bf16.vlgmr.msra.gmra.mrb[0].mxu1 %v2511_v21  ;;  %3088 = vmatpush3.bf16.msra.mxu0 %v3297_v45  ;;  %v2692_v21 = vld [vmem:[%s3447_s18 + $0x38] sm:$0xf]  ;;  %v1724_v45 = vrot.slane %v1722_v57, 4 }
  0x82   : > { %3002 = vmatpush3.bf16.msra.mxu1 %v3298_v0  ;;  %2997 = vmatprep.mubr.bf16.mxu1 %v2512_v13  ;;  %v1750_v42 = vshrl.u32 %v2692_v21, 16  ;;  %v1753_v30 = vshll.u32 %v2692_v21, 16  ;;  %v3310_v0 = vld [vmem:[%s4086_s1 + $0xe8] sm:$0xff]   ;;  %v1738_v13 = vrot.slane %v1736_v40, 4  ;;  %v2730_v21 = vld [vmem:[%s3447_s18 + $0x30] sm:$0xe] }
  0x83   : > { %3003 = vmatprep.subr.bf16.mxu1 %v3302_v49  ;;  %3097 = vmatprep.subr.bf16.mxu0 %v3300_v62  ;;  %v1728_v34 = vor.u32 %v1727_v29, %v1724_v45 }
  0x84   : > { %3090 = vmatmul.mubr.bf16.vlgmr.msra.gmra.mrb[0].mxu0 %v3301_v7  ;;  %v1752_v48 = vrot.slane %v1750_v42, 4  ;;  %v1714_v7 = vor.u32 %v1713_v44, %v1710_v55  ;;  %v1742_v16 = vor.u32 %v1741_v63, %v1738_v13  ;;  %v1770_v42 = vor.u32 %v1769_v25, %v1766_v1 }
  0x85   : > { %3098 = vmatpush3.bf16.msra.mxu0 %v3300_v62  ;;  %3093 = vmatprep.mubr.bf16.mxu0 %v3312_v56  ;;  %v3863_v62 = vld [vmem:[%s3447_s18 + $0x3c] sm:$0x1]  ;;  %v3315_v56 = vld [vmem:[%s4086_s1 + $0x1f0] sm:$0xff]   ;;  %v1729_v54 = vrot.slane %v1728_v34, 4  ;;  %v1987_v55 = vrot.slane %v3860_v47, 5  ;;  %v1979_v25 = vrot.slane %v3854_v51, 5 }
  0x86   : > { %3004 = vmatpush3.bf16.msra.mxu1 %v3302_v49  ;;  %3099 = vmatprep.subr.bf16.mxu0 %v3303_v15  ;;  %v1755_v49 = vrot.slane %v1753_v30, 5  ;;  %v1759_v4 = vshll.u32 %v3863_v62, 16  ;;  %v1715_v10 = vrot.slane %v1714_v7, 4  ;;  %v1743_v19 = vrot.slane %v1742_v16, 4  ;;  %v3325_v16 = vld [vmem:[%s4086_s1 + $0x218] sm:$0xff]  }
  0x87   : > { %3005 = vmatprep.subr.bf16.mxu1 %v3304_v46  ;;  %v1734_v57 = vsel %vm3492_vm2, %v1729_v54, %v1733_v18  ;;  %v1784_v30 = vor.u32 %v1783_v32, %v1780_v28  ;;  %v1991_v45 = vrot.slane %v3863_v62, 5  ;;  %v1975_v7 = vrot.slane %v3809_v61, 5 }
  0x88   : > { %v1999_v54 = vrot.slane %v3887_v60, 5  ;;  %v1983_v32 = vrot.slane %v3857_v2, 5 }
  0x89   : > { %2998 = vmatmul.mubr.bf16.gmra.mrb[4].mxu1 %v2513_v14  ;;  %3100 = vmatpush3.bf16.msra.mxu0 %v3303_v15  ;;  %v3316_v15 = vld [vmem:[%s4086_s1 + $0xf8] sm:$0xff]   ;;  %v1719_v14 = vrot.slane %v1717_v58, 5  ;;  %v3324_v58 = vld [vmem:[%s4086_s1 + $0x210] sm:$0xff]   ;;  %v1976_v61 = vsel %vm3666_vm5, %v2735_v5, %v1975_v7 }
  0x8a   : > { %3006 = vmatpush3.bf16.msra.mxu1 %v3304_v46  ;;  %3017 = vmatprep.mubr.bf16.mxu1 %v3318_v20  ;;  %v1756_v46 = vor.u32 %v1755_v49, %v1752_v48  ;;  %v1747_v20 = vrot.slane %v1745_v3, 5  ;;  %v2726_v49 = vld [vmem:[%s3447_s18 + $0x10] sm:$0xe] }
  0x8b   : > { %3007 = vmatprep.subr.bf16.mxu1 %v3306_v23  ;;  %3101 = vmatprep.subr.bf16.mxu0 %v3305_v9  ;;  %v1720_v31 = vsel %vm3492_vm2, %v1715_v10, %v1719_v14  ;;  %v2734_v3 = vrot.slane %v2726_v49, 9  ;;  %v2733_v10 = vld [vmem:[%s3447_s18 + $0x48] sm:$0xe] }
  0x8c   : > { %3094 = vmatmul.mubr.bf16.gmra.mrb[4].mxu0 %v3314_v11  ;;  %v1757_v22 = vrot.slane %v1756_v46, 4  ;;  %v3320_v11 = vld [vmem:[%s4086_s1 + $0x200] sm:$0xff]   ;;  %v1748_v40 = vsel %vm3492_vm2, %v1743_v19, %v1747_v20  ;;  %v2715_v29 = vcombine.low %v1720_v31, %v1734_v57  ;;  %v2741_v19 = vrot.slane %v2733_v10, 9  ;;  %v3329_v20 = vld [vmem:[%s4086_s1 + $0x238] sm:$0xff]  }
  0x8d   : > { %3102 = vmatpush3.bf16.msra.mxu0 %v3305_v9  ;;  %3113 = vmatprep.mubr.bf16.mxu0 %v2714_v39  ;;  %v1761_v9 = vrot.slane %v1759_v4, 5  ;;  %v3322_v39 = vld [vmem:[%s3447_s18 + $0x28] ss:$8 sps:$4 sm:$0xff]   ;;  %v1971_v4 = vrot.slane %v3805_v24, 5 }
  0x8e   : > { %3008 = vmatpush3.bf16.msra.mxu1 %v3306_v23  ;;  %3103 = vmatprep.subr.bf16.mxu0 %v3307_v37  ;;  %v3884_v23 = vld [vmem:[%s3447_s18 + $0x44] sm:$0x1] }
  0x8f   : > { %3009 = vmatprep.subr.bf16.mxu1 %v3308_v33  ;;  %v1773_v36 = vshll.u32 %v3884_v23, 16  ;;  %v1762_v41 = vsel %vm3492_vm2, %v1757_v22, %v1761_v9  ;;  %v1972_v24 = vsel %vm3666_vm5, %v2734_v3, %v1971_v4  ;;  %v1995_v14 = vrot.slane %v3884_v23, 5  ;;  %v2728_v22 = vld [vmem:[%s3447_s18 + $0x20] sm:$0xe]  ;;  %v2729_v9 = vld [vmem:[%s3447_s18 + $0x28] sm:$0xe] }
  0x90   : > { %v2716_v13 = vcombine.low %v1748_v40, %v1762_v41  ;;  %v2758_v50 = vcombine.low %v1972_v24, %v1976_v61  ;;  %v2000_v23 = vsel %vm3666_vm5, %v2741_v19, %v1999_v54  ;;  %v2737_v28 = vrot.slane %v2729_v9, 9 }
  0x91   : > { %3104 = vmatpush3.bf16.msra.mxu0 %v3307_v37  ;;  %v1787_v37 = vshll.u32 %v3887_v60, 16  ;;  %v1775_v63 = vrot.slane %v1773_v36, 5  ;;  %v2736_v60 = vrot.slane %v2728_v22, 9 }
  0x92   : > { %3010 = vmatpush3.bf16.msra.mxu1 %v3308_v33  ;;  %3105 = vmatprep.subr.bf16.mxu0 %v3309_v43  ;;  %v2731_v33 = vld [vmem:[%s3447_s18 + $0x38] sm:$0xe] }
  0x93   : > { %3011 = vmatprep.subr.bf16.mxu1 %v3310_v0  ;;  %v2739_v44 = vrot.slane %v2731_v33, 9  ;;  %v1789_v48 = vrot.slane %v1787_v37, 5 }
  0x95   : > { %3106 = vmatpush3.bf16.msra.mxu0 %v3309_v43  ;;  %v3321_v43 = vld [vmem:[%s4086_s1 + $0x208] sm:$0xff]   ;;  %v1992_v62 = vsel %vm3666_vm5, %v2739_v44, %v1991_v45  ;;  %v2156_v45 = vstv %s2155_s13 }
  0x96   : > { %3012 = vmatpush3.bf16.msra.mxu1 %v3310_v0  ;;  %3107 = vmatprep.subr.bf16.mxu0 %v3311_v52  ;;  %v2738_v0 = vrot.slane %v2730_v21, 9  ;;  %v1984_v21 = vsel %vm3666_vm5, %v2737_v28, %v1983_v32 }
  0x97   : > { %3013 = vmatprep.subr.bf16.mxu1 %v3313_v26 }
  0x98   : > { %v1988_v47 = vsel %vm3666_vm5, %v2738_v0, %v1987_v55 }
  0x99   : > { %3108 = vmatpush3.bf16.msra.mxu0 %v3311_v52  ;;  %v1771_v52 = vrot.slane %v1770_v42, 4  ;;  %v2760_v34 = vcombine.low %v1988_v47, %v1992_v62  ;;  %v3992_v47 = vstv %s2770_s9 }
  0x9a   : > { %3014 = vmatpush3.bf16.msra.mxu1 %v3313_v26  ;;  %3109 = vmatprep.subr.bf16.mxu0 %v3315_v56  ;;  %v1785_v26 = vrot.slane %v1784_v30, 4 }
  0x9b   : > { %3015 = vmatprep.subr.bf16.mxu1 %v3316_v15  ;;  %v1776_v17 = vsel %vm3492_vm2, %v1771_v52, %v1775_v63 }
  0x9c   : > { %v1790_v27 = vsel %vm3492_vm2, %v1785_v26, %v1789_v48 }
  0x9d   : > { %3110 = vmatpush3.bf16.msra.mxu0 %v3315_v56  ;;  %v2717_v46 = vcombine.low %v1776_v17, %v1790_v27  ;;  %v2732_v56 = vld [vmem:[%s3447_s18 + $0x40] sm:$0xe] }
  0x9e   : > { %3016 = vmatpush3.bf16.msra.mxu1 %v3316_v15  ;;  %3111 = vmatprep.subr.bf16.mxu0 %v3317_v12  ;;  %v3328_v15 = vld [vmem:[%s4086_s1 + $0x230] sm:$0xff]   ;;  %v2740_v18 = vrot.slane %v2732_v56, 9 }
  0x9f   : > { %3145 = vmatprep.subr.bf16.mxu1 %v3320_v11 }
  0xa0   : > { %v1996_v1 = vsel %vm3666_vm5, %v2740_v18, %v1995_v14 }
  0xa1   : > { %3018 = vmatmul.mubr.bf16.vlgmr.msra.gmra.mrb[0].mxu1 %v3319_v35  ;;  %3112 = vmatpush3.bf16.msra.mxu0 %v3317_v12  ;;  %v1980_v12 = vsel %vm3666_vm5, %v2736_v60, %v1979_v25 }
  0xa2   : > { %3153 = vmatpush3.bf16.msra.mxu1 %v3320_v11  ;;  %3021 = vmatprep.mubr.bf16.mxu1 %v3322_v39  ;;  %v2759_v33 = vcombine.low %v1980_v12, %v1984_v21 }
  0xa3   : > { %3146 = vmatprep.subr.bf16.mxu1 %v3321_v43  ;;  %3121 = vmatprep.subr.bf16.mxu0 %v3320_v11 }
  0xa4   : > { %3114 = vmatmul.mubr.bf16.vlgmr.msra.gmra.mrb[0].mxu0 %v2715_v29 }
  0xa5   : > { %3122 = vmatpush3.bf16.msra.mxu0 %v3320_v11  ;;  %3117 = vmatprep.mubr.bf16.mxu0 %v2716_v13  ;;  %v2761_v11 = vcombine.low %v1996_v1, %v2000_v23 }
  0xa6   : > { %3154 = vmatpush3.bf16.msra.mxu1 %v3321_v43  ;;  %3123 = vmatprep.subr.bf16.mxu0 %v3321_v43 }
  0xa7   : > { %3147 = vmatprep.subr.bf16.mxu1 %v3324_v58 }
  0xa9   : > { %3022 = vmatmul.mubr.bf16.gmra.mrb[4].mxu1 %v3323_v59  ;;  %3124 = vmatpush3.bf16.msra.mxu0 %v3321_v43 }
  0xaa   : > { %3155 = vmatpush3.bf16.msra.mxu1 %v3324_v58  ;;  %3141 = vmatprep.mubr.bf16.mxu1 %v2760_v34 }
  0xab   : > { %3148 = vmatprep.subr.bf16.mxu1 %v3325_v16  ;;  %3125 = vmatprep.subr.bf16.mxu0 %v3324_v58 }
  0xac   : > { %3118 = vmatmul.mubr.bf16.gmra.mrb[4].mxu0 %v2717_v46 }
  0xad   : > { %3126 = vmatpush3.bf16.msra.mxu0 %v3324_v58  ;;  %3137 = vmatprep.mubr.bf16.mxu0 %v2758_v50 }
  0xae   : > { %3156 = vmatpush3.bf16.msra.mxu1 %v3325_v16  ;;  %3127 = vmatprep.subr.bf16.mxu0 %v3325_v16 }
  0xaf   : > { %3149 = vmatprep.subr.bf16.mxu1 %v3326_v38 }
  0xb1   : > { %3128 = vmatpush3.bf16.msra.mxu0 %v3325_v16 }
  0xb2   : > { %3157 = vmatpush3.bf16.msra.mxu1 %v3326_v38  ;;  %3129 = vmatprep.subr.bf16.mxu0 %v3326_v38 }
  0xb3   : > { %3150 = vmatprep.subr.bf16.mxu1 %v3327_v6 }
  0xb5   : > { %3130 = vmatpush3.bf16.msra.mxu0 %v3326_v38 }
  0xb6   : > { %3158 = vmatpush3.bf16.msra.mxu1 %v3327_v6  ;;  %3131 = vmatprep.subr.bf16.mxu0 %v3327_v6 }
  0xb7   : > { %3151 = vmatprep.subr.bf16.mxu1 %v3328_v15 }
  0xb9   : > { %3132 = vmatpush3.bf16.msra.mxu0 %v3327_v6 }
  0xba   : > { %3159 = vmatpush3.bf16.msra.mxu1 %v3328_v15  ;;  %3133 = vmatprep.subr.bf16.mxu0 %v3328_v15 }
  0xbb   : > { %3152 = vmatprep.subr.bf16.mxu1 %v3329_v20 }
  0xbd   : > { %3134 = vmatpush3.bf16.msra.mxu0 %v3328_v15 }
  0xbe   : > { %3160 = vmatpush3.bf16.msra.mxu1 %v3329_v20  ;;  %3135 = vmatprep.subr.bf16.mxu0 %v3329_v20 }
  0xc1   : > { %3142 = vmatmul.mubr.bf16.vlgmr.msra.gmra.mrb[8].mxu1 %v2761_v11  ;;  %3136 = vmatpush3.bf16.msra.mxu0 %v3329_v20 }
  0xc4   : > { %3138 = vmatmul.mubr.bf16.vlgmr.msra.gmra.mrb[0].mxu0 %v2759_v33 }
 0x174   : > { %v3019_v51 = vpop.f32.mrb[0].mxu1 }
 0x175   : > { %v961_v2 = vpop.f32.mrb[1].mxu1 }
 0x176   : > { %v3020_v35 = vpop.f32.mrb[2].mxu1 }
 0x177   : > { %v964_v31 = vpop.f32.mrb[3].mxu1 }
 0x17c   : > { %v3023_v57 = vpop.f32.mrb[4].mxu1 }
 0x17d   : > { %v977_v36 = vpop.f32.mrb[5].mxu1 }
 0x17e   : > { %v3024_v37 = vpop.f32.mrb[6].mxu1 }
 0x17f   : > { %v980_v39 = vpop.f32.mrb[7].mxu1  ;;  %v3119_v40 = vpop.f32.mrb[4].mxu0 }
 0x180   : > { %v3165_v41 = vadd.f32 %v3119_v40, %v3023_v57  ;;  %v1922_v42 = vpop.f32.mrb[5].mxu0  ;;  %v2805_v57 = vld [vmem:[%s3970_s29 + $0x3c] sm:$0x1] }
 0x181   : > { %v3167_v30 = vadd.f32 %v1922_v42, %v977_v36  ;;  %v3120_v43 = vpop.f32.mrb[6].mxu0 }
 0x182   : > { %v3169_v0 = vadd.f32 %v3120_v43, %v3024_v37  ;;  %v1925_v55 = vpop.f32.mrb[7].mxu0  ;;  %v2797_v43 = vld [vmem:[%s3970_s29 + $0x2c] sm:$0x1] }
 0x183   : > { %v3171_v44 = vadd.f32 %v1925_v55, %v980_v39 }
 0x194   : > { %v3143_v29 = vpop.f32.mrb[8].mxu1 }
 0x195   : > { %v3166_v13 = vadd.f32 %v3165_v41, %v3143_v29  ;;  %v2132_v63 = vpop.f32.mrb[9].mxu1 }
 0x196   : > { %v3168_v48 = vadd.f32 %v3167_v30, %v2132_v63  ;;  %v3144_v49 = vpop.f32.mrb[10].mxu1  ;;  %v2795_v30 = vld [vmem:[%s3970_s29 + $0x28] sm:$0xf]  ;;  %v2787_v63 = vld [vmem:[%s3970_s29 + $0x18] sm:$0xf] }
 0x197   : > { %v2163_v53 = vadd.f32 %v3166_v13, %v2156_v45  ;;  %v3170_v52 = vadd.f32 %v3169_v0, %v3144_v49  ;;  %v2135_v26 = vpop.f32.mrb[11].mxu1  ;;  %v3139_v59 = vpop.f32.mrb[0].mxu0 }
 0x198   : > { %v2161_v62 = vadd.f32 %v3168_v48, %v2156_v45  ;;  %v3172_v58 = vadd.f32 %v3171_v44, %v2135_v26  ;;  %v3161_v5 = vadd.f32 %v3139_v59, %v3019_v51  ;;  %v2116_v7 = vpop.f32.mrb[1].mxu0  ;;  %v2789_v48 = vld [vmem:[%s3970_s29 + $0x1c] sm:$0x1] }
 0x199   : > { %v2171_v3 = vmax.f32 %v2163_v53, 0.0  ;;  %v2164_v4 = vadd.f32 %v3170_v52, %v2156_v45  ;;  %v3162_v16 = vadd.f32 %v2116_v7, %v961_v2  ;;  %v3140_v24 = vpop.f32.mrb[2].mxu0  ;;  %v2779_v7 = vld [vmem:[%s3970_s29 + $0x8] sm:$0xf] }
 0x19a   : > { %v2169_v34 = vmax.f32 %v2161_v62, 0.0  ;;  %v2162_v17 = vadd.f32 %v3172_v58, %v2156_v45  ;;  %v2159_v46 = vadd.f32 %v3161_v5, %v2156_v45  ;;  %v3163_v50 = vadd.f32 %v3140_v24, %v3020_v35  ;;  %v2119_v6 = vpop.f32.mrb[3].mxu0 }
 0x19b   : > { %v2181_v27 = vadd.f32 %v3992_v47, %v2171_v3  ;;  %v2172_v61 = vmax.f32 %v2164_v4, 0.0  ;;  %v2157_v10 = vadd.f32 %v3162_v16, %v2156_v45  ;;  %v3164_v54 = vadd.f32 %v2119_v6, %v964_v31  ;;  %v2803_v31 = vld [vmem:[%s3970_s29 + $0x38] sm:$0xf]  ;;  %v2807_v3 = vld [vmem:[%s3970_s29 + $0x40] sm:$0xf] }
 0x19c   : > { %v2179_v38 = vadd.f32 %v3992_v47, %v2169_v34  ;;  %v2170_v15 = vmax.f32 %v2162_v17, 0.0  ;;  %v2167_v18 = vmax.f32 %v2159_v46, 0.0  ;;  %v2160_v20 = vadd.f32 %v3163_v50, %v2156_v45  ;;  %v2809_v4 = vld [vmem:[%s3970_s29 + $0x44] sm:$0x1] }
 0x19d   : > { %v2819_v56 = vpack.c.bf16 %v2181_v27, %v2181_v27  ;;  %v2182_v14 = vadd.f32 %v3992_v47, %v2172_v61  ;;  %v2165_v23 = vmax.f32 %v2157_v10, 0.0  ;;  %v2158_v39 = vadd.f32 %v3164_v54, %v2156_v45  ;;  %v2781_v61 = vld [vmem:[%s3970_s29 + $0xc] sm:$0x1] }
 0x19e   : > { %v2817_v19 = vpack.c.bf16 %v2179_v38, %v2179_v38  ;;  %v3998_v22 = vadd.f32 %v3992_v47, %v2170_v15  ;;  %v2177_v25 = vadd.f32 %v3992_v47, %v2167_v18  ;;  %v2168_v11 = vmax.f32 %v2160_v20, 0.0 }
 0x19f   : > { %v2284_v9 = vshrl.u32 %v2819_v56, 16  ;;  %v2287_v1 = vshll.u32 %v2819_v56, 16  ;;  %v2820_v60 = vpack.c.bf16 %v2182_v14, %v2182_v14  ;;  %v2175_v33 = vadd.f32 %v3992_v47, %v2165_v23 }
 0x1a0   : > { %v2268_v28 = vshrl.u32 %v2817_v19, 16  ;;  %v2271_v32 = vshll.u32 %v2817_v19, 16  ;;  %v2815_v2 = vpack.c.bf16 %v2177_v25, %v2177_v25  ;;  %v2178_v37 = vadd.f32 %v3992_v47, %v2168_v11 }
 0x1a1   : > { %v2286_v21 = vrot.slane %v2284_v9, 7  ;;  %v2292_v8 = vshrl.u32 %v2820_v60, 16  ;;  %v2295_v51 = vshll.u32 %v2820_v60, 16  ;;  %v2813_v42 = vpack.c.bf16 %v2175_v33, %v2175_v33  ;;  %v2791_v9 = vld [vmem:[%s3970_s29 + $0x20] sm:$0xf] }
 0x1a2   : > { %v2270_v36 = vrot.slane %v2268_v28, 7  ;;  %v2252_v55 = vshrl.u32 %v2815_v2, 16  ;;  %v2255_v44 = vshll.u32 %v2815_v2, 16  ;;  %v2816_v59 = vpack.c.bf16 %v2178_v37, %v2178_v37  ;;  %v2799_v2 = vld [vmem:[%s3970_s29 + $0x30] sm:$0xf] }
 0x1a3   : > { %v2289_v40 = vor.u32 %v2287_v1, %v2286_v21  ;;  %v2290_v41 = vrot.slane %v2286_v21, 4  ;;  %v2294_v0 = vrot.slane %v2292_v8, 7  ;;  %v2236_v53 = vshrl.u32 %v2813_v42, 16  ;;  %v2793_v1 = vld [vmem:[%s3970_s29 + $0x24] sm:$0x1] }
 0x1a4   : > { %v2273_v29 = vor.u32 %v2271_v32, %v2270_v36  ;;  %v2274_v13 = vrot.slane %v2270_v36, 4  ;;  %v2239_v52 = vshll.u32 %v2813_v42, 16  ;;  %v2254_v26 = vrot.slane %v2252_v55, 7  ;;  %v2785_v36 = vld [vmem:[%s3970_s29 + $0x14] sm:$0x1] }
 0x1a5   : > { %v2359_v45 = vsel %vm4003_vm10, %v2289_v40, %v2803_v31  ;;  %v2362_v49 = vsel %vm4010_vm11, %v2290_v41, %v2805_v57  ;;  %v2238_v5 = vrot.slane %v2236_v53, 7  ;;  %v2297_v34 = vor.u32 %v2295_v51, %v2294_v0  ;;  %v2801_v31 = vld [vmem:[%s3970_s29 + $0x34] sm:$0x1]  ;;  %v2783_v57 = vld [vmem:[%s3970_s29 + $0x10] sm:$0xf] }
 0x1a6   : > { %2804 = vst [vmem:[%s3970_s29 + $0x38] sm:$0xf] %v2359_v45  ;;  %2806 = vst [vmem:[%s3970_s29 + $0x3c] sm:$0x1] %v2362_v49  ;;  %v2347_v62 = vsel %vm4003_vm10, %v2273_v29, %v2795_v30  ;;  %v2350_v58 = vsel %vm4010_vm11, %v2274_v13, %v2797_v43  ;;  %v2298_v17 = vrot.slane %v2294_v0, 4  ;;  %v2166_v27 = vmax.f32 %v2158_v39, 0.0 }
 0x1a7   : > { %2796 = vst [vmem:[%s3970_s29 + $0x28] sm:$0xf] %v2347_v62  ;;  %2798 = vst [vmem:[%s3970_s29 + $0x2c] sm:$0x1] %v2350_v58  ;;  %v2257_v16 = vor.u32 %v2255_v44, %v2254_v26  ;;  %v2258_v24 = vrot.slane %v2254_v26, 4  ;;  %v2260_v46 = vshrl.u32 %v2816_v59, 16  ;;  %v2241_v50 = vor.u32 %v2239_v52, %v2238_v5 }
 0x1a8   : > { %v2263_v38 = vshll.u32 %v2816_v59, 16  ;;  %v2242_v6 = vrot.slane %v2238_v5, 4  ;;  %v2365_v15 = vsel %vm4003_vm10, %v2297_v34, %v2807_v3  ;;  %v2368_v56 = vsel %vm4010_vm11, %v2298_v17, %v2809_v4 }
 0x1a9   : > { %v2335_v10 = vsel %vm4003_vm10, %v2257_v16, %v2787_v63  ;;  %v2338_v14 = vsel %vm4010_vm11, %v2258_v24, %v2789_v48  ;;  %v2262_v54 = vrot.slane %v2260_v46, 7  ;;  %2808 = vst [vmem:[%s3970_s29 + $0x40] sm:$0xf] %v2365_v15  ;;  %2810 = vst [vmem:[%s3970_s29 + $0x44] sm:$0x1] %v2368_v56  ;;  %v2176_v18 = vadd.f32 %v3992_v47, %v2166_v27 }
 0x1aa   : > { %2788 = vst [vmem:[%s3970_s29 + $0x18] sm:$0xf] %v2335_v10  ;;  %2790 = vst [vmem:[%s3970_s29 + $0x1c] sm:$0x1] %v2338_v14  ;;  %v2320_v19 = vsel %vm4003_vm10, %v2241_v50, %v2779_v7  ;;  %v2326_v20 = vsel %vm4010_vm11, %v2242_v6, %v2781_v61  ;;  %v2818_v23 = vpack.c.bf16 %v3998_v22, %v3998_v22 }
 0x1ab   : > { %2780 = vst [vmem:[%s3970_s29 + $0x8] sm:$0xf] %v2320_v19  ;;  %2782 = vst [vmem:[%s3970_s29 + $0xc] sm:$0x1] %v2326_v20  ;;  %v2265_v47 = vor.u32 %v2263_v38, %v2262_v54  ;;  %v2266_v60 = vrot.slane %v2262_v54, 4  ;;  %v2814_v25 = vpack.c.bf16 %v2176_v18, %v2176_v18 }
 0x1ac   : > { %v2276_v28 = vshrl.u32 %v2818_v23, 16  ;;  %v2279_v33 = vshll.u32 %v2818_v23, 16 }
 0x1ad   : > { %v2341_v32 = vsel %vm4003_vm10, %v2265_v47, %v2791_v9  ;;  %v2344_v11 = vsel %vm4010_vm11, %v2266_v60, %v2793_v1  ;;  %v2244_v21 = vshrl.u32 %v2814_v25, 16  ;;  %v2247_v51 = vshll.u32 %v2814_v25, 16 }
 0x1ae   : > { %2792 = vst [vmem:[%s3970_s29 + $0x20] sm:$0xf] %v2341_v32  ;;  %2794 = vst [vmem:[%s3970_s29 + $0x24] sm:$0x1] %v2344_v11  ;;  %v2278_v22 = vrot.slane %v2276_v28, 7 }
 0x1af   : > { %v2246_v8 = vrot.slane %v2244_v21, 7 }
 0x1b0   : > { %v2281_v37 = vor.u32 %v2279_v33, %v2278_v22  ;;  %v2282_v39 = vrot.slane %v2278_v22, 4 }
 0x1b1   : > { %v2249_v40 = vor.u32 %v2247_v51, %v2246_v8  ;;  %v2250_v41 = vrot.slane %v2246_v8, 4 }
 0x1b2   : > { %v2353_v42 = vsel %vm4003_vm10, %v2281_v37, %v2799_v2  ;;  %v2356_v30 = vsel %vm4010_vm11, %v2282_v39, %v2801_v31 }
 0x1b3   : > { %v2329_v43 = vsel %vm4003_vm10, %v2249_v40, %v2783_v57  ;;  %v2332_v0 = vsel %vm4010_vm11, %v2250_v41, %v2785_v36  ;;  %2800 = vst [vmem:[%s3970_s29 + $0x30] sm:$0xf] %v2353_v42  ;;  %2802 = vst [vmem:[%s3970_s29 + $0x34] sm:$0x1] %v2356_v30 }
 0x1b4   : > { %2784 = vst [vmem:[%s3970_s29 + $0x10] sm:$0xf] %v2329_v43  ;;  %2786 = vst [vmem:[%s3970_s29 + $0x14] sm:$0x1] %v2332_v0 }
 0x1b5 PF: > { %s14_s12 = sadd.s32 1, %s3355_s12  }
 0x1b6   : > { %p11_p1 = scmp.ge.s32.totalorder %s14_s12, 4  }
 0x1b8   :  { %13 = sbr.rel (!%p11_p1) target bundleno = 1 (0x1), region = 78 }
 0x1bf   :  { %2391 = vsyncpa [#allocation3], 1 }
 0x1c0   :  { %2393 = vsyncpa [#allocation3 + $0x1], 1 }

// kernel: fixup_network_block.11
= control target key start
LH: loop header
LB: loop body
LE: loop exit
PB: predicated region body
PF: predicated region fallthrough
CT: control target
= control target key end

     0   :  { %9 = vsyncpa [#allocation4], 0  ;;  %s4018_s0 = inlined_call_operand.vmem [shape: bf16[2,10,10,128], index: 0, kind: input, shape index: {}]   ;;  %s4019_s1 = inlined_call_operand.vmem [shape: bf16[9,128,128], index: 1, kind: input, shape index: {}]   ;;  %s4020_s2 = inlined_call_operand.vmem [shape: f32[2,8,8,128], index: 2, kind: input, shape index: {}]   ;;  %s4021_s3 = inlined_call_operand.vmem [shape: f32[2], index: 3, kind: input, shape index: {}]   ;;  %s4022_s4 = inlined_call_operand.hbm [shape: f32[2,8,8,128], index: 4, kind: output, shape index: {}]  }
   0x1   :  { %10 = vsyncpa [#allocation3], 0 }
   0x2   :  { %12 = vsyncpa [#allocation3 + $0x1], 0  ;;  %s3328_s15 = smov 0   ;;  %s3330_s16 = smov 0  }
   0x3   :  { %s3332_s17 = smov 0   ;;  %s3334_s18 = smov 0  }
   0x4 LB: > { %s3349_s19 = sadd.s32 4294967295, %s3297_s18   ;;  %s2334_s20 = sadd.s32 4294967294, %s3297_s18   ;;  %s3297_s18 = sphi %s3334_s18, %s4033_s18   ;;  %s3293_s17 = sphi %s3332_s17, %s4032_s17   ;;  %s3289_s16 = sphi %s3330_s16, %s4031_s16   ;;  %s3285_s15 = sphi %s3328_s15, %s4030_s15  }
   0x5   : > { %s3353_s21 = sadd.s32 1, %s3297_s18   ;;  %s119_s22 = sadd.s32 1, %s3293_s17 }
   0x6   : > { %s116_s23 = ssub.s32 %s3297_s18, %s3353_s21  ;;  %p129_p0 = scmp.ne.s32.totalorder %s3293_s17, %s3289_s16 }
   0x7   : > { %p117_p1 = scmp.eq.s32.totalorder %s116_s23, 0  ;;  %p130_p2 = scmp.eq.s32.totalorder %s3349_s19, 1 }
   0x8   : > { %p135_p3 = scmp.ne.s32.totalorder %s3289_s16, %s3285_s15  ;;  %p136_p4 = scmp.eq.s32.totalorder %s2334_s20, 1 }
   0x9   : > { %s3364_s24 = scalar_select %p117_p1, %s3293_s17, %s119_s22  }
   0xa   : > { %p3366_p5 = por %p130_p2, %p129_p0  ;;  %p3370_p6 = por %p136_p4, %p135_p3 }
   0xb   : > { %p2335_p7 = scmp.ge.s32.totalorder %s3297_s18, 1  ;;  %p143_p8 = scmp.lt.s32.totalorder %s3297_s18, 3 }
   0xc   : > { %p3094_p9 = scmp.eq.s32.totalorder %s3349_s19, 0  ;;  %s159_s30 = sshll.u32 %s4021_s3, 4  ;;  %s160_s30 = int_to_ptr.vmem [resolvable:$true] %s159_s30 }
   0xd   : > { %p3377_p10 = pnand %p2335_p7, %p143_p8  ;;  %s3216_s5 = scalar_lea.vmem %s160_s30, 16 }
   0xe   : > { %p3217_p13 = scmp.ne.s32.totalorder %s160_s30, %s3216_s5  ;;  %p3224_p3 = scmp.lt.s32.totalorder %s160_s30, %s160_s30 }
   0xf   : > { %p3086_p11 = pneg %p3377_p10  ;;  %p3225_p4 = scmp.lt.s32.totalorder %s3216_s5, %s3216_s5 }
  0x11   : > { %p3087_p12 = pnand %p3094_p9, %p3086_p11  ;;  %p3226_p7 = por %p3225_p4, %p3224_p3 }
  0x13   : > { %p3218_p0 = pneg %p3087_p12 }
  0x15   : > { %p3219_p1 = pnand %p3218_p0, %p3217_p13 }
  0x17   : > { %p3220_p2 = pneg %p3219_p1 }
  0x19   : > { %p3227_p8 = pnand %p3226_p7, %p3220_p2 }
  0x1b   : > { %3230 = shalt.err (!%p3227_p8)
}
  0x1c   : > { %s3299_s6 = smov [#allocation2]   ;;  %188 = sbr.rel (%p3377_p10) target bundleno = 441 (0x1b9), region = 36 }
  0x1d   : > { %3089 = dma.vmem_to_smem (!%p3087_p12), %s160_s30, 16, %s3299_s6, [#allocation4]  }
  0x23   : > { %3276 = dma.done.wait (%p3094_p9), [#allocation4], 16  }
  0x24   : > { %3278 = vsyncadd (%p3094_p9), [#allocation4], 4294967280 }
  0x25   : > { %194 = sfence }
  0x26   : > { %v3132_v0 = vld [vmem:[%s4019_s1 + $0x40] sm:$0xff]   ;;  %p220_p11 = scmp.lt.s32.totalorder %s3349_s19, 1  ;;  %v3134_v2 = vld [vmem:[%s4019_s1 + $0x48] sm:$0xff]   ;;  %v3136_v4 = vld [vmem:[%s4019_s1 + $0x50] sm:$0xff]   ;;  %vm263_vm0 = vsmask.f32 3328 }
  0x27   : > { %v3133_v1 = vld [vmem:[%s4019_s1 + $0x100] sm:$0xff]   ;;  %2783 = vmatprep.subr.bf16.mxu1 %v3132_v0  ;;  %v3135_v3 = vld [vmem:[%s4019_s1 + $0x108] sm:$0xff]   ;;  %v3137_v5 = vld [vmem:[%s4019_s1 + $0x110] sm:$0xff]   ;;  %vm264_vm1 = vsmask.f32 7440  ;;  %vm685_vm3 = vcmask 1042432  }
  0x28   : > { %2879 = vmatprep.subr.bf16.mxu0 %v3133_v1  ;;  %2784 = vmatpush3.bf16.msra.mxu1 %v3132_v0  ;;  %s3414_s28 = scalar_select %p220_p11, %s3349_s19, 1  ;;  %v3138_v6 = vld [vmem:[%s4019_s1 + $0x58] sm:$0xff]   ;;  %v3140_v8 = vld [vmem:[%s4019_s1 + $0x60] sm:$0xff]   ;;  %v3142_v10 = vld [vmem:[%s4019_s1 + $0x68] sm:$0xff]   ;;  %vm686_vm4 = vcmask 1046532  }
  0x29   : > { %2880 = vmatpush3.bf16.msra.mxu0 %v3133_v1  ;;  %2785 = vmatprep.subr.bf16.mxu1 %v3134_v2  ;;  %v3139_v7 = vld [vmem:[%s4019_s1 + $0x118] sm:$0xff]   ;;  %v3141_v9 = vld [vmem:[%s4019_s1 + $0x120] sm:$0xff]   ;;  %v3143_v14 = vld [vmem:[%s4019_s1 + $0x128] sm:$0xff]   ;;  %s217_s30 = sand.u32 1, %s3289_s16   ;;  %s2674_s9 = sshll.u32 %s3349_s19, 10 }
  0x2a   : > { %2881 = vmatprep.subr.bf16.mxu0 %v3135_v3  ;;  %s3079_s7 = smul.u32 80, %s3414_s28  ;;  %v3144_v22 = vld [vmem:[%s4019_s1 + $0x70] sm:$0xff]   ;;  %v3146_v37 = vld [vmem:[%s4019_s1 + $0x78] sm:$0xff]   ;;  %vm3477_vm2 = vmor %vm263_vm0, %vm264_vm1  ;;  %s2673_s29 = sshll.u32 %s3414_s28, 6 }
  0x2b   : > { %v3145_v23 = vld [vmem:[%s4019_s1 + $0x130] sm:$0xff]   ;;  %v3147_v47 = vld [vmem:[%s4019_s1 + $0x138] sm:$0xff]   ;;  %v3148_v63 = vld [vmem:[%s4019_s1] sm:$0xff]   ;;  %s2340_s8 = sshll.u32 %s217_s30, 6  ;;  %s3971_s13 = scalar_lea.hbm %s4022_s4, %s2674_s9 }
  0x2c   : > { %2786 = vmatpush3.bf16.msra.mxu1 %v3134_v2  ;;  %s3432_s14 = scalar_lea.vmem %s4018_s0, %s3079_s7  ;;  %v3509_v1 = vld [vmem:[%s4019_s1 + $0x140] sm:$0xff]   ;;  %vm3651_vm5 = vmor %vm685_vm3, %vm686_vm4  ;;  %s3955_s7 = scalar_lea.vmem %s4020_s2, %s2673_s29 }
  0x2d   : > { %2882 = vmatpush3.bf16.msra.mxu0 %v3135_v3  ;;  %2787 = vmatprep.subr.bf16.mxu1 %v3136_v4  ;;  %v3438_v11 = vld [vmem:[%s3432_s14] sm:$0xf]  ;;  %v3441_v12 = vld [vmem:[%s3432_s14 + $0x8] sm:$0xf]  ;;  %v3444_v13 = vld [vmem:[%s3432_s14 + $0x4] sm:$0x1] }
  0x2e   : > { %2883 = vmatprep.subr.bf16.mxu0 %v3137_v5  ;;  %v3450_v15 = vld [vmem:[%s3432_s14 + $0xc] sm:$0x1]  ;;  %v267_v16 = vshrl.u32 %v3438_v11, 16  ;;  %v270_v17 = vshll.u32 %v3438_v11, 16  ;;  %v276_v18 = vshll.u32 %v3444_v13, 16  ;;  %v281_v19 = vshrl.u32 %v3441_v12, 16 }
  0x2f   : > { %v284_v20 = vshll.u32 %v3441_v12, 16  ;;  %v290_v21 = vshll.u32 %v3450_v15, 16  ;;  %v2456_v30 = vld [vmem:[%s3432_s14 + $0x8] sm:$0xf]  ;;  %v3466_v31 = vld [vmem:[%s3432_s14 + $0xc] sm:$0x1] }
  0x30   : > { %2788 = vmatpush3.bf16.msra.mxu1 %v3136_v4  ;;  %v269_v24 = vrot.slane %v267_v16, 4  ;;  %v272_v25 = vrot.slane %v270_v17, 5  ;;  %v278_v26 = vrot.slane %v276_v18, 5  ;;  %v283_v27 = vrot.slane %v281_v19, 4  ;;  %v2458_v33 = vld [vmem:[%s3432_s14 + $0x10] sm:$0xf] }
  0x31   : > { %2884 = vmatpush3.bf16.msra.mxu0 %v3137_v5  ;;  %2789 = vmatprep.subr.bf16.mxu1 %v3138_v6  ;;  %v286_v28 = vrot.slane %v284_v20, 5  ;;  %v292_v29 = vrot.slane %v290_v21, 5  ;;  %v3470_v34 = vld [vmem:[%s3432_s14 + $0x14] sm:$0x1]  ;;  %v1062_v35 = vshrl.u32 %v2456_v30, 16  ;;  %v1065_v36 = vshll.u32 %v2456_v30, 16 }
  0x32   : > { %2885 = vmatprep.subr.bf16.mxu0 %v3139_v7  ;;  %v273_v32 = vor.u32 %v272_v25, %v269_v24  ;;  %v1071_v40 = vshll.u32 %v3466_v31, 16  ;;  %v1076_v41 = vshrl.u32 %v2458_v33, 16  ;;  %v1079_v42 = vshll.u32 %v2458_v33, 16  ;;  %v3487_v51 = vld [vmem:[%s3432_s14 + $0x10] sm:$0xf]  ;;  %v3212_v38 = vld [vmem:[%s4019_s1 + $0x220] sm:$0xff]  }
  0x33   : > { %v287_v39 = vor.u32 %v286_v28, %v283_v27  ;;  %v1064_v44 = vrot.slane %v1062_v35, 4  ;;  %v1067_v45 = vrot.slane %v1065_v36, 5  ;;  %v1085_v46 = vshll.u32 %v3470_v34, 16  ;;  %v3492_v55 = vld [vmem:[%s3432_s14 + $0x18] sm:$0xf]  ;;  %s219_s28 = scalar_lea.vmem [#allocation5], %s2340_s8 }
  0x34   : > { %2790 = vmatpush3.bf16.msra.mxu1 %v3138_v6  ;;  %v274_v43 = vrot.slane %v273_v32, 4  ;;  %v1078_v49 = vrot.slane %v1076_v41, 4  ;;  %v1081_v50 = vrot.slane %v1079_v42, 5  ;;  %v1073_v54 = vrot.slane %v1071_v40, 5  ;;  %v3495_v56 = vld [vmem:[%s3432_s14 + $0x14] sm:$0x1] }
  0x35   : > { %2886 = vmatpush3.bf16.msra.mxu0 %v3139_v7  ;;  %2791 = vmatprep.subr.bf16.mxu1 %v3140_v8  ;;  %v288_v48 = vrot.slane %v287_v39, 4  ;;  %v1068_v53 = vor.u32 %v1067_v45, %v1064_v44  ;;  %v1087_v59 = vrot.slane %v1085_v46, 5  ;;  %v3500_v60 = vld [vmem:[%s3432_s14 + $0x1c] sm:$0x1]  ;;  %v295_v61 = vshrl.u32 %v3487_v51, 16  ;;  %s2248_s10 = sshll.u32 %s219_s28, 4  ;;  %s3973_s10 = int_to_ptr.vmem [resolvable:$true] %s2248_s10 }
  0x36   : > { %2887 = vmatprep.subr.bf16.mxu0 %v3141_v9  ;;  %v279_v52 = vsel %vm3477_vm2, %v274_v43, %v278_v26  ;;  %v1082_v58 = vor.u32 %v1081_v50, %v1078_v49  ;;  %v298_v2 = vshll.u32 %v3487_v51, 16  ;;  %v304_v3 = vshll.u32 %v3495_v56, 16  ;;  %v3520_v16 = vld [vmem:[%s3432_s14 + $0x1c] sm:$0x1]  ;;  %v2462_v17 = vld [vmem:[%s3432_s14 + $0x20] sm:$0xf] }
  0x37   : > { %v293_v57 = vsel %vm3477_vm2, %v288_v48, %v292_v29  ;;  %v1069_v0 = vrot.slane %v1068_v53, 4  ;;  %v297_v5 = vrot.slane %v295_v61, 4  ;;  %v309_v6 = vshrl.u32 %v3492_v55, 16  ;;  %v3526_v21 = vld [vmem:[%s3432_s14 + $0x24] sm:$0x1]  ;;  %v3150_v43 = vld [vmem:[%s4019_s1 + $0x8] sm:$0xff]  }
  0x38   : > { %2792 = vmatpush3.bf16.msra.mxu1 %v3140_v8  ;;  %v2360_v62 = vcombine.low %v279_v52, %v293_v57  ;;  %v1083_v4 = vrot.slane %v1082_v58, 4  ;;  %v312_v7 = vshll.u32 %v3492_v55, 16  ;;  %v2460_v8 = vld [vmem:[%s3432_s14 + $0x18] sm:$0xf]  ;;  %v306_v24 = vrot.slane %v304_v3, 5  ;;  %s3977_s19 = scalar_lea.sflag [#allocation3], %s217_s30 }
  0x39   : > { %2888 = vmatpush3.bf16.msra.mxu0 %v3141_v9  ;;  %2793 = vmatprep.subr.bf16.mxu1 %v3142_v10  ;;  %v1074_v9 = vsel %vm3477_vm2, %v1069_v0, %v1073_v54  ;;  %v311_v19 = vrot.slane %v309_v6, 4  ;;  %v1090_v27 = vshrl.u32 %v2460_v8, 16  ;;  %v1093_v28 = vshll.u32 %v2460_v8, 16  ;;  %v3151_v54 = vld [vmem:[%s4019_s1 + $0x148] sm:$0xff]   ;;  %v3556_v0 = vld [vmem:[%s3432_s14 + $0x24] sm:$0x1] }
  0x3a   : > { %2889 = vmatprep.subr.bf16.mxu0 %v3143_v14  ;;  %2799 = vmatprep.mubr.bf16.mxu1 %v2360_v62  ;;  %v1088_v18 = vsel %vm3477_vm2, %v1083_v4, %v1087_v59  ;;  %v314_v20 = vrot.slane %v312_v7, 5  ;;  %v1099_v29 = vshll.u32 %v3520_v16, 16  ;;  %v1104_v32 = vshrl.u32 %v2462_v17, 16  ;;  %v3152_v59 = vld [vmem:[%s4019_s1 + $0x10] sm:$0xff]   ;;  %v3550_v62 = vld [vmem:[%s3432_s14 + $0x20] sm:$0xf] }
  0x3b   : > { %v1107_v33 = vshll.u32 %v2462_v17, 16  ;;  %v1113_v35 = vshll.u32 %v3526_v21, 16  ;;  %v1095_v39 = vrot.slane %v1093_v28, 5  ;;  %v1353_v57 = vrot.slane %v3466_v31, 5  ;;  %s3231_s20 = scalar_lea.vmem %s3973_s10, 1024  ;;  %s3300_s22 = smov [#allocation5]  }
  0x3c   : > { %2794 = vmatpush3.bf16.msra.mxu1 %v3142_v10  ;;  %v300_v10 = vrot.slane %v298_v2, 5  ;;  %v315_v26 = vor.u32 %v314_v20, %v311_v19  ;;  %v1106_v41 = vrot.slane %v1104_v32, 4  ;;  %v1101_v46 = vrot.slane %v1099_v29, 5  ;;  %v3559_v2 = vld [vmem:[%s3432_s14 + $0x2c] sm:$0x1]  ;;  %v3155_v29 = vld [vmem:[%s4019_s1 + $0x158] sm:$0xff]   ;;  %p3232_p9 = scmp.ne.s32.totalorder %s3973_s10, %s3231_s20 }
  0x3d   : > { %2890 = vmatpush3.bf16.msra.mxu0 %v3143_v14  ;;  %2795 = vmatprep.subr.bf16.mxu1 %v3144_v22  ;;  %v318_v14 = vshll.u32 %v3500_v60, 16  ;;  %v1109_v42 = vrot.slane %v1107_v33, 5  ;;  %v323_v3 = vshrl.u32 %v3550_v62, 16  ;;  %v326_v4 = vshll.u32 %v3550_v62, 16  ;;  %s3235_s23 = sshll.u32 %s3300_s22, 4  ;;  %s3236_s23 = int_to_ptr.vmem [resolvable:$false] %s3235_s23 }
  0x3e   : > { %2891 = vmatprep.subr.bf16.mxu0 %v3145_v23  ;;  %v316_v36 = vrot.slane %v315_v26, 4  ;;  %v346_v8 = vshll.u32 %v3559_v2, 16  ;;  %v3580_v26 = vld [vmem:[%s3432_s14 + $0x34] sm:$0x1]  ;;  %p3233_p10 = pnand %p3232_p9, %p3366_p5  ;;  %s3237_s27 = scalar_lea.vmem %s3236_s23, 2048 }
  0x3f   : > { %v320_v25 = vrot.slane %v318_v14, 5  ;;  %v1110_v49 = vor.u32 %v1109_v42, %v1106_v41  ;;  %v325_v14 = vrot.slane %v323_v3, 4  ;;  %v328_v17 = vrot.slane %v326_v4, 5  ;;  %p3238_p13 = scmp.lt.s32.totalorder %s3973_s10, %s3236_s23  ;;  %p3239_p0 = scmp.lt.s32.totalorder %s3237_s27, %s3231_s20 }
  0x40   : > { %2796 = vmatpush3.bf16.msra.mxu1 %v3144_v22  ;;  %v2488_v22 = vcombine.low %v1074_v9, %v1088_v18  ;;  %v3153_v9 = vld [vmem:[%s4019_s1 + $0x150] sm:$0xff]   ;;  %v1141_v41 = vshll.u32 %v3580_v26, 16  ;;  %p3234_p12 = pneg %p3233_p10 }
  0x41   : > { %2892 = vmatpush3.bf16.msra.mxu0 %v3145_v23  ;;  %2797 = vmatprep.subr.bf16.mxu1 %v3146_v37  ;;  %v301_v23 = vor.u32 %v300_v10, %v297_v5  ;;  %v321_v44 = vsel %vm3477_vm2, %v316_v36, %v320_v25  ;;  %v1111_v52 = vrot.slane %v1110_v49, 4  ;;  %v332_v5 = vshll.u32 %v3556_v0, 16  ;;  %v3154_v10 = vld [vmem:[%s4019_s1 + $0x18] sm:$0xff]   ;;  %v2466_v25 = vld [vmem:[%s3432_s14 + $0x30] sm:$0xf]  ;;  %p3240_p1 = por %p3239_p0, %p3238_p13 }
  0x42   : > { %2893 = vmatprep.subr.bf16.mxu0 %v3147_v47  ;;  %2895 = vmatprep.mubr.bf16.mxu0 %v2488_v22  ;;  %v348_v22 = vrot.slane %v346_v8, 5  ;;  %v1135_v36 = vshll.u32 %v2466_v25, 16  ;;  %v1143_v49 = vrot.slane %v1141_v41, 5 }
  0x43   : > { %v302_v30 = vrot.slane %v301_v23, 4  ;;  %v334_v18 = vrot.slane %v332_v5, 5  ;;  %v2464_v23 = vld [vmem:[%s3432_s14 + $0x28] sm:$0xf]  ;;  %v2468_v5 = vld [vmem:[%s3432_s14 + $0x38] sm:$0xf]  ;;  %p3241_p2 = pnand %p3240_p1, %p3234_p12 }
  0x44   : > { %2798 = vmatpush3.bf16.msra.mxu1 %v3146_v37  ;;  %v1092_v37 = vrot.slane %v1090_v27, 4  ;;  %v1118_v27 = vshrl.u32 %v2464_v23, 16  ;;  %v1121_v28 = vshll.u32 %v2464_v23, 16 }
  0x45   : > { %2894 = vmatpush3.bf16.msra.mxu0 %v3147_v47  ;;  %2807 = vmatprep.subr.bf16.mxu1 %v3148_v63  ;;  %v307_v40 = vsel %vm3477_vm2, %v302_v30, %v306_v24  ;;  %v1115_v47 = vrot.slane %v1113_v35, 5  ;;  %v3576_v24 = vld [vmem:[%s3432_s14 + $0x2c] sm:$0x1]  ;;  %v3156_v30 = vld [vmem:[%s4019_s1 + $0x20] sm:$0xff]   ;;  %v1132_v35 = vshrl.u32 %v2466_v25, 16 }
  0x46   : > { %2903 = vmatprep.subr.bf16.mxu0 %v3509_v1  ;;  %v1096_v45 = vor.u32 %v1095_v39, %v1092_v37  ;;  %v2361_v48 = vcombine.low %v307_v40, %v321_v44  ;;  %v1127_v33 = vshll.u32 %v3576_v24, 16  ;;  %v1120_v39 = vrot.slane %v1118_v27, 4  ;;  %v3626_v27 = vld [vmem:[%s3432_s14 + $0x44] sm:$0x1] }
  0x47   : > { %v1116_v58 = vsel %vm3477_vm2, %v1111_v52, %v1115_v47  ;;  %v1123_v40 = vrot.slane %v1121_v28, 5  ;;  %v1134_v44 = vrot.slane %v1132_v35, 4  ;;  %v3599_v52 = vld [vmem:[%s3432_s14 + $0x34] sm:$0x1]  ;;  %v1146_v28 = vshrl.u32 %v2468_v5, 16 }
  0x48   : > { %v1097_v50 = vrot.slane %v1096_v45, 4  ;;  %2800 = vmatmul.mubr.bf16.vlgmr.msra.gmra.mrb[0].mxu1 %v2361_v48  ;;  %v1137_v45 = vrot.slane %v1135_v36, 5  ;;  %v360_v4 = vshll.u32 %v3599_v52, 16  ;;  %v1149_v36 = vshll.u32 %v2468_v5, 16 }
  0x49   : > { %2808 = vmatpush3.bf16.msra.mxu1 %v3148_v63  ;;  %v3553_v63 = vld [vmem:[%s3432_s14 + $0x28] sm:$0xf]  ;;  %v1124_v48 = vor.u32 %v1123_v40, %v1120_v39  ;;  %v1148_v41 = vrot.slane %v1146_v28, 4  ;;  %v3163_v28 = vld [vmem:[%s4019_s1 + $0x178] sm:$0xff]  }
  0x4a   : > { %v1102_v53 = vsel %vm3477_vm2, %v1097_v50, %v1101_v46  ;;  %2809 = vmatprep.subr.bf16.mxu1 %v3150_v43  ;;  %v337_v6 = vshrl.u32 %v3553_v63, 16  ;;  %v340_v7 = vshll.u32 %v3553_v63, 16  ;;  %v3591_v46 = vld [vmem:[%s3432_s14 + $0x30] sm:$0xf]  ;;  %v3596_v50 = vld [vmem:[%s3432_s14 + $0x38] sm:$0xf] }
  0x4b   : > { %v2489_v61 = vcombine.low %v1102_v53, %v1116_v58  ;;  %v351_v53 = vshrl.u32 %v3591_v46, 16  ;;  %v354_v3 = vshll.u32 %v3591_v46, 16  ;;  %v1125_v8 = vrot.slane %v1124_v48, 4 }
  0x4c   : > { %v339_v19 = vrot.slane %v337_v6, 4  ;;  %v342_v20 = vrot.slane %v340_v7, 5  ;;  %v3158_v6 = vld [vmem:[%s4019_s1 + $0x28] sm:$0xff]   ;;  %v1361_v48 = vrot.slane %v3520_v16, 5 }
  0x4d   : > { %2896 = vmatmul.mubr.bf16.vlgmr.msra.gmra.mrb[0].mxu0 %v2489_v61  ;;  %2810 = vmatpush3.bf16.msra.mxu1 %v3150_v43  ;;  %v1129_v43 = vrot.slane %v1127_v33, 5  ;;  %v3608_v61 = vld [vmem:[%s3432_s14 + $0x3c] sm:$0x1] }
  0x4e   : > { %2904 = vmatpush3.bf16.msra.mxu0 %v3509_v1  ;;  %2811 = vmatprep.subr.bf16.mxu1 %v3152_v59  ;;  %v329_v1 = vor.u32 %v328_v17, %v325_v14  ;;  %v343_v32 = vor.u32 %v342_v20, %v339_v19  ;;  %v365_v14 = vshrl.u32 %v3596_v50, 16  ;;  %v3618_v17 = vld [vmem:[%s3432_s14 + $0x3c] sm:$0x1]  ;;  %v356_v19 = vrot.slane %v354_v3, 5 }
  0x4f   : > { %2905 = vmatprep.subr.bf16.mxu0 %v3151_v54  ;;  %v362_v20 = vrot.slane %v360_v4, 5  ;;  %v1130_v23 = vsel %vm3477_vm2, %v1125_v8, %v1129_v43  ;;  %v374_v25 = vshll.u32 %v3608_v61, 16 }
  0x50   : > { %v330_v37 = vrot.slane %v329_v1, 4  ;;  %v344_v42 = vrot.slane %v343_v32, 4  ;;  %v367_v1 = vrot.slane %v365_v14, 4 }
  0x51   : > { %2812 = vmatpush3.bf16.msra.mxu1 %v3152_v59  ;;  %v1138_v59 = vor.u32 %v1137_v45, %v1134_v44  ;;  %v376_v40 = vrot.slane %v374_v25, 5  ;;  %v1151_v45 = vrot.slane %v1149_v36, 5  ;;  %v2502_v25 = vld [vmem:[%s3432_s14 + $0x18] sm:$0xe] }
  0x52   : > { %2906 = vmatpush3.bf16.msra.mxu0 %v3151_v54  ;;  %2813 = vmatprep.subr.bf16.mxu1 %v3154_v10  ;;  %v335_v47 = vsel %vm3477_vm2, %v330_v37, %v334_v18  ;;  %v3157_v54 = vld [vmem:[%s4019_s1 + $0x160] sm:$0xff]   ;;  %v349_v58 = vsel %vm3477_vm2, %v344_v42, %v348_v22  ;;  %v368_v22 = vshll.u32 %v3596_v50, 16  ;;  %v3160_v37 = vld [vmem:[%s4019_s1 + $0x30] sm:$0xff]   ;;  %v1155_v42 = vshll.u32 %v3618_v17, 16 }
  0x53   : > { %2907 = vmatprep.subr.bf16.mxu0 %v3153_v9  ;;  %v2362_v7 = vcombine.low %v335_v47, %v349_v58  ;;  %v1139_v18 = vrot.slane %v1138_v59, 4  ;;  %v1357_v47 = vrot.slane %v3470_v34, 5  ;;  %v3161_v58 = vld [vmem:[%s4019_s1 + $0x170] sm:$0xff]   ;;  %v1152_v4 = vor.u32 %v1151_v45, %v1148_v41  ;;  %v3166_v41 = vld [vmem:[%s4019_s1 + $0x180] sm:$0xff]  }
  0x54   : > { %v370_v35 = vrot.slane %v368_v22, 5  ;;  %v1157_v34 = vrot.slane %v1155_v42, 5  ;;  %v1365_v22 = vrot.slane %v3526_v21, 5  ;;  %v2510_v36 = vrot.slane %v2502_v25, 9 }
  0x55   : > { %2814 = vmatpush3.bf16.msra.mxu1 %v3154_v10  ;;  %v353_v10 = vrot.slane %v351_v53, 4  ;;  %2803 = vmatprep.mubr.bf16.mxu1 %v2362_v7  ;;  %v1144_v32 = vsel %vm3477_vm2, %v1139_v18, %v1143_v49  ;;  %v1169_v53 = vshll.u32 %v3626_v27, 16  ;;  %v2500_v7 = vld [vmem:[%s3432_s14 + $0x8] sm:$0xe]  ;;  %v1153_v18 = vrot.slane %v1152_v4, 4 }
  0x56   : > { %2908 = vmatpush3.bf16.msra.mxu0 %v3153_v9  ;;  %2815 = vmatprep.subr.bf16.mxu1 %v3156_v30  ;;  %v2470_v9 = vld [vmem:[%s3432_s14 + $0x40] sm:$0xf]  ;;  %v2490_v39 = vcombine.low %v1130_v23, %v1144_v32  ;;  %v371_v44 = vor.u32 %v370_v35, %v367_v1  ;;  %v2508_v14 = vrot.slane %v2500_v7, 9  ;;  %v1362_v42 = vsel %vm3651_vm5, %v2510_v36, %v1361_v48 }
  0x57   : > { %2909 = vmatprep.subr.bf16.mxu0 %v3155_v29  ;;  %v357_v33 = vor.u32 %v356_v19, %v353_v10  ;;  %v1163_v49 = vshll.u32 %v2470_v9, 16  ;;  %v2501_v10 = vld [vmem:[%s3432_s14 + $0x10] sm:$0xe]  ;;  %v2372_v19 = vcombine.low %v3438_v11, %v3441_v12  ;;  %v1171_v1 = vrot.slane %v1169_v53, 5  ;;  %v2503_v12 = vld [vmem:[%s3432_s14 + $0x20] sm:$0xe] }
  0x58   : > { %2899 = vmatprep.mubr.bf16.mxu0 %v2490_v39  ;;  %v372_v3 = vrot.slane %v371_v44, 4  ;;  %v1354_v32 = vsel %vm3651_vm5, %v2508_v14, %v1353_v57  ;;  %v1158_v21 = vsel %vm3477_vm2, %v1153_v18, %v1157_v34  ;;  %v3165_v35 = vld [vmem:[%s4019_s1 + $0x80] sm:$0xff]   ;;  %v3170_v44 = vld [vmem:[%s4019_s1 + $0x90] sm:$0xff]   ;;  %v1369_v45 = vrot.slane %v3576_v24, 5 }
  0x59   : > { %2816 = vmatpush3.bf16.msra.mxu1 %v3156_v30  ;;  %v3159_v30 = vld [vmem:[%s4019_s1 + $0x168] sm:$0xff]   ;;  %v358_v43 = vrot.slane %v357_v33, 4  ;;  %v1165_v16 = vrot.slane %v1163_v49, 5  ;;  %v1377_v53 = vrot.slane %v3618_v17, 5  ;;  %v1381_v24 = vrot.slane %v3626_v27, 5  ;;  %v3174_v18 = vld [vmem:[%s4019_s1 + $0xa0] sm:$0xff]  }
  0x5a   : > { %2910 = vmatpush3.bf16.msra.mxu0 %v3155_v29  ;;  %2817 = vmatprep.subr.bf16.mxu1 %v3158_v6  ;;  %v1160_v29 = vshrl.u32 %v2470_v9, 16  ;;  %v694_v34 = vrot.slane %v3450_v15, 5  ;;  %v698_v17 = vrot.slane %v3495_v56, 5  ;;  %v662_v15 = vld [vmem:[%s3432_s14 + $0x8] sm:$0xe]  ;;  %v706_v36 = vrot.slane %v3556_v0, 5 }
  0x5b   : > { %2911 = vmatprep.subr.bf16.mxu0 %v3157_v54  ;;  %v363_v59 = vsel %vm3477_vm2, %v358_v43, %v362_v20  ;;  %v2509_v20 = vrot.slane %v2501_v10, 9  ;;  %v3168_v43 = vld [vmem:[%s4019_s1 + $0x88] sm:$0xff]   ;;  %v3171_v10 = vld [vmem:[%s4019_s1 + $0x190] sm:$0xff]   ;;  %v2385_v14 = vrot.slane %v662_v15, 9  ;;  %v3184_v0 = vld [vmem:[%s4019_s1 + $0xc0] sm:$0xff]  }
  0x5c   : > { %v1162_v5 = vrot.slane %v1160_v29, 4  ;;  %v1373_v29 = vrot.slane %v3580_v26, 5  ;;  %v2375_v26 = vcombine.low %v3591_v46, %v3596_v50  ;;  %v3172_v46 = vld [vmem:[%s4019_s1 + $0x98] sm:$0xff]   ;;  %v3189_v15 = vld [vmem:[%s4019_s1 + $0x1c8] sm:$0xff]  }
  0x5d   : > { %2818 = vmatpush3.bf16.msra.mxu1 %v3158_v6  ;;  %v3162_v6 = vld [vmem:[%s4019_s1 + $0x38] sm:$0xff]   ;;  %v1358_v11 = vsel %vm3651_vm5, %v2509_v20, %v1357_v47 }
  0x5e   : > { %2912 = vmatpush3.bf16.msra.mxu0 %v3157_v54  ;;  %2819 = vmatprep.subr.bf16.mxu1 %v3160_v37  ;;  %v377_v54 = vsel %vm3477_vm2, %v372_v3, %v376_v40  ;;  %v1166_v23 = vor.u32 %v1165_v16, %v1162_v5  ;;  %v2532_v57 = vcombine.low %v1354_v32, %v1358_v11  ;;  %v661_v16 = vld [vmem:[%s3432_s14] sm:$0xe]  ;;  %v3173_v20 = vld [vmem:[%s4019_s1 + $0x198] sm:$0xff]  }
  0x5f   : > { %2913 = vmatprep.subr.bf16.mxu0 %v3159_v30  ;;  %v2363_v9 = vcombine.low %v363_v59, %v377_v54  ;;  %v2373_v40 = vcombine.low %v3487_v51, %v3492_v55  ;;  %v2374_v51 = vcombine.low %v3550_v62, %v3553_v63  ;;  %v690_v55 = vrot.slane %v3444_v13, 5  ;;  %v3169_v62 = vld [vmem:[%s4019_s1 + $0x188] sm:$0xff]   ;;  %v2505_v63 = vld [vmem:[%s3432_s14 + $0x30] sm:$0xe]  ;;  %v2507_v59 = vld [vmem:[%s3432_s14 + $0x40] sm:$0xe] }
  0x60   : > { %v1167_v33 = vrot.slane %v1166_v23, 4  ;;  %v2504_v13 = vld [vmem:[%s3432_s14 + $0x28] sm:$0xe]  ;;  %v2513_v49 = vrot.slane %v2505_v63, 9  ;;  %v2515_v7 = vrot.slane %v2507_v59, 9  ;;  %v2384_v56 = vrot.slane %v661_v16, 9 }
  0x61   : > { %2820 = vmatpush3.bf16.msra.mxu1 %v3160_v37  ;;  %v2511_v37 = vrot.slane %v2503_v12, 9  ;;  %v2512_v48 = vrot.slane %v2504_v13, 9  ;;  %v702_v54 = vrot.slane %v3500_v60, 5  ;;  %v663_v23 = vld [vmem:[%s3432_s14 + $0x10] sm:$0xe] }
  0x62   : > { %2914 = vmatpush3.bf16.msra.mxu0 %v3159_v30  ;;  %2804 = vmatmul.mubr.bf16.gmra.mrb[4].mxu1 %v2363_v9  ;;  %v1172_v31 = vsel %vm3477_vm2, %v1167_v33, %v1171_v1  ;;  %v1374_v4 = vsel %vm3651_vm5, %v2513_v49, %v1373_v29  ;;  %v695_v9 = vsel %vm3651_vm5, %v2385_v14, %v694_v34  ;;  %v664_v60 = vld [vmem:[%s3432_s14 + $0x18] sm:$0xe]  ;;  %v2386_v25 = vrot.slane %v663_v23, 9  ;;  %v3176_v33 = vld [vmem:[%s4019_s1 + $0xa8] sm:$0xff]  }
  0x63   : > { %2915 = vmatprep.subr.bf16.mxu0 %v3161_v58  ;;  %2821 = vmatprep.subr.bf16.mxu1 %v3162_v6  ;;  %v2491_v39 = vcombine.low %v1158_v21, %v1172_v31  ;;  %v1366_v30 = vsel %vm3651_vm5, %v2511_v37, %v1365_v22  ;;  %v1370_v3 = vsel %vm3651_vm5, %v2512_v48, %v1369_v45  ;;  %v3185_v32 = vld [vmem:[%s3432_s14 + $0x10] ss:$8 sps:$4 sm:$0xff]   ;;  %v714_v29 = vrot.slane %v3599_v52, 5  ;;  %v3188_v49 = vld [vmem:[%s4019_s1 + $0xc8] sm:$0xff]  }
  0x64   : > { %2823 = vmatprep.mubr.bf16.mxu1 %v2372_v19  ;;  %v2533_v47 = vcombine.low %v1362_v42, %v1366_v30  ;;  %v2534_v27 = vcombine.low %v1370_v3, %v1374_v4  ;;  %v691_v19 = vsel %vm3651_vm5, %v2384_v56, %v690_v55  ;;  %v699_v11 = vsel %vm3651_vm5, %v2386_v25, %v698_v17  ;;  %v3179_v31 = vld [vmem:[%s4019_s1 + $0xb0] sm:$0xff]   ;;  %v3182_v37 = vld [vmem:[%s4019_s1 + $0xb8] sm:$0xff]   ;;  %v2586_v25 = vld [vmem:[%s3432_s14 + $0x28] sm:$0xf] }
  0x65   : > { %2822 = vmatpush3.bf16.msra.mxu1 %v3162_v6  ;;  %2900 = vmatmul.mubr.bf16.gmra.mrb[4].mxu0 %v2491_v39  ;;  %v1382_v6 = vsel %vm3651_vm5, %v2515_v7, %v1381_v24  ;;  %v2408_v1 = vcombine.low %v691_v19, %v695_v9  ;;  %v665_v39 = vld [vmem:[%s3432_s14 + $0x20] sm:$0xe]  ;;  %v3183_v45 = vld [vmem:[%s4019_s1 + $0x1b8] sm:$0xff]   ;;  %v3790_v24 = vld [vmem:[%s3432_s14 + $0x14] sm:$0x1] }
  0x66   : > { %2916 = vmatpush3.bf16.msra.mxu0 %v3161_v58  ;;  %2831 = vmatprep.subr.bf16.mxu1 %v3165_v35  ;;  %v2506_v58 = vld [vmem:[%s3432_s14 + $0x38] sm:$0xe]  ;;  %v2388_v42 = vrot.slane %v665_v39, 9  ;;  %v1734_v59 = vshll.u32 %v3790_v24, 16  ;;  %v3187_v7 = vld [vmem:[%s3432_s14 + $0x20] ss:$8 sps:$4 sm:$0xff]  }
  0x67   : > { %2917 = vmatprep.subr.bf16.mxu0 %v3163_v28  ;;  %2919 = vmatprep.mubr.bf16.mxu0 %v2532_v57  ;;  %v2514_v5 = vrot.slane %v2506_v58, 9  ;;  %v3177_v57 = vld [vmem:[%s4019_s1 + $0x1a8] sm:$0xff]   ;;  %v2582_v52 = vld [vmem:[%s3432_s14 + $0x18] sm:$0xf]  ;;  %v3191_v9 = vld [vmem:[%s4019_s1 + $0x1d0] sm:$0xff]  }
  0x68   : > { %v1739_v3 = vshrl.u32 %v2582_v52, 16  ;;  %v1742_v4 = vshll.u32 %v2582_v52, 16  ;;  %v3198_v56 = vld [vmem:[%s3432_s14 + $0x30] ss:$8 sps:$4 sm:$0xff]   ;;  %v3197_v52 = vld [vmem:[%s4019_s1 + $0x1e8] sm:$0xff]  }
  0x69   : > { %v1378_v50 = vsel %vm3651_vm5, %v2514_v5, %v1377_v53  ;;  %v2580_v53 = vld [vmem:[%s3432_s14 + $0x10] sm:$0xf]  ;;  %v3192_v23 = vld [vmem:[%s4019_s1 + $0xd8] sm:$0xff]  }
  0x6a   : > { %2918 = vmatpush3.bf16.msra.mxu0 %v3163_v28  ;;  %2824 = vmatmul.mubr.bf16.vlgmr.msra.gmra.mrb[0].mxu1 %v2373_v40  ;;  %v2535_v22 = vcombine.low %v1378_v50, %v1382_v6  ;;  %v2387_v28 = vrot.slane %v664_v60, 9  ;;  %v666_v40 = vld [vmem:[%s3432_s14 + $0x28] sm:$0xe]  ;;  %v1728_v58 = vshll.u32 %v2580_v53, 16  ;;  %v1741_v50 = vrot.slane %v1739_v3, 4 }
  0x6b   : > { %2927 = vmatprep.subr.bf16.mxu0 %v3166_v41  ;;  %2832 = vmatpush3.bf16.msra.mxu1 %v3165_v35  ;;  %v3175_v35 = vld [vmem:[%s4019_s1 + $0x1a0] sm:$0xff]   ;;  %v2389_v30 = vrot.slane %v666_v40, 9  ;;  %v1744_v6 = vrot.slane %v1742_v4, 5 }
  0x6c   : > { %2833 = vmatprep.subr.bf16.mxu1 %v3168_v43  ;;  %2827 = vmatprep.mubr.bf16.mxu1 %v2374_v51  ;;  %v703_v12 = vsel %vm3651_vm5, %v2387_v28, %v702_v54  ;;  %v667_v51 = vld [vmem:[%s3432_s14 + $0x30] sm:$0xe]  ;;  %v1730_v16 = vrot.slane %v1728_v58, 5  ;;  %v1736_v54 = vrot.slane %v1734_v59, 5 }
  0x6d   : > { %2920 = vmatmul.mubr.bf16.vlgmr.msra.gmra.mrb[0].mxu0 %v2533_v47  ;;  %v2409_v21 = vcombine.low %v699_v11, %v703_v12  ;;  %v718_v47 = vrot.slane %v3608_v61, 5  ;;  %v2390_v63 = vrot.slane %v667_v51, 9  ;;  %v3794_v61 = vld [vmem:[%s3432_s14 + $0x1c] sm:$0x1]  ;;  %v3200_v11 = vld [vmem:[%s3432_s14 + $0x40] ss:$8 sps:$4 sm:$0xff]  }
  0x6e   : > { %2928 = vmatpush3.bf16.msra.mxu0 %v3166_v41  ;;  %2923 = vmatprep.mubr.bf16.mxu0 %v2534_v27  ;;  %v710_v41 = vrot.slane %v3559_v2, 5  ;;  %v707_v2 = vsel %vm3651_vm5, %v2388_v42, %v706_v36  ;;  %v1748_v5 = vshll.u32 %v3794_v61, 16  ;;  %v2588_v12 = vld [vmem:[%s3432_s14 + $0x30] sm:$0xf]  ;;  %v1770_v36 = vshll.u32 %v2586_v25, 16 }
  0x6f   : > { %2834 = vmatpush3.bf16.msra.mxu1 %v3168_v43  ;;  %2929 = vmatprep.subr.bf16.mxu0 %v3169_v62  ;;  %v3180_v43 = vld [vmem:[%s4019_s1 + $0x1b0] sm:$0xff]   ;;  %v715_v34 = vsel %vm3651_vm5, %v2390_v63, %v714_v29  ;;  %v1781_v40 = vshrl.u32 %v2588_v12, 16  ;;  %v3839_v51 = vld [vmem:[%s3432_s14 + $0x24] sm:$0x1] }
  0x70   : > { %2835 = vmatprep.subr.bf16.mxu1 %v3170_v44  ;;  %v711_v55 = vsel %vm3651_vm5, %v2389_v30, %v710_v41  ;;  %v1750_v19 = vrot.slane %v1748_v5, 5  ;;  %v1784_v41 = vshll.u32 %v2588_v12, 16  ;;  %v1772_v29 = vrot.slane %v1770_v36, 5  ;;  %v2594_v5 = vld [vmem:[%s3432_s14 + $0x48] sm:$0xf]  ;;  %v3203_v12 = vld [vmem:[%s4019_s1 + $0x1f8] sm:$0xff]  }
  0x71   : > { %v2410_v13 = vcombine.low %v707_v2, %v711_v55  ;;  %v3842_v2 = vld [vmem:[%s3432_s14 + $0x2c] sm:$0x1]  ;;  %v1762_v58 = vshll.u32 %v3839_v51, 16 }
  0x72   : > { %2828 = vmatmul.mubr.bf16.gmra.mrb[4].mxu1 %v2375_v26  ;;  %2930 = vmatpush3.bf16.msra.mxu0 %v3169_v62  ;;  %v3186_v62 = vld [vmem:[%s4019_s1 + $0x1c0] sm:$0xff]   ;;  %v1725_v26 = vshrl.u32 %v2580_v53, 16  ;;  %v1786_v63 = vrot.slane %v1784_v41, 5  ;;  %v1776_v59 = vshll.u32 %v3842_v2, 16 }
  0x73   : > { %2836 = vmatpush3.bf16.msra.mxu1 %v3170_v44  ;;  %2931 = vmatprep.subr.bf16.mxu0 %v3171_v10  ;;  %v668_v44 = vld [vmem:[%s3432_s14 + $0x38] sm:$0xe]  ;;  %v2592_v53 = vld [vmem:[%s3432_s14 + $0x40] sm:$0xf] }
  0x74   : > { %2837 = vmatprep.subr.bf16.mxu1 %v3172_v46  ;;  %2847 = vmatprep.mubr.bf16.mxu1 %v2408_v1  ;;  %v2391_v48 = vrot.slane %v668_v44, 9  ;;  %v1727_v27 = vrot.slane %v1725_v26, 4  ;;  %v2584_v1 = vld [vmem:[%s3432_s14 + $0x20] sm:$0xf]  ;;  %v3199_v26 = vld [vmem:[%s4019_s1 + $0xf0] sm:$0xff]  }
  0x75   : > { %2924 = vmatmul.mubr.bf16.gmra.mrb[4].mxu0 %v2535_v22 }
  0x76   : > { %2932 = vmatpush3.bf16.msra.mxu0 %v3171_v10  ;;  %2943 = vmatprep.mubr.bf16.mxu0 %v3185_v32  ;;  %v719_v17 = vsel %vm3651_vm5, %v2391_v48, %v718_v47  ;;  %v1731_v10 = vor.u32 %v1730_v16, %v1727_v27  ;;  %v3845_v47 = vld [vmem:[%s3432_s14 + $0x34] sm:$0x1]  ;;  %v1812_v27 = vshll.u32 %v2592_v53, 16 }
  0x77   : > { %2838 = vmatpush3.bf16.msra.mxu1 %v3172_v46  ;;  %2933 = vmatprep.subr.bf16.mxu0 %v3173_v20  ;;  %v3190_v46 = vld [vmem:[%s4019_s1 + $0xd0] sm:$0xff]   ;;  %v2411_v14 = vcombine.low %v715_v34, %v719_v17  ;;  %v1790_v3 = vshll.u32 %v3845_v47, 16  ;;  %v1809_v17 = vshrl.u32 %v2592_v53, 16  ;;  %v2625_v53 = vld [vmem:[%s3432_s14 + $0x18] sm:$0xe] }
  0x78   : > { %2839 = vmatprep.subr.bf16.mxu1 %v3174_v18  ;;  %v1732_v22 = vrot.slane %v1731_v10, 4 }
  0x7a   : > { %2934 = vmatpush3.bf16.msra.mxu0 %v3173_v20  ;;  %v3204_v20 = vld [vmem:[%s3432_s14 + $0x8] ss:$8 sps:$4 sm:$0xff]   ;;  %v1737_v28 = vsel %vm3477_vm2, %v1732_v22, %v1736_v54 }
  0x7b   : > { %2840 = vmatpush3.bf16.msra.mxu1 %v3174_v18  ;;  %2935 = vmatprep.subr.bf16.mxu0 %v3175_v35  ;;  %v1745_v18 = vor.u32 %v1744_v6, %v1741_v50  ;;  %v1823_v50 = vshrl.u32 %v2594_v5, 16  ;;  %v1826_v6 = vshll.u32 %v2594_v5, 16  ;;  %v2633_v5 = vrot.slane %v2625_v53, 9 }
  0x7c   : > { %2841 = vmatprep.subr.bf16.mxu1 %v3176_v33 }
  0x7d   : > { %v1746_v60 = vrot.slane %v1745_v18, 4  ;;  %v1778_v18 = vrot.slane %v1776_v59, 5  ;;  %v3209_v59 = vld [vmem:[%s3432_s14 + $0x38] ss:$8 sps:$4 sm:$0xff]  }
  0x7e   : > { %2936 = vmatpush3.bf16.msra.mxu0 %v3175_v35  ;;  %v1753_v35 = vshrl.u32 %v2584_v1, 16 }
  0x7f   : > { %2842 = vmatpush3.bf16.msra.mxu1 %v3176_v33  ;;  %2937 = vmatprep.subr.bf16.mxu0 %v3177_v57  ;;  %v1751_v32 = vsel %vm3477_vm2, %v1746_v60, %v1750_v19  ;;  %v3194_v33 = vld [vmem:[%s4019_s1 + $0xe0] sm:$0xff]   ;;  %v3872_v60 = vld [vmem:[%s3432_s14 + $0x4c] sm:$0x1] }
  0x80   : > { %2843 = vmatprep.subr.bf16.mxu1 %v3179_v31  ;;  %v2612_v39 = vcombine.low %v1737_v28, %v1751_v32  ;;  %v1755_v55 = vrot.slane %v1753_v35, 4  ;;  %v1825_v28 = vrot.slane %v1823_v50, 4  ;;  %v1828_v32 = vrot.slane %v1826_v6, 5  ;;  %v3205_v35 = vld [vmem:[%s3432_s14 + $0x18] ss:$8 sps:$4 sm:$0xff]   ;;  %v3213_v6 = vld [vmem:[%s4019_s1 + $0x228] sm:$0xff]  }
  0x82   : > { %2938 = vmatpush3.bf16.msra.mxu0 %v3177_v57  ;;  %v1767_v57 = vshrl.u32 %v2586_v25, 16  ;;  %v1814_v25 = vrot.slane %v1812_v27, 5 }
  0x83   : > { %2844 = vmatpush3.bf16.msra.mxu1 %v3179_v31  ;;  %2939 = vmatprep.subr.bf16.mxu0 %v3180_v43  ;;  %v1756_v31 = vshll.u32 %v2584_v1, 16  ;;  %v1811_v1 = vrot.slane %v1809_v17, 4 }
  0x84   : > { %2845 = vmatprep.subr.bf16.mxu1 %v3182_v37 }
  0x85   : > { %v1758_v44 = vrot.slane %v1756_v31, 5 }
  0x86   : > { %2940 = vmatpush3.bf16.msra.mxu0 %v3180_v43  ;;  %v3195_v43 = vld [vmem:[%s4019_s1 + $0x1e0] sm:$0xff]  }
  0x87   : > { %2846 = vmatpush3.bf16.msra.mxu1 %v3182_v37  ;;  %2941 = vmatprep.subr.bf16.mxu0 %v3183_v45  ;;  %v3193_v37 = vld [vmem:[%s4019_s1 + $0x1d8] sm:$0xff]  }
  0x88   : > { %2855 = vmatprep.subr.bf16.mxu1 %v3184_v0 }
  0x8a   : > { %2848 = vmatmul.mubr.bf16.vlgmr.msra.gmra.mrb[0].mxu1 %v2409_v21  ;;  %2942 = vmatpush3.bf16.msra.mxu0 %v3183_v45  ;;  %v2590_v21 = vld [vmem:[%s3432_s14 + $0x38] sm:$0xf]  ;;  %v1769_v45 = vrot.slane %v1767_v57, 4 }
  0x8b   : > { %2856 = vmatpush3.bf16.msra.mxu1 %v3184_v0  ;;  %2851 = vmatprep.mubr.bf16.mxu1 %v2410_v13  ;;  %v1795_v42 = vshrl.u32 %v2590_v21, 16  ;;  %v1798_v30 = vshll.u32 %v2590_v21, 16  ;;  %v3196_v0 = vld [vmem:[%s4019_s1 + $0xe8] sm:$0xff]   ;;  %v1783_v13 = vrot.slane %v1781_v40, 4  ;;  %v2628_v21 = vld [vmem:[%s3432_s14 + $0x30] sm:$0xe] }
  0x8c   : > { %2857 = vmatprep.subr.bf16.mxu1 %v3188_v49  ;;  %2951 = vmatprep.subr.bf16.mxu0 %v3186_v62  ;;  %v1773_v34 = vor.u32 %v1772_v29, %v1769_v45 }
  0x8d   : > { %2944 = vmatmul.mubr.bf16.vlgmr.msra.gmra.mrb[0].mxu0 %v3187_v7  ;;  %v1797_v48 = vrot.slane %v1795_v42, 4  ;;  %v1759_v7 = vor.u32 %v1758_v44, %v1755_v55  ;;  %v1787_v16 = vor.u32 %v1786_v63, %v1783_v13  ;;  %v1815_v42 = vor.u32 %v1814_v25, %v1811_v1 }
  0x8e   : > { %2952 = vmatpush3.bf16.msra.mxu0 %v3186_v62  ;;  %2947 = vmatprep.mubr.bf16.mxu0 %v3198_v56  ;;  %v3848_v62 = vld [vmem:[%s3432_s14 + $0x3c] sm:$0x1]  ;;  %v3201_v56 = vld [vmem:[%s4019_s1 + $0x1f0] sm:$0xff]   ;;  %v1774_v54 = vrot.slane %v1773_v34, 4  ;;  %v2032_v55 = vrot.slane %v3845_v47, 5  ;;  %v2024_v25 = vrot.slane %v3839_v51, 5 }
  0x8f   : > { %2858 = vmatpush3.bf16.msra.mxu1 %v3188_v49  ;;  %2953 = vmatprep.subr.bf16.mxu0 %v3189_v15  ;;  %v1800_v49 = vrot.slane %v1798_v30, 5  ;;  %v1804_v4 = vshll.u32 %v3848_v62, 16  ;;  %v1760_v10 = vrot.slane %v1759_v7, 4  ;;  %v1788_v19 = vrot.slane %v1787_v16, 4  ;;  %v3211_v16 = vld [vmem:[%s4019_s1 + $0x218] sm:$0xff]  }
  0x90   : > { %2859 = vmatprep.subr.bf16.mxu1 %v3190_v46  ;;  %v1779_v57 = vsel %vm3477_vm2, %v1774_v54, %v1778_v18  ;;  %v1829_v30 = vor.u32 %v1828_v32, %v1825_v28  ;;  %v2036_v45 = vrot.slane %v3848_v62, 5  ;;  %v2020_v7 = vrot.slane %v3794_v61, 5 }
  0x91   : > { %v2044_v54 = vrot.slane %v3872_v60, 5  ;;  %v2028_v32 = vrot.slane %v3842_v2, 5 }
  0x92   : > { %2852 = vmatmul.mubr.bf16.gmra.mrb[4].mxu1 %v2411_v14  ;;  %2954 = vmatpush3.bf16.msra.mxu0 %v3189_v15  ;;  %v3202_v15 = vld [vmem:[%s4019_s1 + $0xf8] sm:$0xff]   ;;  %v1764_v14 = vrot.slane %v1762_v58, 5  ;;  %v3210_v58 = vld [vmem:[%s4019_s1 + $0x210] sm:$0xff]   ;;  %v2021_v61 = vsel %vm3651_vm5, %v2633_v5, %v2020_v7  ;;  %v2206_v7 = vld [vmem:[%s3955_s7 + $0x28] sm:$0xff] }
  0x93   : > { %2860 = vmatpush3.bf16.msra.mxu1 %v3190_v46  ;;  %2871 = vmatprep.mubr.bf16.mxu1 %v3204_v20  ;;  %v1801_v46 = vor.u32 %v1800_v49, %v1797_v48  ;;  %v1792_v20 = vrot.slane %v1790_v3, 5  ;;  %v2624_v49 = vld [vmem:[%s3432_s14 + $0x10] sm:$0xe] }
  0x94   : > { %2861 = vmatprep.subr.bf16.mxu1 %v3192_v23  ;;  %2955 = vmatprep.subr.bf16.mxu0 %v3191_v9  ;;  %v1765_v31 = vsel %vm3477_vm2, %v1760_v10, %v1764_v14  ;;  %v2632_v3 = vrot.slane %v2624_v49, 9  ;;  %v2631_v10 = vld [vmem:[%s3432_s14 + $0x48] sm:$0xe] }
  0x95   : > { %2948 = vmatmul.mubr.bf16.gmra.mrb[4].mxu0 %v3200_v11  ;;  %v1802_v22 = vrot.slane %v1801_v46, 4  ;;  %v3206_v11 = vld [vmem:[%s4019_s1 + $0x200] sm:$0xff]   ;;  %v1793_v40 = vsel %vm3477_vm2, %v1788_v19, %v1792_v20  ;;  %v2613_v29 = vcombine.low %v1765_v31, %v1779_v57  ;;  %v2639_v19 = vrot.slane %v2631_v10, 9  ;;  %v3215_v20 = vld [vmem:[%s4019_s1 + $0x238] sm:$0xff]  }
  0x96   : > { %2956 = vmatpush3.bf16.msra.mxu0 %v3191_v9  ;;  %2967 = vmatprep.mubr.bf16.mxu0 %v2612_v39  ;;  %v1806_v9 = vrot.slane %v1804_v4, 5  ;;  %v3208_v39 = vld [vmem:[%s3432_s14 + $0x28] ss:$8 sps:$4 sm:$0xff]   ;;  %v2016_v4 = vrot.slane %v3790_v24, 5 }
  0x97   : > { %2862 = vmatpush3.bf16.msra.mxu1 %v3192_v23  ;;  %2957 = vmatprep.subr.bf16.mxu0 %v3193_v37  ;;  %v3869_v23 = vld [vmem:[%s3432_s14 + $0x44] sm:$0x1] }
  0x98   : > { %2863 = vmatprep.subr.bf16.mxu1 %v3194_v33  ;;  %v1818_v36 = vshll.u32 %v3869_v23, 16  ;;  %v1807_v41 = vsel %vm3477_vm2, %v1802_v22, %v1806_v9  ;;  %v2017_v24 = vsel %vm3651_vm5, %v2632_v3, %v2016_v4  ;;  %v2040_v14 = vrot.slane %v3869_v23, 5  ;;  %v2626_v22 = vld [vmem:[%s3432_s14 + $0x20] sm:$0xe]  ;;  %v2627_v9 = vld [vmem:[%s3432_s14 + $0x28] sm:$0xe] }
  0x99   : > { %v2614_v13 = vcombine.low %v1793_v40, %v1807_v41  ;;  %v2656_v50 = vcombine.low %v2017_v24, %v2021_v61  ;;  %v2045_v23 = vsel %vm3651_vm5, %v2639_v19, %v2044_v54  ;;  %v2635_v28 = vrot.slane %v2627_v9, 9  ;;  %v2203_v24 = vld [vmem:[%s3955_s7 + $0x10] sm:$0xff]  ;;  %v2204_v54 = vld [vmem:[%s3955_s7 + $0x18] sm:$0xff] }
  0x9a   : > { %2958 = vmatpush3.bf16.msra.mxu0 %v3193_v37  ;;  %v1832_v37 = vshll.u32 %v3872_v60, 16  ;;  %v1820_v63 = vrot.slane %v1818_v36, 5  ;;  %v2634_v60 = vrot.slane %v2626_v22, 9  ;;  %v2202_v22 = vld [vmem:[%s3955_s7 + $0x8] sm:$0xff] }
  0x9b   : > { %2864 = vmatpush3.bf16.msra.mxu1 %v3194_v33  ;;  %2959 = vmatprep.subr.bf16.mxu0 %v3195_v43  ;;  %v2629_v33 = vld [vmem:[%s3432_s14 + $0x38] sm:$0xe] }
  0x9c   : > { %2865 = vmatprep.subr.bf16.mxu1 %v3196_v0  ;;  %v2637_v44 = vrot.slane %v2629_v33, 9  ;;  %v1834_v48 = vrot.slane %v1832_v37, 5 }
  0x9e   : > { %2960 = vmatpush3.bf16.msra.mxu0 %v3195_v43  ;;  %v3207_v43 = vld [vmem:[%s4019_s1 + $0x208] sm:$0xff]   ;;  %v2037_v62 = vsel %vm3651_vm5, %v2637_v44, %v2036_v45 }
  0x9f   : > { %2866 = vmatpush3.bf16.msra.mxu1 %v3196_v0  ;;  %2961 = vmatprep.subr.bf16.mxu0 %v3197_v52  ;;  %v2636_v0 = vrot.slane %v2628_v21, 9  ;;  %v2029_v21 = vsel %vm3651_vm5, %v2635_v28, %v2028_v32 }
  0xa0   : > { %2867 = vmatprep.subr.bf16.mxu1 %v3199_v26 }
  0xa1   : > { %v2033_v47 = vsel %vm3651_vm5, %v2636_v0, %v2032_v55 }
  0xa2   : > { %2962 = vmatpush3.bf16.msra.mxu0 %v3197_v52  ;;  %v1816_v52 = vrot.slane %v1815_v42, 4  ;;  %v2658_v34 = vcombine.low %v2033_v47, %v2037_v62 }
  0xa3   : > { %2868 = vmatpush3.bf16.msra.mxu1 %v3199_v26  ;;  %2963 = vmatprep.subr.bf16.mxu0 %v3201_v56  ;;  %v1830_v26 = vrot.slane %v1829_v30, 4 }
  0xa4   : > { %2869 = vmatprep.subr.bf16.mxu1 %v3202_v15  ;;  %v1821_v17 = vsel %vm3477_vm2, %v1816_v52, %v1820_v63  ;;  %v2207_v63 = vld [vmem:[%s3955_s7 + $0x30] sm:$0xff]  ;;  %v2205_v52 = vld [vmem:[%s3955_s7 + $0x20] sm:$0xff] }
  0xa5   : > { %v1835_v27 = vsel %vm3477_vm2, %v1830_v26, %v1834_v48 }
  0xa6   : > { %2964 = vmatpush3.bf16.msra.mxu0 %v3201_v56  ;;  %v2615_v46 = vcombine.low %v1821_v17, %v1835_v27  ;;  %v2630_v56 = vld [vmem:[%s3432_s14 + $0x40] sm:$0xe]  ;;  %s2200_s14 = sld [smem:[#allocation2]] }
  0xa7   : > { %2870 = vmatpush3.bf16.msra.mxu1 %v3202_v15  ;;  %2965 = vmatprep.subr.bf16.mxu0 %v3203_v12  ;;  %v3214_v15 = vld [vmem:[%s4019_s1 + $0x230] sm:$0xff]   ;;  %v2638_v18 = vrot.slane %v2630_v56, 9 }
  0xa8   : > { %2999 = vmatprep.subr.bf16.mxu1 %v3206_v11 }
  0xa9   : > { %v2041_v1 = vsel %vm3651_vm5, %v2638_v18, %v2040_v14 }
  0xaa   : > { %2872 = vmatmul.mubr.bf16.vlgmr.msra.gmra.mrb[0].mxu1 %v3205_v35  ;;  %2966 = vmatpush3.bf16.msra.mxu0 %v3203_v12  ;;  %v2025_v12 = vsel %vm3651_vm5, %v2634_v60, %v2024_v25 }
  0xab   : > { %3007 = vmatpush3.bf16.msra.mxu1 %v3206_v11  ;;  %2875 = vmatprep.mubr.bf16.mxu1 %v3208_v39  ;;  %v2657_v33 = vcombine.low %v2025_v12, %v2029_v21 }
  0xac   : > { %3000 = vmatprep.subr.bf16.mxu1 %v3207_v43  ;;  %2975 = vmatprep.subr.bf16.mxu0 %v3206_v11  ;;  %v2209_v44 = vstv %s2200_s14 }
  0xad   : > { %2968 = vmatmul.mubr.bf16.vlgmr.msra.gmra.mrb[0].mxu0 %v2613_v29 }
  0xae   : > { %2976 = vmatpush3.bf16.msra.mxu0 %v3206_v11  ;;  %2971 = vmatprep.mubr.bf16.mxu0 %v2614_v13  ;;  %v2659_v11 = vcombine.low %v2041_v1, %v2045_v23 }
  0xaf   : > { %3008 = vmatpush3.bf16.msra.mxu1 %v3207_v43  ;;  %2977 = vmatprep.subr.bf16.mxu0 %v3207_v43 }
  0xb0   : > { %3001 = vmatprep.subr.bf16.mxu1 %v3210_v58 }
  0xb2   : > { %2876 = vmatmul.mubr.bf16.gmra.mrb[4].mxu1 %v3209_v59  ;;  %2978 = vmatpush3.bf16.msra.mxu0 %v3207_v43 }
  0xb3   : > { %3009 = vmatpush3.bf16.msra.mxu1 %v3210_v58  ;;  %2995 = vmatprep.mubr.bf16.mxu1 %v2658_v34 }
  0xb4   : > { %3002 = vmatprep.subr.bf16.mxu1 %v3211_v16  ;;  %2979 = vmatprep.subr.bf16.mxu0 %v3210_v58 }
  0xb5   : > { %2972 = vmatmul.mubr.bf16.gmra.mrb[4].mxu0 %v2615_v46 }
  0xb6   : > { %2980 = vmatpush3.bf16.msra.mxu0 %v3210_v58  ;;  %2991 = vmatprep.mubr.bf16.mxu0 %v2656_v50  ;;  %v2208_v58 = vld [vmem:[%s3955_s7 + $0x38] sm:$0xff] }
  0xb7   : > { %3010 = vmatpush3.bf16.msra.mxu1 %v3211_v16  ;;  %2981 = vmatprep.subr.bf16.mxu0 %v3211_v16 }
  0xb8   : > { %3003 = vmatprep.subr.bf16.mxu1 %v3212_v38 }
  0xba   : > { %2982 = vmatpush3.bf16.msra.mxu0 %v3211_v16 }
  0xbb   : > { %3011 = vmatpush3.bf16.msra.mxu1 %v3212_v38  ;;  %2983 = vmatprep.subr.bf16.mxu0 %v3212_v38 }
  0xbc   : > { %3004 = vmatprep.subr.bf16.mxu1 %v3213_v6 }
  0xbe   : > { %2984 = vmatpush3.bf16.msra.mxu0 %v3212_v38 }
  0xbf   : > { %3012 = vmatpush3.bf16.msra.mxu1 %v3213_v6  ;;  %2985 = vmatprep.subr.bf16.mxu0 %v3213_v6 }
  0xc0   : > { %3005 = vmatprep.subr.bf16.mxu1 %v3214_v15 }
  0xc2   : > { %2986 = vmatpush3.bf16.msra.mxu0 %v3213_v6  ;;  %v2201_v6 = vld [vmem:[%s3955_s7] sm:$0xff] }
  0xc3   : > { %3013 = vmatpush3.bf16.msra.mxu1 %v3214_v15  ;;  %2987 = vmatprep.subr.bf16.mxu0 %v3214_v15 }
  0xc4   : > { %3006 = vmatprep.subr.bf16.mxu1 %v3215_v20 }
  0xc6   : > { %2988 = vmatpush3.bf16.msra.mxu0 %v3214_v15 }
  0xc7   : > { %3014 = vmatpush3.bf16.msra.mxu1 %v3215_v20  ;;  %2989 = vmatprep.subr.bf16.mxu0 %v3215_v20 }
  0xca   : > { %2996 = vmatmul.mubr.bf16.vlgmr.msra.gmra.mrb[8].mxu1 %v2659_v11  ;;  %2990 = vmatpush3.bf16.msra.mxu0 %v3215_v20 }
  0xcd   : > { %2992 = vmatmul.mubr.bf16.vlgmr.msra.gmra.mrb[0].mxu0 %v2657_v33 }
 0x17d   : > { %v2873_v35 = vpop.f32.mrb[0].mxu1 }
 0x17e   : > { %v1006_v51 = vpop.f32.mrb[1].mxu1 }
 0x17f   : > { %v2874_v31 = vpop.f32.mrb[2].mxu1 }
 0x180   : > { %v1009_v2 = vpop.f32.mrb[3].mxu1 }
 0x185   : > { %v2877_v57 = vpop.f32.mrb[4].mxu1 }
 0x186   : > { %v1022_v36 = vpop.f32.mrb[5].mxu1 }
 0x187   : > { %v2878_v37 = vpop.f32.mrb[6].mxu1 }
 0x188   : > { %v1025_v39 = vpop.f32.mrb[7].mxu1  ;;  %v2973_v40 = vpop.f32.mrb[4].mxu0 }
 0x189   : > { %v3019_v41 = vadd.f32 %v2973_v40, %v2877_v57  ;;  %v1967_v8 = vpop.f32.mrb[5].mxu0 }
 0x18a   : > { %v3021_v42 = vadd.f32 %v1967_v8, %v1022_v36  ;;  %v2974_v30 = vpop.f32.mrb[6].mxu0 }
 0x18b   : > { %v3023_v43 = vadd.f32 %v2974_v30, %v2878_v37  ;;  %v1970_v0 = vpop.f32.mrb[7].mxu0 }
 0x18c   : > { %v3025_v55 = vadd.f32 %v1970_v0, %v1025_v39 }
 0x19d   : > { %v2997_v45 = vpop.f32.mrb[8].mxu1 }
 0x19e   : > { %v3020_v29 = vadd.f32 %v3019_v41, %v2997_v45  ;;  %v2177_v13 = vpop.f32.mrb[9].mxu1 }
 0x19f   : > { %v3022_v48 = vadd.f32 %v3021_v42, %v2177_v13  ;;  %v2998_v49 = vpop.f32.mrb[10].mxu1 }
 0x1a0   : > { %v2216_v53 = vmul.f32 %v3020_v29, %v2209_v44  ;;  %v3024_v26 = vadd.f32 %v3023_v43, %v2998_v49  ;;  %v2180_v47 = vpop.f32.mrb[11].mxu1  ;;  %v2993_v3 = vpop.f32.mrb[0].mxu0 }
 0x1a1   : > { %v2214_v62 = vmul.f32 %v3022_v48, %v2209_v44  ;;  %v3026_v59 = vadd.f32 %v3025_v55, %v2180_v47  ;;  %v3015_v34 = vadd.f32 %v2993_v3, %v2873_v35  ;;  %v2161_v17 = vpop.f32.mrb[1].mxu0 }
 0x1a2   : > { %v2224_v4 = vadd.f32 %v2216_v53, %v2207_v63  ;;  %v2217_v5 = vmul.f32 %v3024_v26, %v2209_v44  ;;  %v3016_v61 = vadd.f32 %v2161_v17, %v1006_v51  ;;  %v2994_v46 = vpop.f32.mrb[2].mxu0 }
 0x1a3   : > { %v2222_v27 = vadd.f32 %v2214_v62, %v2205_v52  ;;  %v2215_v16 = vmul.f32 %v3026_v59, %v2209_v44  ;;  %v2212_v50 = vmul.f32 %v3015_v34, %v2209_v44  ;;  %v3017_v15 = vadd.f32 %v2994_v46, %v2874_v31  ;;  %v2164_v56 = vpop.f32.mrb[3].mxu0 }
 0x1a4   : > { %2232 = vst [vmem:[%s219_s28 + $0x30] sm:$0xff] %v2224_v4  ;;  %v2225_v38 = vadd.f32 %v2217_v5, %v2208_v58  ;;  %v2210_v14 = vmul.f32 %v3016_v61, %v2209_v44  ;;  %v3018_v18 = vadd.f32 %v2164_v56, %v1009_v2 }
 0x1a5   : > { %2230 = vst [vmem:[%s219_s28 + $0x20] sm:$0xff] %v2222_v27  ;;  %v2223_v10 = vadd.f32 %v2215_v16, %v2206_v7  ;;  %v2220_v19 = vadd.f32 %v2212_v50, %v2203_v24  ;;  %v2213_v20 = vmul.f32 %v3017_v15, %v2209_v44 }
 0x1a6   : > { %2233 = vst [vmem:[%s219_s28 + $0x38] sm:$0xff] %v2225_v38  ;;  %v2218_v9 = vadd.f32 %v2210_v14, %v2201_v6  ;;  %v2211_v1 = vmul.f32 %v3018_v18, %v2209_v44 }
 0x1a7   : > { %2231 = vst [vmem:[%s219_s28 + $0x28] sm:$0xff] %v2223_v10  ;;  %2228 = vst [vmem:[%s219_s28 + $0x10] sm:$0xff] %v2220_v19  ;;  %v2221_v23 = vadd.f32 %v2213_v20, %v2204_v54 }
 0x1a8   : > { %2226 = vst [vmem:[%s219_s28] sm:$0xff] %v2218_v9  ;;  %v2219_v60 = vadd.f32 %v2211_v1, %v2202_v22 }
 0x1a9   : > { %2229 = vst [vmem:[%s219_s28 + $0x18] sm:$0xff] %v2221_v23 }
 0x1aa   : > { %2227 = vst [vmem:[%s219_s28 + $0x8] sm:$0xff] %v2219_v60 }
 0x1ab   : > { %3244 = shalt.err (!%p3241_p2)
}
 0x1ac   : > { %s3245_s14 = scalar_lea.hbm %s3971_s13, 1024  ;;  %s3249_s5 = scalar_lea.hbm %s4022_s4, 2048 }
 0x1ad   : > { %p3246_p3 = scmp.ne.s32.totalorder %s3971_s13, %s3245_s14  ;;  %p3250_p8 = scmp.lt.u32.totalorder %s3971_s13, %s4022_s4 }
 0x1ae   : > { %p3251_p11 = scmp.lt.u32.totalorder %s3249_s5, %s3245_s14  ;;  %p3253_p10 = scmp.lt.u32.totalorder %s3245_s14, %s3971_s13 }
 0x1af   : > { %p3247_p4 = pnand %p3246_p3, %p3366_p5 }
 0x1b0   : > { %p3252_p9 = por %p3251_p11, %p3250_p8 }
 0x1b1   : > { %p3248_p7 = pneg %p3247_p4 }
 0x1b2   : > { %p3254_p12 = por %p3253_p10, %p3252_p9 }
 0x1b4   : > { %p3255_p13 = pnand %p3254_p12, %p3248_p7 }
 0x1b6   : > { %3258 = shalt.err (!%p3255_p13)
}
 0x1b7   : > { %s3301_s8 = smov 128   ;;  %s3302_s28 = smov 8  }
 0x1b8   : > { %3084 = dma.vmem_to_hbm [thread:$0]  (%p3366_p5), %s3973_s10, 1024, %s3971_s13, %s3977_s19, %s3301_s8, %s3301_s8, %s3302_s28  }
 0x1b9 PF: > { %p3096_p0 = scmp.ge.s32.totalorder %s3297_s18, 2  ;;  %s2263_s9 = sand.u32 1, %s3285_s15  }
 0x1ba   : > { %s2264_s11 = scalar_lea.sflag [#allocation3], %s2263_s9 }
 0x1bb   : > { %p3091_p1 = pnand %p3096_p0, %p3370_p6 }
 0x1bd   : > { %3280 = dma.done.wait (!%p3091_p1), %s2264_s11, 1024  }
 0x1be   : > { %3282 = vsyncadd (!%p3091_p1), %s2264_s11, 4294966272  ;;  %p15_p2 = scmp.ge.s32.totalorder %s3353_s21, 4   ;;  %s4030_s15 = smov %s3289_s16 }
 0x1bf   : > { %s4031_s16 = smov %s3293_s17  ;;  %s4032_s17 = smov %s3364_s24 }
 0x1c0   : > { %s4033_s18 = smov %s3353_s21  ;;  %17 = sbr.rel (!%p15_p2) target bundleno = 4 (0x4), region = 89 }
 0x1c7   :  { %2269 = vsyncpa [#allocation3], 1 }
 0x1c8   :  { %2271 = vsyncpa [#allocation3 + $0x1], 1 }
 0x1c9   :  { %2272 = vsyncpa [#allocation4], 1 }
 0x1ca   :  { %2274 = vsyncpa [#allocation4 + $0x1], 1 }

</bundles_post_ra>
